<compile_context>
chip_gen: v7x
topology: tpu7x:2x2x1
jax: 0.10.0
libtpu: 0.0.40
codegen_flags: <defaults>
</compile_context>

<pallas_src>
import functools

import jax
import jax.numpy as jnp
from jax.experimental import pallas as pl
from jax.experimental.pallas import tpu as pltpu

LN_EPS = 1e-5    # torch.nn.LayerNorm default eps
GEN_EPS = 1e-7   # GENConv message eps

# Slab row layout (one (8,128) f32 tile per layer, plus one "globals" tile):
#   per-layer l : row 0 b1[2H] | row 1 g1[2H] | row 2 be1[2H] | row 3 b2[H]
#                 row 4 ln_g[H] | row 5 ln_b[H] | row 6[0] t
#   globals (L) : row 0 enc_b[H] | row 1 lin_w[H] | row 2[0] lin_b


def _layernorm(x, gamma, beta):
    # var = E[x^2] - mu^2 : the two cross-lane reductions are independent,
    # shortening the XLU-dominated serial chain (2L+1 LayerNorms in a row).
    mu = jnp.mean(x, axis=-1, keepdims=True)
    ex2 = jnp.mean(x * x, axis=-1, keepdims=True)
    var = jnp.maximum(ex2 - mu * mu, 0.0)
    return (x - mu) * jax.lax.rsqrt(var + LN_EPS) * gamma + beta


def fused_forward_kernel(x_ref, adj_ref, encw_ref, w1_ref, w2_ref, slab_ref,
                         o_ref, *, num_layers, hidden):
    H, H2, L = hidden, 2 * hidden, num_layers

    x = x_ref[0]        # [NB, IN_PAD] bf16
    adj = adj_ref[0]    # [NB, NB]     bf16, block-diagonal over graphs

    glob = slab_ref[L]                   # (8, 128) globals tile
    enc_b = glob[0:1, 0:H]
    lin_w = glob[1:2, 0:H]
    lin_b = glob[2:3, 0:1]

    # node encoder: bf16 MXU inputs (padded contraction dim), f32 accumulation
    h = jnp.dot(x, encw_ref[...], preferred_element_type=jnp.float32) + enc_b

    def genconv(hin, l):
        """GENConv(aggr='softmax', num_layers=2, norm='layer') on dense adj."""
        row = slab_ref[l]                          # (8, 128) per-layer params
        b1, g1, be1 = row[0:1, 0:H2], row[1:2, 0:H2], row[2:3, 0:H2]
        b2 = row[3:4, 0:H]
        t = row[6:7, 0:1]                          # learned temperature (1,1)
        # message: relu(x_j) + eps
        m = jnp.maximum(hin, 0.0) + GEN_EPS
        tm = t * m
        # Per-channel global max cancels exactly in num/den so this matches
        # PyG's scatter_softmax in exact arithmetic.
        # TODO(synk): a per-destination (adj>0 masked) max would be numerically
        # safer for very large learned t / wide activation ranges.
        s = jnp.exp(tm - jnp.max(tm, axis=0, keepdims=True))     # f32 (EUP)
        # Two back-to-back MXU dots (no lane concat / lane-offset slice).
        num = jnp.dot(adj, (s * m).astype(jnp.bfloat16),
                      preferred_element_type=jnp.float32)
        den = jnp.dot(adj, s.astype(jnp.bfloat16),
                      preferred_element_type=jnp.float32)
        den_safe = jnp.where(den > 0.0, den, 1.0)
        # approx reciprocal: ~2^-12 rel error, runs on the EUP slot (free).
        agg = jnp.where(den > 0.0,
                        num * pl.reciprocal(den_safe, approx=True), 0.0)
        out = agg + hin                                           # GENConv skip
        # MLP: Linear(H,2H) -> LayerNorm(2H) -> ReLU -> Linear(2H,H)
        hm = jnp.dot(out.astype(jnp.bfloat16), w1_ref[l],
                     preferred_element_type=jnp.float32) + b1
        hm = jnp.maximum(_layernorm(hm, g1, be1), 0.0)
        return jnp.dot(hm.astype(jnp.bfloat16), w2_ref[l],
                       preferred_element_type=jnp.float32) + b2

    # layers[0].conv(x, edge_index): bare GENConv, no pre-norm, no residual.
    h = genconv(h, 0)

    # layers[1:]: DeepGCNLayer block='res+': x + conv(dropout(relu(norm(x))))
    for l in range(1, L):
        row = slab_ref[l]
        hn = jnp.maximum(_layernorm(h, row[4:5, 0:H], row[5:6, 0:H]), 0.0)
        # TODO(synk): DeepGCNLayer dropout(p=0.1) implemented as identity (inference).
        h = h + genconv(hn, l)

    # head: x = act(layers[0].norm(x)); dropout(p=0.2) identity; lin(x)
    row0 = slab_ref[0]
    ha = jnp.maximum(_layernorm(h, row0[4:5, 0:H], row0[5:6, 0:H]), 0.0)
    # TODO(synk): F.dropout(p=0.2) implemented as identity (inference mode).
    # Lane-dense (1, NB) store (nodes on the lane axis). The tiny M=1 MXU pass
    # is kept (instead of a VPU row-reduce) because the reduce result would be
    # sublane-major and need an XLU transpose before a lane-dense store.
    y = jax.lax.dot_general(lin_w, ha,
                            dimension_numbers=(((1,), (1,)), ((), ())),
                            preferred_element_type=jnp.float32)   # (1, NB)
    o_ref[0] = y + lin_b


# ----------------------------------------------------------------------------
# pallas_call wrapper (inputs already packed/padded/cast by pack_inputs).
# ----------------------------------------------------------------------------
@jax.jit
def ligand_gnn_forward(x_blocks, adj_blocks, params):
    nb, NB, in_pad = x_blocks.shape
    L, H = params["w1"].shape[0], params["w1"].shape[1]

    kernel = functools.partial(fused_forward_kernel, num_layers=L, hidden=H)

    def full(shape):
        return pl.BlockSpec(shape, lambda b: (0,) * len(shape))

    out = pl.pallas_call(
        kernel,
        grid=(nb,),
        in_specs=[
            pl.BlockSpec((1, NB, in_pad), lambda b: (b, 0, 0)),   # x blocks
            pl.BlockSpec((1, NB, NB), lambda b: (b, 0, 0)),       # adj blocks
            full(params["enc_w"].shape),                          # enc_w (bf16)
            full(params["w1"].shape),                             # w1 (bf16)
            full(params["w2"].shape),                             # w2 (bf16)
            full(params["slab"].shape),                           # small-param slab
        ],
        out_specs=pl.BlockSpec((1, 1, NB), lambda b: (b, 0, 0)),
        out_shape=jax.ShapeDtypeStruct((nb, 1, NB), jnp.float32),
        compiler_params=pltpu.CompilerParams(
            dimension_semantics=("parallel",)),                   # v7x: 2 TCs
    )(x_blocks, adj_blocks, params["enc_w"], params["w1"], params["w2"],
      params["slab"])

    return out.reshape(nb * NB, 1)   # node order matches the input graph order


# ----------------------------------------------------------------------------
# One-time preprocessing (hoisted out of the per-call path).
# ----------------------------------------------------------------------------
def pack_inputs(x, adj, graphs_per_block, in_pad):
    """x: [B, n, in_dim] f32, adj: [B, n, n] f32 (A[dst, src] multiplicity)."""
    B, n, in_dim = x.shape
    assert B % graphs_per_block == 0
    nb = B // graphs_per_block
    NB = graphs_per_block * n
    x_p = jnp.pad(x, ((0, 0), (0, 0), (0, in_pad - in_dim))).astype(jnp.bfloat16)
    x_blocks = x_p.reshape(nb, NB, in_pad)
    # Block-diagonal adjacency: graphs packed into one block never mix.
    adj_g = adj.reshape(nb, graphs_per_block, n, n)
    eye = jnp.eye(graphs_per_block, dtype=adj.dtype)
    adj_blocks = jnp.einsum("gh,bgij->bgihj", eye, adj_g).reshape(nb, NB, NB)
    return x_blocks, adj_blocks.astype(jnp.bfloat16)


# ----------------------------------------------------------------------------
# Deterministic parameter construction (synthetic weights, pre-packed).
# ----------------------------------------------------------------------------
def init_params(key, in_dim, hidden, num_layers):
    H, H2, L = hidden, 2 * hidden, num_layers
    assert H2 <= 128
    in_pad = pl.cdiv(in_dim, 128) * 128

    def lin(k, fi, fo):
        return (jax.random.normal(k, (fi, fo), jnp.float32)
                / jnp.sqrt(jnp.float32(fi)))

    keys = iter(jax.random.split(key, 4 + 4 * L))
    enc_w = jnp.pad(lin(next(keys), in_dim, H), ((0, in_pad - in_dim), (0, 0)))
    enc_b = jax.random.normal(next(keys), (H,), jnp.float32) * 0.01
    lin_w = (jax.random.normal(next(keys), (H,), jnp.float32)
             / jnp.sqrt(jnp.float32(H)))
    lin_b = jax.random.normal(next(keys), (), jnp.float32) * 0.01

    slab = jnp.zeros((L + 1, 8, 128), jnp.float32)
    w1s, w2s = [], []
    for l in range(L):
        w1s.append(lin(next(keys), H, H2))
        b1 = jax.random.normal(next(keys), (H2,), jnp.float32) * 0.01
        w2s.append(lin(next(keys), H2, H))
        b2 = jax.random.normal(next(keys), (H,), jnp.float32) * 0.01
        slab = (slab.at[l, 0, :H2].set(b1)
                    .at[l, 1, :H2].set(jnp.ones((H2,), jnp.float32))   # MLP LN gamma
                    .at[l, 2, :H2].set(jnp.zeros((H2,), jnp.float32))  # MLP LN beta
                    .at[l, 3, :H].set(b2)
                    .at[l, 4, :H].set(jnp.ones((H,), jnp.float32))     # res+ LN gamma
                    .at[l, 5, :H].set(jnp.zeros((H,), jnp.float32))    # res+ LN beta
                    .at[l, 6, 0].set(1.0))                             # learn_t init
    slab = (slab.at[L, 0, :H].set(enc_b)
                .at[L, 1, :H].set(lin_w)
                .at[L, 2, 0].set(lin_b))

    return {
        "enc_w": enc_w.astype(jnp.bfloat16),   # pre-padded + pre-cast (hoisted)
        "w1": jnp.stack(w1s).astype(jnp.bfloat16),
        "w2": jnp.stack(w2s).astype(jnp.bfloat16),
        "slab": slab,
    }


if __name__ == "__main__":
    N_PER_GRAPH = 16
    EDGES_PER_GRAPH = 48
    IN_DIM = 1070           # ligand node feature dim fixed by the module
    HIDDEN = 32
    NUM_LAYERS = 3
    GRAPHS_PER_BLOCK = 8    # 8 * 16 = 128 node rows per grid step (fills MXU rows)
    NUM_GRAPHS = 16         # -> grid of 2 "parallel" steps (v7x uses both TCs)

    root = jax.random.PRNGKey(0)
    k_x, k_src, k_dst, k_par = jax.random.split(root, 4)

    x = jax.random.normal(k_x, (NUM_GRAPHS, N_PER_GRAPH, IN_DIM), jnp.float32)
    src = jax.random.randint(k_src, (NUM_GRAPHS, EDGES_PER_GRAPH), 0, N_PER_GRAPH)
    dst = jax.random.randint(k_dst, (NUM_GRAPHS, EDGES_PER_GRAPH), 0, N_PER_GRAPH)

    # dense adjacency A[dst, src] = multiplicity of edge src->dst (glue in JAX)
    def to_adj(s, d):
        return jnp.zeros((N_PER_GRAPH, N_PER_GRAPH), jnp.float32).at[d, s].add(1.0)
    adj = jax.vmap(to_adj)(src, dst)

    params = init_params(k_par, IN_DIM, HIDDEN, NUM_LAYERS)
    in_pad = params["enc_w"].shape[0]

    # one-time packing: pad/cast features, build block-diagonal adjacency
    x_blocks, adj_blocks = pack_inputs(x, adj, GRAPHS_PER_BLOCK, in_pad)

    out = ligand_gnn_forward(x_blocks, adj_blocks, params)
    out = jax.block_until_ready(out)
    out = out.reshape(NUM_GRAPHS, N_PER_GRAPH, 1)   # per-graph (N, 1) outputs

    assert out.shape == (NUM_GRAPHS, N_PER_GRAPH, 1)
    assert bool(jnp.all(jnp.isfinite(out)))
    print("KERNEL_OK")
</pallas_src>

<mosaic_0001>
module attributes {stable_mosaic.version = 11 : i64} {
  func.func @fused_forward_kernel(%arg0: i32, %arg1: memref<1x128x1152xbf16, #tpu.memory_space<vmem>>, %arg2: memref<1x128x128xbf16, #tpu.memory_space<vmem>>, %arg3: memref<1152x32xbf16, #tpu.memory_space<vmem>>, %arg4: memref<3x32x64xbf16, #tpu.memory_space<vmem>>, %arg5: memref<3x64x32xbf16, #tpu.memory_space<vmem>>, %arg6: memref<4x8x128xf32, #tpu.memory_space<vmem>>, %arg7: memref<1x1x128xf32, #tpu.memory_space<vmem>>) attributes {dimension_semantics = [#tpu.dimension_semantics<parallel>], iteration_bounds = array<i64: 2>, scalar_prefetch = 0 : i64, scratch_operands = 0 : i64, tpu.core_type = #tpu.core_type<tc>, window_params = [{transform_indices = @transform_0, window_bounds = array<i64: 1, 128, 1152>}, {transform_indices = @transform_1, window_bounds = array<i64: 1, 128, 128>}, {pipeline_mode = #tpu.pipeline_mode<synchronous>, transform_indices = @transform_2, window_bounds = array<i64: 1152, 32>}, {pipeline_mode = #tpu.pipeline_mode<synchronous>, transform_indices = @transform_3, window_bounds = array<i64: 3, 32, 64>}, {pipeline_mode = #tpu.pipeline_mode<synchronous>, transform_indices = @transform_4, window_bounds = array<i64: 3, 64, 32>}, {pipeline_mode = #tpu.pipeline_mode<synchronous>, transform_indices = @transform_5, window_bounds = array<i64: 4, 8, 128>}, {transform_indices = @transform_6, window_bounds = array<i64: 1, 1, 128>}]} {
    %c0 = arith.constant 0 : index
    %c0_0 = arith.constant 0 : index
    %c0_1 = arith.constant 0 : index
    %0 = vector.load %arg1[%c0, %c0_0, %c0_1] : memref<1x128x1152xbf16, #tpu.memory_space<vmem>>, vector<1x128x1152xbf16>
    %1 = vector.shape_cast %0 : vector<1x128x1152xbf16> to vector<128x1152xbf16>
    %c0_2 = arith.constant 0 : index
    %c0_3 = arith.constant 0 : index
    %c0_4 = arith.constant 0 : index
    %2 = vector.load %arg2[%c0_2, %c0_3, %c0_4] : memref<1x128x128xbf16, #tpu.memory_space<vmem>>, vector<1x128x128xbf16>
    %3 = vector.shape_cast %2 : vector<1x128x128xbf16> to vector<128x128xbf16>
    %c3 = arith.constant 3 : index
    %c0_5 = arith.constant 0 : index
    %c0_6 = arith.constant 0 : index
    %4 = vector.load %arg6[%c3, %c0_5, %c0_6] : memref<4x8x128xf32, #tpu.memory_space<vmem>>, vector<1x8x128xf32>
    %5 = vector.shape_cast %4 : vector<1x8x128xf32> to vector<8x128xf32>
    %6 = vector.extract_strided_slice %5 {offsets = [0, 0], sizes = [1, 32], strides = [1, 1]} : vector<8x128xf32> to vector<1x32xf32>
    %7 = vector.extract_strided_slice %5 {offsets = [1, 0], sizes = [1, 32], strides = [1, 1]} : vector<8x128xf32> to vector<1x32xf32>
    %8 = vector.extract_strided_slice %5 {offsets = [2, 0], sizes = [1, 1], strides = [1, 1]} : vector<8x128xf32> to vector<1x1xf32>
    %c0_7 = arith.constant 0 : index
    %c0_8 = arith.constant 0 : index
    %9 = vector.load %arg3[%c0_7, %c0_8] : memref<1152x32xbf16, #tpu.memory_space<vmem>>, vector<1152x32xbf16>
    %cst = arith.constant dense<0.000000e+00> : vector<128x32xf32>
    %10 = tpu.matmul %1, %9, %cst {dimension_numbers = #tpu.dot_dimension_numbers<[1], [0], [0], [1], [0, 0, 1, 1], [], []>} : vector<128x1152xbf16>, vector<1152x32xbf16>, vector<128x32xf32> -> vector<128x32xf32>
    %11 = vector.broadcast %6 : vector<1x32xf32> to vector<128x32xf32>
    %12 = arith.addf %10, %11 : vector<128x32xf32>
    %c0_9 = arith.constant 0 : index
    %c0_10 = arith.constant 0 : index
    %c0_11 = arith.constant 0 : index
    %13 = vector.load %arg6[%c0_9, %c0_10, %c0_11] : memref<4x8x128xf32, #tpu.memory_space<vmem>>, vector<1x8x128xf32>
    %14 = vector.shape_cast %13 : vector<1x8x128xf32> to vector<8x128xf32>
    %15 = vector.extract_strided_slice %14 {offsets = [0, 0], sizes = [1, 64], strides = [1, 1]} : vector<8x128xf32> to vector<1x64xf32>
    %16 = vector.extract_strided_slice %14 {offsets = [1, 0], sizes = [1, 64], strides = [1, 1]} : vector<8x128xf32> to vector<1x64xf32>
    %17 = vector.extract_strided_slice %14 {offsets = [2, 0], sizes = [1, 64], strides = [1, 1]} : vector<8x128xf32> to vector<1x64xf32>
    %18 = vector.extract_strided_slice %14 {offsets = [3, 0], sizes = [1, 32], strides = [1, 1]} : vector<8x128xf32> to vector<1x32xf32>
    %19 = vector.extract_strided_slice %14 {offsets = [6, 0], sizes = [1, 1], strides = [1, 1]} : vector<8x128xf32> to vector<1x1xf32>
    %cst_12 = arith.constant 0.000000e+00 : f32
    %20 = vector.broadcast %cst_12 : f32 to vector<128x32xf32>
    %21 = arith.maximumf %12, %20 : vector<128x32xf32>
    %cst_13 = arith.constant 1.000000e-07 : f32
    %22 = vector.broadcast %cst_13 : f32 to vector<128x32xf32>
    %23 = arith.addf %21, %22 : vector<128x32xf32>
    %24 = vector.broadcast %19 : vector<1x1xf32> to vector<128x32xf32>
    %25 = arith.mulf %24, %23 : vector<128x32xf32>
    %cst_14 = arith.constant dense<0xFF800000> : vector<32xf32>
    %26 = vector.multi_reduction <maximumf>, %25, %cst_14 [0] : vector<128x32xf32> to vector<32xf32>
    %27 = vector.shape_cast %26 : vector<32xf32> to vector<1x32xf32>
    %28 = vector.broadcast %27 : vector<1x32xf32> to vector<128x32xf32>
    %29 = arith.subf %25, %28 : vector<128x32xf32>
    %30 = math.exp %29 : vector<128x32xf32>
    %31 = arith.mulf %30, %23 : vector<128x32xf32>
    %32 = arith.truncf %31 : vector<128x32xf32> to vector<128x32xbf16>
    %cst_15 = arith.constant dense<0.000000e+00> : vector<128x32xf32>
    %33 = tpu.matmul %3, %32, %cst_15 {dimension_numbers = #tpu.dot_dimension_numbers<[1], [0], [0], [1], [0, 0, 1, 1], [], []>} : vector<128x128xbf16>, vector<128x32xbf16>, vector<128x32xf32> -> vector<128x32xf32>
    %34 = arith.truncf %30 : vector<128x32xf32> to vector<128x32xbf16>
    %cst_16 = arith.constant dense<0.000000e+00> : vector<128x32xf32>
    %35 = tpu.matmul %3, %34, %cst_16 {dimension_numbers = #tpu.dot_dimension_numbers<[1], [0], [0], [1], [0, 0, 1, 1], [], []>} : vector<128x128xbf16>, vector<128x32xbf16>, vector<128x32xf32> -> vector<128x32xf32>
    %cst_17 = arith.constant 0.000000e+00 : f32
    %36 = vector.broadcast %cst_17 : f32 to vector<128x32xf32>
    %37 = arith.cmpf ogt, %35, %36 : vector<128x32xf32>
    %cst_18 = arith.constant 1.000000e+00 : f32
    %38 = vector.broadcast %cst_18 : f32 to vector<128x32xf32>
    %39 = arith.select %37, %35, %38 : vector<128x32xi1>, vector<128x32xf32>
    %cst_19 = arith.constant 0.000000e+00 : f32
    %40 = vector.broadcast %cst_19 : f32 to vector<128x32xf32>
    %41 = arith.cmpf ogt, %35, %40 : vector<128x32xf32>
    %42 = tpu.reciprocal %39 {approx = true} : vector<128x32xf32> -> vector<128x32xf32>
    %43 = arith.mulf %33, %42 : vector<128x32xf32>
    %cst_20 = arith.constant 0.000000e+00 : f32
    %44 = vector.broadcast %cst_20 : f32 to vector<128x32xf32>
    %45 = arith.select %41, %43, %44 : vector<128x32xi1>, vector<128x32xf32>
    %46 = arith.addf %45, %12 : vector<128x32xf32>
    %47 = arith.truncf %46 : vector<128x32xf32> to vector<128x32xbf16>
    %c0_21 = arith.constant 0 : index
    %c0_22 = arith.constant 0 : index
    %c0_23 = arith.constant 0 : index
    %48 = vector.load %arg4[%c0_21, %c0_22, %c0_23] : memref<3x32x64xbf16, #tpu.memory_space<vmem>>, vector<1x32x64xbf16>
    %49 = vector.shape_cast %48 : vector<1x32x64xbf16> to vector<32x64xbf16>
    %cst_24 = arith.constant dense<0.000000e+00> : vector<128x64xf32>
    %50 = tpu.matmul %47, %49, %cst_24 {dimension_numbers = #tpu.dot_dimension_numbers<[1], [0], [0], [1], [0, 0, 1, 1], [], []>} : vector<128x32xbf16>, vector<32x64xbf16>, vector<128x64xf32> -> vector<128x64xf32>
    %51 = vector.broadcast %15 : vector<1x64xf32> to vector<128x64xf32>
    %52 = arith.addf %50, %51 : vector<128x64xf32>
    %cst_25 = arith.constant dense<0.000000e+00> : vector<128xf32>
    %53 = vector.multi_reduction <add>, %52, %cst_25 [1] : vector<128x64xf32> to vector<128xf32>
    %54 = vector.shape_cast %53 : vector<128xf32> to vector<128x1xf32>
    %cst_26 = arith.constant 6.400000e+01 : f32
    %55 = vector.broadcast %cst_26 : f32 to vector<128x1xf32>
    %56 = arith.divf %54, %55 : vector<128x1xf32>
    %57 = arith.mulf %52, %52 : vector<128x64xf32>
    %cst_27 = arith.constant dense<0.000000e+00> : vector<128xf32>
    %58 = vector.multi_reduction <add>, %57, %cst_27 [1] : vector<128x64xf32> to vector<128xf32>
    %59 = vector.shape_cast %58 : vector<128xf32> to vector<128x1xf32>
    %cst_28 = arith.constant 6.400000e+01 : f32
    %60 = vector.broadcast %cst_28 : f32 to vector<128x1xf32>
    %61 = arith.divf %59, %60 : vector<128x1xf32>
    %62 = arith.mulf %56, %56 : vector<128x1xf32>
    %63 = arith.subf %61, %62 : vector<128x1xf32>
    %cst_29 = arith.constant 0.000000e+00 : f32
    %64 = vector.broadcast %cst_29 : f32 to vector<128x1xf32>
    %65 = arith.maximumf %63, %64 : vector<128x1xf32>
    %66 = vector.broadcast %56 : vector<128x1xf32> to vector<128x64xf32>
    %67 = arith.subf %52, %66 : vector<128x64xf32>
    %cst_30 = arith.constant 9.99999974E-6 : f32
    %68 = vector.broadcast %cst_30 : f32 to vector<128x1xf32>
    %69 = arith.addf %65, %68 : vector<128x1xf32>
    %70 = math.rsqrt %69 : vector<128x1xf32>
    %71 = vector.broadcast %70 : vector<128x1xf32> to vector<128x64xf32>
    %72 = arith.mulf %67, %71 : vector<128x64xf32>
    %73 = vector.broadcast %16 : vector<1x64xf32> to vector<128x64xf32>
    %74 = arith.mulf %72, %73 : vector<128x64xf32>
    %75 = vector.broadcast %17 : vector<1x64xf32> to vector<128x64xf32>
    %76 = arith.addf %74, %75 : vector<128x64xf32>
    %cst_31 = arith.constant 0.000000e+00 : f32
    %77 = vector.broadcast %cst_31 : f32 to vector<128x64xf32>
    %78 = arith.maximumf %76, %77 : vector<128x64xf32>
    %79 = arith.truncf %78 : vector<128x64xf32> to vector<128x64xbf16>
    %c0_32 = arith.constant 0 : index
    %c0_33 = arith.constant 0 : index
    %c0_34 = arith.constant 0 : index
    %80 = vector.load %arg5[%c0_32, %c0_33, %c0_34] : memref<3x64x32xbf16, #tpu.memory_space<vmem>>, vector<1x64x32xbf16>
    %81 = vector.shape_cast %80 : vector<1x64x32xbf16> to vector<64x32xbf16>
    %cst_35 = arith.constant dense<0.000000e+00> : vector<128x32xf32>
    %82 = tpu.matmul %79, %81, %cst_35 {dimension_numbers = #tpu.dot_dimension_numbers<[1], [0], [0], [1], [0, 0, 1, 1], [], []>} : vector<128x64xbf16>, vector<64x32xbf16>, vector<128x32xf32> -> vector<128x32xf32>
    %83 = vector.broadcast %18 : vector<1x32xf32> to vector<128x32xf32>
    %84 = arith.addf %82, %83 : vector<128x32xf32>
    %c1 = arith.constant 1 : index
    %c0_36 = arith.constant 0 : index
    %c0_37 = arith.constant 0 : index
    %85 = vector.load %arg6[%c1, %c0_36, %c0_37] : memref<4x8x128xf32, #tpu.memory_space<vmem>>, vector<1x8x128xf32>
    %86 = vector.shape_cast %85 : vector<1x8x128xf32> to vector<8x128xf32>
    %87 = vector.extract_strided_slice %86 {offsets = [4, 0], sizes = [1, 32], strides = [1, 1]} : vector<8x128xf32> to vector<1x32xf32>
    %88 = vector.extract_strided_slice %86 {offsets = [5, 0], sizes = [1, 32], strides = [1, 1]} : vector<8x128xf32> to vector<1x32xf32>
    %cst_38 = arith.constant dense<0.000000e+00> : vector<128xf32>
    %89 = vector.multi_reduction <add>, %84, %cst_38 [1] : vector<128x32xf32> to vector<128xf32>
    %90 = vector.shape_cast %89 : vector<128xf32> to vector<128x1xf32>
    %cst_39 = arith.constant 3.200000e+01 : f32
    %91 = vector.broadcast %cst_39 : f32 to vector<128x1xf32>
    %92 = arith.divf %90, %91 : vector<128x1xf32>
    %93 = arith.mulf %84, %84 : vector<128x32xf32>
    %cst_40 = arith.constant dense<0.000000e+00> : vector<128xf32>
    %94 = vector.multi_reduction <add>, %93, %cst_40 [1] : vector<128x32xf32> to vector<128xf32>
    %95 = vector.shape_cast %94 : vector<128xf32> to vector<128x1xf32>
    %cst_41 = arith.constant 3.200000e+01 : f32
    %96 = vector.broadcast %cst_41 : f32 to vector<128x1xf32>
    %97 = arith.divf %95, %96 : vector<128x1xf32>
    %98 = arith.mulf %92, %92 : vector<128x1xf32>
    %99 = arith.subf %97, %98 : vector<128x1xf32>
    %cst_42 = arith.constant 0.000000e+00 : f32
    %100 = vector.broadcast %cst_42 : f32 to vector<128x1xf32>
    %101 = arith.maximumf %99, %100 : vector<128x1xf32>
    %102 = vector.broadcast %92 : vector<128x1xf32> to vector<128x32xf32>
    %103 = arith.subf %84, %102 : vector<128x32xf32>
    %cst_43 = arith.constant 9.99999974E-6 : f32
    %104 = vector.broadcast %cst_43 : f32 to vector<128x1xf32>
    %105 = arith.addf %101, %104 : vector<128x1xf32>
    %106 = math.rsqrt %105 : vector<128x1xf32>
    %107 = vector.broadcast %106 : vector<128x1xf32> to vector<128x32xf32>
    %108 = arith.mulf %103, %107 : vector<128x32xf32>
    %109 = vector.broadcast %87 : vector<1x32xf32> to vector<128x32xf32>
    %110 = arith.mulf %108, %109 : vector<128x32xf32>
    %111 = vector.broadcast %88 : vector<1x32xf32> to vector<128x32xf32>
    %112 = arith.addf %110, %111 : vector<128x32xf32>
    %cst_44 = arith.constant 0.000000e+00 : f32
    %113 = vector.broadcast %cst_44 : f32 to vector<128x32xf32>
    %114 = arith.maximumf %112, %113 : vector<128x32xf32>
    %c1_45 = arith.constant 1 : index
    %c0_46 = arith.constant 0 : index
    %c0_47 = arith.constant 0 : index
    %115 = vector.load %arg6[%c1_45, %c0_46, %c0_47] : memref<4x8x128xf32, #tpu.memory_space<vmem>>, vector<1x8x128xf32>
    %116 = vector.shape_cast %115 : vector<1x8x128xf32> to vector<8x128xf32>
    %117 = vector.extract_strided_slice %116 {offsets = [0, 0], sizes = [1, 64], strides = [1, 1]} : vector<8x128xf32> to vector<1x64xf32>
    %118 = vector.extract_strided_slice %116 {offsets = [1, 0], sizes = [1, 64], strides = [1, 1]} : vector<8x128xf32> to vector<1x64xf32>
    %119 = vector.extract_strided_slice %116 {offsets = [2, 0], sizes = [1, 64], strides = [1, 1]} : vector<8x128xf32> to vector<1x64xf32>
    %120 = vector.extract_strided_slice %116 {offsets = [3, 0], sizes = [1, 32], strides = [1, 1]} : vector<8x128xf32> to vector<1x32xf32>
    %121 = vector.extract_strided_slice %116 {offsets = [6, 0], sizes = [1, 1], strides = [1, 1]} : vector<8x128xf32> to vector<1x1xf32>
    %cst_48 = arith.constant 0.000000e+00 : f32
    %122 = vector.broadcast %cst_48 : f32 to vector<128x32xf32>
    %123 = arith.maximumf %114, %122 : vector<128x32xf32>
    %cst_49 = arith.constant 1.000000e-07 : f32
    %124 = vector.broadcast %cst_49 : f32 to vector<128x32xf32>
    %125 = arith.addf %123, %124 : vector<128x32xf32>
    %126 = vector.broadcast %121 : vector<1x1xf32> to vector<128x32xf32>
    %127 = arith.mulf %126, %125 : vector<128x32xf32>
    %cst_50 = arith.constant dense<0xFF800000> : vector<32xf32>
    %128 = vector.multi_reduction <maximumf>, %127, %cst_50 [0] : vector<128x32xf32> to vector<32xf32>
    %129 = vector.shape_cast %128 : vector<32xf32> to vector<1x32xf32>
    %130 = vector.broadcast %129 : vector<1x32xf32> to vector<128x32xf32>
    %131 = arith.subf %127, %130 : vector<128x32xf32>
    %132 = math.exp %131 : vector<128x32xf32>
    %133 = arith.mulf %132, %125 : vector<128x32xf32>
    %134 = arith.truncf %133 : vector<128x32xf32> to vector<128x32xbf16>
    %cst_51 = arith.constant dense<0.000000e+00> : vector<128x32xf32>
    %135 = tpu.matmul %3, %134, %cst_51 {dimension_numbers = #tpu.dot_dimension_numbers<[1], [0], [0], [1], [0, 0, 1, 1], [], []>} : vector<128x128xbf16>, vector<128x32xbf16>, vector<128x32xf32> -> vector<128x32xf32>
    %136 = arith.truncf %132 : vector<128x32xf32> to vector<128x32xbf16>
    %cst_52 = arith.constant dense<0.000000e+00> : vector<128x32xf32>
    %137 = tpu.matmul %3, %136, %cst_52 {dimension_numbers = #tpu.dot_dimension_numbers<[1], [0], [0], [1], [0, 0, 1, 1], [], []>} : vector<128x128xbf16>, vector<128x32xbf16>, vector<128x32xf32> -> vector<128x32xf32>
    %cst_53 = arith.constant 0.000000e+00 : f32
    %138 = vector.broadcast %cst_53 : f32 to vector<128x32xf32>
    %139 = arith.cmpf ogt, %137, %138 : vector<128x32xf32>
    %cst_54 = arith.constant 1.000000e+00 : f32
    %140 = vector.broadcast %cst_54 : f32 to vector<128x32xf32>
    %141 = arith.select %139, %137, %140 : vector<128x32xi1>, vector<128x32xf32>
    %cst_55 = arith.constant 0.000000e+00 : f32
    %142 = vector.broadcast %cst_55 : f32 to vector<128x32xf32>
    %143 = arith.cmpf ogt, %137, %142 : vector<128x32xf32>
    %144 = tpu.reciprocal %141 {approx = true} : vector<128x32xf32> -> vector<128x32xf32>
    %145 = arith.mulf %135, %144 : vector<128x32xf32>
    %cst_56 = arith.constant 0.000000e+00 : f32
    %146 = vector.broadcast %cst_56 : f32 to vector<128x32xf32>
    %147 = arith.select %143, %145, %146 : vector<128x32xi1>, vector<128x32xf32>
    %148 = arith.addf %147, %114 : vector<128x32xf32>
    %149 = arith.truncf %148 : vector<128x32xf32> to vector<128x32xbf16>
    %c1_57 = arith.constant 1 : index
    %c0_58 = arith.constant 0 : index
    %c0_59 = arith.constant 0 : index
    %150 = vector.load %arg4[%c1_57, %c0_58, %c0_59] : memref<3x32x64xbf16, #tpu.memory_space<vmem>>, vector<1x32x64xbf16>
    %151 = vector.shape_cast %150 : vector<1x32x64xbf16> to vector<32x64xbf16>
    %cst_60 = arith.constant dense<0.000000e+00> : vector<128x64xf32>
    %152 = tpu.matmul %149, %151, %cst_60 {dimension_numbers = #tpu.dot_dimension_numbers<[1], [0], [0], [1], [0, 0, 1, 1], [], []>} : vector<128x32xbf16>, vector<32x64xbf16>, vector<128x64xf32> -> vector<128x64xf32>
    %153 = vector.broadcast %117 : vector<1x64xf32> to vector<128x64xf32>
    %154 = arith.addf %152, %153 : vector<128x64xf32>
    %cst_61 = arith.constant dense<0.000000e+00> : vector<128xf32>
    %155 = vector.multi_reduction <add>, %154, %cst_61 [1] : vector<128x64xf32> to vector<128xf32>
    %156 = vector.shape_cast %155 : vector<128xf32> to vector<128x1xf32>
    %cst_62 = arith.constant 6.400000e+01 : f32
    %157 = vector.broadcast %cst_62 : f32 to vector<128x1xf32>
    %158 = arith.divf %156, %157 : vector<128x1xf32>
    %159 = arith.mulf %154, %154 : vector<128x64xf32>
    %cst_63 = arith.constant dense<0.000000e+00> : vector<128xf32>
    %160 = vector.multi_reduction <add>, %159, %cst_63 [1] : vector<128x64xf32> to vector<128xf32>
    %161 = vector.shape_cast %160 : vector<128xf32> to vector<128x1xf32>
    %cst_64 = arith.constant 6.400000e+01 : f32
    %162 = vector.broadcast %cst_64 : f32 to vector<128x1xf32>
    %163 = arith.divf %161, %162 : vector<128x1xf32>
    %164 = arith.mulf %158, %158 : vector<128x1xf32>
    %165 = arith.subf %163, %164 : vector<128x1xf32>
    %cst_65 = arith.constant 0.000000e+00 : f32
    %166 = vector.broadcast %cst_65 : f32 to vector<128x1xf32>
    %167 = arith.maximumf %165, %166 : vector<128x1xf32>
    %168 = vector.broadcast %158 : vector<128x1xf32> to vector<128x64xf32>
    %169 = arith.subf %154, %168 : vector<128x64xf32>
    %cst_66 = arith.constant 9.99999974E-6 : f32
    %170 = vector.broadcast %cst_66 : f32 to vector<128x1xf32>
    %171 = arith.addf %167, %170 : vector<128x1xf32>
    %172 = math.rsqrt %171 : vector<128x1xf32>
    %173 = vector.broadcast %172 : vector<128x1xf32> to vector<128x64xf32>
    %174 = arith.mulf %169, %173 : vector<128x64xf32>
    %175 = vector.broadcast %118 : vector<1x64xf32> to vector<128x64xf32>
    %176 = arith.mulf %174, %175 : vector<128x64xf32>
    %177 = vector.broadcast %119 : vector<1x64xf32> to vector<128x64xf32>
    %178 = arith.addf %176, %177 : vector<128x64xf32>
    %cst_67 = arith.constant 0.000000e+00 : f32
    %179 = vector.broadcast %cst_67 : f32 to vector<128x64xf32>
    %180 = arith.maximumf %178, %179 : vector<128x64xf32>
    %181 = arith.truncf %180 : vector<128x64xf32> to vector<128x64xbf16>
    %c1_68 = arith.constant 1 : index
    %c0_69 = arith.constant 0 : index
    %c0_70 = arith.constant 0 : index
    %182 = vector.load %arg5[%c1_68, %c0_69, %c0_70] : memref<3x64x32xbf16, #tpu.memory_space<vmem>>, vector<1x64x32xbf16>
    %183 = vector.shape_cast %182 : vector<1x64x32xbf16> to vector<64x32xbf16>
    %cst_71 = arith.constant dense<0.000000e+00> : vector<128x32xf32>
    %184 = tpu.matmul %181, %183, %cst_71 {dimension_numbers = #tpu.dot_dimension_numbers<[1], [0], [0], [1], [0, 0, 1, 1], [], []>} : vector<128x64xbf16>, vector<64x32xbf16>, vector<128x32xf32> -> vector<128x32xf32>
    %185 = vector.broadcast %120 : vector<1x32xf32> to vector<128x32xf32>
    %186 = arith.addf %184, %185 : vector<128x32xf32>
    %187 = arith.addf %84, %186 : vector<128x32xf32>
    %c2 = arith.constant 2 : index
    %c0_72 = arith.constant 0 : index
    %c0_73 = arith.constant 0 : index
    %188 = vector.load %arg6[%c2, %c0_72, %c0_73] : memref<4x8x128xf32, #tpu.memory_space<vmem>>, vector<1x8x128xf32>
    %189 = vector.shape_cast %188 : vector<1x8x128xf32> to vector<8x128xf32>
    %190 = vector.extract_strided_slice %189 {offsets = [4, 0], sizes = [1, 32], strides = [1, 1]} : vector<8x128xf32> to vector<1x32xf32>
    %191 = vector.extract_strided_slice %189 {offsets = [5, 0], sizes = [1, 32], strides = [1, 1]} : vector<8x128xf32> to vector<1x32xf32>
    %cst_74 = arith.constant dense<0.000000e+00> : vector<128xf32>
    %192 = vector.multi_reduction <add>, %187, %cst_74 [1] : vector<128x32xf32> to vector<128xf32>
    %193 = vector.shape_cast %192 : vector<128xf32> to vector<128x1xf32>
    %cst_75 = arith.constant 3.200000e+01 : f32
    %194 = vector.broadcast %cst_75 : f32 to vector<128x1xf32>
    %195 = arith.divf %193, %194 : vector<128x1xf32>
    %196 = arith.mulf %187, %187 : vector<128x32xf32>
    %cst_76 = arith.constant dense<0.000000e+00> : vector<128xf32>
    %197 = vector.multi_reduction <add>, %196, %cst_76 [1] : vector<128x32xf32> to vector<128xf32>
    %198 = vector.shape_cast %197 : vector<128xf32> to vector<128x1xf32>
    %cst_77 = arith.constant 3.200000e+01 : f32
    %199 = vector.broadcast %cst_77 : f32 to vector<128x1xf32>
    %200 = arith.divf %198, %199 : vector<128x1xf32>
    %201 = arith.mulf %195, %195 : vector<128x1xf32>
    %202 = arith.subf %200, %201 : vector<128x1xf32>
    %cst_78 = arith.constant 0.000000e+00 : f32
    %203 = vector.broadcast %cst_78 : f32 to vector<128x1xf32>
    %204 = arith.maximumf %202, %203 : vector<128x1xf32>
    %205 = vector.broadcast %195 : vector<128x1xf32> to vector<128x32xf32>
    %206 = arith.subf %187, %205 : vector<128x32xf32>
    %cst_79 = arith.constant 9.99999974E-6 : f32
    %207 = vector.broadcast %cst_79 : f32 to vector<128x1xf32>
    %208 = arith.addf %204, %207 : vector<128x1xf32>
    %209 = math.rsqrt %208 : vector<128x1xf32>
    %210 = vector.broadcast %209 : vector<128x1xf32> to vector<128x32xf32>
    %211 = arith.mulf %206, %210 : vector<128x32xf32>
    %212 = vector.broadcast %190 : vector<1x32xf32> to vector<128x32xf32>
    %213 = arith.mulf %211, %212 : vector<128x32xf32>
    %214 = vector.broadcast %191 : vector<1x32xf32> to vector<128x32xf32>
    %215 = arith.addf %213, %214 : vector<128x32xf32>
    %cst_80 = arith.constant 0.000000e+00 : f32
    %216 = vector.broadcast %cst_80 : f32 to vector<128x32xf32>
    %217 = arith.maximumf %215, %216 : vector<128x32xf32>
    %c2_81 = arith.constant 2 : index
    %c0_82 = arith.constant 0 : index
    %c0_83 = arith.constant 0 : index
    %218 = vector.load %arg6[%c2_81, %c0_82, %c0_83] : memref<4x8x128xf32, #tpu.memory_space<vmem>>, vector<1x8x128xf32>
    %219 = vector.shape_cast %218 : vector<1x8x128xf32> to vector<8x128xf32>
    %220 = vector.extract_strided_slice %219 {offsets = [0, 0], sizes = [1, 64], strides = [1, 1]} : vector<8x128xf32> to vector<1x64xf32>
    %221 = vector.extract_strided_slice %219 {offsets = [1, 0], sizes = [1, 64], strides = [1, 1]} : vector<8x128xf32> to vector<1x64xf32>
    %222 = vector.extract_strided_slice %219 {offsets = [2, 0], sizes = [1, 64], strides = [1, 1]} : vector<8x128xf32> to vector<1x64xf32>
    %223 = vector.extract_strided_slice %219 {offsets = [3, 0], sizes = [1, 32], strides = [1, 1]} : vector<8x128xf32> to vector<1x32xf32>
    %224 = vector.extract_strided_slice %219 {offsets = [6, 0], sizes = [1, 1], strides = [1, 1]} : vector<8x128xf32> to vector<1x1xf32>
    %cst_84 = arith.constant 0.000000e+00 : f32
    %225 = vector.broadcast %cst_84 : f32 to vector<128x32xf32>
    %226 = arith.maximumf %217, %225 : vector<128x32xf32>
    %cst_85 = arith.constant 1.000000e-07 : f32
    %227 = vector.broadcast %cst_85 : f32 to vector<128x32xf32>
    %228 = arith.addf %226, %227 : vector<128x32xf32>
    %229 = vector.broadcast %224 : vector<1x1xf32> to vector<128x32xf32>
    %230 = arith.mulf %229, %228 : vector<128x32xf32>
    %cst_86 = arith.constant dense<0xFF800000> : vector<32xf32>
    %231 = vector.multi_reduction <maximumf>, %230, %cst_86 [0] : vector<128x32xf32> to vector<32xf32>
    %232 = vector.shape_cast %231 : vector<32xf32> to vector<1x32xf32>
    %233 = vector.broadcast %232 : vector<1x32xf32> to vector<128x32xf32>
    %234 = arith.subf %230, %233 : vector<128x32xf32>
    %235 = math.exp %234 : vector<128x32xf32>
    %236 = arith.mulf %235, %228 : vector<128x32xf32>
    %237 = arith.truncf %236 : vector<128x32xf32> to vector<128x32xbf16>
    %cst_87 = arith.constant dense<0.000000e+00> : vector<128x32xf32>
    %238 = tpu.matmul %3, %237, %cst_87 {dimension_numbers = #tpu.dot_dimension_numbers<[1], [0], [0], [1], [0, 0, 1, 1], [], []>} : vector<128x128xbf16>, vector<128x32xbf16>, vector<128x32xf32> -> vector<128x32xf32>
    %239 = arith.truncf %235 : vector<128x32xf32> to vector<128x32xbf16>
    %cst_88 = arith.constant dense<0.000000e+00> : vector<128x32xf32>
    %240 = tpu.matmul %3, %239, %cst_88 {dimension_numbers = #tpu.dot_dimension_numbers<[1], [0], [0], [1], [0, 0, 1, 1], [], []>} : vector<128x128xbf16>, vector<128x32xbf16>, vector<128x32xf32> -> vector<128x32xf32>
    %cst_89 = arith.constant 0.000000e+00 : f32
    %241 = vector.broadcast %cst_89 : f32 to vector<128x32xf32>
    %242 = arith.cmpf ogt, %240, %241 : vector<128x32xf32>
    %cst_90 = arith.constant 1.000000e+00 : f32
    %243 = vector.broadcast %cst_90 : f32 to vector<128x32xf32>
    %244 = arith.select %242, %240, %243 : vector<128x32xi1>, vector<128x32xf32>
    %cst_91 = arith.constant 0.000000e+00 : f32
    %245 = vector.broadcast %cst_91 : f32 to vector<128x32xf32>
    %246 = arith.cmpf ogt, %240, %245 : vector<128x32xf32>
    %247 = tpu.reciprocal %244 {approx = true} : vector<128x32xf32> -> vector<128x32xf32>
    %248 = arith.mulf %238, %247 : vector<128x32xf32>
    %cst_92 = arith.constant 0.000000e+00 : f32
    %249 = vector.broadcast %cst_92 : f32 to vector<128x32xf32>
    %250 = arith.select %246, %248, %249 : vector<128x32xi1>, vector<128x32xf32>
    %251 = arith.addf %250, %217 : vector<128x32xf32>
    %252 = arith.truncf %251 : vector<128x32xf32> to vector<128x32xbf16>
    %c2_93 = arith.constant 2 : index
    %c0_94 = arith.constant 0 : index
    %c0_95 = arith.constant 0 : index
    %253 = vector.load %arg4[%c2_93, %c0_94, %c0_95] : memref<3x32x64xbf16, #tpu.memory_space<vmem>>, vector<1x32x64xbf16>
    %254 = vector.shape_cast %253 : vector<1x32x64xbf16> to vector<32x64xbf16>
    %cst_96 = arith.constant dense<0.000000e+00> : vector<128x64xf32>
    %255 = tpu.matmul %252, %254, %cst_96 {dimension_numbers = #tpu.dot_dimension_numbers<[1], [0], [0], [1], [0, 0, 1, 1], [], []>} : vector<128x32xbf16>, vector<32x64xbf16>, vector<128x64xf32> -> vector<128x64xf32>
    %256 = vector.broadcast %220 : vector<1x64xf32> to vector<128x64xf32>
    %257 = arith.addf %255, %256 : vector<128x64xf32>
    %cst_97 = arith.constant dense<0.000000e+00> : vector<128xf32>
    %258 = vector.multi_reduction <add>, %257, %cst_97 [1] : vector<128x64xf32> to vector<128xf32>
    %259 = vector.shape_cast %258 : vector<128xf32> to vector<128x1xf32>
    %cst_98 = arith.constant 6.400000e+01 : f32
    %260 = vector.broadcast %cst_98 : f32 to vector<128x1xf32>
    %261 = arith.divf %259, %260 : vector<128x1xf32>
    %262 = arith.mulf %257, %257 : vector<128x64xf32>
    %cst_99 = arith.constant dense<0.000000e+00> : vector<128xf32>
    %263 = vector.multi_reduction <add>, %262, %cst_99 [1] : vector<128x64xf32> to vector<128xf32>
    %264 = vector.shape_cast %263 : vector<128xf32> to vector<128x1xf32>
    %cst_100 = arith.constant 6.400000e+01 : f32
    %265 = vector.broadcast %cst_100 : f32 to vector<128x1xf32>
    %266 = arith.divf %264, %265 : vector<128x1xf32>
    %267 = arith.mulf %261, %261 : vector<128x1xf32>
    %268 = arith.subf %266, %267 : vector<128x1xf32>
    %cst_101 = arith.constant 0.000000e+00 : f32
    %269 = vector.broadcast %cst_101 : f32 to vector<128x1xf32>
    %270 = arith.maximumf %268, %269 : vector<128x1xf32>
    %271 = vector.broadcast %261 : vector<128x1xf32> to vector<128x64xf32>
    %272 = arith.subf %257, %271 : vector<128x64xf32>
    %cst_102 = arith.constant 9.99999974E-6 : f32
    %273 = vector.broadcast %cst_102 : f32 to vector<128x1xf32>
    %274 = arith.addf %270, %273 : vector<128x1xf32>
    %275 = math.rsqrt %274 : vector<128x1xf32>
    %276 = vector.broadcast %275 : vector<128x1xf32> to vector<128x64xf32>
    %277 = arith.mulf %272, %276 : vector<128x64xf32>
    %278 = vector.broadcast %221 : vector<1x64xf32> to vector<128x64xf32>
    %279 = arith.mulf %277, %278 : vector<128x64xf32>
    %280 = vector.broadcast %222 : vector<1x64xf32> to vector<128x64xf32>
    %281 = arith.addf %279, %280 : vector<128x64xf32>
    %cst_103 = arith.constant 0.000000e+00 : f32
    %282 = vector.broadcast %cst_103 : f32 to vector<128x64xf32>
    %283 = arith.maximumf %281, %282 : vector<128x64xf32>
    %284 = arith.truncf %283 : vector<128x64xf32> to vector<128x64xbf16>
    %c2_104 = arith.constant 2 : index
    %c0_105 = arith.constant 0 : index
    %c0_106 = arith.constant 0 : index
    %285 = vector.load %arg5[%c2_104, %c0_105, %c0_106] : memref<3x64x32xbf16, #tpu.memory_space<vmem>>, vector<1x64x32xbf16>
    %286 = vector.shape_cast %285 : vector<1x64x32xbf16> to vector<64x32xbf16>
    %cst_107 = arith.constant dense<0.000000e+00> : vector<128x32xf32>
    %287 = tpu.matmul %284, %286, %cst_107 {dimension_numbers = #tpu.dot_dimension_numbers<[1], [0], [0], [1], [0, 0, 1, 1], [], []>} : vector<128x64xbf16>, vector<64x32xbf16>, vector<128x32xf32> -> vector<128x32xf32>
    %288 = vector.broadcast %223 : vector<1x32xf32> to vector<128x32xf32>
    %289 = arith.addf %287, %288 : vector<128x32xf32>
    %290 = arith.addf %187, %289 : vector<128x32xf32>
    %c0_108 = arith.constant 0 : index
    %c0_109 = arith.constant 0 : index
    %c0_110 = arith.constant 0 : index
    %291 = vector.load %arg6[%c0_108, %c0_109, %c0_110] : memref<4x8x128xf32, #tpu.memory_space<vmem>>, vector<1x8x128xf32>
    %292 = vector.shape_cast %291 : vector<1x8x128xf32> to vector<8x128xf32>
    %293 = vector.extract_strided_slice %292 {offsets = [4, 0], sizes = [1, 32], strides = [1, 1]} : vector<8x128xf32> to vector<1x32xf32>
    %294 = vector.extract_strided_slice %292 {offsets = [5, 0], sizes = [1, 32], strides = [1, 1]} : vector<8x128xf32> to vector<1x32xf32>
    %cst_111 = arith.constant dense<0.000000e+00> : vector<128xf32>
    %295 = vector.multi_reduction <add>, %290, %cst_111 [1] : vector<128x32xf32> to vector<128xf32>
    %296 = vector.shape_cast %295 : vector<128xf32> to vector<128x1xf32>
    %cst_112 = arith.constant 3.200000e+01 : f32
    %297 = vector.broadcast %cst_112 : f32 to vector<128x1xf32>
    %298 = arith.divf %296, %297 : vector<128x1xf32>
    %299 = arith.mulf %290, %290 : vector<128x32xf32>
    %cst_113 = arith.constant dense<0.000000e+00> : vector<128xf32>
    %300 = vector.multi_reduction <add>, %299, %cst_113 [1] : vector<128x32xf32> to vector<128xf32>
    %301 = vector.shape_cast %300 : vector<128xf32> to vector<128x1xf32>
    %cst_114 = arith.constant 3.200000e+01 : f32
    %302 = vector.broadcast %cst_114 : f32 to vector<128x1xf32>
    %303 = arith.divf %301, %302 : vector<128x1xf32>
    %304 = arith.mulf %298, %298 : vector<128x1xf32>
    %305 = arith.subf %303, %304 : vector<128x1xf32>
    %cst_115 = arith.constant 0.000000e+00 : f32
    %306 = vector.broadcast %cst_115 : f32 to vector<128x1xf32>
    %307 = arith.maximumf %305, %306 : vector<128x1xf32>
    %308 = vector.broadcast %298 : vector<128x1xf32> to vector<128x32xf32>
    %309 = arith.subf %290, %308 : vector<128x32xf32>
    %cst_116 = arith.constant 9.99999974E-6 : f32
    %310 = vector.broadcast %cst_116 : f32 to vector<128x1xf32>
    %311 = arith.addf %307, %310 : vector<128x1xf32>
    %312 = math.rsqrt %311 : vector<128x1xf32>
    %313 = vector.broadcast %312 : vector<128x1xf32> to vector<128x32xf32>
    %314 = arith.mulf %309, %313 : vector<128x32xf32>
    %315 = vector.broadcast %293 : vector<1x32xf32> to vector<128x32xf32>
    %316 = arith.mulf %314, %315 : vector<128x32xf32>
    %317 = vector.broadcast %294 : vector<1x32xf32> to vector<128x32xf32>
    %318 = arith.addf %316, %317 : vector<128x32xf32>
    %cst_117 = arith.constant 0.000000e+00 : f32
    %319 = vector.broadcast %cst_117 : f32 to vector<128x32xf32>
    %320 = arith.maximumf %318, %319 : vector<128x32xf32>
    %cst_118 = arith.constant dense<0.000000e+00> : vector<1x128xf32>
    %321 = tpu.matmul %7, %320, %cst_118 {dimension_numbers = #tpu.dot_dimension_numbers<[1], [1], [0], [0], [0, 0, 1, 0], [], []>} : vector<1x32xf32>, vector<128x32xf32>, vector<1x128xf32> -> vector<1x128xf32>
    %322 = vector.broadcast %8 : vector<1x1xf32> to vector<1x128xf32>
    %323 = arith.addf %321, %322 : vector<1x128xf32>
    %c0_119 = arith.constant 0 : index
    %c0_120 = arith.constant 0 : index
    %c0_121 = arith.constant 0 : index
    %324 = vector.load %arg7[%c0_119, %c0_120, %c0_121] : memref<1x1x128xf32, #tpu.memory_space<vmem>>, vector<1x1x128xf32>
    %325 = vector.shape_cast %324 : vector<1x1x128xf32> to vector<1x128xf32>
    %326 = vector.shape_cast %323 : vector<1x128xf32> to vector<1x1x128xf32>
    tpu.vector_store %arg7[%c0_119, %c0_120, %c0_121], %326 {strides = array<i32>} : memref<1x1x128xf32, #tpu.memory_space<vmem>>, vector<1x1x128xf32>,
    return
  }
  func.func @transform_0(%arg0: i32) -> (i32, i32, i32) {
    %c0_i32 = arith.constant 0 : i32
    %c0_i32_0 = arith.constant 0 : i32
    %c0_i32_1 = arith.constant 0 : i32
    return %arg0, %c0_i32, %c0_i32_0 : i32, i32, i32
  }
  func.func @transform_1(%arg0: i32) -> (i32, i32, i32) {
    %c0_i32 = arith.constant 0 : i32
    %c0_i32_0 = arith.constant 0 : i32
    %c0_i32_1 = arith.constant 0 : i32
    return %arg0, %c0_i32, %c0_i32_0 : i32, i32, i32
  }
  func.func @transform_2(%arg0: i32) -> (i32, i32) {
    %c0_i32 = arith.constant 0 : i32
    %c0_i32_0 = arith.constant 0 : i32
    %c0_i32_1 = arith.constant 0 : i32
    return %c0_i32, %c0_i32_0 : i32, i32
  }
  func.func @transform_3(%arg0: i32) -> (i32, i32, i32) {
    %c0_i32 = arith.constant 0 : i32
    %c0_i32_0 = arith.constant 0 : i32
    %c0_i32_1 = arith.constant 0 : i32
    %c0_i32_2 = arith.constant 0 : i32
    return %c0_i32, %c0_i32_0, %c0_i32_1 : i32, i32, i32
  }
  func.func @transform_4(%arg0: i32) -> (i32, i32, i32) {
    %c0_i32 = arith.constant 0 : i32
    %c0_i32_0 = arith.constant 0 : i32
    %c0_i32_1 = arith.constant 0 : i32
    %c0_i32_2 = arith.constant 0 : i32
    return %c0_i32, %c0_i32_0, %c0_i32_1 : i32, i32, i32
  }
  func.func @transform_5(%arg0: i32) -> (i32, i32, i32) {
    %c0_i32 = arith.constant 0 : i32
    %c0_i32_0 = arith.constant 0 : i32
    %c0_i32_1 = arith.constant 0 : i32
    %c0_i32_2 = arith.constant 0 : i32
    return %c0_i32, %c0_i32_0, %c0_i32_1 : i32, i32, i32
  }
  func.func @transform_6(%arg0: i32) -> (i32, i32, i32) {
    %c0_i32 = arith.constant 0 : i32
    %c0_i32_0 = arith.constant 0 : i32
    %c0_i32_1 = arith.constant 0 : i32
    return %arg0, %c0_i32, %c0_i32_0 : i32, i32, i32
  }
}

</mosaic_0001>

<bundles_post_ra>
// kernel: ligand_gnn_forward.1
= control target key start
LH: loop header
LB: loop body
LE: loop exit
PB: predicated region body
PF: predicated region fallthrough
CT: control target
= control target key end

     0   :  { %11 = vsyncpa [#allocation3], 0  ;;  %s11741_s0 = inlined_call_operand.hbm [shape: bf16[2,128,1152], index: 0, kind: input, shape index: {}]   ;;  %s11742_s1 = inlined_call_operand.vmem [shape: bf16[2,128,128], index: 1, kind: input, shape index: {}]   ;;  %s11743_s2 = inlined_call_operand.vmem [shape: bf16[1152,32], index: 2, kind: input, shape index: {}]   ;;  %s11744_s3 = inlined_call_operand.vmem [shape: bf16[3,32,64], index: 3, kind: input, shape index: {}]   ;;  %s11745_s4 = inlined_call_operand.vmem [shape: bf16[3,64,32], index: 4, kind: input, shape index: {}]   ;;  %s11746_s5 = inlined_call_operand.vmem [shape: f32[4,8,128], index: 5, kind: input, shape index: {}]   ;;  %s11747_s6 = inlined_call_operand.hbm [shape: f32[2,1,128], index: 6, kind: output, shape index: {}]  }
   0x1   :  { %13 = vsyncpa [#allocation3 + $0x1], 0 }
   0x2   :  { %14 = vsyncpa [#allocation4], 0 }
   0x3   :  { %16 = vsyncpa [#allocation4 + $0x1], 0  ;;  %s8284_s21 = smov 0   ;;  %s8286_s22 = smov 0  }
   0x4   :  { %s8288_s23 = smov 0   ;;  %s8290_s24 = smov 0  }
   0x5 LB: > { %s8305_s25 = sadd.s32 4294967295, %s8239_s24   ;;  %s6327_s26 = sadd.s32 4294967294, %s8239_s24   ;;  %s8239_s24 = sphi %s8290_s24, %s12052_s24   ;;  %s8235_s23 = sphi %s8288_s23, %s12051_s23   ;;  %s8231_s22 = sphi %s8286_s22, %s12050_s22   ;;  %s8227_s21 = sphi %s8284_s21, %s12049_s21  }
   0x6   : > { %s8309_s27 = sadd.s32 1, %s8239_s24   ;;  %s29_s28 = sadd.s32 1, %s8235_s23 }
   0x7   : > { %s26_s29 = ssub.s32 %s8239_s24, %s8309_s27  ;;  %p36_p0 = scmp.ne.s32.totalorder %s8235_s23, %s8231_s22 }
   0x8   : > { %p27_p1 = scmp.eq.s32.totalorder %s26_s29, 0  ;;  %p37_p2 = scmp.eq.s32.totalorder %s8239_s24, 0 }
   0x9   : > { %p42_p3 = scmp.ne.s32.totalorder %s8231_s22, %s8227_s21  ;;  %p43_p4 = scmp.eq.s32.totalorder %s8305_s25, 0 }
   0xa   : > { %s8321_s30 = scalar_select %p27_p1, %s8235_s23, %s29_s28  }
   0xb   : > { %p38_p5 = por %p37_p2, %p36_p0  ;;  %p8323_p6 = por %p43_p4, %p42_p3 }
   0xc   : > { %p176_p7 = scmp.eq.s32.totalorder %s8305_s25, 1  ;;  %p182_p8 = scmp.eq.s32.totalorder %s6327_s26, 1 }
   0xd   : > { %p7495_p10 = scmp.lt.s32.totalorder %s8239_s24, 2  ;;  %s214_s10 = sand.u32 1, %s8235_s23  }
   0xe   : > { %p8330_p11 = por %p176_p7, %p36_p0  ;;  %p8334_p12 = por %p182_p8, %p42_p3 }
   0xf   : > { %s7475_s11 = smul.u32 9216, %s8239_s24  ;;  %p8345_p13 = pnand %p7495_p10, %p38_p5 }
  0x10   : > { %s11856_s8 = scalar_select %p8330_p11, 1, 0 }
  0x11   : > { %s11857_s9 = scalar_select %p8334_p12, 1, 0 }
  0x12   : > { %s7474_s12 = smul.u32 576, %s214_s10  ;;  %s8343_s15 = scalar_lea.hbm %s11741_s0, %s7475_s11 }
  0x13   : > { %s8351_s19 = scalar_lea.sflag [#allocation3], %s214_s10  ;;  %s8143_s20 = scalar_lea.hbm %s8343_s15, 9216 }
  0x14   : > { %s218_s17 = scalar_lea.vmem [#allocation2], %s7474_s12  ;;  %p8144_p0 = scmp.ne.s32.totalorder %s8343_s15, %s8143_s20 }
  0x15   : > { %s225_s18 = sshll.u32 %s218_s17, 4  ;;  %p8145_p1 = pneg %p8345_p13  ;;  %s8349_s18 = int_to_ptr.vmem [resolvable:$true] %s225_s18 }
  0x16   : > { %s8148_s29 = scalar_lea.hbm %s11741_s0, 18432  ;;  %p8149_p4 = scmp.lt.u32.totalorder %s8343_s15, %s11741_s0 }
  0x17   : > { %p8146_p2 = pnand %p8145_p1, %p8144_p0  ;;  %p8150_p5 = scmp.lt.u32.totalorder %s8148_s29, %s8143_s20 }
  0x18   : > { %p8152_p8 = scmp.lt.u32.totalorder %s8143_s20, %s8343_s15 }
  0x19   : > { %p8147_p3 = pneg %p8146_p2  ;;  %p8151_p7 = por %p8150_p5, %p8149_p4 }
  0x1b   : > { %p8153_p10 = por %p8152_p8, %p8151_p7 }
  0x1d   : > { %p8154_p9 = pnand %p8153_p10, %p8147_p3 }
  0x1f   : > { %8157 = shalt.err (!%p8154_p9)
}
  0x20   : > { %s8158_s10 = scalar_lea.vmem %s8349_s18, 9216  ;;  %s8241_s12 = smov [#allocation2]  }
  0x21   : > { %p8159_p0 = scmp.ne.s32.totalorder %s8349_s18, %s8158_s10  ;;  %s8163_s14 = sshll.u32 %s8241_s12, 4  ;;  %s8164_s14 = int_to_ptr.vmem [resolvable:$false] %s8163_s14 }
  0x22   : > { %s8165_s17 = scalar_lea.vmem %s8164_s14, 18432  ;;  %p8166_p11 = scmp.lt.s32.totalorder %s8349_s18, %s8164_s14 }
  0x23   : > { %p8161_p2 = pnand %p8159_p0, %p8145_p1  ;;  %p8167_p4 = scmp.lt.s32.totalorder %s8165_s17, %s8158_s10 }
  0x25   : > { %p8162_p12 = pneg %p8161_p2  ;;  %p8168_p5 = por %p8167_p4, %p8166_p11 }
  0x27   : > { %p8169_p7 = pnand %p8168_p5, %p8162_p12 }
  0x29   : > { %8172 = shalt.err (!%p8169_p7)
}
  0x2a   : > { %s8242_s20 = smov 576   ;;  %s8243_s26 = smov 36  }
  0x2b   : > { %7490 = dma.hbm_to_vmem [thread:$0]  (!%p8345_p13), %s8343_s15, 9216, %s8349_s18, %s8351_s19, %s8242_s20, %s8242_s20, %s8243_s26  }
  0x2c   : > { %p6331_p9 = scmp.ge.s32.totalorder %s8239_s24, 1  ;;  %p241_p1 = scmp.lt.s32.totalorder %s8239_s24, 3 }
  0x2e   : > { %p242_p3 = pnand %p6331_p9, %p241_p1 }
  0x30   : > { %245 = sbr.rel (%p242_p3) target bundleno = 4176 (0x1050), region = 44 }
  0x37   : > { %s8382_s28 = sand.u32 1, %s8231_s22  }
  0x38   : > { %s7476_s29 = smul.u32 576, %s8382_s28  ;;  %s248_s11 = scalar_lea.sflag [#allocation3], %s8382_s28 }
  0x3a   : > { %s8386_s13 = scalar_lea.vmem [#allocation2], %s7476_s29 }
  0x3b   : > { %8218 = dma.done.wait (%p8323_p6), %s248_s11, 9216  }
  0x3c   : > { %8220 = vsyncadd (%p8323_p6), %s248_s11, 4294958080  ;;  %v7536_v0 = vld [vmem:[%s11743_s2 + $0x40] sm:$0xff]   ;;  %v7540_v4 = vld [vmem:[%s11743_s2 + $0x48] sm:$0xff]   ;;  %p284_p6 = scmp.lt.s32.totalorder %s8305_s25, 1  ;;  %vm1875_vm0 = vcmask 261120   ;;  %s6237_s16 = scalar_lea.sflag [#allocation4], %s8382_s28 }
  0x3d   : > { %v7537_v1 = vld [vmem:[%s11743_s2] sm:$0xff]   ;;  %6600 = vmatprep.subr.bf16.mxu0 %v7536_v0  ;;  %v7541_v5 = vld [vmem:[%s11743_s2 + $0x8] sm:$0xff]   ;;  %v7544_v8 = vld [vmem:[%s11743_s2 + $0x50] sm:$0xff]   ;;  %p12046_p12 = scmp.ne.s32.totalorder %s11856_s8, 0 }
  0x3e   : > { %v7538_v2 = vld [vmem:[%s11743_s2 + $0xc0] sm:$0xff]   ;;  %6601 = vmatpush3.bf16.msra.mxu0 %v7537_v1  ;;  %v7542_v6 = vld [vmem:[%s11743_s2 + $0xc8] sm:$0xff]   ;;  %v7545_v9 = vld [vmem:[%s11743_s2 + $0x10] sm:$0xff]  }
  0x3f   : > { %v7539_v3 = vld [vmem:[%s11743_s2 + $0x80] sm:$0xff]   ;;  %6664 = vmatprep.subr.bf16.mxu1 %v7538_v2  ;;  %6602 = vmatprep.subr.bf16.mxu0 %v7540_v4  ;;  %v7543_v7 = vld [vmem:[%s11743_s2 + $0x88] sm:$0xff]   ;;  %v7546_v10 = vld [vmem:[%s11743_s2 + $0xd0] sm:$0xff]  }
  0x40   : > { %6665 = vmatpush3.bf16.msra.mxu1 %v7539_v3  ;;  %v7547_v11 = vld [vmem:[%s11743_s2 + $0x90] sm:$0xff]   ;;  %v7548_v12 = vld [vmem:[%s11743_s2 + $0x58] sm:$0xff]   ;;  %v7552_v16 = vld [vmem:[%s11743_s2 + $0x60] sm:$0xff]  }
  0x41   : > { %6666 = vmatprep.subr.bf16.mxu1 %v7542_v6  ;;  %v7549_v13 = vld [vmem:[%s11743_s2 + $0x18] sm:$0xff]   ;;  %v7553_v17 = vld [vmem:[%s11743_s2 + $0x20] sm:$0xff]   ;;  %v7556_v20 = vld [vmem:[%s11743_s2 + $0x68] sm:$0xff]  }
  0x42   : > { %6603 = vmatpush3.bf16.msra.mxu0 %v7541_v5  ;;  %v7550_v14 = vld [vmem:[%s11743_s2 + $0xd8] sm:$0xff]   ;;  %v7554_v18 = vld [vmem:[%s11743_s2 + $0xe0] sm:$0xff]   ;;  %v7557_v21 = vld [vmem:[%s11743_s2 + $0x28] sm:$0xff]  }
  0x43   : > { %6604 = vmatprep.subr.bf16.mxu0 %v7544_v8  ;;  %v7551_v15 = vld [vmem:[%s11743_s2 + $0x98] sm:$0xff]   ;;  %v7555_v19 = vld [vmem:[%s11743_s2 + $0xa0] sm:$0xff]   ;;  %v7558_v22 = vld [vmem:[%s11743_s2 + $0xe8] sm:$0xff]  }
  0x44   : > { %6667 = vmatpush3.bf16.msra.mxu1 %v7543_v7  ;;  %v7559_v23 = vld [vmem:[%s11743_s2 + $0xa8] sm:$0xff]   ;;  %v7560_v24 = vld [vmem:[%s11743_s2 + $0x70] sm:$0xff]   ;;  %v7564_v28 = vld [vmem:[%s11743_s2 + $0x78] sm:$0xff]  }
  0x45   : > { %6668 = vmatprep.subr.bf16.mxu1 %v7546_v10  ;;  %v7561_v25 = vld [vmem:[%s11743_s2 + $0x30] sm:$0xff]   ;;  %v7565_v29 = vld [vmem:[%s11743_s2 + $0x38] sm:$0xff]   ;;  %v7567_v31 = vld [vmem:[%s8386_s13] ss:$36 sps:$4 sm:$0xff]  }
  0x46   : > { %6605 = vmatpush3.bf16.msra.mxu0 %v7545_v9  ;;  %v7562_v26 = vld [vmem:[%s11743_s2 + $0xf0] sm:$0xff]   ;;  %v7566_v30 = vld [vmem:[%s11743_s2 + $0xf8] sm:$0xff]   ;;  %v7569_v32 = vld [vmem:[%s8386_s13 + $0x4] ss:$36 sps:$4 sm:$0xff]  }
  0x47   : > { %6606 = vmatprep.subr.bf16.mxu0 %v7548_v12  ;;  %v7563_v27 = vld [vmem:[%s11743_s2 + $0xb0] sm:$0xff]   ;;  %v7570_v33 = vld [vmem:[%s11743_s2 + $0xb8] sm:$0xff]   ;;  %1368 = vmatprep.mubr.bf16.mxu0 %v7569_v32  ;;  %v7571_v34 = vld [vmem:[%s8386_s13 + $0x8] ss:$36 sps:$4 sm:$0xff]  }
  0x48   : > { %6669 = vmatpush3.bf16.msra.mxu1 %v7547_v11  ;;  %v7573_v35 = vld [vmem:[%s8386_s13 + $0xc] ss:$36 sps:$4 sm:$0xff]   ;;  %v7577_v37 = vld [vmem:[%s8386_s13 + $0x54] ss:$36 sps:$4 sm:$0xff]   ;;  %v7586_v40 = vld [vmem:[%s11743_s2 + $0x140] sm:$0xff]  }
  0x49   : > { %6670 = vmatprep.subr.bf16.mxu1 %v7550_v14  ;;  %v7574_v36 = vld [vmem:[%s8386_s13 + $0x4c] ss:$36 sps:$4 sm:$0xff]   ;;  %1465 = vmatprep.mubr.bf16.mxu1 %v7573_v35  ;;  %v7580_v39 = vld [vmem:[%s8386_s13 + $0x94] ss:$36 sps:$4 sm:$0xff]   ;;  %v7587_v41 = vld [vmem:[%s11743_s2 + $0x100] sm:$0xff]  }
  0x4a   : > { %6607 = vmatpush3.bf16.msra.mxu0 %v7549_v13  ;;  %v7576_v38 = vld [vmem:[%s8386_s13 + $0x48] ss:$36 sps:$4 sm:$0xff]   ;;  %v7579_v42 = vld [vmem:[%s8386_s13 + $0x50] ss:$36 sps:$4 sm:$0xff]   ;;  %v7583_v43 = vld [vmem:[%s8386_s13 + $0x9c] ss:$36 sps:$4 sm:$0xff]  }
  0x4b   : > { %6608 = vmatprep.subr.bf16.mxu0 %v7552_v16  ;;  %v7594_v44 = vld [vmem:[%s11743_s2 + $0x148] sm:$0xff]   ;;  %v7582_v46 = vld [vmem:[%s8386_s13 + $0x90] ss:$36 sps:$4 sm:$0xff]   ;;  %v7585_v47 = vld [vmem:[%s8386_s13 + $0x98] ss:$36 sps:$4 sm:$0xff]  }
  0x4c   : > { %6671 = vmatpush3.bf16.msra.mxu1 %v7551_v15  ;;  %v7595_v45 = vld [vmem:[%s11743_s2 + $0x108] sm:$0xff]   ;;  %v7588_v48 = vld [vmem:[%s8386_s13 + $0xdc] ss:$36 sps:$4 sm:$0xff]   ;;  %v7604_v52 = vld [vmem:[%s11743_s2 + $0x150] sm:$0xff]  }
  0x4d   : > { %6672 = vmatprep.subr.bf16.mxu1 %v7554_v18  ;;  %v7591_v49 = vld [vmem:[%s8386_s13 + $0xe4] ss:$36 sps:$4 sm:$0xff]   ;;  %v7605_v53 = vld [vmem:[%s11743_s2 + $0x110] sm:$0xff]   ;;  %v7590_v55 = vld [vmem:[%s8386_s13 + $0xd8] ss:$36 sps:$4 sm:$0xff]  }
  0x4e   : > { %6609 = vmatpush3.bf16.msra.mxu0 %v7553_v17  ;;  %v7602_v50 = vld [vmem:[%s11743_s2 + $0x1c0] sm:$0xff]   ;;  %v7606_v54 = vld [vmem:[%s11743_s2 + $0x1c8] sm:$0xff]   ;;  %v7614_v60 = vld [vmem:[%s11743_s2 + $0x1d0] sm:$0xff]  }
  0x4f   : > { %6610 = vmatprep.subr.bf16.mxu0 %v7556_v20  ;;  %v7603_v51 = vld [vmem:[%s11743_s2 + $0x180] sm:$0xff]   ;;  %v7609_v57 = vld [vmem:[%s11743_s2 + $0x188] sm:$0xff]   ;;  %v7615_v61 = vld [vmem:[%s11743_s2 + $0x190] sm:$0xff]  }
  0x50   : > { %6673 = vmatpush3.bf16.msra.mxu1 %v7555_v19  ;;  %v7596_v56 = vld [vmem:[%s8386_s13 + $0x124] ss:$36 sps:$4 sm:$0xff]   ;;  %v7599_v59 = vld [vmem:[%s8386_s13 + $0x12c] ss:$36 sps:$4 sm:$0xff]   ;;  %v7616_v62 = vld [vmem:[%s11743_s2 + $0x158] sm:$0xff]  }
  0x51   : > { %6674 = vmatprep.subr.bf16.mxu1 %v7558_v22  ;;  %v7593_v58 = vld [vmem:[%s8386_s13 + $0xe0] ss:$36 sps:$4 sm:$0xff]   ;;  %v7617_v0 = vld [vmem:[%s11743_s2 + $0x118] sm:$0xff]   ;;  %v7607_v2 = vld [vmem:[%s8386_s13 + $0x16c] ss:$36 sps:$4 sm:$0xff]  }
  0x52   : > { %6611 = vmatpush3.bf16.msra.mxu0 %v7557_v21  ;;  %v7598_v63 = vld [vmem:[%s8386_s13 + $0x120] ss:$36 sps:$4 sm:$0xff]   ;;  %v7618_v1 = vld [vmem:[%s11743_s2 + $0x1d8] sm:$0xff]   ;;  %v7601_v4 = vld [vmem:[%s8386_s13 + $0x128] ss:$36 sps:$4 sm:$0xff]  }
  0x53   : > { %6612 = vmatprep.subr.bf16.mxu0 %v7560_v24  ;;  %v7621_v3 = vld [vmem:[%s11743_s2 + $0x198] sm:$0xff]   ;;  %v7623_v5 = vld [vmem:[%s11743_s2 + $0x160] sm:$0xff]   ;;  %v7610_v8 = vld [vmem:[%s8386_s13 + $0x168] ss:$36 sps:$4 sm:$0xff]  }
  0x54   : > { %6675 = vmatpush3.bf16.msra.mxu1 %v7559_v23  ;;  %v7611_v6 = vld [vmem:[%s8386_s13 + $0x174] ss:$36 sps:$4 sm:$0xff]   ;;  %v7626_v7 = vld [vmem:[%s11743_s2 + $0x120] sm:$0xff]   ;;  %v7630_v12 = vld [vmem:[%s11743_s2 + $0x168] sm:$0xff]  }
  0x55   : > { %6676 = vmatprep.subr.bf16.mxu1 %v7562_v26  ;;  %v7628_v9 = vld [vmem:[%s11743_s2 + $0x1e0] sm:$0xff]   ;;  %v7619_v10 = vld [vmem:[%s8386_s13 + $0x1b4] ss:$36 sps:$4 sm:$0xff]   ;;  %v7631_v13 = vld [vmem:[%s11743_s2 + $0x128] sm:$0xff]  }
  0x56   : > { %6613 = vmatpush3.bf16.msra.mxu0 %v7561_v25  ;;  %v7629_v11 = vld [vmem:[%s11743_s2 + $0x1a0] sm:$0xff]   ;;  %v7632_v14 = vld [vmem:[%s11743_s2 + $0x1e8] sm:$0xff]   ;;  %v7613_v15 = vld [vmem:[%s8386_s13 + $0x170] ss:$36 sps:$4 sm:$0xff]  }
  0x57   : > { %6614 = vmatprep.subr.bf16.mxu0 %v7564_v28  ;;  %v7624_v16 = vld [vmem:[%s8386_s13 + $0x1bc] ss:$36 sps:$4 sm:$0xff]   ;;  %v7635_v17 = vld [vmem:[%s11743_s2 + $0x1a8] sm:$0xff]   ;;  %v7637_v18 = vld [vmem:[%s11743_s2 + $0x170] sm:$0xff]  }
  0x58   : > { %6677 = vmatpush3.bf16.msra.mxu1 %v7563_v27  ;;  %v7622_v19 = vld [vmem:[%s8386_s13 + $0x1b0] ss:$36 sps:$4 sm:$0xff]   ;;  %v7633_v21 = vld [vmem:[%s8386_s13 + $0x1fc] ss:$36 sps:$4 sm:$0xff]   ;;  %v7638_v24 = vld [vmem:[%s8386_s13 + $0x204] ss:$36 sps:$4 sm:$0xff]  }
  0x59   : > { %6678 = vmatprep.subr.bf16.mxu1 %v7566_v30  ;;  %v7640_v20 = vld [vmem:[%s11743_s2 + $0x130] sm:$0xff]   ;;  %v7627_v22 = vld [vmem:[%s8386_s13 + $0x1b8] ss:$36 sps:$4 sm:$0xff]   ;;  %v7641_v32 = vld [vmem:[%s8386_s13 + $0x200] ss:$36 sps:$4 sm:$0xff]  }
  0x5a   : > { %6615 = vmatpush3.bf16.msra.mxu0 %v7565_v29  ;;  %v7642_v23 = vld [vmem:[%s11743_s2 + $0x1f0] sm:$0xff]   ;;  %v7644_v26 = vld [vmem:[%s11743_s2 + $0x178] sm:$0xff]  }
  0x5b   : > { %6728 = vmatprep.subr.bf16.mxu0 %v7586_v40  ;;  %v7643_v25 = vld [vmem:[%s11743_s2 + $0x1b0] sm:$0xff]   ;;  %v7645_v27 = vld [vmem:[%s11743_s2 + $0x138] sm:$0xff]  }
  0x5c   : > { %6679 = vmatpush3.bf16.msra.mxu1 %v7570_v33  ;;  %v7646_v28 = vld [vmem:[%s11743_s2 + $0x1f8] sm:$0xff]   ;;  %v7647_v35 = vld [vmem:[%s8386_s13 + $0x10] ss:$36 sps:$4 sm:$0xff]  }
  0x5d   : > { %1369 = vmatmul.mubr.bf16.vlgmr.msra.gmra.mrb[0].mxu0 %v7567_v31  ;;  %6792 = vmatprep.subr.bf16.mxu1 %v7602_v50  ;;  %v7650_v29 = vld [vmem:[%s11743_s2 + $0x1b8] sm:$0xff]   ;;  %v7680_v40 = vld [vmem:[%s11743_s2 + $0x210] sm:$0xff]   ;;  %v7665_v50 = vld [vmem:[%s8386_s13 + $0xa8] ss:$36 sps:$4 sm:$0xff]  }
  0x5e   : > { %1376 = vmatprep.mubr.bf16.mxu0 %v7574_v36  ;;  %6729 = vmatpush3.bf16.msra.mxu0 %v7587_v41  ;;  %v7636_v30 = vld [vmem:[%s8386_s13 + $0x1f8] ss:$36 sps:$4 sm:$0xff]  }
  0x5f   : > { %1466 = vmatmul.mubr.bf16.vlgmr.msra.gmra.mrb[0].mxu1 %v7571_v34  ;;  %6730 = vmatprep.subr.bf16.mxu0 %v7594_v44  ;;  %v7649_v31 = vld [vmem:[%s8386_s13 + $0x14] ss:$36 sps:$4 sm:$0xff]   ;;  %v7653_v33 = vld [vmem:[%s8386_s13 + $0x1c] ss:$36 sps:$4 sm:$0xff]  }
  0x60   : > { %1473 = vmatprep.mubr.bf16.mxu1 %v7577_v37  ;;  %6793 = vmatpush3.bf16.msra.mxu1 %v7603_v51  ;;  %v7666_v34 = vld [vmem:[%s11743_s2 + $0x200] sm:$0xff]   ;;  %v7673_v37 = vld [vmem:[%s11743_s2 + $0x208] sm:$0xff]   ;;  %v7656_v41 = vld [vmem:[%s8386_s13 + $0x58] ss:$36 sps:$4 sm:$0xff]  }
  0x61   : > { %6794 = vmatprep.subr.bf16.mxu1 %v7606_v54  ;;  %v7654_v36 = vld [vmem:[%s8386_s13 + $0x5c] ss:$36 sps:$4 sm:$0xff]   ;;  %v7670_v51 = vld [vmem:[%s8386_s13 + $0xf4] ss:$36 sps:$4 sm:$0xff]  }
  0x62   : > { %6731 = vmatpush3.bf16.msra.mxu0 %v7595_v45  ;;  %v7659_v44 = vld [vmem:[%s8386_s13 + $0x60] ss:$36 sps:$4 sm:$0xff]   ;;  %v7663_v45 = vld [vmem:[%s8386_s13 + $0xac] ss:$36 sps:$4 sm:$0xff]   ;;  %v7674_v54 = vld [vmem:[%s8386_s13 + $0x134] ss:$36 sps:$4 sm:$0xff]  }
  0x63   : > { %6732 = vmatprep.subr.bf16.mxu0 %v7604_v52  ;;  %v7699_v52 = vld [vmem:[%s11743_s2 + $0x230] sm:$0xff]  }
  0x64   : > { %6795 = vmatpush3.bf16.msra.mxu1 %v7609_v57  ;;  %v7677_v57 = vld [vmem:[%s8386_s13 + $0x13c] ss:$36 sps:$4 sm:$0xff]  }
  0x65   : > { %1377 = vmatmul.mubr.bf16.gmra.mrb[4].mxu0 %v7576_v38  ;;  %6796 = vmatprep.subr.bf16.mxu1 %v7614_v60  ;;  %v7651_v38 = vld [vmem:[%s8386_s13 + $0x18] ss:$36 sps:$4 sm:$0xff]  }
  0x66   : > { %1384 = vmatprep.mubr.bf16.mxu0 %v7580_v39  ;;  %6733 = vmatpush3.bf16.msra.mxu0 %v7605_v53  ;;  %v7657_v39 = vld [vmem:[%s8386_s13 + $0x64] ss:$36 sps:$4 sm:$0xff]   ;;  %v7679_v60 = vld [vmem:[%s8386_s13 + $0x138] ss:$36 sps:$4 sm:$0xff]  }
  0x67   : > { %1474 = vmatmul.mubr.bf16.gmra.mrb[4].mxu1 %v7579_v42  ;;  %6734 = vmatprep.subr.bf16.mxu0 %v7616_v62  ;;  %v7660_v42 = vld [vmem:[%s8386_s13 + $0xa4] ss:$36 sps:$4 sm:$0xff]   ;;  %v7683_v62 = vld [vmem:[%s8386_s13 + $0x178] ss:$36 sps:$4 sm:$0xff]  }
  0x68   : > { %1481 = vmatprep.mubr.bf16.mxu1 %v7583_v43  ;;  %6797 = vmatpush3.bf16.msra.mxu1 %v7615_v61  ;;  %v7687_v43 = vld [vmem:[%s11743_s2 + $0x218] sm:$0xff]   ;;  %v7669_v53 = vld [vmem:[%s8386_s13 + $0xe8] ss:$36 sps:$4 sm:$0xff]  }
  0x69   : > { %6798 = vmatprep.subr.bf16.mxu1 %v7618_v1  ;;  %v7684_v61 = vld [vmem:[%s8386_s13 + $0x184] ss:$36 sps:$4 sm:$0xff]   ;;  %v7692_v1 = vld [vmem:[%s8386_s13 + $0x1cc] ss:$36 sps:$4 sm:$0xff]  }
  0x6a   : > { %6735 = vmatpush3.bf16.msra.mxu0 %v7617_v0  ;;  %v7686_v0 = vld [vmem:[%s8386_s13 + $0x180] ss:$36 sps:$4 sm:$0xff]  }
  0x6b   : > { %6736 = vmatprep.subr.bf16.mxu0 %v7623_v5  ;;  %v7700_v5 = vld [vmem:[%s8386_s13 + $0x214] ss:$36 sps:$4 sm:$0xff]  }
  0x6c   : > { %6799 = vmatpush3.bf16.msra.mxu1 %v7621_v3  ;;  %v7696_v3 = vld [vmem:[%s8386_s13 + $0x20c] ss:$36 sps:$4 sm:$0xff]  }
  0x6d   : > { %1385 = vmatmul.mubr.bf16.gmra.mrb[8].mxu0 %v7582_v46  ;;  %6800 = vmatprep.subr.bf16.mxu1 %v7628_v9  ;;  %v7691_v46 = vld [vmem:[%s11743_s2 + $0x220] sm:$0xff]   ;;  %v7705_v9 = vld [vmem:[%s8386_s13 + $0x68] ss:$36 sps:$4 sm:$0xff]  }
  0x6e   : > { %1392 = vmatprep.mubr.bf16.mxu0 %v7588_v48  ;;  %6737 = vmatpush3.bf16.msra.mxu0 %v7626_v7  ;;  %v7667_v48 = vld [vmem:[%s8386_s13 + $0xec] ss:$36 sps:$4 sm:$0xff]   ;;  %v7704_v7 = vld [vmem:[%s8386_s13 + $0x20] ss:$36 sps:$4 sm:$0xff]  }
  0x6f   : > { %1482 = vmatmul.mubr.bf16.gmra.mrb[8].mxu1 %v7585_v47  ;;  %6738 = vmatprep.subr.bf16.mxu0 %v7630_v12  ;;  %v7662_v47 = vld [vmem:[%s8386_s13 + $0xa0] ss:$36 sps:$4 sm:$0xff]  }
  0x70   : > { %1489 = vmatprep.mubr.bf16.mxu1 %v7591_v49  ;;  %6801 = vmatpush3.bf16.msra.mxu1 %v7629_v11  ;;  %v7695_v49 = vld [vmem:[%s11743_s2 + $0x228] sm:$0xff]   ;;  %v7707_v11 = vld [vmem:[%s8386_s13 + $0xf8] ss:$36 sps:$4 sm:$0xff]   ;;  %v7708_v12 = vld [vmem:[%s8386_s13 + $0x140] ss:$36 sps:$4 sm:$0xff]  }
  0x71   : > { %6802 = vmatprep.subr.bf16.mxu1 %v7632_v14  ;;  %v7710_v14 = vld [vmem:[%s8386_s13 + $0x1d0] ss:$36 sps:$4 sm:$0xff]  }
  0x72   : > { %6739 = vmatpush3.bf16.msra.mxu0 %v7631_v13  ;;  %v7709_v13 = vld [vmem:[%s8386_s13 + $0x188] ss:$36 sps:$4 sm:$0xff]  }
  0x73   : > { %6740 = vmatprep.subr.bf16.mxu0 %v7637_v18  ;;  %v532_v18 = vlaneseq }
  0x74   : > { %6803 = vmatpush3.bf16.msra.mxu1 %v7635_v17 }
  0x75   : > { %1393 = vmatmul.mubr.bf16.gmra.mrb[12].mxu0 %v7590_v55  ;;  %6804 = vmatprep.subr.bf16.mxu1 %v7642_v23  ;;  %v7703_v55 = vld [vmem:[%s11743_s2 + $0x238] sm:$0xff]  }
  0x76   : > { %1400 = vmatprep.mubr.bf16.mxu0 %v7596_v56  ;;  %6741 = vmatpush3.bf16.msra.mxu0 %v7640_v20  ;;  %v7672_v56 = vld [vmem:[%s8386_s13 + $0xf0] ss:$36 sps:$4 sm:$0xff]  }
  0x77   : > { %1490 = vmatmul.mubr.bf16.gmra.mrb[12].mxu1 %v7593_v58  ;;  %6742 = vmatprep.subr.bf16.mxu0 %v7644_v26  ;;  %v7676_v58 = vld [vmem:[%s8386_s13 + $0x130] ss:$36 sps:$4 sm:$0xff]  }
  0x78   : > { %1497 = vmatprep.mubr.bf16.mxu1 %v7599_v59  ;;  %6805 = vmatpush3.bf16.msra.mxu1 %v7643_v25  ;;  %v7681_v59 = vld [vmem:[%s8386_s13 + $0x17c] ss:$36 sps:$4 sm:$0xff]  }
  0x79   : > { %6806 = vmatprep.subr.bf16.mxu1 %v7646_v28 }
  0x7a   : > { %6743 = vmatpush3.bf16.msra.mxu0 %v7645_v27 }
  0x7b   : > { %7051 = vmatprep.subr.bf16.mxu0 %v7666_v34 }
  0x7c   : > { %6807 = vmatpush3.bf16.msra.mxu1 %v7650_v29 }
  0x7d   : > { %1401 = vmatmul.mubr.bf16.gmra.mrb[16].mxu0 %v7598_v63  ;;  %v7688_v63 = vld [vmem:[%s8386_s13 + $0x1c4] ss:$36 sps:$4 sm:$0xff]  }
  0x7e   : > { %1408 = vmatprep.mubr.bf16.mxu0 %v7607_v2  ;;  %v7690_v2 = vld [vmem:[%s8386_s13 + $0x1c0] ss:$36 sps:$4 sm:$0xff]  }
  0x7f   : > { %1498 = vmatmul.mubr.bf16.gmra.mrb[16].mxu1 %v7601_v4  ;;  %v7694_v4 = vld [vmem:[%s8386_s13 + $0x1c8] ss:$36 sps:$4 sm:$0xff]  }
  0x80   : > { %1505 = vmatprep.mubr.bf16.mxu1 %v7611_v6  ;;  %v7698_v6 = vld [vmem:[%s8386_s13 + $0x208] ss:$36 sps:$4 sm:$0xff]  }
  0x85   : > { %1409 = vmatmul.mubr.bf16.gmra.mrb[20].mxu0 %v7610_v8  ;;  %v7702_v8 = vld [vmem:[%s8386_s13 + $0x210] ss:$36 sps:$4 sm:$0xff]  }
  0x86   : > { %1416 = vmatprep.mubr.bf16.mxu0 %v7619_v10  ;;  %v7706_v10 = vld [vmem:[%s8386_s13 + $0xb0] ss:$36 sps:$4 sm:$0xff]  }
  0x87   : > { %1506 = vmatmul.mubr.bf16.gmra.mrb[20].mxu1 %v7613_v15  ;;  %v7711_v15 = vld [vmem:[%s8386_s13 + $0x218] ss:$36 sps:$4 sm:$0xff]   ;;  %s285_s13 = scalar_select %p284_p6, %s8305_s25, 1 }
  0x88   : > { %1513 = vmatprep.mubr.bf16.mxu1 %v7624_v16  ;;  %v1821_v16 = vld [vmem:[%s11746_s5] sm:$0xff] }
  0x89   : > { %v1855_v17 = vrot.slane %v1821_v16, 6  ;;  %s6599_s12 = sshll.u32 %s285_s13, 6 }
  0x8a   : > { %s8779_s7 = scalar_lea.vmem %s11742_s1, %s6599_s12 }
  0x8b   : > { %7477 = vpush %v1855_v17 }
  0x8d   : > { %1417 = vmatmul.mubr.bf16.gmra.mrb[24].mxu0 %v7622_v19  ;;  %v8683_v19 = vshrl.u32 %v532_v18, 7 }
  0x8e   : > { %1424 = vmatprep.mubr.bf16.mxu0 %v7633_v21  ;;  %v6334_v21 = vld [vmem:[%s11746_s5 + $0x18] sm:$0xff] }
  0x8f   : > { %1514 = vmatmul.mubr.bf16.gmra.mrb[24].mxu1 %v7627_v22  ;;  %11859 = vst [vmem:[#allocation8_spill] sm:$0xff] %v8683_v19  ;;  %v8686_v20 = vsub.s32 0, %v8683_v19 }
  0x90   : > { %1521 = vmatprep.mubr.bf16.mxu1 %v7638_v24 }
  0x91   : > { %11860 = vst [vmem:[#allocation9_spill] sm:$0xff] %v8686_v20  ;;  %v8692_v23 = vrot.slane %v6334_v21, %v8686_v20 }
  0x95   : > { %1425 = vmatmul.mubr.bf16.gmra.mrb[28].mxu0 %v7636_v30 }
  0x96   : > { %1562 = vmatprep.mubr.bf16.mxu0 %v7649_v31 }
  0x97   : > { %1522 = vmatmul.mubr.bf16.gmra.mrb[28].mxu1 %v7641_v32 }
  0x98   : > { %1659 = vmatprep.mubr.bf16.mxu1 %v7653_v33 }
  0x9d   : > { %1563 = vmatmul.mubr.bf16.vlgmr.msra.gmra.mrb[32].mxu0 %v7647_v35 }
  0x9e   : > { %1570 = vmatprep.mubr.bf16.mxu0 %v7654_v36  ;;  %7052 = vmatpush3.bf16.msra.mxu0 %v7666_v34 }
  0x9f   : > { %7053 = vmatprep.subr.bf16.mxu0 %v7673_v37  ;;  %1660 = vmatmul.mubr.bf16.vlgmr.msra.gmra.mrb[32].mxu1 %v7651_v38 }
  0xa0   : > { %1667 = vmatprep.mubr.bf16.mxu1 %v7657_v39 }
  0xa2   : > { %7054 = vmatpush3.bf16.msra.mxu0 %v7673_v37 }
  0xa3   : > { %7055 = vmatprep.subr.bf16.mxu0 %v7680_v40 }
  0xa5   : > { %1571 = vmatmul.mubr.bf16.gmra.mrb[36].mxu0 %v7656_v41 }
  0xa6   : > { %1578 = vmatprep.mubr.bf16.mxu0 %v7660_v42  ;;  %7056 = vmatpush3.bf16.msra.mxu0 %v7680_v40 }
  0xa7   : > { %7057 = vmatprep.subr.bf16.mxu0 %v7687_v43  ;;  %1668 = vmatmul.mubr.bf16.gmra.mrb[36].mxu1 %v7659_v44 }
  0xa8   : > { %1675 = vmatprep.mubr.bf16.mxu1 %v7663_v45 }
  0xaa   : > { %7058 = vmatpush3.bf16.msra.mxu0 %v7687_v43 }
  0xab   : > { %7059 = vmatprep.subr.bf16.mxu0 %v7691_v46 }
  0xad   : > { %1579 = vmatmul.mubr.bf16.gmra.mrb[40].mxu0 %v7662_v47 }
  0xae   : > { %1586 = vmatprep.mubr.bf16.mxu0 %v7667_v48  ;;  %7060 = vmatpush3.bf16.msra.mxu0 %v7691_v46 }
  0xaf   : > { %7061 = vmatprep.subr.bf16.mxu0 %v7695_v49  ;;  %1676 = vmatmul.mubr.bf16.gmra.mrb[40].mxu1 %v7665_v50 }
  0xb0   : > { %1683 = vmatprep.mubr.bf16.mxu1 %v7670_v51 }
  0xb2   : > { %7062 = vmatpush3.bf16.msra.mxu0 %v7695_v49 }
  0xb3   : > { %7063 = vmatprep.subr.bf16.mxu0 %v7699_v52 }
  0xb5   : > { %1587 = vmatmul.mubr.bf16.gmra.mrb[44].mxu0 %v7669_v53 }
  0xb6   : > { %1594 = vmatprep.mubr.bf16.mxu0 %v7674_v54  ;;  %7064 = vmatpush3.bf16.msra.mxu0 %v7699_v52 }
  0xb7   : > { %7065 = vmatprep.subr.bf16.mxu0 %v7703_v55  ;;  %1684 = vmatmul.mubr.bf16.gmra.mrb[44].mxu1 %v7672_v56 }
  0xb8   : > { %1691 = vmatprep.mubr.bf16.mxu1 %v7677_v57 }
  0xba   : > { %7066 = vmatpush3.bf16.msra.mxu0 %v7703_v55 }
  0xbc   : > { %s7478_s20 = spop %7477 }
  0xbd   : > { %1595 = vmatmul.mubr.bf16.gmra.mrb[48].mxu0 %v7676_v58 }
  0xbe   : > { %1602 = vmatprep.mubr.bf16.mxu0 %v7681_v59 }
  0xbf   : > { %1692 = vmatmul.mubr.bf16.gmra.mrb[48].mxu1 %v7679_v60 }
  0xc0   : > { %1699 = vmatprep.mubr.bf16.mxu1 %v7684_v61 }
  0xc5   : > { %1603 = vmatmul.mubr.bf16.gmra.mrb[52].mxu0 %v7683_v62 }
  0xc6   : > { %1610 = vmatprep.mubr.bf16.mxu0 %v7688_v63 }
  0xc7   : > { %1700 = vmatmul.mubr.bf16.gmra.mrb[52].mxu1 %v7686_v0 }
  0xc8   : > { %1707 = vmatprep.mubr.bf16.mxu1 %v7692_v1 }
  0xcd   : > { %1611 = vmatmul.mubr.bf16.gmra.mrb[56].mxu0 %v7690_v2 }
  0xce   : > { %1618 = vmatprep.mubr.bf16.mxu0 %v7696_v3 }
  0xcf   : > { %1708 = vmatmul.mubr.bf16.gmra.mrb[56].mxu1 %v7694_v4 }
  0xd0   : > { %1715 = vmatprep.mubr.bf16.mxu1 %v7700_v5 }
  0xd5   : > { %1619 = vmatmul.mubr.bf16.gmra.mrb[60].mxu0 %v7698_v6 }
  0xd6   : > { %7067 = vmatprep.mubr.bf16.mxu0 %v7704_v7 }
  0xd7   : > { %1716 = vmatmul.mubr.bf16.gmra.mrb[60].mxu1 %v7702_v8 }
  0xdd   : > { %7068 = vmatmul.mubr.bf16.vlgmr.msra.gmra.mrb[64].mxu0 %v7705_v9 }
  0xde   : > { %7071 = vmatprep.mubr.bf16.mxu0 %v7706_v10 }
  0xe5   : > { %7072 = vmatmul.mubr.bf16.gmra.mrb[68].mxu0 %v7707_v11 }
  0xe6   : > { %7075 = vmatprep.mubr.bf16.mxu0 %v7708_v12 }
  0xed   : > { %7076 = vmatmul.mubr.bf16.gmra.mrb[72].mxu0 %v7709_v13 }
  0xee   : > { %7079 = vmatprep.mubr.bf16.mxu0 %v7710_v14 }
  0xf5   : > { %7080 = vmatmul.mubr.bf16.gmra.mrb[76].mxu0 %v7711_v15 }
 0x130   : > { %v6616_v22 = vpop.f32.mrb[0].mxu0 }
 0x131   : > { %v6617_v24 = vpop.f32.mrb[1].mxu0 }
 0x132   : > { %v6618_v25 = vadd.f32 %v6617_v24, %v6616_v22  ;;  %v6619_v26 = vpop.f32.mrb[2].mxu0  ;;  %v6680_v27 = vpop.f32.mrb[0].mxu1 }
 0x133   : > { %v6620_v28 = vpop.f32.mrb[3].mxu0  ;;  %v6681_v31 = vpop.f32.mrb[1].mxu1 }
 0x134   : > { %v1371_v29 = vadd.f32 %v6618_v25, %v8692_v23  ;;  %v6621_v30 = vadd.f32 %v6620_v28, %v6619_v26  ;;  %v6682_v32 = vadd.f32 %v6681_v31, %v6680_v27  ;;  %v6683_v33 = vpop.f32.mrb[2].mxu1 }
 0x135   : > { %v6684_v35 = vpop.f32.mrb[3].mxu1 }
 0x136   : > { %v1374_v34 = vadd.f32 %v6621_v30, %v8692_v23  ;;  %v8696_v36 = vadd.f32 %v6682_v32, %v1371_v29  ;;  %v6685_v37 = vadd.f32 %v6684_v35, %v6683_v33 }
 0x138   : > { %v6622_v38 = vpop.f32.mrb[4].mxu0  ;;  %v8698_v39 = vadd.f32 %v6685_v37, %v1374_v34 }
 0x139   : > { %v6623_v40 = vpop.f32.mrb[5].mxu0 }
 0x13a   : > { %v6624_v41 = vadd.f32 %v6623_v40, %v6622_v38  ;;  %v6625_v42 = vpop.f32.mrb[6].mxu0  ;;  %v6686_v43 = vpop.f32.mrb[4].mxu1 }
 0x13b   : > { %v6626_v44 = vpop.f32.mrb[7].mxu0  ;;  %v6687_v47 = vpop.f32.mrb[5].mxu1 }
 0x13c   : > { %v1379_v45 = vadd.f32 %v6624_v41, %v8692_v23  ;;  %v6627_v46 = vadd.f32 %v6626_v44, %v6625_v42  ;;  %v6688_v48 = vadd.f32 %v6687_v47, %v6686_v43  ;;  %v6689_v49 = vpop.f32.mrb[6].mxu1 }
 0x13d   : > { %v6690_v51 = vpop.f32.mrb[7].mxu1 }
 0x13e   : > { %v1382_v50 = vadd.f32 %v6627_v46, %v8692_v23  ;;  %v8702_v52 = vadd.f32 %v6688_v48, %v1379_v45  ;;  %v6691_v53 = vadd.f32 %v6690_v51, %v6689_v49 }
 0x140   : > { %v6628_v54 = vpop.f32.mrb[8].mxu0  ;;  %v8704_v55 = vadd.f32 %v6691_v53, %v1382_v50 }
 0x141   : > { %v6629_v56 = vpop.f32.mrb[9].mxu0 }
 0x142   : > { %v6630_v57 = vadd.f32 %v6629_v56, %v6628_v54  ;;  %v6631_v58 = vpop.f32.mrb[10].mxu0  ;;  %v6692_v59 = vpop.f32.mrb[8].mxu1 }
 0x143   : > { %v6632_v60 = vpop.f32.mrb[11].mxu0  ;;  %v6693_v63 = vpop.f32.mrb[9].mxu1 }
 0x144   : > { %v1387_v61 = vadd.f32 %v6630_v57, %v8692_v23  ;;  %v6633_v62 = vadd.f32 %v6632_v60, %v6631_v58  ;;  %v6694_v0 = vadd.f32 %v6693_v63, %v6692_v59  ;;  %v6695_v1 = vpop.f32.mrb[10].mxu1 }
 0x145   : > { %v6696_v3 = vpop.f32.mrb[11].mxu1 }
 0x146   : > { %v1390_v2 = vadd.f32 %v6633_v62, %v8692_v23  ;;  %v8708_v4 = vadd.f32 %v6694_v0, %v1387_v61  ;;  %v6697_v5 = vadd.f32 %v6696_v3, %v6695_v1 }
 0x148   : > { %v6634_v6 = vpop.f32.mrb[12].mxu0  ;;  %v8710_v7 = vadd.f32 %v6697_v5, %v1390_v2 }
 0x149   : > { %v6635_v8 = vpop.f32.mrb[13].mxu0 }
 0x14a   : > { %v6636_v9 = vadd.f32 %v6635_v8, %v6634_v6  ;;  %v6637_v10 = vpop.f32.mrb[14].mxu0  ;;  %v6698_v11 = vpop.f32.mrb[12].mxu1 }
 0x14b   : > { %v6638_v12 = vpop.f32.mrb[15].mxu0  ;;  %v6699_v15 = vpop.f32.mrb[13].mxu1 }
 0x14c   : > { %v1395_v13 = vadd.f32 %v6636_v9, %v8692_v23  ;;  %v6639_v14 = vadd.f32 %v6638_v12, %v6637_v10  ;;  %v6700_v16 = vadd.f32 %v6699_v15, %v6698_v11  ;;  %v6701_v17 = vpop.f32.mrb[14].mxu1 }
 0x14d   : > { %v6702_v21 = vpop.f32.mrb[15].mxu1 }
 0x14e   : > { %v1398_v18 = vadd.f32 %v6639_v14, %v8692_v23  ;;  %v8714_v22 = vadd.f32 %v6700_v16, %v1395_v13  ;;  %v6703_v24 = vadd.f32 %v6702_v21, %v6701_v17 }
 0x150   : > { %v6640_v25 = vpop.f32.mrb[16].mxu0  ;;  %v8716_v26 = vadd.f32 %v6703_v24, %v1398_v18 }
 0x151   : > { %v6641_v27 = vpop.f32.mrb[17].mxu0 }
 0x152   : > { %v6642_v28 = vadd.f32 %v6641_v27, %v6640_v25  ;;  %v6643_v29 = vpop.f32.mrb[18].mxu0  ;;  %v6704_v30 = vpop.f32.mrb[16].mxu1 }
 0x153   : > { %v6644_v31 = vpop.f32.mrb[19].mxu0  ;;  %v6705_v34 = vpop.f32.mrb[17].mxu1 }
 0x154   : > { %v1403_v32 = vadd.f32 %v6642_v28, %v8692_v23  ;;  %v6645_v33 = vadd.f32 %v6644_v31, %v6643_v29  ;;  %v6706_v35 = vadd.f32 %v6705_v34, %v6704_v30  ;;  %v6707_v37 = vpop.f32.mrb[18].mxu1 }
 0x155   : > { %v6708_v40 = vpop.f32.mrb[19].mxu1 }
 0x156   : > { %v1406_v38 = vadd.f32 %v6645_v33, %v8692_v23  ;;  %v8720_v41 = vadd.f32 %v6706_v35, %v1403_v32  ;;  %v6709_v42 = vadd.f32 %v6708_v40, %v6707_v37 }
 0x158   : > { %v6646_v43 = vpop.f32.mrb[20].mxu0  ;;  %v8722_v44 = vadd.f32 %v6709_v42, %v1406_v38 }
 0x159   : > { %v6647_v45 = vpop.f32.mrb[21].mxu0 }
 0x15a   : > { %v6648_v46 = vadd.f32 %v6647_v45, %v6646_v43  ;;  %v6649_v47 = vpop.f32.mrb[22].mxu0  ;;  %v6710_v48 = vpop.f32.mrb[20].mxu1 }
 0x15b   : > { %v6650_v49 = vpop.f32.mrb[23].mxu0  ;;  %v6711_v53 = vpop.f32.mrb[21].mxu1 }
 0x15c   : > { %v1411_v50 = vadd.f32 %v6648_v46, %v8692_v23  ;;  %v6651_v51 = vadd.f32 %v6650_v49, %v6649_v47  ;;  %v6712_v54 = vadd.f32 %v6711_v53, %v6710_v48  ;;  %v6713_v56 = vpop.f32.mrb[22].mxu1 }
 0x15d   : > { %v6714_v58 = vpop.f32.mrb[23].mxu1 }
 0x15e   : > { %v1414_v57 = vadd.f32 %v6651_v51, %v8692_v23  ;;  %v8726_v59 = vadd.f32 %v6712_v54, %v1411_v50  ;;  %v6715_v60 = vadd.f32 %v6714_v58, %v6713_v56 }
 0x160   : > { %v6652_v61 = vpop.f32.mrb[24].mxu0  ;;  %v8728_v62 = vadd.f32 %v6715_v60, %v1414_v57 }
 0x161   : > { %v6653_v63 = vpop.f32.mrb[25].mxu0 }
 0x162   : > { %v6654_v0 = vadd.f32 %v6653_v63, %v6652_v61  ;;  %v6655_v1 = vpop.f32.mrb[26].mxu0  ;;  %v6716_v2 = vpop.f32.mrb[24].mxu1 }
 0x163   : > { %v6656_v3 = vpop.f32.mrb[27].mxu0  ;;  %v6717_v8 = vpop.f32.mrb[25].mxu1 }
 0x164   : > { %v1419_v5 = vadd.f32 %v6654_v0, %v8692_v23  ;;  %v6657_v6 = vadd.f32 %v6656_v3, %v6655_v1  ;;  %v6718_v9 = vadd.f32 %v6717_v8, %v6716_v2  ;;  %v6719_v10 = vpop.f32.mrb[26].mxu1 }
 0x165   : > { %v6720_v12 = vpop.f32.mrb[27].mxu1 }
 0x166   : > { %v1422_v11 = vadd.f32 %v6657_v6, %v8692_v23  ;;  %v8732_v13 = vadd.f32 %v6718_v9, %v1419_v5  ;;  %v6721_v14 = vadd.f32 %v6720_v12, %v6719_v10 }
 0x168   : > { %v6658_v15 = vpop.f32.mrb[28].mxu0  ;;  %v8734_v16 = vadd.f32 %v6721_v14, %v1422_v11 }
 0x169   : > { %v6659_v17 = vpop.f32.mrb[29].mxu0 }
 0x16a   : > { %v6660_v18 = vadd.f32 %v6659_v17, %v6658_v15  ;;  %v6661_v21 = vpop.f32.mrb[30].mxu0  ;;  %v6722_v24 = vpop.f32.mrb[28].mxu1 }
 0x16b   : > { %v6662_v25 = vpop.f32.mrb[31].mxu0  ;;  %v6723_v29 = vpop.f32.mrb[29].mxu1 }
 0x16c   : > { %v1427_v27 = vadd.f32 %v6660_v18, %v8692_v23  ;;  %v6663_v28 = vadd.f32 %v6662_v25, %v6661_v21  ;;  %v6724_v30 = vadd.f32 %v6723_v29, %v6722_v24  ;;  %v6725_v31 = vpop.f32.mrb[30].mxu1 }
 0x16d   : > { %v6726_v33 = vpop.f32.mrb[31].mxu1 }
 0x16e   : > { %v1430_v32 = vadd.f32 %v6663_v28, %v8692_v23  ;;  %v8738_v34 = vadd.f32 %v6724_v30, %v1427_v27  ;;  %v6727_v35 = vadd.f32 %v6726_v33, %v6725_v31 }
 0x170   : > { %v6744_v37 = vpop.f32.mrb[32].mxu0  ;;  %v8740_v38 = vadd.f32 %v6727_v35, %v1430_v32 }
 0x171   : > { %v6745_v40 = vpop.f32.mrb[33].mxu0 }
 0x172   : > { %v6746_v42 = vadd.f32 %v6745_v40, %v6744_v37  ;;  %v6747_v43 = vpop.f32.mrb[34].mxu0  ;;  %v6808_v45 = vpop.f32.mrb[32].mxu1 }
 0x173   : > { %v6748_v46 = vpop.f32.mrb[35].mxu0  ;;  %v6809_v49 = vpop.f32.mrb[33].mxu1 }
 0x174   : > { %v1565_v47 = vadd.f32 %v6746_v42, %v8696_v36  ;;  %v6749_v48 = vadd.f32 %v6748_v46, %v6747_v43  ;;  %v6810_v50 = vadd.f32 %v6809_v49, %v6808_v45  ;;  %v6811_v51 = vpop.f32.mrb[34].mxu1 }
 0x175   : > { %v6812_v53 = vpop.f32.mrb[35].mxu1 }
 0x176   : > { %v1568_v23 = vadd.f32 %v6749_v48, %v8698_v39  ;;  %v6813_v54 = vadd.f32 %v6812_v53, %v6811_v51  ;;  %v8744_v56 = vadd.f32 %v6810_v50, %v1565_v47 }
 0x178   : > { %v6750_v57 = vpop.f32.mrb[36].mxu0  ;;  %v8746_v60 = vadd.f32 %v6813_v54, %v1568_v23 }
 0x179   : > { %v6751_v58 = vpop.f32.mrb[37].mxu0 }
 0x17a   : > { %v6752_v61 = vadd.f32 %v6751_v58, %v6750_v57  ;;  %v6753_v63 = vpop.f32.mrb[38].mxu0  ;;  %v6814_v0 = vpop.f32.mrb[36].mxu1 }
 0x17b   : > { %v6754_v1 = vpop.f32.mrb[39].mxu0  ;;  %v6815_v3 = vpop.f32.mrb[37].mxu1 }
 0x17c   : > { %v1573_v36 = vadd.f32 %v6752_v61, %v8702_v52  ;;  %v6755_v2 = vadd.f32 %v6754_v1, %v6753_v63  ;;  %v6816_v5 = vadd.f32 %v6815_v3, %v6814_v0  ;;  %v6817_v6 = vpop.f32.mrb[38].mxu1 }
 0x17d   : > { %v6818_v8 = vpop.f32.mrb[39].mxu1 }
 0x17e   : > { %v1576_v39 = vadd.f32 %v6755_v2, %v8704_v55  ;;  %v6819_v9 = vadd.f32 %v6818_v8, %v6817_v6  ;;  %v8750_v10 = vadd.f32 %v6816_v5, %v1573_v36 }
 0x180   : > { %v6756_v11 = vpop.f32.mrb[40].mxu0  ;;  %v8752_v14 = vadd.f32 %v6819_v9, %v1576_v39 }
 0x181   : > { %v6757_v12 = vpop.f32.mrb[41].mxu0 }
 0x182   : > { %v6758_v15 = vadd.f32 %v6757_v12, %v6756_v11  ;;  %v6759_v17 = vpop.f32.mrb[42].mxu0  ;;  %v6820_v18 = vpop.f32.mrb[40].mxu1 }
 0x183   : > { %v6760_v21 = vpop.f32.mrb[43].mxu0  ;;  %v6821_v25 = vpop.f32.mrb[41].mxu1 }
 0x184   : > { %v1581_v52 = vadd.f32 %v6758_v15, %v8708_v4  ;;  %v6761_v24 = vadd.f32 %v6760_v21, %v6759_v17  ;;  %v6822_v27 = vadd.f32 %v6821_v25, %v6820_v18  ;;  %v6823_v28 = vpop.f32.mrb[42].mxu1 }
 0x185   : > { %v6824_v29 = vpop.f32.mrb[43].mxu1 }
 0x186   : > { %v1584_v55 = vadd.f32 %v6761_v24, %v8710_v7  ;;  %v6825_v30 = vadd.f32 %v6824_v29, %v6823_v28  ;;  %v8756_v31 = vadd.f32 %v6822_v27, %v1581_v52 }
 0x188   : > { %v6762_v32 = vpop.f32.mrb[44].mxu0  ;;  %v8758_v35 = vadd.f32 %v6825_v30, %v1584_v55  ;;  %v8784_v55 = vld [vmem:[%s8779_s7] sm:$0xff]  }
 0x189   : > { %v6763_v33 = vpop.f32.mrb[45].mxu0  ;;  %11861 = vst [vmem:[#allocation10_spill] sm:$0xff] %v8784_v55  ;;  %7131 = vmatprep.mubr.bf16.mxu0 %v8784_v55  ;;  %7099 = vmatprep.mubr.bf16.mxu1 %v8784_v55 }
 0x18a   : > { %v6764_v37 = vadd.f32 %v6763_v33, %v6762_v32  ;;  %v6765_v40 = vpop.f32.mrb[46].mxu0  ;;  %v6826_v42 = vpop.f32.mrb[44].mxu1 }
 0x18b   : > { %v6766_v43 = vpop.f32.mrb[47].mxu0  ;;  %v6827_v46 = vpop.f32.mrb[45].mxu1 }
 0x18c   : > { %v1589_v4 = vadd.f32 %v6764_v37, %v8714_v22  ;;  %v6767_v45 = vadd.f32 %v6766_v43, %v6765_v40  ;;  %v6828_v47 = vadd.f32 %v6827_v46, %v6826_v42  ;;  %v6829_v48 = vpop.f32.mrb[46].mxu1 }
 0x18d   : > { %v6830_v49 = vpop.f32.mrb[47].mxu1 }
 0x18e   : > { %v1592_v7 = vadd.f32 %v6767_v45, %v8716_v26  ;;  %v6831_v50 = vadd.f32 %v6830_v49, %v6829_v48  ;;  %v8762_v51 = vadd.f32 %v6828_v47, %v1589_v4 }
 0x190   : > { %v6768_v23 = vpop.f32.mrb[48].mxu0  ;;  %v8764_v54 = vadd.f32 %v6831_v50, %v1592_v7 }
 0x191   : > { %v6769_v53 = vpop.f32.mrb[49].mxu0 }
 0x192   : > { %v6770_v57 = vadd.f32 %v6769_v53, %v6768_v23  ;;  %v6771_v58 = vpop.f32.mrb[50].mxu0  ;;  %v6832_v61 = vpop.f32.mrb[48].mxu1 }
 0x193   : > { %v6772_v63 = vpop.f32.mrb[51].mxu0  ;;  %v6833_v1 = vpop.f32.mrb[49].mxu1 }
 0x194   : > { %v1597_v22 = vadd.f32 %v6770_v57, %v8720_v41  ;;  %v6773_v0 = vadd.f32 %v6772_v63, %v6771_v58  ;;  %v6834_v36 = vadd.f32 %v6833_v1, %v6832_v61  ;;  %v6835_v26 = vpop.f32.mrb[50].mxu1 }
 0x195   : > { %v6836_v3 = vpop.f32.mrb[51].mxu1 }
 0x196   : > { %v1600_v2 = vadd.f32 %v6773_v0, %v8722_v44  ;;  %v6837_v5 = vadd.f32 %v6836_v3, %v6835_v26  ;;  %v8768_v6 = vadd.f32 %v6834_v36, %v1597_v22 }
 0x198   : > { %v6774_v39 = vpop.f32.mrb[52].mxu0  ;;  %v8770_v9 = vadd.f32 %v6837_v5, %v1600_v2 }
 0x199   : > { %v6775_v8 = vpop.f32.mrb[53].mxu0 }
 0x19a   : > { %v6776_v11 = vadd.f32 %v6775_v8, %v6774_v39  ;;  %v6777_v12 = vpop.f32.mrb[54].mxu0  ;;  %v6838_v15 = vpop.f32.mrb[52].mxu1 }
 0x19b   : > { %v6778_v41 = vpop.f32.mrb[55].mxu0  ;;  %v6839_v21 = vpop.f32.mrb[53].mxu1 }
 0x19c   : > { %v1605_v17 = vadd.f32 %v6776_v11, %v8726_v59  ;;  %v6779_v18 = vadd.f32 %v6778_v41, %v6777_v12  ;;  %v6840_v52 = vadd.f32 %v6839_v21, %v6838_v15  ;;  %v6841_v44 = vpop.f32.mrb[54].mxu1 }
 0x19d   : > { %v6842_v25 = vpop.f32.mrb[55].mxu1 }
 0x19e   : > { %v1608_v24 = vadd.f32 %v6779_v18, %v8728_v62  ;;  %v6843_v27 = vadd.f32 %v6842_v25, %v6841_v44  ;;  %v8781_v28 = vadd.f32 %v6840_v52, %v1605_v17 }
 0x1a0   : > { %v6780_v59 = vpop.f32.mrb[56].mxu0  ;;  %v8786_v30 = vadd.f32 %v6843_v27, %v1608_v24 }
 0x1a1   : > { %v6781_v29 = vpop.f32.mrb[57].mxu0 }
 0x1a2   : > { %v6782_v62 = vadd.f32 %v6781_v29, %v6780_v59  ;;  %v6783_v32 = vpop.f32.mrb[58].mxu0  ;;  %v6844_v33 = vpop.f32.mrb[56].mxu1 }
 0x1a3   : > { %v6784_v37 = vpop.f32.mrb[59].mxu0  ;;  %v6845_v43 = vpop.f32.mrb[57].mxu1 }
 0x1a4   : > { %v1613_v40 = vadd.f32 %v6782_v62, %v8732_v13  ;;  %v6785_v42 = vadd.f32 %v6784_v37, %v6783_v32  ;;  %v6846_v4 = vadd.f32 %v6845_v43, %v6844_v33  ;;  %v6847_v45 = vpop.f32.mrb[58].mxu1 }
 0x1a5   : > { %v6848_v47 = vpop.f32.mrb[59].mxu1 }
 0x1a6   : > { %v1616_v46 = vadd.f32 %v6785_v42, %v8734_v16  ;;  %v6849_v48 = vadd.f32 %v6848_v47, %v6847_v45  ;;  %v8792_v7 = vadd.f32 %v6846_v4, %v1613_v40 }
 0x1a8   : > { %v6786_v49 = vpop.f32.mrb[60].mxu0  ;;  %v8794_v23 = vadd.f32 %v6849_v48, %v1616_v46 }
 0x1a9   : > { %v6787_v50 = vpop.f32.mrb[61].mxu0 }
 0x1aa   : > { %v6788_v53 = vadd.f32 %v6787_v50, %v6786_v49  ;;  %v6789_v57 = vpop.f32.mrb[62].mxu0  ;;  %v6850_v58 = vpop.f32.mrb[60].mxu1 }
 0x1ab   : > { %v6790_v61 = vpop.f32.mrb[63].mxu0  ;;  %v6851_v22 = vpop.f32.mrb[61].mxu1 }
 0x1ac   : > { %v1621_v13 = vadd.f32 %v6788_v53, %v8738_v34  ;;  %v6791_v63 = vadd.f32 %v6790_v61, %v6789_v57  ;;  %v6852_v0 = vadd.f32 %v6851_v22, %v6850_v58  ;;  %v6853_v1 = vpop.f32.mrb[62].mxu1 }
 0x1ad   : > { %v6854_v36 = vpop.f32.mrb[63].mxu1 }
 0x1ae   : > { %v1624_v16 = vadd.f32 %v6791_v63, %v8740_v38  ;;  %v6855_v26 = vadd.f32 %v6854_v36, %v6853_v1  ;;  %v8798_v2 = vadd.f32 %v6852_v0, %v1621_v13 }
 0x1b0   : > { %v7069_v3 = vpop.f32.mrb[64].mxu0  ;;  %v8803_v8 = vadd.f32 %v6855_v26, %v1624_v16 }
 0x1b1   : > { %v8801_v5 = vadd.f32 %v7069_v3, %v8750_v10  ;;  %v1758_v39 = vpop.f32.mrb[65].mxu0 }
 0x1b2   : > { %v8806_v11 = vadd.f32 %v1758_v39, %v8744_v56  ;;  %v7070_v34 = vpop.f32.mrb[66].mxu0 }
 0x1b3   : > { %v8809_v12 = vadd.f32 %v7070_v34, %v8752_v14  ;;  %v1761_v15 = vpop.f32.mrb[67].mxu0  ;;  %v1824_v56 = vmax.f32 %v8801_v5, 0.0 }
 0x1b4   : > { %v8812_v38 = vadd.f32 %v1761_v15, %v8746_v60  ;;  %v1822_v44 = vmax.f32 %v8806_v11, 0.0 }
 0x1b5   : > { %v1825_v24 = vmax.f32 %v8809_v12, 0.0  ;;  %v8832_v27 = vadd.f32 1e-07, %v1824_v56 }
 0x1b6   : > { %v8834_v59 = vadd.f32 1e-07, %v1822_v44 }
 0x1b7   : > { %v8838_v62 = vadd.f32 1e-07, %v1825_v24 }
 0x1b8   : > { %v7073_v41 = vpop.f32.mrb[68].mxu0 }
 0x1b9   : > { %v8815_v17 = vadd.f32 %v7073_v41, %v8762_v51  ;;  %v1774_v10 = vpop.f32.mrb[69].mxu0  ;;  %v1823_v51 = vmax.f32 %v8812_v38, 0.0 }
 0x1ba   : > { %v8818_v18 = vadd.f32 %v1774_v10, %v8756_v31  ;;  %v7074_v21 = vpop.f32.mrb[70].mxu0 }
 0x1bb   : > { %v8822_v52 = vadd.f32 %v7074_v21, %v8764_v54  ;;  %v1777_v14 = vpop.f32.mrb[71].mxu0  ;;  %v1828_v31 = vmax.f32 %v8815_v17, 0.0  ;;  %v8836_v54 = vstv %s7478_s20  ;;  %s283_s20 = scalar_lea.vmem [#allocation5], %s8382_s28 }
 0x1bc   : > { %v8826_v60 = vadd.f32 %v1777_v14, %v8758_v35  ;;  %v8840_v35 = vadd.f32 1e-07, %v1823_v51  ;;  %v1826_v32 = vmax.f32 %v8818_v18, 0.0  ;;  %v8856_v46 = vmul.f32 %v8836_v54, %v8832_v27  ;;  %s6249_s26 = sshll.u32 %s283_s20, 4  ;;  %s11699_s26 = int_to_ptr.vmem [resolvable:$true] %s6249_s26 }
 0x1bd   : > { %v1829_v25 = vmax.f32 %v8822_v52, 0.0  ;;  %v8846_v40 = vadd.f32 1e-07, %v1828_v31  ;;  %v8864_v49 = vmul.f32 %v8836_v54, %v8834_v59  ;;  %v8874_v57 = vmul.f32 %v8836_v54, %v8838_v62  ;;  %s8173_s18 = scalar_lea.vmem %s11699_s26, 16 }
 0x1be   : > { %11862 = vst [vmem:[#allocation11_spill] sm:$0xff] %v8826_v60  ;;  %v1827_v43 = vmax.f32 %v8826_v60, 0.0  ;;  %v8870_v53 = vadd.f32 1e-07, %v1826_v32  ;;  %v1878_v22 = vsel %vm1875_vm0, %v8856_v46, -inf  ;;  %p8174_p11 = scmp.ne.s32.totalorder %s11699_s26, %s8173_s18 }
 0x1bf   : > { %v8848_v42 = vadd.f32 1e-07, %v1829_v25  ;;  %v8883_v61 = vmul.f32 %v8836_v54, %v8846_v40  ;;  %v1876_v16 = vsel %vm1875_vm0, %v8864_v49, -inf  ;;  %v1879_v34 = vsel %vm1875_vm0, %v8874_v57, -inf }
 0x1c0   : > { %v7077_v29 = vpop.f32.mrb[72].mxu0  ;;  %v8889_v13 = vadd.f32 1e-07, %v1827_v43  ;;  %v8906_v39 = vmul.f32 %v8836_v54, %v8870_v53  ;;  %p8175_p13 = pnand %p8174_p11, %p12046_p12 }
 0x1c1   : > { %v8844_v33 = vadd.f32 %v7077_v29, %v8781_v28  ;;  %v1790_v37 = vpop.f32.mrb[73].mxu0  ;;  %v1884_v21 = vsel %vm1875_vm0, %v8883_v61, -inf }
 0x1c2   : > { %v8852_v4 = vadd.f32 %v1790_v37, %v8768_v6  ;;  %v7078_v45 = vpop.f32.mrb[74].mxu0  ;;  %v8921_v14 = vmul.f32 %v8836_v54, %v8889_v13  ;;  %p8176_p8 = pneg %p8175_p13 }
 0x1c3   : > { %11863 = vst [vmem:[#allocation12_spill] sm:$0xff] %v8844_v33  ;;  %v1832_v47 = vmax.f32 %v8844_v33, 0.0  ;;  %v8860_v28 = vadd.f32 %v7078_v45, %v8786_v30  ;;  %v1793_v48 = vpop.f32.mrb[75].mxu0  ;;  %v8878_v30 = vmul.f32 %v8836_v54, %v8840_v35  ;;  %v1885_v45 = vmax.f32 %v1878_v22, %v1884_v21 }
 0x1c4   : > { %11864 = vst [vmem:[#allocation13_spill] sm:$0xff] %v8852_v4  ;;  %v1830_v50 = vmax.f32 %v8852_v4, 0.0  ;;  %v8868_v6 = vadd.f32 %v1793_v48, %v8770_v9  ;;  %v8887_v9 = vmul.f32 %v8836_v54, %v8848_v42 }
 0x1c5   : > { %11865 = vst [vmem:[#allocation14_spill] sm:$0xff] %v8860_v28  ;;  %v1833_v58 = vmax.f32 %v8860_v28, 0.0  ;;  %v8894_v0 = vadd.f32 1e-07, %v1832_v47  ;;  %v1877_v15 = vsel %vm1875_vm0, %v8878_v30, -inf  ;;  %v1880_v47 = vsel %vm1875_vm0, %v8906_v39, -inf }
 0x1c6   : > { %11866 = vst [vmem:[#allocation15_spill] sm:$0xff] %v8868_v6  ;;  %v1831_v63 = vmax.f32 %v8868_v6, 0.0  ;;  %v8900_v36 = vadd.f32 1e-07, %v1830_v50  ;;  %v1886_v56 = vsel %vm1875_vm0, %v8887_v9, -inf }
 0x1c7   : > { %v8896_v1 = vadd.f32 1e-07, %v1833_v58  ;;  %v8928_v51 = vmul.f32 %v8836_v54, %v8894_v0  ;;  %v1887_v50 = vmax.f32 %v1879_v34, %v1886_v56  ;;  %v1882_v58 = vsel %vm1875_vm0, %v8921_v14, -inf }
 0x1c8   : > { %v8902_v26 = vadd.f32 1e-07, %v1831_v63  ;;  %v7081_v3 = vpop.f32.mrb[76].mxu0  ;;  %v8940_v32 = vmul.f32 %v8836_v54, %v8900_v36 }
 0x1c9   : > { %v8913_v41 = vadd.f32 %v7081_v3, %v8798_v2  ;;  %v1806_v10 = vpop.f32.mrb[77].mxu0  ;;  %v8932_v2 = vmul.f32 %v8836_v54, %v8896_v1 }
 0x1ca   : > { %v8924_v44 = vadd.f32 %v1806_v10, %v8792_v7  ;;  %v7082_v24 = vpop.f32.mrb[78].mxu0  ;;  %v8944_v7 = vmul.f32 %v8836_v54, %v8902_v26  ;;  %v1888_v34 = vsel %vm1875_vm0, %v8940_v32, -inf }
 0x1cb   : > { %11867 = vst [vmem:[#allocation16_spill] sm:$0xff] %v8913_v41  ;;  %v1836_v31 = vmax.f32 %v8913_v41, 0.0  ;;  %v8936_v25 = vadd.f32 %v7082_v24, %v8803_v8  ;;  %v1809_v29 = vpop.f32.mrb[79].mxu0  ;;  %v1894_v22 = vsel %vm1875_vm0, %v8932_v2, -inf }
 0x1cc   : > { %11868 = vst [vmem:[#allocation17_spill] sm:$0xff] %v8924_v44  ;;  %v1834_v37 = vmax.f32 %v8924_v44, 0.0  ;;  %v8948_v43 = vadd.f32 %v1809_v29, %v8794_v23  ;;  %v1892_v23 = vsel %vm1875_vm0, %v8928_v51, -inf  ;;  %v1890_v56 = vsel %vm1875_vm0, %v8944_v7, -inf }
 0x1cd   : > { %11869 = vst [vmem:[#allocation18_spill] sm:$0xff] %v8936_v25  ;;  %v8952_v8 = vadd.f32 1e-07, %v1836_v31  ;;  %v1837_v48 = vmax.f32 %v8936_v25, 0.0  ;;  %v1881_v29 = vmax.f32 %v1876_v16, %v1880_v47  ;;  %v1893_v20 = vmax.f32 %v1885_v45, %v1892_v23 }
 0x1ce   : > { %11870 = vst [vmem:[#allocation19_spill] sm:$0xff] %v8948_v43  ;;  %v8957_v63 = vadd.f32 1e-07, %v1834_v37  ;;  %v1835_v3 = vmax.f32 %v8948_v43, 0.0  ;;  %v1883_v37 = vmax.f32 %v1877_v15, %v1882_v58  ;;  %v1895_v55 = vmax.f32 %v1887_v50, %v1894_v22 }
 0x1cf   : > { %v8966_v10 = vmul.f32 %v8836_v54, %v8952_v8  ;;  %v8968_v21 = vadd.f32 1e-07, %v1837_v48  ;;  %v1889_v25 = vmax.f32 %v1881_v29, %v1888_v34 }
 0x1d0   : > { %v8976_v24 = vmul.f32 %v8836_v54, %v8957_v63  ;;  %v8978_v31 = vadd.f32 1e-07, %v1835_v3  ;;  %v1891_v3 = vmax.f32 %v1883_v37, %v1890_v56 }
 0x1d1   : > { %v1900_v19 = vsel %vm1875_vm0, %v8966_v10, -inf  ;;  %v8984_v48 = vmul.f32 %v8836_v54, %v8968_v21 }
 0x1d2   : > { %v1896_v43 = vsel %vm1875_vm0, %v8976_v24, -inf  ;;  %v1872_v44 = vmul.f32 %v8836_v54, %v8978_v31  ;;  %v1901_v15 = vmax.f32 %v1893_v20, %v1900_v19 }
 0x1d3   : > { %v1902_v16 = vsel %vm1875_vm0, %v8984_v48, -inf  ;;  %v1897_v41 = vmax.f32 %v1889_v25, %v1896_v43 }
 0x1d4   : > { %v1903_v47 = vmax.f32 %v1895_v55, %v1902_v16  ;;  %v1898_v58 = vsel %vm1875_vm0, %v1872_v44, -inf }
 0x1d5   : > { %v1899_v6 = vmax.f32 %v1891_v3, %v1898_v58 }
 0x1d6   : > { %v1905_v4 = vmax.f32 %v1901_v15, %v1903_v47 }
 0x1d7   : > { %v1904_v45 = vmax.f32 %v1897_v41, %v1899_v6 }
 0x1d9   : > { %v1906_v50 = vmax.f32 %v1904_v45, %v1905_v4 }
 0x1db   : > { %v1907_v23 = vrot.slane %v1906_v50, 4 }
 0x1dd   : > { %v1908_v22 = vmax.f32 %v1906_v50, %v1907_v23 }
 0x1df   : > { %v1909_v28 = vrot.slane %v1908_v22, 2 }
 0x1e1   : > { %v1910_v33 = vmax.f32 %v1908_v22, %v1909_v28 }
 0x1e3   : > { %v1911_v60 = vrot.slane %v1910_v33, 1 }
 0x1e5   : > { %v8993_v54 = vmax.f32 %v1910_v33, %v1911_v60 }
 0x1e7   : > { %v1913_v34 = vsub.f32 %v8864_v49, %v8993_v54  ;;  %v1914_v19 = vsub.f32 %v8878_v30, %v8993_v54  ;;  %v1915_v20 = vsub.f32 %v8856_v46, %v8993_v54  ;;  %v1916_v55 = vsub.f32 %v8874_v57, %v8993_v54 }
 0x1e8   : > { %v1917_v4 = vsub.f32 %v8906_v39, %v8993_v54  ;;  %v1918_v60 = vsub.f32 %v8921_v14, %v8993_v54  ;;  %v1919_v49 = vsub.f32 %v8883_v61, %v8993_v54  ;;  %v1920_v30 = vsub.f32 %v8887_v9, %v8993_v54 }
 0x1e9   : > { %v1929_v6 = vmul.f32 1.442695, %v1913_v34  ;;  %v1931_v28 = vmul.f32 1.442695, %v1914_v19  ;;  %v1933_v33 = vmul.f32 1.442695, %v1915_v20  ;;  %v1921_v39 = vsub.f32 %v8940_v32, %v8993_v54 }
 0x1ea   : > { %v1935_v41 = vmul.f32 1.442695, %v1916_v55  ;;  %v1937_v46 = vmul.f32 1.442695, %v1917_v4  ;;  %v1939_v57 = vmul.f32 1.442695, %v1918_v60  ;;  %v1922_v14 = vsub.f32 %v8944_v7, %v8993_v54 }
 0x1eb   : > { %7738 = vpow2.f32 %v1929_v6  ;;  %v1941_v25 = vmul.f32 1.442695, %v1919_v49  ;;  %v1943_v43 = vmul.f32 1.442695, %v1920_v30  ;;  %v1945_v61 = vmul.f32 1.442695, %v1921_v39 }
 0x1ec   : > { %7740 = vpow2.f32 %v1931_v28  ;;  %v1923_v9 = vsub.f32 %v8928_v51, %v8993_v54  ;;  %v1947_v56 = vmul.f32 1.442695, %v1922_v14  ;;  %v1924_v29 = vsub.f32 %v8932_v2, %v8993_v54 }
 0x1ed   : > { %7742 = vpow2.f32 %v1933_v33  ;;  %v1926_v37 = vsub.f32 %v1872_v44, %v8993_v54  ;;  %v1925_v47 = vsub.f32 %v8976_v24, %v8993_v54  ;;  %v1927_v44 = vsub.f32 %v8966_v10, %v8993_v54 }
 0x1ee   : > { %7744 = vpow2.f32 %v1935_v41  ;;  %v1949_v3 = vmul.f32 1.442695, %v1923_v9  ;;  %v1951_v15 = vmul.f32 1.442695, %v1924_v29 }
 0x1ef   : > { %7746 = vpow2.f32 %v1937_v46  ;;  %v1955_v23 = vmul.f32 1.442695, %v1926_v37  ;;  %v1953_v24 = vmul.f32 1.442695, %v1925_v47  ;;  %v1957_v28 = vmul.f32 1.442695, %v1927_v44 }
 0x1f0   : > { %7748 = vpow2.f32 %v1939_v57  ;;  %v7718_v47 = vld [vmem:[%s8779_s7 + $0x30] sm:$0xff]  }
 0x1f1   : > { %7750 = vpow2.f32 %v1941_v25 }
 0x1f2   : > { %7752 = vpow2.f32 %v1943_v43 }
 0x1f3   : > { %7754 = vpow2.f32 %v1945_v61 }
 0x1f4   : > { %7756 = vpow2.f32 %v1947_v56 }
 0x1f5   : > { %v7739_v32 = vpop.eup %7738  ;;  %7758 = vpow2.f32 %v1949_v3 }
 0x1f6   : > { %v7741_v16 = vpop.eup %7740  ;;  %v1961_v7 = vmul.f32 %v7739_v32, %v8834_v59  ;;  %7760 = vpow2.f32 %v1951_v15  ;;  %v7717_v15 = vld [vmem:[%s8779_s7 + $0x28] sm:$0xff]  }
 0x1f7   : > { %v7743_v58 = vpop.eup %7742  ;;  %v2130_v51 = vpack.c.bf16 %v7741_v16, %v7739_v32  ;;  %v1962_v45 = vmul.f32 %v7741_v16, %v8840_v35  ;;  %v1928_v35 = vsub.f32 %v8984_v48, %v8993_v54  ;;  %7762 = vpow2.f32 %v1955_v23  ;;  %v7713_v16 = vld [vmem:[%s8779_s7 + $0x8] sm:$0xff]  }
 0x1f8   : > { %v7745_v50 = vpop.eup %7744  ;;  %v1963_v2 = vmul.f32 %v7743_v58, %v8832_v27  ;;  %7764 = vpow2.f32 %v1953_v24 }
 0x1f9   : > { %v7747_v22 = vpop.eup %7746  ;;  %7115 = vmatprep.subr.bf16.mxu0 %v2130_v51  ;;  %v1977_v34 = vpack.c.bf16 %v1962_v45, %v1961_v7  ;;  %v2131_v59 = vpack.c.bf16 %v7745_v50, %v7743_v58  ;;  %v1964_v19 = vmul.f32 %v7745_v50, %v8838_v62  ;;  %v1959_v60 = vmul.f32 1.442695, %v1928_v35  ;;  %v7714_v7 = vld [vmem:[%s8779_s7 + $0x10] sm:$0xff]   ;;  %v7719_v58 = vld [vmem:[%s8779_s7 + $0x38] sm:$0xff]   ;;  %v7721_v45 = vld [vmem:[%s11744_s3 + $0x8] sm:$0xff]  }
 0x1fa   : > { %v7749_v20 = vpop.eup %7748  ;;  %7116 = vmatpush3.bf16.msra.mxu0 %v2130_v51  ;;  %v1965_v10 = vmul.f32 %v7747_v22, %v8870_v53  ;;  %7766 = vpow2.f32 %v1957_v28  ;;  %v7720_v51 = vld [vmem:[%s11744_s3] sm:$0xff]  }
 0x1fb   : > { %v7751_v55 = vpop.eup %7750  ;;  %7083 = vmatprep.subr.bf16.mxu1 %v1977_v34  ;;  %7117 = vmatprep.subr.bf16.mxu0 %v2131_v59  ;;  %v1978_v27 = vpack.c.bf16 %v1964_v19, %v1963_v2  ;;  %v1966_v4 = vmul.f32 %v7749_v20, %v8889_v13  ;;  %v2132_v62 = vpack.c.bf16 %v7749_v20, %v7747_v22  ;;  %7768 = vpow2.f32 %v1959_v60 }
 0x1fc   : > { %v7753_v6 = vpop.eup %7752  ;;  %7084 = vmatpush3.bf16.msra.mxu1 %v1977_v34  ;;  %v1967_v54 = vmul.f32 %v7751_v55, %v8846_v40 }
 0x1fd   : > { %7085 = vmatprep.subr.bf16.mxu1 %v1978_v27  ;;  %v7755_v33 = vpop.eup %7754  ;;  %v1979_v48 = vpack.c.bf16 %v1966_v4, %v1965_v10  ;;  %v1968_v49 = vmul.f32 %v7753_v6, %v8848_v42  ;;  %v2133_v53 = vpack.c.bf16 %v7753_v6, %v7751_v55 }
 0x1fe   : > { %7118 = vmatpush3.bf16.msra.mxu0 %v2131_v59  ;;  %v7757_v41 = vpop.eup %7756  ;;  %v1969_v46 = vmul.f32 %v7755_v33, %v8900_v36 }
 0x1ff   : > { %7119 = vmatprep.subr.bf16.mxu0 %v2132_v62  ;;  %v7759_v13 = vpop.eup %7758  ;;  %v1980_v30 = vpack.c.bf16 %v1968_v49, %v1967_v54  ;;  %v1970_v57 = vmul.f32 %v7757_v41, %v8902_v26  ;;  %v2134_v40 = vpack.c.bf16 %v7757_v41, %v7755_v33 }
 0x200   : > { %7086 = vmatpush3.bf16.msra.mxu1 %v1978_v27  ;;  %v7761_v25 = vpop.eup %7760  ;;  %v1971_v43 = vmul.f32 %v7759_v13, %v8894_v0 }
 0x201   : > { %7087 = vmatprep.subr.bf16.mxu1 %v1979_v48  ;;  %v7763_v42 = vpop.eup %7762  ;;  %v1981_v39 = vpack.c.bf16 %v1970_v57, %v1969_v46  ;;  %v1972_v14 = vmul.f32 %v7761_v25, %v8896_v1  ;;  %v2135_v9 = vpack.c.bf16 %v7761_v25, %v7759_v13 }
 0x202   : > { %7120 = vmatpush3.bf16.msra.mxu0 %v2132_v62  ;;  %v7765_v61 = vpop.eup %7764  ;;  %v1974_v26 = vmul.f32 %v7763_v42, %v8978_v31 }
 0x203   : > { %7121 = vmatprep.subr.bf16.mxu0 %v2133_v53  ;;  %v1982_v56 = vpack.c.bf16 %v1972_v14, %v1971_v43  ;;  %v1973_v29 = vmul.f32 %v7765_v61, %v8957_v63  ;;  %v2136_v32 = vpack.c.bf16 %v7763_v42, %v7765_v61 }
 0x204   : > { %7088 = vmatpush3.bf16.msra.mxu1 %v1979_v48  ;;  %v7767_v36 = vpop.eup %7766 }
 0x205   : > { %7089 = vmatprep.subr.bf16.mxu1 %v1980_v30  ;;  %v7769_v37 = vpop.eup %7768  ;;  %v1983_v0 = vpack.c.bf16 %v1974_v26, %v1973_v29  ;;  %v1975_v1 = vmul.f32 %v7767_v36, %v8952_v8  ;;  %v7715_v8 = vld [vmem:[%s8779_s7 + $0x18] sm:$0xff]  }
 0x206   : > { %7122 = vmatpush3.bf16.msra.mxu0 %v2133_v53  ;;  %v1976_v3 = vmul.f32 %v7769_v37, %v8968_v21  ;;  %v2137_v31 = vpack.c.bf16 %v7769_v37, %v7767_v36  ;;  %v7716_v21 = vld [vmem:[%s8779_s7 + $0x20] sm:$0xff]  }
 0x207   : > { %7123 = vmatprep.subr.bf16.mxu0 %v2134_v40 }
 0x208   : > { %7090 = vmatpush3.bf16.msra.mxu1 %v1980_v30  ;;  %v1984_v63 = vpack.c.bf16 %v1976_v3, %v1975_v1 }
 0x209   : > { %7091 = vmatprep.subr.bf16.mxu1 %v1981_v39 }
 0x20a   : > { %7124 = vmatpush3.bf16.msra.mxu0 %v2134_v40 }
 0x20b   : > { %7125 = vmatprep.subr.bf16.mxu0 %v2135_v9 }
 0x20c   : > { %7092 = vmatpush3.bf16.msra.mxu1 %v1981_v39 }
 0x20d   : > { %7093 = vmatprep.subr.bf16.mxu1 %v1982_v56 }
 0x20e   : > { %7126 = vmatpush3.bf16.msra.mxu0 %v2135_v9 }
 0x20f   : > { %7127 = vmatprep.subr.bf16.mxu0 %v2136_v32 }
 0x210   : > { %7094 = vmatpush3.bf16.msra.mxu1 %v1982_v56 }
 0x211   : > { %7095 = vmatprep.subr.bf16.mxu1 %v1983_v0 }
 0x212   : > { %7128 = vmatpush3.bf16.msra.mxu0 %v2136_v32 }
 0x213   : > { %7129 = vmatprep.subr.bf16.mxu0 %v2137_v31 }
 0x214   : > { %7096 = vmatpush3.bf16.msra.mxu1 %v1983_v0 }
 0x215   : > { %7097 = vmatprep.subr.bf16.mxu1 %v1984_v63 }
 0x216   : > { %7130 = vmatpush3.bf16.msra.mxu0 %v2137_v31 }
 0x218   : > { %7098 = vmatpush3.bf16.msra.mxu1 %v1984_v63 }
 0x219   : > { %7132 = vmatmul.mubr.bf16.vlgmr.msra.gmra.mrb[80].mxu0 %v7713_v16  ;;  %7147 = vmatprep.subr.bf16.mxu1 %v7720_v51 }
 0x21a   : > { %7135 = vmatprep.mubr.bf16.mxu0 %v7714_v7 }
 0x21b   : > { %7100 = vmatmul.mubr.bf16.vlgmr.msra.gmra.mrb[64].mxu1 %v7713_v16 }
 0x21c   : > { %7103 = vmatprep.mubr.bf16.mxu1 %v7714_v7  ;;  %7148 = vmatpush3.bf16.msra.mxu1 %v7720_v51 }
 0x21d   : > { %7149 = vmatprep.subr.bf16.mxu1 %v7721_v45 }
 0x220   : > { %7150 = vmatpush3.bf16.msra.mxu1 %v7721_v45 }
 0x221   : > { %7136 = vmatmul.mubr.bf16.gmra.mrb[84].mxu0 %v7715_v8 }
 0x222   : > { %7139 = vmatprep.mubr.bf16.mxu0 %v7716_v21 }
 0x223   : > { %7104 = vmatmul.mubr.bf16.gmra.mrb[68].mxu1 %v7715_v8 }
 0x224   : > { %7107 = vmatprep.mubr.bf16.mxu1 %v7716_v21 }
 0x229   : > { %7140 = vmatmul.mubr.bf16.gmra.mrb[88].mxu0 %v7717_v15 }
 0x22a   : > { %7143 = vmatprep.mubr.bf16.mxu0 %v7718_v47 }
 0x22b   : > { %7108 = vmatmul.mubr.bf16.gmra.mrb[72].mxu1 %v7717_v15 }
 0x22c   : > { %7111 = vmatprep.mubr.bf16.mxu1 %v7718_v47 }
 0x231   : > { %7144 = vmatmul.mubr.bf16.gmra.mrb[92].mxu0 %v7719_v58 }
 0x233   : > { %7112 = vmatmul.mubr.bf16.gmra.mrb[76].mxu1 %v7719_v58 }
 0x2ec   : > { %v7133_v50 = vpop.f32.mrb[80].mxu0 }
 0x2ed   : > { %vm2237_vm1 = vcmp.gt.f32.partialorder %v7133_v50, 0.0  ;;  %v2172_v23 = vpop.f32.mrb[81].mxu0 }
 0x2ee   : > { %v2253_v2 = vsel %vm2237_vm1, %v7133_v50, 1.0  ;;  %vm2235_vm2 = vcmp.gt.f32.partialorder %v2172_v23, 0.0  ;;  %v7134_v44 = vpop.f32.mrb[82].mxu0  ;;  %v7101_v22 = vpop.f32.mrb[64].mxu1 }
 0x2ef   : > { %7770 = vrcp.f32 %v2253_v2  ;;  %v2251_v34 = vsel %vm2235_vm2, %v2172_v23, 1.0  ;;  %vm2238_vm3 = vcmp.gt.f32.partialorder %v7134_v44, 0.0  ;;  %v2175_v59 = vpop.f32.mrb[83].mxu0  ;;  %v2067_v19 = vpop.f32.mrb[65].mxu1 }
 0x2f0   : > { %7772 = vrcp.f32 %v2251_v34  ;;  %v2254_v20 = vsel %vm2238_vm3, %v7134_v44, 1.0  ;;  %vm2236_vm4 = vcmp.gt.f32.partialorder %v2175_v59, 0.0  ;;  %v7102_v24 = vpop.f32.mrb[66].mxu1 }
 0x2f1   : > { %7774 = vrcp.f32 %v2254_v20  ;;  %v2252_v35 = vsel %vm2236_vm4, %v2175_v59, 1.0  ;;  %v2070_v55 = vpop.f32.mrb[67].mxu1 }
 0x2f2   : > { %7776 = vrcp.f32 %v2252_v35 }
 0x2f4   : > { %v9059_v27 = vpop.f32.mrb[84].mxu0 }
 0x2f5   : > { %vm2241_vm5 = vcmp.gt.f32.partialorder %v9059_v27, 0.0  ;;  %v9062_v10 = vpop.f32.mrb[85].mxu0 }
 0x2f6   : > { %v2257_v4 = vsel %vm2241_vm5, %v9059_v27, 1.0  ;;  %vm2239_vm6 = vcmp.gt.f32.partialorder %v9062_v10, 0.0  ;;  %v9068_v6 = vpop.f32.mrb[86].mxu0  ;;  %v7105_v62 = vpop.f32.mrb[68].mxu1 }
 0x2f7   : > { %7778 = vrcp.f32 %v2257_v4  ;;  %v2255_v28 = vsel %vm2239_vm6, %v9062_v10, 1.0  ;;  %vm2242_vm7 = vcmp.gt.f32.partialorder %v9068_v6, 0.0  ;;  %v9074_v60 = vpop.f32.mrb[87].mxu0  ;;  %v2083_v33 = vpop.f32.mrb[69].mxu1 }
 0x2f8   : > { %7780 = vrcp.f32 %v2255_v28  ;;  %v2258_v48 = vsel %vm2242_vm7, %v9068_v6, 1.0  ;;  %vm2240_vm8 = vcmp.gt.f32.partialorder %v9074_v60, 0.0  ;;  %v7106_v54 = vpop.f32.mrb[70].mxu1 }
 0x2f9   : > { %v7771_v49 = vpop.eup %7770  ;;  %7782 = vrcp.f32 %v2258_v48  ;;  %v2256_v41 = vsel %vm2240_vm8, %v9074_v60, 1.0  ;;  %v2086_v53 = vpop.f32.mrb[71].mxu1 }
 0x2fa   : > { %v7773_v13 = vpop.eup %7772  ;;  %7784 = vrcp.f32 %v2256_v41  ;;  %v2285_v30 = vmul.f32 %v7771_v49, %v7101_v22 }
 0x2fb   : > { %v7775_v46 = vpop.eup %7774  ;;  %v2283_v57 = vmul.f32 %v7773_v13, %v2067_v19 }
 0x2fc   : > { %v7777_v25 = vpop.eup %7776  ;;  %v2301_v40 = vsel %vm2237_vm1, %v2285_v30, 0.0  ;;  %v2286_v42 = vmul.f32 %v7775_v46, %v7102_v24  ;;  %v9084_v39 = vpop.f32.mrb[88].mxu0 }
 0x2fd   : > { %v2317_v43 = vadd.f32 %v2301_v40, %v8801_v5  ;;  %v2299_v14 = vsel %vm2235_vm2, %v2283_v57, 0.0  ;;  %v2284_v61 = vmul.f32 %v7777_v25, %v2070_v55  ;;  %vm2245_vm9 = vcmp.gt.f32.partialorder %v9084_v39, 0.0  ;;  %v9089_v9 = vpop.f32.mrb[89].mxu0 }
 0x2fe   : > { %v2315_v36 = vadd.f32 %v2299_v14, %v8806_v11  ;;  %v2302_v26 = vsel %vm2238_vm3, %v2286_v42, 0.0  ;;  %v2261_v56 = vsel %vm2245_vm9, %v9084_v39, 1.0  ;;  %vm2243_vm10 = vcmp.gt.f32.partialorder %v9089_v9, 0.0  ;;  %v9097_v29 = vpop.f32.mrb[90].mxu0  ;;  %v7109_v5 = vpop.f32.mrb[72].mxu1 }
 0x2ff   : > { %v2318_v37 = vadd.f32 %v2302_v26, %v8809_v12  ;;  %v2300_v32 = vsel %vm2236_vm4, %v2284_v61, 0.0  ;;  %7786 = vrcp.f32 %v2261_v56  ;;  %v2259_v11 = vsel %vm2243_vm10, %v9089_v9, 1.0  ;;  %v9104_v0 = vpop.f32.mrb[91].mxu0  ;;  %v2099_v1 = vpop.f32.mrb[73].mxu1  ;;  %v11873_v61 = vld [vmem:[#allocation14_spill] sm:$0xff]  ;;  %v11874_v56 = vld [vmem:[#allocation13_spill] sm:$0xff] }
 0x300   : > { %v2316_v3 = vadd.f32 %v2300_v32, %v8812_v38  ;;  %7788 = vrcp.f32 %v2259_v11  ;;  %vm2246_vm11 = vcmp.gt.f32.partialorder %v9097_v29, 0.0  ;;  %vm2244_vm12 = vcmp.gt.f32.partialorder %v9104_v0, 0.0  ;;  %v7110_v31 = vpop.f32.mrb[74].mxu1 }
 0x301   : > { %v7779_v63 = vpop.eup %7778  ;;  %v2332_v12 = vpack.c.bf16 %v2318_v37, %v2317_v43  ;;  %v2262_v16 = vsel %vm2246_vm11, %v9097_v29, 1.0  ;;  %v2260_v7 = vsel %vm2244_vm12, %v9104_v0, 1.0  ;;  %v2102_v8 = vpop.f32.mrb[75].mxu1  ;;  %v11872_v43 = vld [vmem:[#allocation12_spill] sm:$0xff]  ;;  %v11875_v37 = vld [vmem:[#allocation15_spill] sm:$0xff]  ;;  %vm2480_vm2 = vcmask 523264  }
 0x302   : > { %v7781_v21 = vpop.eup %7780  ;;  %v2331_v15 = vpack.c.bf16 %v2316_v3, %v2315_v36  ;;  %7790 = vrcp.f32 %v2262_v16  ;;  %v2289_v38 = vmul.f32 %v7779_v63, %v7105_v62  ;;  %v11871_v62 = vld [vmem:[#allocation11_spill] sm:$0xff] }
 0x303   : > { %v7783_v47 = vpop.eup %7782  ;;  %7792 = vrcp.f32 %v2260_v7  ;;  %v2287_v58 = vmul.f32 %v7781_v21, %v2083_v33  ;;  %v11876_v21 = vld [vmem:[#allocation16_spill] sm:$0xff] }
 0x304   : > { %v7785_v51 = vpop.eup %7784  ;;  %v2305_v45 = vsel %vm2241_vm5, %v2289_v38, 0.0  ;;  %v2290_v50 = vmul.f32 %v7783_v47, %v7106_v54  ;;  %v7145_v23 = vpop.f32.mrb[92].mxu0  ;;  %7151 = vmatprep.mubr.msk.bf16.mxu1 %vm1875_vm0, %v2331_v15  ;;  %v11877_v38 = vld [vmem:[#allocation18_spill] sm:$0xff] }
 0x305   : > { %v2321_v2 = vadd.f32 %v2305_v45, %v8815_v17  ;;  %v2303_v44 = vsel %vm2239_vm6, %v2287_v58, 0.0  ;;  %v2288_v22 = vmul.f32 %v7785_v51, %v2086_v53  ;;  %vm2249_vm13 = vcmp.gt.f32.partialorder %v7145_v23, 0.0  ;;  %v2220_v34 = vpop.f32.mrb[93].mxu0  ;;  %7152 = vmatmul.mubr.msk.bf16.vlgmr.msra.gmra.mrb[80].mxu1 %vm1875_vm0, %v2332_v12  ;;  %v11878_v51 = vld [vmem:[#allocation17_spill] sm:$0xff] }
 0x306   : > { %v2319_v59 = vadd.f32 %v2303_v44, %v8818_v18  ;;  %v2306_v19 = vsel %vm2242_vm7, %v2290_v50, 0.0  ;;  %v2265_v20 = vsel %vm2249_vm13, %v7145_v23, 1.0  ;;  %vm2247_vm14 = vcmp.gt.f32.partialorder %v2220_v34, 0.0  ;;  %v7146_v24 = vpop.f32.mrb[94].mxu0  ;;  %v7113_v35 = vpop.f32.mrb[76].mxu1  ;;  %v11879_v50 = vld [vmem:[#allocation19_spill] sm:$0xff] }
 0x307   : > { %v2322_v17 = vadd.f32 %v2306_v19, %v8822_v52  ;;  %v2304_v55 = vsel %vm2240_vm8, %v2288_v22, 0.0  ;;  %7794 = vrcp.f32 %v2265_v20  ;;  %v2263_v27 = vsel %vm2247_vm14, %v2220_v34, 1.0  ;;  %v2223_v10 = vpop.f32.mrb[95].mxu0  ;;  %v2115_v4 = vpop.f32.mrb[77].mxu1  ;;  %v11880_v22 = vld [vmem:[#allocation10_spill] sm:$0xff]  ;;  %v9163_v34 = vld [vmem:[%s11746_s5] sm:$0xff] }
 0x308   : > { %v2320_v18 = vadd.f32 %v2304_v55, %v11871_v62  ;;  %7796 = vrcp.f32 %v2263_v27  ;;  %vm2250_vm15 = vcmp.gt.f32.partialorder %v7146_v24, 0.0  ;;  %vm2248_vm1 = vcmp.gt.f32.partialorder %v2223_v10, 0.0  ;;  %v7114_v6 = vpop.f32.mrb[78].mxu1 }
 0x309   : > { %v7787_v28 = vpop.eup %7786  ;;  %v2334_v33 = vpack.c.bf16 %v2322_v17, %v2321_v2  ;;  %v2266_v48 = vsel %vm2250_vm15, %v7146_v24, 1.0  ;;  %v2264_v52 = vsel %vm2248_vm1, %v2223_v10, 1.0  ;;  %v2118_v54 = vpop.f32.mrb[79].mxu1 }
 0x30a   : > { %v7789_v60 = vpop.eup %7788  ;;  %v2333_v49 = vpack.c.bf16 %v2320_v18, %v2319_v59  ;;  %7798 = vrcp.f32 %v2266_v48  ;;  %v2293_v41 = vmul.f32 %v7787_v28, %v7109_v5  ;;  %v11881_v59 = vld [vmem:[#allocation9_spill] sm:$0xff] }
 0x30b   : > { %7800 = vrcp.f32 %v2264_v52  ;;  %v2291_v53 = vmul.f32 %v7789_v60, %v2099_v1  ;;  %v9167_v19 = vrot.slane %v9163_v34, %v11881_v59 }
 0x30c   : > { %v7791_v13 = vpop.eup %7790  ;;  %v2309_v30 = vsel %vm2245_vm9, %v2293_v41, 0.0  ;;  %7155 = vmatprep.mubr.msk.bf16.mxu1 %vm1875_vm0, %v2333_v49 }
 0x30d   : > { %v7793_v46 = vpop.eup %7792  ;;  %v2307_v57 = vsel %vm2243_vm10, %v2291_v53, 0.0  ;;  %v2294_v25 = vmul.f32 %v7791_v13, %v7110_v31  ;;  %7156 = vmatmul.mubr.msk.bf16.gmra.mrb[84].mxu1 %vm1875_vm0, %v2334_v33  ;;  %v2325_v14 = vadd.f32 %v2309_v30, %v11872_v43 }
 0x30e   : > { %v2292_v40 = vmul.f32 %v7793_v46, %v2102_v8  ;;  %v2323_v5 = vadd.f32 %v2307_v57, %v11874_v56 }
 0x30f   : > { %v2310_v42 = vsel %vm2246_vm11, %v2294_v25, 0.0 }
 0x310   : > { %v2326_v36 = vadd.f32 %v2310_v42, %v11873_v61  ;;  %v2308_v39 = vsel %vm2244_vm12, %v2292_v40, 0.0 }
 0x311   : > { %v7795_v26 = vpop.eup %7794  ;;  %v2324_v9 = vadd.f32 %v2308_v39, %v11875_v37 }
 0x312   : > { %v7797_v32 = vpop.eup %7796  ;;  %v2336_v11 = vpack.c.bf16 %v2326_v36, %v2325_v14  ;;  %v2297_v1 = vmul.f32 %v7795_v26, %v7113_v35 }
 0x313   : > { %v2335_v3 = vpack.c.bf16 %v2324_v9, %v2323_v5  ;;  %v2295_v31 = vmul.f32 %v7797_v32, %v2115_v4 }
 0x314   : > { %v7799_v63 = vpop.eup %7798  ;;  %v2313_v29 = vsel %vm2249_vm13, %v2297_v1, 0.0 }
 0x315   : > { %v7801_v12 = vpop.eup %7800  ;;  %v2311_v16 = vsel %vm2247_vm14, %v2295_v31, 0.0  ;;  %v2298_v7 = vmul.f32 %v7799_v63, %v7114_v6  ;;  %7159 = vmatprep.mubr.msk.bf16.mxu1 %vm1875_vm0, %v2335_v3  ;;  %v2329_v15 = vadd.f32 %v2313_v29, %v11876_v21 }
 0x316   : > { %v2296_v0 = vmul.f32 %v7801_v12, %v2118_v54  ;;  %7160 = vmatmul.mubr.msk.bf16.gmra.mrb[88].mxu1 %vm1875_vm0, %v2336_v11  ;;  %v2327_v45 = vadd.f32 %v2311_v16, %v11878_v51 }
 0x317   : > { %v2314_v8 = vsel %vm2250_vm15, %v2298_v7, 0.0 }
 0x318   : > { %v2330_v47 = vadd.f32 %v2314_v8, %v11877_v38  ;;  %v2312_v58 = vsel %vm2248_vm1, %v2296_v0, 0.0 }
 0x319   : > { %v2328_v23 = vadd.f32 %v2312_v58, %v11879_v50 }
 0x31a   : > { %v2338_v2 = vpack.c.bf16 %v2330_v47, %v2329_v15 }
 0x31b   : > { %v2337_v44 = vpack.c.bf16 %v2328_v23, %v2327_v45 }
 0x31d   : > { %7163 = vmatprep.mubr.msk.bf16.mxu1 %vm1875_vm0, %v2337_v44 }
 0x31e   : > { %7164 = vmatmul.mubr.msk.bf16.gmra.mrb[92].mxu1 %vm1875_vm0, %v2338_v2 }
 0x31f   : > { %7207 = vmatprep.mubr.bf16.mxu1 %v11880_v22 }
 0x3d8   : > { %v7153_v20 = vpop.f32.mrb[80].mxu1 }
 0x3d9   : > { %v9170_v24 = vadd.f32 %v7153_v20, %v9167_v19  ;;  %v2417_v35 = vpop.f32.mrb[81].mxu1 }
 0x3da   : > { %v9173_v17 = vadd.f32 %v2417_v35, %v9167_v19  ;;  %v7154_v55 = vpop.f32.mrb[82].mxu1 }
 0x3db   : > { %v9176_v27 = vadd.f32 %v7154_v55, %v9167_v19  ;;  %v2420_v10 = vpop.f32.mrb[83].mxu1  ;;  %v2487_v4 = vsel %vm2480_vm2, %v9170_v24, 0.0  ;;  %v2548_v6 = vmul.f32 %v9170_v24, %v9170_v24 }
 0x3dc   : > { %v9181_v62 = vadd.f32 %v2420_v10, %v9167_v19  ;;  %2488 = vadd.xlane.f32.xlu1 %v2487_v4  ;;  %v2481_v18 = vsel %vm2480_vm2, %v9173_v17, 0.0  ;;  %v2546_v40 = vmul.f32 %v9173_v17, %v9173_v17 }
 0x3dd   : > { %2482 = vadd.xlane.f32.xlu0 %v2481_v18  ;;  %v2490_v28 = vsel %vm2480_vm2, %v9176_v27, 0.0  ;;  %v2549_v33 = vmul.f32 %v9176_v27, %v9176_v27  ;;  %v2568_v52 = vsel %vm2480_vm2, %v2548_v6, 0.0 }
 0x3de   : > { %v2547_v46 = vmul.f32 %v9181_v62, %v9181_v62  ;;  %v2484_v25 = vsel %vm2480_vm2, %v9181_v62, 0.0  ;;  %v2562_v43 = vsel %vm2480_vm2, %v2546_v40, 0.0  ;;  %v7725_v40 = vld [vmem:[%s11745_s4 + $0x18] sm:$0xff]  }
 0x3df   : > { %v2571_v30 = vsel %vm2480_vm2, %v2549_v33, 0.0 }
 0x3e0   : > { %2491 = vadd.xlane.f32.xlu1 %v2490_v28  ;;  %v7157_v48 = vpop.f32.mrb[84].mxu1  ;;  %v2565_v42 = vsel %vm2480_vm2, %v2547_v46, 0.0  ;;  %v7722_v28 = vld [vmem:[%s11745_s4] sm:$0xff]  }
 0x3e1   : > { %v9193_v54 = vadd.f32 %v7157_v48, %v9167_v19  ;;  %v2433_v60 = vpop.f32.mrb[85].mxu1  ;;  %2569 = vadd.xlane.f32.xlu0 %v2568_v52  ;;  %7167 = vmatprep.subr.bf16.mxu0 %v7722_v28 }
 0x3e2   : > { %v9196_v49 = vadd.f32 %v2433_v60, %v9167_v19  ;;  %v7158_v41 = vpop.f32.mrb[86].mxu1  ;;  %7168 = vmatpush3.bf16.msra.mxu0 %v7722_v28  ;;  %v7723_v60 = vld [vmem:[%s11745_s4 + $0x8] sm:$0xff]  }
 0x3e3   : > { %v9199_v53 = vadd.f32 %v7158_v41, %v9167_v19  ;;  %v2436_v13 = vpop.f32.mrb[87].mxu1  ;;  %v2499_v9 = vsel %vm2480_vm2, %v9193_v54, 0.0  ;;  %v2552_v31 = vmul.f32 %v9193_v54, %v9193_v54  ;;  %v7724_v41 = vld [vmem:[%s11745_s4 + $0x10] sm:$0xff]   ;;  %7169 = vmatprep.subr.bf16.mxu0 %v7723_v60 }
 0x3e4   : > { %v9205_v57 = vadd.f32 %v2436_v13, %v9167_v19  ;;  %2572 = vadd.xlane.f32.xlu1 %v2571_v30  ;;  %v2493_v3 = vsel %vm2480_vm2, %v9196_v49, 0.0  ;;  %v2550_v47 = vmul.f32 %v9196_v49, %v9196_v49 }
 0x3e5   : > { %2485 = vadd.xlane.f32.xlu0 %v2484_v25  ;;  %v2502_v56 = vsel %vm2480_vm2, %v9199_v53, 0.0  ;;  %v2553_v1 = vmul.f32 %v9199_v53, %v9199_v53  ;;  %v2580_v38 = vsel %vm2480_vm2, %v2552_v31, 0.0 }
 0x3e6   : > { %v2496_v11 = vsel %vm2480_vm2, %v9205_v57, 0.0  ;;  %v2551_v8 = vmul.f32 %v9205_v57, %v9205_v57  ;;  %v2574_v45 = vsel %vm2480_vm2, %v2550_v47, 0.0  ;;  %7170 = vmatpush3.bf16.msra.mxu0 %v7723_v60 }
 0x3e7   : > { %v2583_v0 = vsel %vm2480_vm2, %v2553_v1, 0.0  ;;  %7171 = vmatprep.subr.bf16.mxu0 %v7724_v41 }
 0x3e8   : > { %2566 = vadd.xlane.f32.xlu1 %v2565_v42  ;;  %v2577_v51 = vsel %vm2480_vm2, %v2551_v8, 0.0 }
 0x3e9   : > { %v7161_v14 = vpop.f32.mrb[88].mxu1  ;;  %2563 = vadd.xlane.f32.xlu0 %v2562_v43 }
 0x3ea   : > { %v9214_v61 = vadd.f32 %v7161_v14, %v9167_v19  ;;  %v2449_v36 = vpop.f32.mrb[89].mxu1  ;;  %7172 = vmatpush3.bf16.msra.mxu0 %v7724_v41 }
 0x3eb   : > { %v9217_v39 = vadd.f32 %v2449_v36, %v9167_v19  ;;  %v7162_v26 = vpop.f32.mrb[90].mxu1  ;;  %7173 = vmatprep.subr.bf16.mxu0 %v7725_v40 }
 0x3ec   : > { %v9222_v5 = vadd.f32 %v7162_v26, %v9167_v19  ;;  %v2452_v37 = vpop.f32.mrb[91].mxu1  ;;  %2503 = vadd.xlane.f32.xlu1 %v2502_v56  ;;  %v2511_v23 = vsel %vm2480_vm2, %v9214_v61, 0.0 }
 0x3ed   : > { %v9227_v32 = vadd.f32 %v2452_v37, %v9167_v19  ;;  %2500 = vadd.xlane.f32.xlu0 %v2499_v9  ;;  %v2505_v22 = vsel %vm2480_vm2, %v9217_v39, 0.0  ;;  %v2554_v10 = vmul.f32 %v9217_v39, %v9217_v39 }
 0x3ee   : > { %v2514_v50 = vsel %vm2480_vm2, %v9222_v5, 0.0  ;;  %v2557_v44 = vmul.f32 %v9222_v5, %v9222_v5  ;;  %7174 = vmatpush3.bf16.msra.mxu0 %v7725_v40 }
 0x3ef   : > { %v2508_v2 = vsel %vm2480_vm2, %v9227_v32, 0.0  ;;  %v2555_v35 = vmul.f32 %v9227_v32, %v9227_v32  ;;  %v2586_v18 = vsel %vm2480_vm2, %v2554_v10, 0.0 }
 0x3f0   : > { %2497 = vadd.xlane.f32.xlu1 %v2496_v11  ;;  %v2595_v20 = vsel %vm2480_vm2, %v2557_v44, 0.0 }
 0x3f1   : > { %v7165_v63 = vpop.f32.mrb[92].mxu1  ;;  %2494 = vadd.xlane.f32.xlu0 %v2493_v3  ;;  %v2589_v4 = vsel %vm2480_vm2, %v2555_v35, 0.0 }
 0x3f2   : > { %v9238_v29 = vadd.f32 %v7165_v63, %v9167_v19  ;;  %v2465_v12 = vpop.f32.mrb[93].mxu1 }
 0x3f3   : > { %v9241_v16 = vadd.f32 %v2465_v12, %v9167_v19  ;;  %v7166_v7 = vpop.f32.mrb[94].mxu1 }
 0x3f4   : > { %v9247_v21 = vadd.f32 %v7166_v7, %v9167_v19  ;;  %v2468_v15 = vpop.f32.mrb[95].mxu1  ;;  %2584 = vadd.xlane.f32.xlu1 %v2583_v0  ;;  %v2523_v33 = vsel %vm2480_vm2, %v9238_v29, 0.0  ;;  %v2560_v43 = vmul.f32 %v9238_v29, %v9238_v29 }
 0x3f5   : > { %v9253_v58 = vadd.f32 %v2468_v15, %v9167_v19  ;;  %2581 = vadd.xlane.f32.xlu0 %v2580_v38  ;;  %v2556_v19 = vmul.f32 %v9214_v61, %v9214_v61  ;;  %v2517_v13 = vsel %vm2480_vm2, %v9241_v16, 0.0  ;;  %v2558_v30 = vmul.f32 %v9241_v16, %v9241_v16 }
 0x3f6   : > { %v2526_v6 = vsel %vm2480_vm2, %v9247_v21, 0.0  ;;  %v2561_v25 = vmul.f32 %v9247_v21, %v9247_v21  ;;  %v2604_v36 = vsel %vm2480_vm2, %v2560_v43, 0.0 }
 0x3f7   : > { %v2592_v55 = vsel %vm2480_vm2, %v2556_v19, 0.0  ;;  %v2520_v48 = vsel %vm2480_vm2, %v9253_v58, 0.0  ;;  %v2559_v52 = vmul.f32 %v9253_v58, %v9253_v58  ;;  %v2598_v42 = vsel %vm2480_vm2, %v2558_v30, 0.0  ;;  %v11882_v30 = vld [vmem:[#allocation8_spill] sm:$0xff] }
 0x3f8   : > { %2578 = vadd.xlane.f32.xlu1 %v2577_v51  ;;  %v2607_v14 = vsel %vm2480_vm2, %v2561_v25, 0.0 }
 0x3f9   : > { %2575 = vadd.xlane.f32.xlu0 %v2574_v45  ;;  %v2601_v46 = vsel %vm2480_vm2, %v2559_v52, 0.0 }
 0x3fc   : > { %2515 = vadd.xlane.f32.xlu1 %v2514_v50 }
 0x3fd   : > { %2512 = vadd.xlane.f32.xlu0 %v2511_v23 }
 0x400   : > { %2509 = vadd.xlane.f32.xlu1 %v2508_v2 }
 0x401   : > { %2506 = vadd.xlane.f32.xlu0 %v2505_v22 }
 0x404   : > { %2596 = vadd.xlane.f32.xlu1 %v2595_v20 }
 0x405   : > { %2593 = vadd.xlane.f32.xlu0 %v2592_v55 }
 0x408   : > { %2590 = vadd.xlane.f32.xlu1 %v2589_v4 }
 0x409   : > { %2587 = vadd.xlane.f32.xlu0 %v2586_v18 }
 0x40c   : > { %2527 = vadd.xlane.f32.xlu1 %v2526_v6 }
 0x40d   : > { %2524 = vadd.xlane.f32.xlu0 %v2523_v33 }
 0x410   : > { %2521 = vadd.xlane.f32.xlu1 %v2520_v48 }
 0x411   : > { %2518 = vadd.xlane.f32.xlu0 %v2517_v13 }
 0x414   : > { %2602 = vadd.xlane.f32.xlu1 %v2601_v46  ;;  %v9322_v46 = vsub.s32 1, %v11882_v30 }
 0x415   : > { %2599 = vadd.xlane.f32.xlu0 %v2598_v42 }
 0x416   : > { %11883 = vst [vmem:[#allocation11_spill] sm:$0xff] %v9322_v46 }
 0x418   : > { %2608 = vadd.xlane.f32.xlu1 %v2607_v14 }
 0x419   : > { %2605 = vadd.xlane.f32.xlu0 %v2604_v36 }
 0x469   : > { %v2489_v26 = vpop.xlane.xlu1 %2488 }
 0x46a   : > { %v2483_v56 = vpop.xlane.xlu0 %2482  ;;  %v2532_v37 = vmul.f32 0.015625, %v2489_v26 }
 0x46b   : > { %v9309_v15 = vmul.f32 0.015625, %v2483_v56 }
 0x46c   : > { %v2628_v3 = vmul.f32 %v2532_v37, %v2532_v37  ;;  %v2676_v42 = vsub.f32 %v9170_v24, %v2532_v37  ;;  %v9339_v37 = vrot.slane %v9163_v34, %v9322_v46 }
 0x46d   : > { %v2492_v9 = vpop.xlane.xlu1 %2491  ;;  %v2626_v19 = vmul.f32 %v9309_v15, %v9309_v15 }
 0x46e   : > { %v2533_v11 = vmul.f32 0.015625, %v2492_v9  ;;  %v2570_v1 = vpop.xlane.xlu0 %2569 }
 0x46f   : > { %v2612_v31 = vmul.f32 0.015625, %v2570_v1 }
 0x470   : > { %v2629_v7 = vmul.f32 %v2533_v11, %v2533_v11  ;;  %v2677_v56 = vsub.f32 %v9176_v27, %v2533_v11 }
 0x471   : > { %v2644_v63 = vsub.f32 %v2612_v31, %v2628_v3  ;;  %v2573_v12 = vpop.xlane.xlu1 %2572 }
 0x472   : > { %v2613_v0 = vmul.f32 0.015625, %v2573_v12  ;;  %v2486_v8 = vpop.xlane.xlu0 %2485 }
 0x473   : > { %v2660_v38 = vmax.f32 %v2644_v63, 0.0  ;;  %v9311_v47 = vmul.f32 0.015625, %v2486_v8  ;;  %v9335_v63 = vsub.s32 2, %v11882_v30 }
 0x474   : > { %v2645_v51 = vsub.f32 %v2613_v0, %v2629_v7 }
 0x475   : > { %v2692_v45 = vadd.f32 1e-05, %v2660_v38  ;;  %v2627_v50 = vmul.f32 %v9311_v47, %v9311_v47  ;;  %v2567_v23 = vpop.xlane.xlu1 %2566  ;;  %11884 = vst [vmem:[#allocation12_spill] sm:$0xff] %v9335_v63  ;;  %v2675_v27 = vsub.f32 %v9181_v62, %v9311_v47  ;;  %v2674_v62 = vsub.f32 %v9173_v17, %v9309_v15 }
 0x476   : > { %v2661_v2 = vmax.f32 %v2645_v51, 0.0  ;;  %v2611_v44 = vmul.f32 0.015625, %v2567_v23  ;;  %v2564_v22 = vpop.xlane.xlu0 %2563 }
 0x477   : > { %v2610_v20 = vmul.f32 0.015625, %v2564_v22  ;;  %7802 = vrsqrt.f32 %v2692_v45 }
 0x478   : > { %v2693_v35 = vadd.f32 1e-05, %v2661_v2  ;;  %v2643_v55 = vsub.f32 %v2611_v44, %v2627_v50 }
 0x479   : > { %v2642_v10 = vsub.f32 %v2610_v20, %v2626_v19  ;;  %v2504_v4 = vpop.xlane.xlu1 %2503  ;;  %v9350_v19 = vrot.slane %v9163_v34, %v9335_v63 }
 0x47a   : > { %7804 = vrsqrt.f32 %v2693_v35  ;;  %v2659_v18 = vmax.f32 %v2643_v55, 0.0  ;;  %v2501_v6 = vpop.xlane.xlu0 %2500  ;;  %v9317_v60 = vmul.f32 0.015625, %v2504_v4 }
 0x47b   : > { %v2658_v28 = vmax.f32 %v2642_v10, 0.0  ;;  %v9319_v13 = vmul.f32 0.015625, %v2501_v6 }
 0x47c   : > { %v2691_v33 = vadd.f32 1e-05, %v2659_v18  ;;  %v2633_v43 = vmul.f32 %v9317_v60, %v9317_v60 }
 0x47d   : > { %v2690_v48 = vadd.f32 1e-05, %v2658_v28  ;;  %v2498_v52 = vpop.xlane.xlu1 %2497  ;;  %v2632_v9 = vmul.f32 %v9319_v13, %v9319_v13 }
 0x47e   : > { %7806 = vrsqrt.f32 %v2691_v33  ;;  %v2495_v41 = vpop.xlane.xlu0 %2494  ;;  %v9327_v14 = vmul.f32 0.015625, %v2498_v52 }
 0x47f   : > { %7808 = vrsqrt.f32 %v2690_v48  ;;  %v9332_v1 = vmul.f32 0.015625, %v2495_v41 }
 0x480   : > { %v2631_v11 = vmul.f32 %v9327_v14, %v9327_v14 }
 0x481   : > { %v2585_v25 = vpop.xlane.xlu1 %2584  ;;  %v7803_v40 = vpop.eup %7802  ;;  %v2630_v23 = vmul.f32 %v9332_v1, %v9332_v1 }
 0x482   : > { %v2617_v36 = vmul.f32 0.015625, %v2585_v25  ;;  %v2582_v26 = vpop.xlane.xlu0 %2581  ;;  %v2724_v12 = vmul.f32 %v7803_v40, %v2676_v42 }
 0x483   : > { %v2616_v3 = vmul.f32 0.015625, %v2582_v26 }
 0x484   : > { %v7805_v31 = vpop.eup %7804  ;;  %v2649_v24 = vsub.f32 %v2617_v36, %v2633_v43  ;;  %v2744_v55 = vmul.f32 %v9339_v37, %v2724_v12 }
 0x485   : > { %v2725_v7 = vmul.f32 %v7805_v31, %v2677_v56  ;;  %v2648_v0 = vsub.f32 %v2616_v3, %v2632_v9  ;;  %v2579_v8 = vpop.xlane.xlu1 %2578 }
 0x486   : > { %v2665_v38 = vmax.f32 %v2649_v24, 0.0  ;;  %v2615_v51 = vmul.f32 0.015625, %v2579_v8  ;;  %v2576_v45 = vpop.xlane.xlu0 %2575  ;;  %v2764_v36 = vadd.f32 %v9350_v19, %v2744_v55 }
 0x487   : > { %v2745_v50 = vmul.f32 %v9339_v37, %v2725_v7  ;;  %v2664_v2 = vmax.f32 %v2648_v0, 0.0  ;;  %v2614_v44 = vmul.f32 0.015625, %v2576_v45  ;;  %v2681_v7 = vsub.f32 %v9199_v53, %v9317_v60 }
 0x488   : > { %v7807_v22 = vpop.eup %7806  ;;  %v2697_v47 = vadd.f32 1e-05, %v2665_v38  ;;  %v2647_v20 = vsub.f32 %v2615_v51, %v2631_v11  ;;  %v2780_v8 = vmax.f32 %v2764_v36, 0.0  ;;  %v2680_v53 = vsub.f32 %v9193_v54, %v9319_v13 }
 0x489   : > { %v7809_v35 = vpop.eup %7808  ;;  %v2696_v10 = vadd.f32 1e-05, %v2664_v2  ;;  %v2646_v4 = vsub.f32 %v2614_v44, %v2630_v23  ;;  %v2516_v18 = vpop.xlane.xlu1 %2515  ;;  %v2723_v6 = vmul.f32 %v7807_v22, %v2675_v27  ;;  %v2765_v25 = vadd.f32 %v9350_v19, %v2745_v50 }
 0x48a   : > { %7810 = vrsqrt.f32 %v2697_v47  ;;  %v2663_v28 = vmax.f32 %v2647_v20, 0.0  ;;  %v2513_v33 = vpop.xlane.xlu0 %2512  ;;  %v2722_v48 = vmul.f32 %v7809_v35, %v2674_v62  ;;  %v9360_v26 = vmul.f32 0.015625, %v2516_v18 }
 0x48b   : > { %7812 = vrsqrt.f32 %v2696_v10  ;;  %v2662_v52 = vmax.f32 %v2646_v4, 0.0  ;;  %v2743_v41 = vmul.f32 %v9339_v37, %v2723_v6  ;;  %v9363_v3 = vmul.f32 0.015625, %v2513_v33 }
 0x48c   : > { %v2695_v17 = vadd.f32 1e-05, %v2663_v28  ;;  %v2742_v15 = vmul.f32 %v9339_v37, %v2722_v48  ;;  %v2781_v24 = vmax.f32 %v2765_v25, 0.0  ;;  %v2637_v27 = vmul.f32 %v9360_v26, %v9360_v26 }
 0x48d   : > { %v2694_v40 = vadd.f32 1e-05, %v2662_v52  ;;  %v2510_v42 = vpop.xlane.xlu1 %2509  ;;  %v2763_v43 = vadd.f32 %v9350_v19, %v2743_v41  ;;  %v2636_v50 = vmul.f32 %v9363_v3, %v9363_v3  ;;  %v2679_v47 = vsub.f32 %v9205_v57, %v9327_v14 }
 0x48e   : > { %7814 = vrsqrt.f32 %v2695_v17  ;;  %v2507_v56 = vpop.xlane.xlu0 %2506  ;;  %v2762_v9 = vadd.f32 %v9350_v19, %v2742_v15  ;;  %v9369_v11 = vmul.f32 0.015625, %v2510_v42  ;;  %v2795_v44 = vpack.c.bf16 %v2781_v24, %v2780_v8 }
 0x48f   : > { %7816 = vrsqrt.f32 %v2694_v40  ;;  %v2779_v31 = vmax.f32 %v2763_v43, 0.0  ;;  %v9373_v23 = vmul.f32 0.015625, %v2507_v56  ;;  %v2678_v14 = vsub.f32 %v9196_v49, %v9332_v1 }
 0x490   : > { %v2778_v12 = vmax.f32 %v2762_v9, 0.0  ;;  %v2635_v10 = vmul.f32 %v9369_v11, %v9369_v11 }
 0x491   : > { %v2597_v0 = vpop.xlane.xlu1 %2596  ;;  %v2634_v54 = vmul.f32 %v9373_v23, %v9373_v23 }
 0x492   : > { %v2621_v38 = vmul.f32 0.015625, %v2597_v0  ;;  %v2594_v51 = vpop.xlane.xlu0 %2593  ;;  %v2794_v45 = vpack.c.bf16 %v2779_v31, %v2778_v12 }
 0x493   : > { %v2620_v2 = vmul.f32 0.015625, %v2594_v51 }
 0x494   : > { %v7811_v22 = vpop.eup %7810  ;;  %v2653_v60 = vsub.f32 %v2621_v38, %v2637_v27  ;;  %7175 = vmatprep.mubr.msk.bf16.mxu0 %vm2480_vm2, %v2794_v45 }
 0x495   : > { %v7813_v62 = vpop.eup %7812  ;;  %v2652_v20 = vsub.f32 %v2620_v2, %v2636_v50  ;;  %v2591_v35 = vpop.xlane.xlu1 %2590  ;;  %7176 = vmatmul.mubr.msk.bf16.vlgmr.msra.gmra.mrb[96].mxu0 %vm2480_vm2, %v2795_v44  ;;  %v2729_v55 = vmul.f32 %v7811_v22, %v2681_v7 }
 0x496   : > { %v2669_v4 = vmax.f32 %v2653_v60, 0.0  ;;  %v2619_v18 = vmul.f32 0.015625, %v2591_v35  ;;  %v2588_v6 = vpop.xlane.xlu0 %2587  ;;  %v2728_v28 = vmul.f32 %v7813_v62, %v2680_v53  ;;  %v2685_v60 = vsub.f32 %v9222_v5, %v9360_v26 }
 0x497   : > { %v2668_v13 = vmax.f32 %v2652_v20, 0.0  ;;  %v2618_v33 = vmul.f32 0.015625, %v2588_v6  ;;  %v2749_v48 = vmul.f32 %v9339_v37, %v2729_v55  ;;  %v2684_v5 = vsub.f32 %v9214_v61, %v9363_v3 }
 0x498   : > { %v7815_v57 = vpop.eup %7814  ;;  %v2701_v52 = vadd.f32 1e-05, %v2669_v4  ;;  %v2651_v41 = vsub.f32 %v2619_v18, %v2635_v10  ;;  %v2748_v9 = vmul.f32 %v9339_v37, %v2728_v28 }
 0x499   : > { %v7817_v25 = vpop.eup %7816  ;;  %v2700_v17 = vadd.f32 1e-05, %v2668_v13  ;;  %v2650_v15 = vsub.f32 %v2618_v33, %v2634_v54  ;;  %v2528_v40 = vpop.xlane.xlu1 %2527  ;;  %v2727_v42 = vmul.f32 %v7815_v57, %v2679_v47  ;;  %v2769_v12 = vadd.f32 %v9350_v19, %v2749_v48 }
 0x49a   : > { %7818 = vrsqrt.f32 %v2701_v52  ;;  %v2667_v43 = vmax.f32 %v2651_v41, 0.0  ;;  %v2525_v36 = vpop.xlane.xlu0 %2524  ;;  %v2726_v56 = vmul.f32 %v7817_v25, %v2678_v14  ;;  %v2768_v45 = vadd.f32 %v9350_v19, %v2748_v9 }
 0x49b   : > { %7820 = vrsqrt.f32 %v2700_v17  ;;  %v2666_v31 = vmax.f32 %v2650_v15, 0.0  ;;  %v2747_v24 = vmul.f32 %v9339_v37, %v2727_v42  ;;  %v2785_v44 = vmax.f32 %v2769_v12, 0.0 }
 0x49c   : > { %v2699_v49 = vadd.f32 1e-05, %v2667_v43  ;;  %v2746_v1 = vmul.f32 %v9339_v37, %v2726_v56  ;;  %v2784_v53 = vmax.f32 %v2768_v45, 0.0  ;;  %v9401_v47 = vmul.f32 0.015625, %v2528_v40 }
 0x49d   : > { %v2698_v7 = vadd.f32 1e-05, %v2666_v31  ;;  %v2522_v0 = vpop.xlane.xlu1 %2521  ;;  %v2767_v8 = vadd.f32 %v9350_v19, %v2747_v24  ;;  %v9405_v4 = vmul.f32 0.015625, %v2525_v36  ;;  %v2683_v33 = vsub.f32 %v9227_v32, %v9369_v11 }
 0x49e   : > { %7822 = vrsqrt.f32 %v2699_v49  ;;  %v9393_v27 = vmul.f32 0.015625, %v2522_v0  ;;  %v2519_v38 = vpop.xlane.xlu0 %2518  ;;  %v2766_v51 = vadd.f32 %v9350_v19, %v2746_v1  ;;  %v2797_v28 = vpack.c.bf16 %v2785_v44, %v2784_v53 }
 0x49f   : > { %7824 = vrsqrt.f32 %v2698_v7  ;;  %v9397_v50 = vmul.f32 0.015625, %v2519_v38  ;;  %v2783_v2 = vmax.f32 %v2767_v8, 0.0  ;;  %v2641_v52 = vmul.f32 %v9401_v47, %v9401_v47 }
 0x4a0   : > { %v2782_v22 = vmax.f32 %v2766_v51, 0.0  ;;  %v2639_v20 = vmul.f32 %v9393_v27, %v9393_v27  ;;  %v2640_v61 = vmul.f32 %v9405_v4, %v9405_v4  ;;  %v2682_v11 = vsub.f32 %v9217_v39, %v9373_v23 }
 0x4a1   : > { %v2603_v62 = vpop.xlane.xlu1 %2602  ;;  %v2638_v18 = vmul.f32 %v9397_v50, %v9397_v50 }
 0x4a2   : > { %v2623_v35 = vmul.f32 0.015625, %v2603_v62  ;;  %v2600_v55 = vpop.xlane.xlu0 %2599  ;;  %v2796_v10 = vpack.c.bf16 %v2783_v2, %v2782_v22 }
 0x4a3   : > { %v2622_v6 = vmul.f32 0.015625, %v2600_v55 }
 0x4a4   : > { %v7819_v54 = vpop.eup %7818  ;;  %v2655_v26 = vsub.f32 %v2623_v35, %v2639_v20  ;;  %7179 = vmatprep.mubr.msk.bf16.mxu0 %vm2480_vm2, %v2796_v10  ;;  %v2687_v20 = vsub.f32 %v9253_v58, %v9393_v27  ;;  %v2686_v10 = vsub.f32 %v9241_v16, %v9397_v50  ;;  %v2688_v58 = vsub.f32 %v9238_v29, %v9405_v4 }
 0x4a5   : > { %v7821_v13 = vpop.eup %7820  ;;  %v2654_v48 = vsub.f32 %v2622_v6, %v2638_v18  ;;  %7180 = vmatmul.mubr.msk.bf16.gmra.mrb[100].mxu0 %vm2480_vm2, %v2797_v28  ;;  %v2609_v57 = vpop.xlane.xlu1 %2608  ;;  %v2733_v14 = vmul.f32 %v7819_v54, %v2685_v60  ;;  %v2689_v54 = vsub.f32 %v9247_v21, %v9401_v47 }
 0x4a6   : > { %v2671_v41 = vmax.f32 %v2655_v26, 0.0  ;;  %v2625_v25 = vmul.f32 0.015625, %v2609_v57  ;;  %v2606_v17 = vpop.xlane.xlu0 %2605  ;;  %v2732_v15 = vmul.f32 %v7821_v13, %v2684_v5 }
 0x4a7   : > { %v2670_v3 = vmax.f32 %v2654_v48, 0.0  ;;  %v2624_v40 = vmul.f32 0.015625, %v2606_v17  ;;  %v2753_v42 = vmul.f32 %v9339_v37, %v2733_v14 }
 0x4a8   : > { %v7823_v32 = vpop.eup %7822  ;;  %v2703_v43 = vadd.f32 1e-05, %v2671_v41  ;;  %v2657_v36 = vsub.f32 %v2625_v25, %v2641_v52  ;;  %v2752_v56 = vmul.f32 %v9339_v37, %v2732_v15  ;;  %v8123_v15 = vld [vmem:[%s8779_s7] sm:$0xff]  }
 0x4a9   : > { %v7825_v9 = vpop.eup %7824  ;;  %v2702_v31 = vadd.f32 1e-05, %v2670_v3  ;;  %v2656_v24 = vsub.f32 %v2624_v40, %v2640_v61  ;;  %v2731_v12 = vmul.f32 %v7823_v32, %v2683_v33  ;;  %v2773_v7 = vadd.f32 %v9350_v19, %v2753_v42  ;;  %v9453_v61 = vld [vmem:[%s11746_s5 + $0x8] sm:$0xff] }
 0x4aa   : > { %7826 = vrsqrt.f32 %v2703_v43  ;;  %v2673_v49 = vmax.f32 %v2657_v36, 0.0  ;;  %v2730_v1 = vmul.f32 %v7825_v9, %v2682_v11  ;;  %v2772_v38 = vadd.f32 %v9350_v19, %v2752_v56 }
 0x4ab   : > { %7828 = vrsqrt.f32 %v2702_v31  ;;  %v2672_v0 = vmax.f32 %v2656_v24, 0.0  ;;  %v2751_v8 = vmul.f32 %v9339_v37, %v2731_v12  ;;  %v2789_v53 = vmax.f32 %v2773_v7, 0.0 }
 0x4ac   : > { %v2705_v39 = vadd.f32 1e-05, %v2673_v49  ;;  %v2750_v23 = vmul.f32 %v9339_v37, %v2730_v1  ;;  %v2788_v22 = vmax.f32 %v2772_v38, 0.0  ;;  %v9457_v3 = vsub.s32 3, %v11882_v30 }
 0x4ad   : > { %v2704_v51 = vadd.f32 1e-05, %v2672_v0  ;;  %v2771_v45 = vadd.f32 %v9350_v19, %v2751_v8 }
 0x4ae   : > { %7830 = vrsqrt.f32 %v2705_v39  ;;  %v2770_v2 = vadd.f32 %v9350_v19, %v2750_v23  ;;  %v2799_v35 = vpack.c.bf16 %v2789_v53, %v2788_v22  ;;  %11885 = vst [vmem:[#allocation14_spill] sm:$0xff] %v9457_v3 }
 0x4af   : > { %7832 = vrsqrt.f32 %v2704_v51  ;;  %v2787_v44 = vmax.f32 %v2771_v45, 0.0 }
 0x4b0   : > { %v2786_v60 = vmax.f32 %v2770_v2, 0.0 }
 0x4b2   : > { %v2798_v62 = vpack.c.bf16 %v2787_v44, %v2786_v60 }
 0x4b4   : > { %v7827_v55 = vpop.eup %7826  ;;  %7183 = vmatprep.mubr.msk.bf16.mxu0 %vm2480_vm2, %v2798_v62 }
 0x4b5   : > { %v7829_v18 = vpop.eup %7828  ;;  %7184 = vmatmul.mubr.msk.bf16.gmra.mrb[104].mxu0 %vm2480_vm2, %v2799_v35  ;;  %v2735_v6 = vmul.f32 %v7827_v55, %v2687_v20 }
 0x4b6   : > { %v2734_v28 = vmul.f32 %v7829_v18, %v2686_v10 }
 0x4b7   : > { %v2755_v5 = vmul.f32 %v9339_v37, %v2735_v6 }
 0x4b8   : > { %v7831_v26 = vpop.eup %7830  ;;  %v2754_v27 = vmul.f32 %v9339_v37, %v2734_v28 }
 0x4b9   : > { %v7833_v13 = vpop.eup %7832  ;;  %v2775_v16 = vadd.f32 %v9350_v19, %v2755_v5  ;;  %v2737_v50 = vmul.f32 %v7831_v26, %v2689_v54 }
 0x4ba   : > { %v2774_v33 = vadd.f32 %v9350_v19, %v2754_v27  ;;  %v2736_v48 = vmul.f32 %v7833_v13, %v2688_v58 }
 0x4bb   : > { %v2791_v57 = vmax.f32 %v2775_v16, 0.0  ;;  %v2757_v14 = vmul.f32 %v9339_v37, %v2737_v50 }
 0x4bc   : > { %v2790_v21 = vmax.f32 %v2774_v33, 0.0  ;;  %v2756_v47 = vmul.f32 %v9339_v37, %v2736_v48  ;;  %v3307_v37 = vrot.slane %v9453_v61, 6 }
 0x4bd   : > { %v2777_v52 = vadd.f32 %v9350_v19, %v2757_v14 }
 0x4be   : > { %v2800_v41 = vpack.c.bf16 %v2791_v57, %v2790_v21  ;;  %v2776_v29 = vadd.f32 %v9350_v19, %v2756_v47  ;;  %7479 = vpush %v3307_v37  ;;  %v9461_v19 = vrot.slane %v9163_v34, %v9457_v3 }
 0x4bf   : > { %v2793_v4 = vmax.f32 %v2777_v52, 0.0 }
 0x4c0   : > { %7187 = vmatprep.mubr.msk.bf16.mxu0 %vm2480_vm2, %v2800_v41  ;;  %v2792_v25 = vmax.f32 %v2776_v29, 0.0 }
 0x4c2   : > { %v2801_v17 = vpack.c.bf16 %v2793_v4, %v2792_v25 }
 0x4c4   : > { %7188 = vmatmul.mubr.msk.bf16.gmra.mrb[108].mxu0 %vm2480_vm2, %v2801_v17 }
 0x4c5   : > { %7239 = vmatprep.mubr.bf16.mxu0 %v8123_v15 }
 0x4ef   : > { %s7480_s15 = spop %7479 }
 0x568   : > { %v7177_v40 = vpop.f32.mrb[96].mxu0 }
 0x569   : > { %v9464_v42 = vadd.f32 %v7177_v40, %v9461_v19  ;;  %v2896_v32 = vpop.f32.mrb[97].mxu0 }
 0x56a   : > { %v9467_v11 = vadd.f32 %v2896_v32, %v9461_v19  ;;  %v7178_v43 = vpop.f32.mrb[98].mxu0 }
 0x56b   : > { %11886 = vst [vmem:[#allocation13_spill] sm:$0xff] %v9464_v42  ;;  %v9470_v36 = vadd.f32 %v7178_v43, %v9461_v19  ;;  %v2899_v56 = vpop.f32.mrb[99].mxu0  ;;  %v2967_v9 = vsel %vm1875_vm0, %v9464_v42, 0.0  ;;  %v3028_v12 = vmul.f32 %v9464_v42, %v9464_v42 }
 0x56c   : > { %11887 = vst [vmem:[#allocation15_spill] sm:$0xff] %v9467_v11  ;;  %v9475_v31 = vadd.f32 %v2899_v56, %v9461_v19  ;;  %2968 = vadd.xlane.f32.xlu0 %v2967_v9  ;;  %v2961_v24 = vsel %vm1875_vm0, %v9467_v11, 0.0  ;;  %v3026_v0 = vmul.f32 %v9467_v11, %v9467_v11 }
 0x56d   : > { %11888 = vst [vmem:[#allocation16_spill] sm:$0xff] %v9470_v36  ;;  %v2970_v34 = vsel %vm1875_vm0, %v9470_v36, 0.0  ;;  %v3029_v1 = vmul.f32 %v9470_v36, %v9470_v36  ;;  %v3048_v7 = vsel %vm1875_vm0, %v3028_v12, 0.0 }
 0x56e   : > { %11889 = vst [vmem:[#allocation18_spill] sm:$0xff] %v9475_v31  ;;  %2971 = vadd.xlane.f32.xlu1 %v2970_v34  ;;  %v2964_v49 = vsel %vm1875_vm0, %v9475_v31, 0.0  ;;  %v3027_v38 = vmul.f32 %v9475_v31, %v9475_v31  ;;  %v3042_v39 = vsel %vm1875_vm0, %v3026_v0, 0.0 }
 0x56f   : > { %v3051_v8 = vsel %vm1875_vm0, %v3029_v1, 0.0 }
 0x570   : > { %2962 = vadd.xlane.f32.xlu0 %v2961_v24  ;;  %v3045_v2 = vsel %vm1875_vm0, %v3027_v38, 0.0 }
 0x572   : > { %2965 = vadd.xlane.f32.xlu1 %v2964_v49 }
 0x574   : > { %3049 = vadd.xlane.f32.xlu0 %v3048_v7 }
 0x576   : > { %3052 = vadd.xlane.f32.xlu1 %v3051_v8 }
 0x578   : > { %v7181_v23 = vpop.f32.mrb[100].mxu0  ;;  %3043 = vadd.xlane.f32.xlu0 %v3042_v39 }
 0x579   : > { %v9495_v51 = vadd.f32 %v7181_v23, %v9461_v19  ;;  %v2912_v45 = vpop.f32.mrb[101].mxu0 }
 0x57a   : > { %v9499_v44 = vadd.f32 %v2912_v45, %v9461_v19  ;;  %v7182_v22 = vpop.f32.mrb[102].mxu0  ;;  %3046 = vadd.xlane.f32.xlu1 %v3045_v2 }
 0x57b   : > { %11890 = vst [vmem:[#allocation17_spill] sm:$0xff] %v9495_v51  ;;  %v9502_v53 = vadd.f32 %v7182_v22, %v9461_v19  ;;  %v2915_v60 = vpop.f32.mrb[103].mxu0  ;;  %v2979_v62 = vsel %vm1875_vm0, %v9495_v51, 0.0  ;;  %v3032_v10 = vmul.f32 %v9495_v51, %v9495_v51 }
 0x57c   : > { %11891 = vst [vmem:[#allocation19_spill] sm:$0xff] %v9499_v44  ;;  %v9507_v20 = vadd.f32 %v2915_v60, %v9461_v19  ;;  %2980 = vadd.xlane.f32.xlu0 %v2979_v62  ;;  %v2973_v55 = vsel %vm1875_vm0, %v9499_v44, 0.0  ;;  %v3030_v54 = vmul.f32 %v9499_v44, %v9499_v44 }
 0x57d   : > { %11892 = vst [vmem:[#allocation10_spill] sm:$0xff] %v9502_v53  ;;  %v2982_v35 = vsel %vm1875_vm0, %v9502_v53, 0.0  ;;  %v3033_v6 = vmul.f32 %v9502_v53, %v9502_v53  ;;  %v3060_v28 = vsel %vm1875_vm0, %v3032_v10, 0.0 }
 0x57e   : > { %11893 = vst [vmem:[#allocation8_spill] sm:$0xff] %v9507_v20  ;;  %2983 = vadd.xlane.f32.xlu1 %v2982_v35  ;;  %v2976_v18 = vsel %vm1875_vm0, %v9507_v20, 0.0  ;;  %v3031_v26 = vmul.f32 %v9507_v20, %v9507_v20  ;;  %v3054_v58 = vsel %vm1875_vm0, %v3030_v54, 0.0 }
 0x57f   : > { %v3063_v5 = vsel %vm1875_vm0, %v3033_v6, 0.0 }
 0x580   : > { %2974 = vadd.xlane.f32.xlu0 %v2973_v55  ;;  %v3057_v50 = vsel %vm1875_vm0, %v3031_v26, 0.0 }
 0x582   : > { %2977 = vadd.xlane.f32.xlu1 %v2976_v18 }
 0x584   : > { %3061 = vadd.xlane.f32.xlu0 %v3060_v28 }
 0x586   : > { %3064 = vadd.xlane.f32.xlu1 %v3063_v5 }
 0x588   : > { %v7185_v27 = vpop.f32.mrb[104].mxu0  ;;  %3055 = vadd.xlane.f32.xlu0 %v3054_v58 }
 0x589   : > { %v9527_v13 = vadd.f32 %v7185_v27, %v9461_v19  ;;  %v2928_v16 = vpop.f32.mrb[105].mxu0 }
 0x58a   : > { %v9531_v33 = vadd.f32 %v2928_v16, %v9461_v19  ;;  %v7186_v48 = vpop.f32.mrb[106].mxu0  ;;  %3058 = vadd.xlane.f32.xlu1 %v3057_v50 }
 0x58b   : > { %11894 = vst [vmem:[#allocation20_spill] sm:$0xff] %v9527_v13  ;;  %v9534_v57 = vadd.f32 %v7186_v48, %v9461_v19  ;;  %v2931_v14 = vpop.f32.mrb[107].mxu0  ;;  %v2991_v21 = vsel %vm1875_vm0, %v9527_v13, 0.0  ;;  %v3036_v29 = vmul.f32 %v9527_v13, %v9527_v13 }
 0x58c   : > { %11895 = vst [vmem:[#allocation21_spill] sm:$0xff] %v9531_v33  ;;  %v9539_v47 = vadd.f32 %v2931_v14, %v9461_v19  ;;  %2992 = vadd.xlane.f32.xlu0 %v2991_v21  ;;  %v2985_v41 = vsel %vm1875_vm0, %v9531_v33, 0.0  ;;  %v3034_v15 = vmul.f32 %v9531_v33, %v9531_v33 }
 0x58d   : > { %11896 = vst [vmem:[#allocation22_spill] sm:$0xff] %v9534_v57  ;;  %v2994_v52 = vsel %vm1875_vm0, %v9534_v57, 0.0  ;;  %v3037_v25 = vmul.f32 %v9534_v57, %v9534_v57  ;;  %v3072_v17 = vsel %vm1875_vm0, %v3036_v29, 0.0 }
 0x58e   : > { %11897 = vst [vmem:[#allocation23_spill] sm:$0xff] %v9539_v47  ;;  %2995 = vadd.xlane.f32.xlu1 %v2994_v52  ;;  %v2988_v4 = vsel %vm1875_vm0, %v9539_v47, 0.0  ;;  %v3035_v40 = vmul.f32 %v9539_v47, %v9539_v47  ;;  %v3066_v43 = vsel %vm1875_vm0, %v3034_v15, 0.0 }
 0x58f   : > { %v3075_v37 = vsel %vm1875_vm0, %v3037_v25, 0.0 }
 0x590   : > { %2986 = vadd.xlane.f32.xlu0 %v2985_v41  ;;  %v3069_v12 = vsel %vm1875_vm0, %v3035_v40, 0.0 }
 0x592   : > { %2989 = vadd.xlane.f32.xlu1 %v2988_v4 }
 0x594   : > { %3073 = vadd.xlane.f32.xlu0 %v3072_v17 }
 0x596   : > { %3076 = vadd.xlane.f32.xlu1 %v3075_v37 }
 0x597   : > { %v7189_v32 = vpop.f32.mrb[108].mxu0 }
 0x598   : > { %v9559_v56 = vadd.f32 %v7189_v32, %v9461_v19  ;;  %3067 = vadd.xlane.f32.xlu0 %v3066_v43  ;;  %v2944_v9 = vpop.f32.mrb[109].mxu0 }
 0x599   : > { %v9562_v34 = vadd.f32 %v2944_v9, %v9461_v19  ;;  %v7190_v24 = vpop.f32.mrb[110].mxu0 }
 0x59a   : > { %11898 = vst [vmem:[#allocation24_spill] sm:$0xff] %v9559_v56  ;;  %v9566_v49 = vadd.f32 %v7190_v24, %v9461_v19  ;;  %3070 = vadd.xlane.f32.xlu1 %v3069_v12  ;;  %v2947_v1 = vpop.f32.mrb[111].mxu0  ;;  %v3003_v7 = vsel %vm1875_vm0, %v9559_v56, 0.0  ;;  %v3040_v2 = vmul.f32 %v9559_v56, %v9559_v56 }
 0x59b   : > { %11899 = vst [vmem:[#allocation25_spill] sm:$0xff] %v9562_v34  ;;  %v9571_v0 = vadd.f32 %v2947_v1, %v9461_v19  ;;  %v2997_v38 = vsel %vm1875_vm0, %v9562_v34, 0.0  ;;  %v3038_v39 = vmul.f32 %v9562_v34, %v9562_v34 }
 0x59c   : > { %11900 = vst [vmem:[#allocation26_spill] sm:$0xff] %v9566_v49  ;;  %3004 = vadd.xlane.f32.xlu0 %v3003_v7  ;;  %v3006_v8 = vsel %vm1875_vm0, %v9566_v49, 0.0  ;;  %v3041_v60 = vmul.f32 %v9566_v49, %v9566_v49  ;;  %v3084_v62 = vsel %vm1875_vm0, %v3040_v2, 0.0 }
 0x59d   : > { %11901 = vst [vmem:[#allocation27_spill] sm:$0xff] %v9571_v0  ;;  %v3000_v23 = vsel %vm1875_vm0, %v9571_v0, 0.0  ;;  %v3039_v45 = vmul.f32 %v9571_v0, %v9571_v0  ;;  %v3078_v19 = vsel %vm1875_vm0, %v3038_v39, 0.0 }
 0x59e   : > { %3007 = vadd.xlane.f32.xlu1 %v3006_v8  ;;  %v3087_v35 = vsel %vm1875_vm0, %v3041_v60, 0.0 }
 0x59f   : > { %v3081_v22 = vsel %vm1875_vm0, %v3039_v45, 0.0 }
 0x5a0   : > { %2998 = vadd.xlane.f32.xlu0 %v2997_v38 }
 0x5a2   : > { %3001 = vadd.xlane.f32.xlu1 %v3000_v23 }
 0x5a4   : > { %3079 = vadd.xlane.f32.xlu0 %v3078_v19 }
 0x5a6   : > { %3082 = vadd.xlane.f32.xlu1 %v3081_v22 }
 0x5a8   : > { %3085 = vadd.xlane.f32.xlu0 %v3084_v62 }
 0x5aa   : > { %3088 = vadd.xlane.f32.xlu1 %v3087_v35 }
 0x5f9   : > { %v2969_v55 = vpop.xlane.xlu0 %2968 }
 0x5fa   : > { %v9591_v6 = vmul.f32 0.03125, %v2969_v55 }
 0x5fb   : > { %v2972_v10 = vpop.xlane.xlu1 %2971 }
 0x5fc   : > { %v3108_v26 = vmul.f32 %v9591_v6, %v9591_v6  ;;  %v9595_v27 = vmul.f32 0.03125, %v2972_v10 }
 0x5fd   : > { %v2963_v18 = vpop.xlane.xlu0 %2962 }
 0x5fe   : > { %v3109_v21 = vmul.f32 %v9595_v27, %v9595_v27  ;;  %v9599_v29 = vmul.f32 0.03125, %v2963_v18 }
 0x5ff   : > { %v2966_v28 = vpop.xlane.xlu1 %2965 }
 0x600   : > { %v9601_v15 = vmul.f32 0.03125, %v2966_v28  ;;  %v3106_v32 = vmul.f32 %v9599_v29, %v9599_v29 }
 0x601   : > { %v3050_v54 = vpop.xlane.xlu0 %3049 }
 0x602   : > { %v3092_v5 = vmul.f32 0.03125, %v3050_v54  ;;  %v3107_v1 = vmul.f32 %v9601_v15, %v9601_v15 }
 0x603   : > { %v3053_v58 = vpop.xlane.xlu1 %3052 }
 0x604   : > { %v3124_v16 = vsub.f32 %v3092_v5, %v3108_v26  ;;  %v3093_v48 = vmul.f32 0.03125, %v3053_v58 }
 0x605   : > { %v3044_v50 = vpop.xlane.xlu0 %3043 }
 0x606   : > { %v3140_v52 = vmax.f32 %v3124_v16, 0.0  ;;  %v3125_v4 = vsub.f32 %v3093_v48, %v3109_v21  ;;  %v3090_v17 = vmul.f32 0.03125, %v3044_v50  ;;  %v9620_v16 = vsub.s32 4, %v11882_v30 }
 0x607   : > { %v3047_v14 = vpop.xlane.xlu1 %3046 }
 0x608   : > { %v3172_v37 = vadd.f32 1e-05, %v3140_v52  ;;  %v3141_v43 = vmax.f32 %v3125_v4, 0.0  ;;  %v3091_v9 = vmul.f32 0.03125, %v3047_v14  ;;  %v3122_v12 = vsub.f32 %v3090_v17, %v3106_v32  ;;  %11902 = vst [vmem:[#allocation28_spill] sm:$0xff] %v9620_v16 }
 0x609   : > { %v2981_v41 = vpop.xlane.xlu0 %2980  ;;  %v3156_v4 = vsub.f32 %v9464_v42, %v9591_v6  ;;  %v9629_v32 = vsub.s32 5, %v11882_v30 }
 0x60a   : > { %7834 = vrsqrt.f32 %v3172_v37  ;;  %v3173_v8 = vadd.f32 1e-05, %v3141_v43  ;;  %v3123_v38 = vsub.f32 %v3091_v9, %v3107_v1  ;;  %v9607_v39 = vmul.f32 0.03125, %v2981_v41 }
 0x60b   : > { %v2984_v25 = vpop.xlane.xlu1 %2983  ;;  %v3138_v45 = vmax.f32 %v3122_v12, 0.0  ;;  %11903 = vst [vmem:[#allocation29_spill] sm:$0xff] %v9629_v32  ;;  %v9633_v43 = vrot.slane %v9453_v61, %v9620_v16 }
 0x60c   : > { %7836 = vrsqrt.f32 %v3173_v8  ;;  %v3139_v60 = vmax.f32 %v3123_v38, 0.0  ;;  %v3112_v62 = vmul.f32 %v9607_v39, %v9607_v39  ;;  %v9613_v35 = vmul.f32 0.03125, %v2984_v25 }
 0x60d   : > { %v2975_v40 = vpop.xlane.xlu0 %2974  ;;  %v3170_v10 = vadd.f32 1e-05, %v3138_v45  ;;  %v3157_v38 = vsub.f32 %v9470_v36, %v9595_v27 }
 0x60e   : > { %v9615_v18 = vmul.f32 0.03125, %v2975_v40  ;;  %v3171_v14 = vadd.f32 1e-05, %v3139_v60  ;;  %v3113_v21 = vmul.f32 %v9613_v35, %v9613_v35 }
 0x60f   : > { %v2978_v24 = vpop.xlane.xlu1 %2977  ;;  %7838 = vrsqrt.f32 %v3170_v10 }
 0x610   : > { %v9609_v19 = vmul.f32 0.03125, %v2978_v24  ;;  %v3110_v25 = vmul.f32 %v9615_v18, %v9615_v18  ;;  %7840 = vrsqrt.f32 %v3171_v14 }
 0x611   : > { %v3062_v7 = vpop.xlane.xlu0 %3061 }
 0x612   : > { %v3096_v2 = vmul.f32 0.03125, %v3062_v7  ;;  %v3111_v54 = vmul.f32 %v9609_v19, %v9609_v19 }
 0x613   : > { %v3065_v23 = vpop.xlane.xlu1 %3064 }
 0x614   : > { %v3128_v5 = vsub.f32 %v3096_v2, %v3112_v62  ;;  %v3097_v26 = vmul.f32 0.03125, %v3065_v23  ;;  %v7835_v48 = vpop.eup %7834  ;;  %v9643_v2 = vrot.slane %v9453_v61, %v9629_v32  ;;  %v3154_v61 = vsub.f32 %v9467_v11, %v9599_v29 }
 0x615   : > { %v3056_v22 = vpop.xlane.xlu0 %3055  ;;  %v3204_v9 = vmul.f32 %v7835_v48, %v3156_v4 }
 0x616   : > { %v3094_v50 = vmul.f32 0.03125, %v3056_v22  ;;  %v3144_v17 = vmax.f32 %v3128_v5, 0.0  ;;  %v3129_v37 = vsub.f32 %v3097_v26, %v3113_v21  ;;  %v7837_v7 = vpop.eup %7836 }
 0x617   : > { %v3059_v55 = vpop.xlane.xlu1 %3058  ;;  %v3224_v22 = vmul.f32 %v9633_v43, %v3204_v9 }
 0x618   : > { %v3095_v28 = vmul.f32 0.03125, %v3059_v55  ;;  %v3126_v24 = vsub.f32 %v3094_v50, %v3110_v25  ;;  %v3176_v23 = vadd.f32 1e-05, %v3144_v17  ;;  %v3145_v30 = vmax.f32 %v3129_v37, 0.0 }
 0x619   : > { %v2993_v58 = vpop.xlane.xlu0 %2992  ;;  %v3205_v55 = vmul.f32 %v7837_v7, %v3157_v38  ;;  %v7839_v21 = vpop.eup %7838  ;;  %v9659_v17 = vadd.f32 %v9643_v2, %v3224_v22  ;;  %v3155_v38 = vsub.f32 %v9475_v31, %v9601_v15 }
 0x61a   : > { %v3127_v52 = vsub.f32 %v3095_v28, %v3111_v54  ;;  %v9635_v1 = vmul.f32 0.03125, %v2993_v58  ;;  %v3142_v60 = vmax.f32 %v3126_v24, 0.0  ;;  %7842 = vrsqrt.f32 %v3176_v23  ;;  %v7841_v7 = vpop.eup %7840 }
 0x61b   : > { %v2996_v41 = vpop.xlane.xlu1 %2995  ;;  %v3177_v50 = vadd.f32 1e-05, %v3145_v30  ;;  %v3225_v37 = vmul.f32 %v9633_v43, %v3205_v55  ;;  %v3202_v23 = vmul.f32 %v7839_v21, %v3154_v61 }
 0x61c   : > { %v3143_v12 = vmax.f32 %v3127_v52, 0.0  ;;  %v9637_v8 = vmul.f32 0.03125, %v2996_v41  ;;  %v3116_v28 = vmul.f32 %v9635_v1, %v9635_v1  ;;  %v3174_v52 = vadd.f32 1e-05, %v3142_v60 }
 0x61d   : > { %v2987_v40 = vpop.xlane.xlu0 %2986  ;;  %v3222_v61 = vmul.f32 %v9633_v43, %v3202_v23 }
 0x61e   : > { %v9646_v62 = vmul.f32 0.03125, %v2987_v40  ;;  %v3175_v10 = vadd.f32 1e-05, %v3143_v12  ;;  %v3117_v27 = vmul.f32 %v9637_v8, %v9637_v8 }
 0x61f   : > { %v2990_v6 = vpop.xlane.xlu1 %2989 }
 0x620   : > { %v9652_v26 = vmul.f32 0.03125, %v2990_v6  ;;  %v3114_v41 = vmul.f32 %v9646_v62, %v9646_v62  ;;  %7844 = vrsqrt.f32 %v3175_v10  ;;  %v11764_v10 = vmax.f32 %v9659_v17, 0.0 }
 0x621   : > { %v3074_v45 = vpop.xlane.xlu0 %3073  ;;  %7846 = vrsqrt.f32 %v3177_v50 }
 0x622   : > { %v3100_v54 = vmul.f32 0.03125, %v3074_v45  ;;  %v3115_v29 = vmul.f32 %v9652_v26, %v9652_v26  ;;  %7848 = vrsqrt.f32 %v3174_v52  ;;  %v3163_v16 = vsub.f32 %v9539_v47, %v9652_v26 }
 0x623   : > { %v3077_v5 = vpop.xlane.xlu1 %3076 }
 0x624   : > { %v3101_v58 = vmul.f32 0.03125, %v3077_v5  ;;  %v3132_v48 = vsub.f32 %v3100_v54, %v3116_v28  ;;  %v9668_v28 = vadd.f32 %v9643_v2, %v3225_v37  ;;  %v3203_v5 = vmul.f32 %v7841_v7, %v3155_v38 }
 0x625   : > { %v3068_v14 = vpop.xlane.xlu0 %3067 }
 0x626   : > { %v3133_v4 = vsub.f32 %v3101_v58, %v3117_v27  ;;  %v3098_v25 = vmul.f32 0.03125, %v3068_v14  ;;  %v3148_v40 = vmax.f32 %v3132_v48, 0.0  ;;  %v7843_v48 = vpop.eup %7842  ;;  %v3276_v14 = vmax.f32 %v11764_v10, 0.0 }
 0x627   : > { %v3071_v9 = vpop.xlane.xlu1 %3070  ;;  %v11763_v21 = vmax.f32 %v9668_v28, 0.0 }
 0x628   : > { %v3149_v24 = vmax.f32 %v3133_v4, 0.0  ;;  %v3130_v12 = vsub.f32 %v3098_v25, %v3114_v41  ;;  %v3099_v6 = vmul.f32 0.03125, %v3071_v9  ;;  %v3180_v30 = vadd.f32 1e-05, %v3148_v40 }
 0x629   : > { %v3005_v45 = vpop.xlane.xlu0 %3004  ;;  %v3223_v41 = vmul.f32 %v9633_v43, %v3203_v5  ;;  %v9675_v4 = vstv %s7480_s15  ;;  %v3160_v40 = vsub.f32 %v9495_v51, %v9607_v39  ;;  %v3161_v9 = vsub.f32 %v9502_v53, %v9613_v35 }
 0x62a   : > { %v3181_v22 = vadd.f32 1e-05, %v3149_v24  ;;  %v3146_v60 = vmax.f32 %v3130_v12, 0.0  ;;  %v3131_v55 = vsub.f32 %v3099_v6, %v3115_v29  ;;  %7850 = vrsqrt.f32 %v3180_v30  ;;  %v7845_v37 = vpop.eup %7844 }
 0x62b   : > { %v3008_v54 = vpop.xlane.xlu1 %3007  ;;  %v3158_v29 = vsub.f32 %v9499_v44, %v9615_v18  ;;  %v3159_v24 = vsub.f32 %v9507_v20, %v9609_v19  ;;  %v9688_v6 = vadd.f32 %v9643_v2, %v3222_v61  ;;  %v9690_v7 = vmul.f32 0.03125, %v3005_v45  ;;  %v7847_v23 = vpop.eup %7846 }
 0x62c   : > { %v3178_v27 = vadd.f32 1e-05, %v3146_v60  ;;  %v3147_v58 = vmax.f32 %v3131_v55, 0.0  ;;  %7852 = vrsqrt.f32 %v3181_v22  ;;  %v9694_v39 = vadd.f32 1e-07, %v3276_v14  ;;  %v7849_v22 = vpop.eup %7848 }
 0x62d   : > { %v2999_v15 = vpop.xlane.xlu0 %2998  ;;  %v3277_v35 = vmax.f32 %v11763_v21, 0.0  ;;  %v3208_v30 = vmul.f32 %v7843_v48, %v3160_v40  ;;  %v3164_v18 = vsub.f32 %v9527_v13, %v9635_v1  ;;  %v9701_v60 = vadd.f32 %v9643_v2, %v3223_v41 }
 0x62e   : > { %v3179_v50 = vadd.f32 1e-05, %v3147_v58  ;;  %7854 = vrsqrt.f32 %v3178_v27  ;;  %v9677_v25 = vmul.f32 0.03125, %v2999_v15  ;;  %v9703_v55 = vmul.f32 0.03125, %v3008_v54 }
 0x62f   : > { %v3002_v52 = vpop.xlane.xlu1 %3001  ;;  %v3207_v27 = vmul.f32 %v7845_v37, %v3159_v24  ;;  %v3165_v58 = vsub.f32 %v9534_v57, %v9637_v8  ;;  %v3162_v48 = vsub.f32 %v9531_v33, %v9646_v62  ;;  %v3120_v54 = vmul.f32 %v9690_v7, %v9690_v7 }
 0x630   : > { %7856 = vrsqrt.f32 %v3179_v50  ;;  %v9692_v38 = vmul.f32 0.03125, %v3002_v52  ;;  %v3118_v45 = vmul.f32 %v9677_v25, %v9677_v25  ;;  %v3228_v41 = vmul.f32 %v9633_v43, %v3208_v30 }
 0x631   : > { %v3080_v12 = vpop.xlane.xlu0 %3079  ;;  %v3209_v37 = vmul.f32 %v7847_v23, %v3161_v9  ;;  %v3206_v40 = vmul.f32 %v7849_v22, %v3158_v29  ;;  %v3227_v62 = vmul.f32 %v9633_v43, %v3207_v27 }
 0x632   : > { %v3102_v5 = vmul.f32 0.03125, %v3080_v12  ;;  %v3119_v15 = vmul.f32 %v9692_v38, %v9692_v38  ;;  %v9722_v22 = vadd.f32 %v9643_v2, %v3228_v41  ;;  %v9733_v41 = vadd.f32 1e-07, %v3277_v35 }
 0x633   : > { %v3083_v19 = vpop.xlane.xlu1 %3082  ;;  %v3226_v27 = vmul.f32 %v9633_v43, %v3206_v40 }
 0x634   : > { %v3103_v61 = vmul.f32 0.03125, %v3083_v19  ;;  %v7851_v50 = vpop.eup %7850  ;;  %v3134_v14 = vsub.f32 %v3102_v5, %v3118_v45  ;;  %v3121_v19 = vmul.f32 %v9703_v55, %v9703_v55 }
 0x635   : > { %v3086_v1 = vpop.xlane.xlu0 %3085  ;;  %v3212_v45 = vmul.f32 %v7851_v50, %v3164_v18  ;;  %v11772_v18 = vmax.f32 %v9688_v6, 0.0 }
 0x636   : > { %v3104_v52 = vmul.f32 0.03125, %v3086_v1  ;;  %v3135_v24 = vsub.f32 %v3103_v61, %v3119_v15  ;;  %v7853_v12 = vpop.eup %7852  ;;  %v3150_v21 = vmax.f32 %v3134_v14, 0.0  ;;  %v3229_v15 = vmul.f32 %v9633_v43, %v3209_v37 }
 0x637   : > { %v3089_v8 = vpop.xlane.xlu1 %3088  ;;  %v3213_v30 = vmul.f32 %v7853_v12, %v3165_v58  ;;  %v9728_v58 = vadd.f32 %v9643_v2, %v3227_v62  ;;  %v11771_v37 = vmax.f32 %v9701_v60, 0.0  ;;  %v9742_v12 = vadd.f32 %v9643_v2, %v3226_v27 }
 0x638   : > { %v3136_v10 = vsub.f32 %v3104_v52, %v3120_v54  ;;  %v3105_v32 = vmul.f32 0.03125, %v3089_v8  ;;  %v3151_v5 = vmax.f32 %v3135_v24, 0.0  ;;  %v7855_v1 = vpop.eup %7854  ;;  %v3182_v9 = vadd.f32 1e-05, %v3150_v21 }
 0x639   : > { %v3210_v61 = vmul.f32 %v7855_v1, %v3162_v48  ;;  %11904 = vst [vmem:[#allocation30_spill] sm:$0xff] %v9728_v58  ;;  %v3233_v21 = vmul.f32 %v9633_v43, %v3213_v30  ;;  %v11769_v24 = vmax.f32 %v9722_v22, 0.0  ;;  %v9739_v8 = vadd.f32 %v9643_v2, %v3229_v15  ;;  %11906 = vst [vmem:[#allocation32_spill] sm:$0xff] %v9742_v12 }
 0x63a   : > { %v3152_v29 = vmax.f32 %v3136_v10, 0.0  ;;  %v3137_v23 = vsub.f32 %v3105_v32, %v3121_v19  ;;  %v3183_v54 = vadd.f32 1e-05, %v3151_v5  ;;  %v7857_v14 = vpop.eup %7856  ;;  %7858 = vrsqrt.f32 %v3182_v9 }
 0x63b   : > { %v3232_v32 = vmul.f32 %v9633_v43, %v3212_v45  ;;  %v3211_v10 = vmul.f32 %v7857_v14, %v3163_v16  ;;  %v3230_v50 = vmul.f32 %v9633_v43, %v3210_v61  ;;  %11905 = vst [vmem:[#allocation31_spill] sm:$0xff] %v9739_v8  ;;  %v11770_v16 = vmax.f32 %v9728_v58, 0.0 }
 0x63c   : > { %v3184_v52 = vadd.f32 1e-05, %v3152_v29  ;;  %v3153_v26 = vmax.f32 %v3137_v23, 0.0  ;;  %7860 = vrsqrt.f32 %v3183_v54  ;;  %v9747_v19 = vmul.f32 %v9675_v4, %v9694_v39 }
 0x63d   : > { %v3231_v40 = vmul.f32 %v9633_v43, %v3211_v10  ;;  %v3274_v62 = vmax.f32 %v11772_v18, 0.0  ;;  %v9755_v45 = vadd.f32 %v9643_v2, %v3232_v32  ;;  %v9758_v5 = vadd.f32 %v9643_v2, %v3233_v21 }
 0x63e   : > { %v3185_v48 = vadd.f32 1e-05, %v3153_v26  ;;  %7862 = vrsqrt.f32 %v3184_v52  ;;  %v9761_v1 = vadd.f32 %v9643_v2, %v3230_v50  ;;  %v9765_v30 = vmul.f32 %v9675_v4, %v9733_v41 }
 0x63f   : > { %v9750_v35 = vadd.f32 %v9643_v2, %v3231_v40  ;;  %11908 = vst [vmem:[#allocation34_spill] sm:$0xff] %v9755_v45  ;;  %11909 = vst [vmem:[#allocation35_spill] sm:$0xff] %v9758_v5  ;;  %v3275_v9 = vmax.f32 %v11771_v37, 0.0  ;;  %v3280_v29 = vmax.f32 %v11769_v24, 0.0  ;;  %v11773_v23 = vmax.f32 %v9739_v8, 0.0 }
 0x640   : > { %11910 = vst [vmem:[#allocation36_spill] sm:$0xff] %v9761_v1  ;;  %7864 = vrsqrt.f32 %v3185_v48  ;;  %v11774_v15 = vmax.f32 %v9742_v12, 0.0  ;;  %v9776_v54 = vsel %vm1875_vm0, %v9747_v19, -inf  ;;  %v3166_v14 = vsub.f32 %v9562_v34, %v9677_v25 }
 0x641   : > { %11907 = vst [vmem:[#allocation33_spill] sm:$0xff] %v9750_v35  ;;  %v11775_v61 = vmax.f32 %v9750_v35, 0.0  ;;  %v9780_v27 = vadd.f32 1e-07, %v3274_v62  ;;  %v3279_v26 = vmax.f32 %v11770_v16, 0.0  ;;  %v11780_v32 = vmax.f32 %v9755_v45, 0.0 }
 0x642   : > { %v11779_v10 = vmax.f32 %v9758_v5, 0.0  ;;  %v9789_v50 = vsel %vm1875_vm0, %v9765_v30, -inf  ;;  %v3167_v48 = vsub.f32 %v9571_v0, %v9692_v38  ;;  %v9793_v40 = vadd.f32 1e-07, %v3275_v9 }
 0x643   : > { %v9795_v24 = vadd.f32 1e-07, %v3280_v29  ;;  %v3281_v16 = vmax.f32 %v11773_v23, 0.0  ;;  %v3278_v37 = vmax.f32 %v11774_v15, 0.0  ;;  %v3283_v18 = vmax.f32 %v11775_v61, 0.0 }
 0x644   : > { %v7859_v52 = vpop.eup %7858  ;;  %v3168_v21 = vsub.f32 %v9559_v56, %v9690_v7  ;;  %v9808_v9 = vmul.f32 %v9675_v4, %v9780_v27  ;;  %v3284_v23 = vmax.f32 %v11780_v32, 0.0  ;;  %v3285_v15 = vmax.f32 %v11779_v10, 0.0 }
 0x645   : > { %v3214_v25 = vmul.f32 %v7859_v52, %v3166_v14  ;;  %v9810_v52 = vadd.f32 1e-07, %v3279_v26  ;;  %v11911_v61 = vmax.f32 %v9761_v1, 0.0  ;;  %v3169_v7 = vsub.f32 %v9566_v49, %v9703_v55 }
 0x646   : > { %v7861_v62 = vpop.eup %7860  ;;  %v9824_v34 = vadd.f32 1e-07, %v3281_v16  ;;  %v9826_v56 = vadd.f32 1e-07, %v3278_v37  ;;  %v9830_v10 = vmul.f32 %v9675_v4, %v9795_v24  ;;  %v9832_v32 = vadd.f32 1e-07, %v3283_v18 }
 0x647   : > { %v3234_v38 = vmul.f32 %v9633_v43, %v3214_v25  ;;  %v3215_v14 = vmul.f32 %v7861_v62, %v3167_v48  ;;  %v3282_v0 = vmax.f32 %v11911_v61, 0.0  ;;  %v9841_v16 = vadd.f32 1e-07, %v3285_v15 }
 0x648   : > { %v7863_v29 = vpop.eup %7862  ;;  %v3312_v15 = vmul.f32 %v9675_v4, %v9793_v40  ;;  %v3327_v42 = vsel %vm1875_vm0, %v9808_v9, -inf }
 0x649   : > { %v9821_v48 = vadd.f32 %v9643_v2, %v3234_v38  ;;  %v3235_v25 = vmul.f32 %v9633_v43, %v3215_v14  ;;  %v3216_v62 = vmul.f32 %v7863_v29, %v3168_v21  ;;  %v9839_v21 = vadd.f32 1e-07, %v3284_v23 }
 0x64a   : > { %v7865_v26 = vpop.eup %7864  ;;  %v9843_v37 = vadd.f32 1e-07, %v3282_v0  ;;  %v9847_v29 = vmul.f32 %v9675_v4, %v9810_v52  ;;  %v9858_v23 = vmul.f32 %v9675_v4, %v9824_v34  ;;  %v9862_v0 = vmul.f32 %v9675_v4, %v9832_v32 }
 0x64b   : > { %11912 = vst [vmem:[#allocation37_spill] sm:$0xff] %v9821_v48  ;;  %v11782_v61 = vmax.f32 %v9821_v48, 0.0  ;;  %v9836_v55 = vadd.f32 %v9643_v2, %v3235_v25  ;;  %v3236_v38 = vmul.f32 %v9633_v43, %v3216_v62  ;;  %v3217_v14 = vmul.f32 %v7865_v26, %v3169_v7 }
 0x64c   : > { %v9868_v62 = vmul.f32 %v9675_v4, %v9826_v56  ;;  %v9882_v47 = vmul.f32 %v9675_v4, %v9839_v21  ;;  %v9886_v57 = vmul.f32 %v9675_v4, %v9841_v16  ;;  %v3337_v13 = vsel %vm1875_vm0, %v9858_v23, -inf }
 0x64d   : > { %11913 = vst [vmem:[#allocation38_spill] sm:$0xff] %v9836_v55  ;;  %v3286_v18 = vmax.f32 %v11782_v61, 0.0  ;;  %v11785_v49 = vmax.f32 %v9836_v55, 0.0  ;;  %v9853_v25 = vadd.f32 %v9643_v2, %v3236_v38  ;;  %v3237_v7 = vmul.f32 %v9633_v43, %v3217_v14 }
 0x64e   : > { %v3335_v61 = vsel %vm1875_vm0, %v9830_v10, -inf  ;;  %v3328_v20 = vsel %vm1875_vm0, %v3312_v15, -inf  ;;  %v3331_v53 = vsel %vm1875_vm0, %v9868_v62, -inf  ;;  %v3341_v44 = vsel %vm1875_vm0, %v9862_v0, -inf }
 0x64f   : > { %11914 = vst [vmem:[#allocation39_spill] sm:$0xff] %v9853_v25  ;;  %v9870_v26 = vadd.f32 1e-07, %v3286_v18  ;;  %v3287_v43 = vmax.f32 %v11785_v49, 0.0  ;;  %v11791_v38 = vmax.f32 %v9853_v25, 0.0  ;;  %v9876_v14 = vadd.f32 %v9643_v2, %v3237_v7 }
 0x650   : > { %v3333_v18 = vsel %vm1875_vm0, %v9847_v29, -inf  ;;  %v9892_v49 = vmul.f32 %v9675_v4, %v9843_v37  ;;  %v3343_v36 = vsel %vm1875_vm0, %v9882_v47, -inf  ;;  %v3345_v11 = vsel %vm1875_vm0, %v9886_v57, -inf }
 0x651   : > { %11915 = vst [vmem:[#allocation40_spill] sm:$0xff] %v9876_v14  ;;  %v9894_v2 = vadd.f32 1e-07, %v3287_v43  ;;  %v3288_v7 = vmax.f32 %v11791_v38, 0.0  ;;  %v9908_v43 = vmul.f32 %v9675_v4, %v9870_v26  ;;  %v11916_v51 = vmax.f32 %v9876_v14, 0.0 }
 0x652   : > { %v3334_v3 = vmax.f32 %v3328_v20, %v3333_v18  ;;  %v3336_v59 = vmax.f32 %v9776_v54, %v3335_v61  ;;  %v3338_v55 = vmax.f32 %v9789_v50, %v3337_v13  ;;  %v3332_v48 = vmax.f32 %v3327_v42, %v3331_v53 }
 0x653   : > { %v9912_v38 = vmul.f32 %v9675_v4, %v9894_v2  ;;  %v9914_v33 = vadd.f32 1e-07, %v3288_v7  ;;  %v3289_v31 = vmax.f32 %v11916_v51, 0.0  ;;  %v3339_v7 = vsel %vm1875_vm0, %v9892_v49, -inf }
 0x654   : > { %v3342_v14 = vmax.f32 %v3334_v3, %v3341_v44  ;;  %v3344_v25 = vmax.f32 %v3336_v59, %v3343_v36  ;;  %v3346_v35 = vmax.f32 %v3338_v55, %v3345_v11  ;;  %v3340_v1 = vmax.f32 %v3332_v48, %v3339_v7 }
 0x655   : > { %v9926_v63 = vmul.f32 %v9675_v4, %v9914_v33  ;;  %v9928_v46 = vadd.f32 1e-07, %v3289_v31  ;;  %v3349_v51 = vsel %vm1875_vm0, %v9912_v38, -inf  ;;  %v3347_v31 = vsel %vm1875_vm0, %v9908_v43, -inf }
 0x656   : > { %v3350_v5 = vmax.f32 %v3342_v14, %v3349_v51  ;;  %v3348_v3 = vmax.f32 %v3340_v1, %v3347_v31 }
 0x657   : > { %v3351_v20 = vsel %vm1875_vm0, %v9926_v63, -inf  ;;  %v9940_v18 = vmul.f32 %v9675_v4, %v9928_v46 }
 0x658   : > { %v3352_v13 = vmax.f32 %v3344_v25, %v3351_v20  ;;  %v3355_v53 = vmax.f32 %v3348_v3, %v3350_v5 }
 0x659   : > { %v3353_v54 = vsel %vm1875_vm0, %v9940_v18, -inf }
 0x65a   : > { %v3354_v42 = vmax.f32 %v3346_v35, %v3353_v54 }
 0x65c   : > { %v3356_v44 = vmax.f32 %v3352_v13, %v3354_v42 }
 0x65e   : > { %v3357_v50 = vmax.f32 %v3355_v53, %v3356_v44 }
 0x660   : > { %v3358_v61 = vrot.slane %v3357_v50, 4 }
 0x662   : > { %v3359_v45 = vmax.f32 %v3357_v50, %v3358_v61 }
 0x664   : > { %v3360_v4 = vrot.slane %v3359_v45, 2 }
 0x666   : > { %v3361_v58 = vmax.f32 %v3359_v45, %v3360_v4 }
 0x668   : > { %v3362_v8 = vrot.slane %v3361_v58, 1 }
 0x66a   : > { %v9946_v12 = vmax.f32 %v3361_v58, %v3362_v8 }
 0x66c   : > { %v3364_v59 = vsub.f32 %v9808_v9, %v9946_v12  ;;  %v3365_v11 = vsub.f32 %v3312_v15, %v9946_v12  ;;  %v3366_v36 = vsub.f32 %v9747_v19, %v9946_v12  ;;  %v3367_v35 = vsub.f32 %v9765_v30, %v9946_v12 }
 0x66d   : > { %v3368_v5 = vsub.f32 %v9868_v62, %v9946_v12  ;;  %v3369_v45 = vsub.f32 %v9847_v29, %v9946_v12  ;;  %v3370_v9 = vsub.f32 %v9830_v10, %v9946_v12  ;;  %v3371_v55 = vsub.f32 %v9858_v23, %v9946_v12 }
 0x66e   : > { %v3380_v1 = vmul.f32 1.442695, %v3364_v59  ;;  %v3382_v58 = vmul.f32 1.442695, %v3365_v11  ;;  %v3384_v8 = vmul.f32 1.442695, %v3366_v36  ;;  %v3372_v15 = vsub.f32 %v9892_v49, %v9946_v12 }
 0x66f   : > { %v3386_v48 = vmul.f32 1.442695, %v3367_v35  ;;  %v3388_v19 = vmul.f32 1.442695, %v3368_v5  ;;  %v3390_v30 = vmul.f32 1.442695, %v3369_v45  ;;  %v3373_v62 = vsub.f32 %v9862_v0, %v9946_v12 }
 0x670   : > { %7866 = vpow2.f32 %v3380_v1  ;;  %v3392_v25 = vmul.f32 1.442695, %v3370_v9  ;;  %v3394_v29 = vmul.f32 1.442695, %v3371_v55  ;;  %v3396_v10 = vmul.f32 1.442695, %v3372_v15 }
 0x671   : > { %7868 = vpow2.f32 %v3382_v58  ;;  %v3374_v23 = vsub.f32 %v9882_v47, %v9946_v12  ;;  %v3398_v14 = vmul.f32 1.442695, %v3373_v62  ;;  %v3375_v7 = vsub.f32 %v9886_v57, %v9946_v12 }
 0x672   : > { %7870 = vpow2.f32 %v3384_v8  ;;  %v3376_v49 = vsub.f32 %v9908_v43, %v9946_v12  ;;  %v3377_v13 = vsub.f32 %v9912_v38, %v9946_v12  ;;  %v3378_v43 = vsub.f32 %v9926_v63, %v9946_v12 }
 0x673   : > { %7872 = vpow2.f32 %v3386_v48  ;;  %v3400_v20 = vmul.f32 1.442695, %v3374_v23  ;;  %v3402_v54 = vmul.f32 1.442695, %v3375_v7 }
 0x674   : > { %7874 = vpow2.f32 %v3388_v19  ;;  %v3404_v53 = vmul.f32 1.442695, %v3376_v49  ;;  %v3406_v38 = vmul.f32 1.442695, %v3377_v13  ;;  %v3408_v5 = vmul.f32 1.442695, %v3378_v43 }
 0x675   : > { %7876 = vpow2.f32 %v3390_v30  ;;  %v7726_v13 = vld [vmem:[%s11744_s3 + $0x10] sm:$0xff]  }
 0x676   : > { %7878 = vpow2.f32 %v3392_v25 }
 0x677   : > { %7880 = vpow2.f32 %v3394_v29 }
 0x678   : > { %7882 = vpow2.f32 %v3396_v10 }
 0x679   : > { %7884 = vpow2.f32 %v3398_v14 }
 0x67a   : > { %v7867_v51 = vpop.eup %7866  ;;  %7886 = vpow2.f32 %v3400_v20  ;;  %v8125_v20 = vld [vmem:[%s8779_s7 + $0x10] sm:$0xff]  }
 0x67b   : > { %v7869_v31 = vpop.eup %7868  ;;  %v3412_v0 = vmul.f32 %v7867_v51, %v9780_v27  ;;  %7888 = vpow2.f32 %v3402_v54  ;;  %v8130_v54 = vld [vmem:[%s8779_s7 + $0x38] sm:$0xff]  }
 0x67c   : > { %v7871_v47 = vpop.eup %7870  ;;  %v3533_v42 = vpack.c.bf16 %v7869_v31, %v7867_v51  ;;  %v3413_v3 = vmul.f32 %v7869_v31, %v9793_v40  ;;  %v3379_v40 = vsub.f32 %v9940_v18, %v9946_v12  ;;  %7890 = vpow2.f32 %v3404_v53  ;;  %v8128_v31 = vld [vmem:[%s8779_s7 + $0x28] sm:$0xff]  }
 0x67d   : > { %v7873_v44 = vpop.eup %7872  ;;  %v3414_v57 = vmul.f32 %v7871_v47, %v9694_v39  ;;  %7892 = vpow2.f32 %v3406_v38 }
 0x67e   : > { %v7875_v50 = vpop.eup %7874  ;;  %7223 = vmatprep.subr.bf16.mxu0 %v3533_v42  ;;  %v3428_v61 = vpack.c.bf16 %v3413_v3, %v3412_v0  ;;  %v3534_v27 = vpack.c.bf16 %v7873_v44, %v7871_v47  ;;  %v3415_v4 = vmul.f32 %v7873_v44, %v9733_v41  ;;  %v3410_v45 = vmul.f32 1.442695, %v3379_v40  ;;  %v8129_v0 = vld [vmem:[%s8779_s7 + $0x30] sm:$0xff]   ;;  %v7727_v47 = vld [vmem:[%s11744_s3 + $0x18] sm:$0xff]  }
 0x67f   : > { %v7877_v59 = vpop.eup %7876  ;;  %7224 = vmatpush3.bf16.msra.mxu0 %v3533_v42  ;;  %v3416_v63 = vmul.f32 %v7875_v50, %v9826_v56  ;;  %7894 = vpow2.f32 %v3408_v5 }
 0x680   : > { %v7879_v11 = vpop.eup %7878  ;;  %7191 = vmatprep.subr.bf16.mxu1 %v3428_v61  ;;  %7225 = vmatprep.subr.bf16.mxu0 %v3534_v27  ;;  %v3429_v39 = vpack.c.bf16 %v3415_v4, %v3414_v57  ;;  %v3417_v36 = vmul.f32 %v7877_v59, %v9810_v52  ;;  %v3535_v41 = vpack.c.bf16 %v7877_v59, %v7875_v50  ;;  %7896 = vpow2.f32 %v3410_v45 }
 0x681   : > { %v7881_v35 = vpop.eup %7880  ;;  %7192 = vmatpush3.bf16.msra.mxu1 %v3428_v61  ;;  %v3418_v18 = vmul.f32 %v7879_v11, %v9795_v24 }
 0x682   : > { %7193 = vmatprep.subr.bf16.mxu1 %v3429_v39  ;;  %v7883_v1 = vpop.eup %7882  ;;  %v3430_v12 = vpack.c.bf16 %v3417_v36, %v3416_v63  ;;  %v3419_v58 = vmul.f32 %v7881_v35, %v9824_v34  ;;  %v3536_v56 = vpack.c.bf16 %v7881_v35, %v7879_v11 }
 0x683   : > { %7226 = vmatpush3.bf16.msra.mxu0 %v3534_v27  ;;  %v7885_v8 = vpop.eup %7884  ;;  %v3420_v48 = vmul.f32 %v7883_v1, %v9843_v37 }
 0x684   : > { %7227 = vmatprep.subr.bf16.mxu0 %v3535_v41  ;;  %v7887_v52 = vpop.eup %7886  ;;  %v3431_v9 = vpack.c.bf16 %v3419_v58, %v3418_v18  ;;  %v3421_v55 = vmul.f32 %v7885_v8, %v9832_v32  ;;  %v3537_v24 = vpack.c.bf16 %v7885_v8, %v7883_v1 }
 0x685   : > { %7194 = vmatpush3.bf16.msra.mxu1 %v3429_v39  ;;  %v7889_v19 = vpop.eup %7888  ;;  %v3422_v25 = vmul.f32 %v7887_v52, %v9839_v21 }
 0x686   : > { %7195 = vmatprep.subr.bf16.mxu1 %v3430_v12  ;;  %v7891_v34 = vpop.eup %7890  ;;  %v3432_v30 = vpack.c.bf16 %v3421_v55, %v3420_v48  ;;  %v3423_v15 = vmul.f32 %v7889_v19, %v9841_v16  ;;  %v3538_v62 = vpack.c.bf16 %v7889_v19, %v7887_v52 }
 0x687   : > { %7228 = vmatpush3.bf16.msra.mxu0 %v3535_v41  ;;  %v7893_v29 = vpop.eup %7892  ;;  %v3424_v10 = vmul.f32 %v7891_v34, %v9870_v26 }
 0x688   : > { %7229 = vmatprep.subr.bf16.mxu0 %v3536_v56  ;;  %v3433_v32 = vpack.c.bf16 %v3423_v15, %v3422_v25  ;;  %v3425_v23 = vmul.f32 %v7893_v29, %v9894_v2  ;;  %v3539_v7 = vpack.c.bf16 %v7893_v29, %v7891_v34  ;;  %v8124_v2 = vld [vmem:[%s8779_s7 + $0x8] sm:$0xff]   ;;  %v11917_v34 = vmax.f32 %v9659_v17, 0.0 }
 0x689   : > { %7196 = vmatpush3.bf16.msra.mxu1 %v3430_v12  ;;  %v7895_v37 = vpop.eup %7894 }
 0x68a   : > { %7197 = vmatprep.subr.bf16.mxu1 %v3431_v9  ;;  %v7897_v14 = vpop.eup %7896  ;;  %v3434_v21 = vpack.c.bf16 %v3425_v23, %v3424_v10  ;;  %v3426_v16 = vmul.f32 %v7895_v37, %v9914_v33  ;;  %v8127_v33 = vld [vmem:[%s8779_s7 + $0x20] sm:$0xff]  }
 0x68b   : > { %7230 = vmatpush3.bf16.msra.mxu0 %v3536_v56  ;;  %v3427_v49 = vmul.f32 %v7897_v14, %v9928_v46  ;;  %v3540_v51 = vpack.c.bf16 %v7897_v14, %v7895_v37  ;;  %v8126_v46 = vld [vmem:[%s8779_s7 + $0x18] sm:$0xff]   ;;  %v11919_v14 = vmax.f32 %v9668_v28, 0.0 }
 0x68c   : > { %7231 = vmatprep.subr.bf16.mxu0 %v3537_v24 }
 0x68d   : > { %7198 = vmatpush3.bf16.msra.mxu1 %v3431_v9  ;;  %v3435_v26 = vpack.c.bf16 %v3427_v49, %v3426_v16 }
 0x68e   : > { %7199 = vmatprep.subr.bf16.mxu1 %v3432_v30 }
 0x68f   : > { %7232 = vmatpush3.bf16.msra.mxu0 %v3537_v24 }
 0x690   : > { %7233 = vmatprep.subr.bf16.mxu0 %v3538_v62 }
 0x691   : > { %7200 = vmatpush3.bf16.msra.mxu1 %v3432_v30 }
 0x692   : > { %7201 = vmatprep.subr.bf16.mxu1 %v3433_v32 }
 0x693   : > { %7234 = vmatpush3.bf16.msra.mxu0 %v3538_v62  ;;  %v11918_v62 = vmax.f32 %v9688_v6, 0.0 }
 0x694   : > { %7235 = vmatprep.subr.bf16.mxu0 %v3539_v7 }
 0x695   : > { %7202 = vmatpush3.bf16.msra.mxu1 %v3433_v32 }
 0x696   : > { %7203 = vmatprep.subr.bf16.mxu1 %v3434_v21 }
 0x697   : > { %7236 = vmatpush3.bf16.msra.mxu0 %v3539_v7 }
 0x698   : > { %7237 = vmatprep.subr.bf16.mxu0 %v3540_v51 }
 0x699   : > { %7204 = vmatpush3.bf16.msra.mxu1 %v3434_v21 }
 0x69a   : > { %7205 = vmatprep.subr.bf16.mxu1 %v3435_v26 }
 0x69b   : > { %7238 = vmatpush3.bf16.msra.mxu0 %v3540_v51  ;;  %v11920_v51 = vmax.f32 %v9701_v60, 0.0 }
 0x69d   : > { %7206 = vmatpush3.bf16.msra.mxu1 %v3435_v26 }
 0x69e   : > { %7240 = vmatmul.mubr.bf16.vlgmr.msra.gmra.mrb[112].mxu0 %v8124_v2  ;;  %7255 = vmatprep.subr.bf16.mxu1 %v7726_v13 }
 0x69f   : > { %7243 = vmatprep.mubr.bf16.mxu0 %v8125_v20 }
 0x6a0   : > { %7208 = vmatmul.mubr.bf16.vlgmr.msra.gmra.mrb[96].mxu1 %v8124_v2 }
 0x6a1   : > { %7211 = vmatprep.mubr.bf16.mxu1 %v8125_v20  ;;  %7256 = vmatpush3.bf16.msra.mxu1 %v7726_v13 }
 0x6a2   : > { %7257 = vmatprep.subr.bf16.mxu1 %v7727_v47 }
 0x6a5   : > { %7258 = vmatpush3.bf16.msra.mxu1 %v7727_v47 }
 0x6a6   : > { %7244 = vmatmul.mubr.bf16.gmra.mrb[116].mxu0 %v8126_v46 }
 0x6a7   : > { %7247 = vmatprep.mubr.bf16.mxu0 %v8127_v33 }
 0x6a8   : > { %7212 = vmatmul.mubr.bf16.gmra.mrb[100].mxu1 %v8126_v46 }
 0x6a9   : > { %7215 = vmatprep.mubr.bf16.mxu1 %v8127_v33 }
 0x6ae   : > { %7248 = vmatmul.mubr.bf16.gmra.mrb[120].mxu0 %v8128_v31 }
 0x6af   : > { %7251 = vmatprep.mubr.bf16.mxu0 %v8129_v0 }
 0x6b0   : > { %7216 = vmatmul.mubr.bf16.gmra.mrb[104].mxu1 %v8128_v31 }
 0x6b1   : > { %7219 = vmatprep.mubr.bf16.mxu1 %v8129_v0 }
 0x6b6   : > { %7252 = vmatmul.mubr.bf16.gmra.mrb[124].mxu0 %v8130_v54 }
 0x6b8   : > { %7220 = vmatmul.mubr.bf16.gmra.mrb[108].mxu1 %v8130_v54 }
 0x771   : > { %v7241_v42 = vpop.f32.mrb[112].mxu0 }
 0x772   : > { %vm3640_vm3 = vcmp.gt.f32.partialorder %v7241_v42, 0.0  ;;  %v3575_v3 = vpop.f32.mrb[113].mxu0 }
 0x773   : > { %v3656_v44 = vsel %vm3640_vm3, %v7241_v42, 1.0  ;;  %vm3638_vm4 = vcmp.gt.f32.partialorder %v3575_v3, 0.0  ;;  %v7242_v57 = vpop.f32.mrb[114].mxu0  ;;  %v7209_v53 = vpop.f32.mrb[96].mxu1 }
 0x774   : > { %7898 = vrcp.f32 %v3656_v44  ;;  %v3654_v43 = vsel %vm3638_vm4, %v3575_v3, 1.0  ;;  %vm3641_vm5 = vcmp.gt.f32.partialorder %v7242_v57, 0.0  ;;  %v3578_v50 = vpop.f32.mrb[115].mxu0  ;;  %v3470_v61 = vpop.f32.mrb[97].mxu1 }
 0x775   : > { %7900 = vrcp.f32 %v3654_v43  ;;  %v3657_v27 = vsel %vm3641_vm5, %v7242_v57, 1.0  ;;  %vm3639_vm6 = vcmp.gt.f32.partialorder %v3578_v50, 0.0  ;;  %v7210_v4 = vpop.f32.mrb[98].mxu1 }
 0x776   : > { %7902 = vrcp.f32 %v3657_v27  ;;  %v3655_v59 = vsel %vm3639_vm6, %v3578_v50, 1.0  ;;  %v3473_v38 = vpop.f32.mrb[99].mxu1 }
 0x777   : > { %7904 = vrcp.f32 %v3655_v59 }
 0x779   : > { %v10012_v40 = vpop.f32.mrb[116].mxu0 }
 0x77a   : > { %vm3644_vm7 = vcmp.gt.f32.partialorder %v10012_v40, 0.0  ;;  %v10015_v11 = vpop.f32.mrb[117].mxu0 }
 0x77b   : > { %v3660_v39 = vsel %vm3644_vm7, %v10012_v40, 1.0  ;;  %vm3642_vm8 = vcmp.gt.f32.partialorder %v10015_v11, 0.0  ;;  %v10021_v63 = vpop.f32.mrb[118].mxu0  ;;  %v7213_v36 = vpop.f32.mrb[100].mxu1 }
 0x77c   : > { %7906 = vrcp.f32 %v3660_v39  ;;  %v3658_v35 = vsel %vm3642_vm8, %v10015_v11, 1.0  ;;  %vm3645_vm9 = vcmp.gt.f32.partialorder %v10021_v63, 0.0  ;;  %v10027_v41 = vpop.f32.mrb[119].mxu0  ;;  %v3486_v5 = vpop.f32.mrb[101].mxu1 }
 0x77d   : > { %7908 = vrcp.f32 %v3658_v35  ;;  %v3661_v45 = vsel %vm3645_vm9, %v10021_v63, 1.0  ;;  %vm3643_vm10 = vcmp.gt.f32.partialorder %v10027_v41, 0.0  ;;  %v7214_v1 = vpop.f32.mrb[102].mxu1  ;;  %v11924_v35 = vld [vmem:[#allocation31_spill] sm:$0xff] }
 0x77e   : > { %v7899_v12 = vpop.eup %7898  ;;  %7910 = vrcp.f32 %v3661_v45  ;;  %v3659_v18 = vsel %vm3643_vm10, %v10027_v41, 1.0  ;;  %v3489_v58 = vpop.f32.mrb[103].mxu1 }
 0x77f   : > { %v7901_v8 = vpop.eup %7900  ;;  %7912 = vrcp.f32 %v3659_v18  ;;  %v3688_v56 = vmul.f32 %v7899_v12, %v7209_v53  ;;  %v11921_v53 = vmax.f32 %v9722_v22, 0.0 }
 0x780   : > { %v7903_v52 = vpop.eup %7902  ;;  %v3686_v9 = vmul.f32 %v7901_v8, %v3470_v61 }
 0x781   : > { %v7905_v48 = vpop.eup %7904  ;;  %v3704_v55 = vsel %vm3640_vm3, %v3688_v56, 0.0  ;;  %v3689_v19 = vmul.f32 %v7903_v52, %v7210_v4  ;;  %v10037_v24 = vpop.f32.mrb[120].mxu0  ;;  %v11922_v4 = vld [vmem:[#allocation32_spill] sm:$0xff] }
 0x782   : > { %v3720_v30 = vadd.f32 %v3704_v55, %v11917_v34  ;;  %v3702_v25 = vsel %vm3638_vm4, %v3686_v9, 0.0  ;;  %v3687_v15 = vmul.f32 %v7905_v48, %v3473_v38  ;;  %vm3648_vm11 = vcmp.gt.f32.partialorder %v10037_v24, 0.0  ;;  %v10043_v29 = vpop.f32.mrb[121].mxu0 }
 0x783   : > { %v3718_v37 = vadd.f32 %v3702_v25, %v11918_v62  ;;  %v3705_v32 = vsel %vm3641_vm5, %v3689_v19, 0.0  ;;  %v3664_v10 = vsel %vm3648_vm11, %v10037_v24, 1.0  ;;  %vm3646_vm12 = vcmp.gt.f32.partialorder %v10043_v29, 0.0  ;;  %v10052_v17 = vpop.f32.mrb[122].mxu0  ;;  %v7217_v23 = vpop.f32.mrb[104].mxu1 }
 0x784   : > { %v3721_v7 = vadd.f32 %v3705_v32, %v11919_v14  ;;  %v3703_v21 = vsel %vm3639_vm6, %v3687_v15, 0.0  ;;  %7914 = vrcp.f32 %v3664_v10  ;;  %v3662_v6 = vsel %vm3646_vm12, %v10043_v29, 1.0  ;;  %v10060_v16 = vpop.f32.mrb[123].mxu0  ;;  %v3502_v49 = vpop.f32.mrb[105].mxu1 }
 0x785   : > { %v3719_v26 = vadd.f32 %v3703_v21, %v11920_v51  ;;  %7916 = vrcp.f32 %v3662_v6  ;;  %vm3649_vm13 = vcmp.gt.f32.partialorder %v10052_v17, 0.0  ;;  %vm3647_vm14 = vcmp.gt.f32.partialorder %v10060_v16, 0.0  ;;  %v7218_v28 = vpop.f32.mrb[106].mxu1 }
 0x786   : > { %v7907_v2 = vpop.eup %7906  ;;  %v3735_v20 = vpack.c.bf16 %v3721_v7, %v3720_v30  ;;  %v3665_v46 = vsel %vm3649_vm13, %v10052_v17, 1.0  ;;  %v3663_v33 = vsel %vm3647_vm14, %v10060_v16, 1.0  ;;  %v3505_v31 = vpop.f32.mrb[107].mxu1  ;;  %v11923_v59 = vmax.f32 %v11922_v4, 0.0 }
 0x787   : > { %v7909_v0 = vpop.eup %7908  ;;  %v3734_v60 = vpack.c.bf16 %v3719_v26, %v3718_v37  ;;  %7918 = vrcp.f32 %v3665_v46  ;;  %v3692_v54 = vmul.f32 %v7907_v2, %v7213_v36 }
 0x788   : > { %v7911_v13 = vpop.eup %7910  ;;  %7920 = vrcp.f32 %v3663_v33  ;;  %v3690_v47 = vmul.f32 %v7909_v0, %v3486_v5  ;;  %v11925_v5 = vmax.f32 %v11924_v35, 0.0  ;;  %v11942_v35 = vld [vmem:[#allocation38_spill] sm:$0xff] }
 0x789   : > { %v7913_v42 = vpop.eup %7912  ;;  %v3708_v3 = vsel %vm3644_vm7, %v3692_v54, 0.0  ;;  %v3693_v44 = vmul.f32 %v7911_v13, %v7214_v1  ;;  %v7253_v57 = vpop.f32.mrb[124].mxu0  ;;  %7259 = vmatprep.mubr.msk.bf16.mxu1 %vm1875_vm0, %v3734_v60 }
 0x78a   : > { %v3724_v43 = vadd.f32 %v3708_v3, %v11921_v53  ;;  %v3706_v50 = vsel %vm3642_vm8, %v3690_v47, 0.0  ;;  %v3691_v61 = vmul.f32 %v7913_v42, %v3489_v58  ;;  %vm3652_vm15 = vcmp.gt.f32.partialorder %v7253_v57, 0.0  ;;  %v3623_v27 = vpop.f32.mrb[125].mxu0  ;;  %7260 = vmatmul.mubr.msk.bf16.vlgmr.msra.gmra.mrb[112].mxu1 %vm1875_vm0, %v3735_v20  ;;  %v11926_v58 = vld [vmem:[#allocation30_spill] sm:$0xff]  ;;  %v11932_v20 = vld [vmem:[#allocation36_spill] sm:$0xff] }
 0x78b   : > { %v3722_v38 = vadd.f32 %v3706_v50, %v11923_v59  ;;  %v3709_v40 = vsel %vm3645_vm9, %v3693_v44, 0.0  ;;  %v3668_v39 = vsel %vm3652_vm15, %v7253_v57, 1.0  ;;  %vm3650_vm1 = vcmp.gt.f32.partialorder %v3623_v27, 0.0  ;;  %v7254_v36 = vpop.f32.mrb[126].mxu0  ;;  %v7221_v22 = vpop.f32.mrb[108].mxu1  ;;  %v11936_v50 = vld [vmem:[#allocation39_spill] sm:$0xff] }
 0x78c   : > { %v3725_v11 = vadd.f32 %v3709_v40, %v11925_v5  ;;  %v3707_v45 = vsel %vm3643_vm10, %v3691_v61, 0.0  ;;  %7922 = vrcp.f32 %v3668_v39  ;;  %v3666_v1 = vsel %vm3650_vm1, %v3623_v27, 1.0  ;;  %v3626_v12 = vpop.f32.mrb[127].mxu0  ;;  %v3518_v18 = vpop.f32.mrb[109].mxu1  ;;  %v11938_v59 = vld [vmem:[#allocation40_spill] sm:$0xff]  ;;  %v11940_v39 = vld [vmem:[#allocation37_spill] sm:$0xff] }
 0x78d   : > { %v11927_v8 = vmax.f32 %v11926_v58, 0.0  ;;  %7924 = vrcp.f32 %v3666_v1  ;;  %vm3653_vm3 = vcmp.gt.f32.partialorder %v7254_v36, 0.0  ;;  %vm3651_vm4 = vcmp.gt.f32.partialorder %v3626_v12, 0.0  ;;  %v7222_v56 = vpop.f32.mrb[110].mxu1 }
 0x78e   : > { %v7915_v52 = vpop.eup %7914  ;;  %v3737_v9 = vpack.c.bf16 %v3725_v11, %v3724_v43  ;;  %v3669_v48 = vsel %vm3653_vm3, %v7254_v36, 1.0  ;;  %v3667_v55 = vsel %vm3651_vm4, %v3626_v12, 1.0  ;;  %v3521_v41 = vpop.f32.mrb[111].mxu1  ;;  %v11933_v29 = vmax.f32 %v11932_v20, 0.0  ;;  %v10129_v36 = vld [vmem:[%s8779_s7] sm:$0xff]   ;;  %v10135_v12 = vld [vmem:[%s11746_s5 + $0x8] sm:$0xff] }
 0x78f   : > { %v3723_v63 = vadd.f32 %v3707_v45, %v11927_v8  ;;  %v7917_v19 = vpop.eup %7916  ;;  %7926 = vrcp.f32 %v3669_v48  ;;  %v3696_v30 = vmul.f32 %v7915_v52, %v7217_v23  ;;  %v11928_v23 = vld [vmem:[#allocation34_spill] sm:$0xff]  ;;  %v11937_v61 = vmax.f32 %v11936_v50, 0.0 }
 0x790   : > { %7928 = vrcp.f32 %v3667_v55  ;;  %v3694_v25 = vmul.f32 %v7917_v19, %v3502_v49  ;;  %v11929_v21 = vmax.f32 %v11928_v23, 0.0  ;;  %v11930_v49 = vld [vmem:[#allocation35_spill] sm:$0xff]  ;;  %v11941_v27 = vmax.f32 %v11940_v39, 0.0 }
 0x791   : > { %v3736_v34 = vpack.c.bf16 %v3723_v63, %v3722_v38  ;;  %v7919_v15 = vpop.eup %7918  ;;  %v3712_v62 = vsel %vm3648_vm11, %v3696_v30, 0.0  ;;  %v11931_v51 = vmax.f32 %v11930_v49, 0.0  ;;  %v11939_v38 = vmax.f32 %v11938_v59, 0.0 }
 0x792   : > { %v7921_v37 = vpop.eup %7920  ;;  %v3710_v32 = vsel %vm3646_vm12, %v3694_v25, 0.0  ;;  %v3697_v10 = vmul.f32 %v7919_v15, %v7218_v28  ;;  %v3728_v6 = vadd.f32 %v3712_v62, %v11929_v21  ;;  %v11934_v28 = vld [vmem:[#allocation33_spill] sm:$0xff]  ;;  %v11943_v5 = vmax.f32 %v11942_v35, 0.0 }
 0x793   : > { %7263 = vmatprep.mubr.msk.bf16.mxu1 %vm1875_vm0, %v3736_v34  ;;  %v3695_v14 = vmul.f32 %v7921_v37, %v3505_v31  ;;  %v3726_v46 = vadd.f32 %v3710_v32, %v11933_v29  ;;  %v11935_v33 = vmax.f32 %v11934_v28, 0.0 }
 0x794   : > { %7264 = vmatmul.mubr.msk.bf16.gmra.mrb[116].mxu1 %vm1875_vm0, %v3737_v9  ;;  %v3713_v7 = vsel %vm3649_vm13, %v3697_v10, 0.0 }
 0x795   : > { %v3729_v24 = vadd.f32 %v3713_v7, %v11931_v51  ;;  %v3711_v26 = vsel %vm3647_vm14, %v3695_v14, 0.0 }
 0x796   : > { %v7923_v2 = vpop.eup %7922  ;;  %v3727_v0 = vadd.f32 %v3711_v26, %v11935_v33 }
 0x797   : > { %v7925_v31 = vpop.eup %7924  ;;  %v3739_v60 = vpack.c.bf16 %v3729_v24, %v3728_v6  ;;  %v3700_v17 = vmul.f32 %v7923_v2, %v7221_v22 }
 0x798   : > { %v3738_v54 = vpack.c.bf16 %v3727_v0, %v3726_v46  ;;  %v3698_v13 = vmul.f32 %v7925_v31, %v3518_v18  ;;  %v11944_v18 = vld [vmem:[#allocation9_spill] sm:$0xff] }
 0x799   : > { %v7927_v47 = vpop.eup %7926  ;;  %v3716_v42 = vsel %vm3652_vm15, %v3700_v17, 0.0  ;;  %v10139_v58 = vrot.slane %v10135_v12, %v11944_v18 }
 0x79a   : > { %v7929_v3 = vpop.eup %7928  ;;  %v3714_v16 = vsel %vm3650_vm1, %v3698_v13, 0.0  ;;  %v3701_v44 = vmul.f32 %v7927_v47, %v7222_v56  ;;  %7267 = vmatprep.mubr.msk.bf16.mxu1 %vm1875_vm0, %v3738_v54  ;;  %v3732_v4 = vadd.f32 %v3716_v42, %v11937_v61 }
 0x79b   : > { %v3699_v53 = vmul.f32 %v7929_v3, %v3521_v41  ;;  %v3730_v22 = vadd.f32 %v3714_v16, %v11941_v27 }
 0x79c   : > { %7268 = vmatmul.mubr.msk.bf16.gmra.mrb[120].mxu1 %vm1875_vm0, %v3739_v60  ;;  %v3717_v43 = vsel %vm3653_vm3, %v3701_v44, 0.0 }
 0x79d   : > { %v3733_v40 = vadd.f32 %v3717_v43, %v11939_v38  ;;  %v3715_v57 = vsel %vm3651_vm4, %v3699_v53, 0.0 }
 0x79e   : > { %v3731_v11 = vadd.f32 %v3715_v57, %v11943_v5 }
 0x79f   : > { %v3741_v45 = vpack.c.bf16 %v3733_v40, %v3732_v4 }
 0x7a0   : > { %v3740_v1 = vpack.c.bf16 %v3731_v11, %v3730_v22 }
 0x7a2   : > { %7271 = vmatprep.mubr.msk.bf16.mxu1 %vm1875_vm0, %v3740_v1 }
 0x7a4   : > { %7272 = vmatmul.mubr.msk.bf16.gmra.mrb[124].mxu1 %vm1875_vm0, %v3741_v45 }
 0x7a5   : > { %7315 = vmatprep.mubr.bf16.mxu1 %v10129_v36 }
 0x85d   : > { %v7261_v8 = vpop.f32.mrb[112].mxu1 }
 0x85e   : > { %v10142_v63 = vadd.f32 %v7261_v8, %v10139_v58  ;;  %v3821_v56 = vpop.f32.mrb[113].mxu1 }
 0x85f   : > { %v10145_v52 = vadd.f32 %v3821_v56, %v10139_v58  ;;  %v7262_v9 = vpop.f32.mrb[114].mxu1 }
 0x860   : > { %v10148_v48 = vadd.f32 %v7262_v9, %v10139_v58  ;;  %v3824_v55 = vpop.f32.mrb[115].mxu1  ;;  %v3890_v41 = vsel %vm2480_vm2, %v10142_v63, 0.0  ;;  %v3950_v25 = vmul.f32 %v10142_v63, %v10142_v63 }
 0x861   : > { %v10153_v19 = vadd.f32 %v3824_v55, %v10139_v58  ;;  %3891 = vadd.xlane.f32.xlu0 %v3890_v41  ;;  %v3884_v30 = vsel %vm2480_vm2, %v10145_v52, 0.0  ;;  %v3948_v49 = vmul.f32 %v10145_v52, %v10145_v52 }
 0x862   : > { %v3893_v34 = vsel %vm2480_vm2, %v10148_v48, 0.0  ;;  %v3951_v10 = vmul.f32 %v10148_v48, %v10148_v48  ;;  %v3970_v6 = vsel %vm2480_vm2, %v3950_v25, 0.0 }
 0x863   : > { %3894 = vadd.xlane.f32.xlu1 %v3893_v34  ;;  %v3887_v32 = vsel %vm2480_vm2, %v10153_v19, 0.0  ;;  %v3949_v26 = vmul.f32 %v10153_v19, %v10153_v19  ;;  %v3964_v2 = vsel %vm2480_vm2, %v3948_v49, 0.0  ;;  %v7730_v49 = vld [vmem:[%s11745_s4 + $0x30] sm:$0xff]  }
 0x864   : > { %v3973_v24 = vsel %vm2480_vm2, %v3951_v10, 0.0 }
 0x865   : > { %3885 = vadd.xlane.f32.xlu0 %v3884_v30  ;;  %v3967_v29 = vsel %vm2480_vm2, %v3949_v26, 0.0 }
 0x867   : > { %v7265_v15 = vpop.f32.mrb[116].mxu1  ;;  %3888 = vadd.xlane.f32.xlu1 %v3887_v32 }
 0x868   : > { %v10162_v62 = vadd.f32 %v7265_v15, %v10139_v58  ;;  %v3837_v37 = vpop.f32.mrb[117].mxu1 }
 0x869   : > { %v10169_v14 = vadd.f32 %v3837_v37, %v10139_v58  ;;  %v7266_v7 = vpop.f32.mrb[118].mxu1  ;;  %3971 = vadd.xlane.f32.xlu0 %v3970_v6  ;;  %v7728_v37 = vld [vmem:[%s11745_s4 + $0x20] sm:$0xff]  }
 0x86a   : > { %v10172_v23 = vadd.f32 %v7266_v7, %v10139_v58  ;;  %v3840_v21 = vpop.f32.mrb[119].mxu1  ;;  %v3902_v31 = vsel %vm2480_vm2, %v10162_v62, 0.0  ;;  %v3954_v42 = vmul.f32 %v10162_v62, %v10162_v62  ;;  %7275 = vmatprep.subr.bf16.mxu0 %v7728_v37  ;;  %v7729_v7 = vld [vmem:[%s11745_s4 + $0x28] sm:$0xff]  }
 0x86b   : > { %v10178_v51 = vadd.f32 %v3840_v21, %v10139_v58  ;;  %3974 = vadd.xlane.f32.xlu1 %v3973_v24  ;;  %v3896_v47 = vsel %vm2480_vm2, %v10169_v14, 0.0  ;;  %v3952_v59 = vmul.f32 %v10169_v14, %v10169_v14  ;;  %7276 = vmatpush3.bf16.msra.mxu0 %v7728_v37 }
 0x86c   : > { %v3905_v13 = vsel %vm2480_vm2, %v10172_v23, 0.0  ;;  %v3955_v44 = vmul.f32 %v10172_v23, %v10172_v23  ;;  %v3982_v4 = vsel %vm2480_vm2, %v3954_v42, 0.0  ;;  %7277 = vmatprep.subr.bf16.mxu0 %v7729_v7 }
 0x86d   : > { %3965 = vadd.xlane.f32.xlu0 %v3964_v2  ;;  %v3899_v16 = vsel %vm2480_vm2, %v10178_v51, 0.0  ;;  %v3953_v27 = vmul.f32 %v10178_v51, %v10178_v51  ;;  %v3976_v22 = vsel %vm2480_vm2, %v3952_v59, 0.0 }
 0x86e   : > { %v3985_v39 = vsel %vm2480_vm2, %v3955_v44, 0.0 }
 0x86f   : > { %v7269_v20 = vpop.f32.mrb[120].mxu1  ;;  %3968 = vadd.xlane.f32.xlu1 %v3967_v29  ;;  %v3979_v35 = vsel %vm2480_vm2, %v3953_v27, 0.0  ;;  %7278 = vmatpush3.bf16.msra.mxu0 %v7729_v7 }
 0x870   : > { %v10186_v46 = vadd.f32 %v7269_v20, %v10139_v58  ;;  %v3853_v28 = vpop.f32.mrb[121].mxu1  ;;  %7279 = vmatprep.subr.bf16.mxu0 %v7730_v49 }
 0x871   : > { %v10189_v33 = vadd.f32 %v3853_v28, %v10139_v58  ;;  %v7270_v0 = vpop.f32.mrb[122].mxu1  ;;  %3903 = vadd.xlane.f32.xlu0 %v3902_v31 }
 0x872   : > { %v10194_v60 = vadd.f32 %v7270_v0, %v10139_v58  ;;  %v3856_v17 = vpop.f32.mrb[123].mxu1  ;;  %v3914_v5 = vsel %vm2480_vm2, %v10186_v46, 0.0  ;;  %v3958_v1 = vmul.f32 %v10186_v46, %v10186_v46  ;;  %v7731_v0 = vld [vmem:[%s11745_s4 + $0x38] sm:$0xff]  }
 0x873   : > { %v10197_v54 = vadd.f32 %v3856_v17, %v10139_v58  ;;  %3906 = vadd.xlane.f32.xlu1 %v3905_v13  ;;  %v3908_v45 = vsel %vm2480_vm2, %v10189_v33, 0.0  ;;  %v3956_v9 = vmul.f32 %v10189_v33, %v10189_v33  ;;  %7280 = vmatpush3.bf16.msra.mxu0 %v7730_v49 }
 0x874   : > { %v3917_v11 = vsel %vm2480_vm2, %v10194_v60, 0.0  ;;  %v3959_v8 = vmul.f32 %v10194_v60, %v10194_v60  ;;  %v3994_v56 = vsel %vm2480_vm2, %v3958_v1, 0.0  ;;  %7281 = vmatprep.subr.bf16.mxu0 %v7731_v0 }
 0x875   : > { %3897 = vadd.xlane.f32.xlu0 %v3896_v47  ;;  %v3957_v41 = vmul.f32 %v10197_v54, %v10197_v54  ;;  %v3988_v34 = vsel %vm2480_vm2, %v3956_v9, 0.0 }
 0x876   : > { %v3997_v55 = vsel %vm2480_vm2, %v3959_v8, 0.0 }
 0x877   : > { %v7273_v3 = vpop.f32.mrb[124].mxu1  ;;  %3900 = vadd.xlane.f32.xlu1 %v3899_v16  ;;  %v3991_v30 = vsel %vm2480_vm2, %v3957_v41, 0.0  ;;  %7282 = vmatpush3.bf16.msra.mxu0 %v7731_v0 }
 0x878   : > { %v10210_v53 = vadd.f32 %v7273_v3, %v10139_v58  ;;  %v3869_v43 = vpop.f32.mrb[125].mxu1 }
 0x879   : > { %v10213_v50 = vadd.f32 %v3869_v43, %v10139_v58  ;;  %v7274_v61 = vpop.f32.mrb[126].mxu1  ;;  %3983 = vadd.xlane.f32.xlu0 %v3982_v4 }
 0x87a   : > { %v10219_v38 = vadd.f32 %v7274_v61, %v10139_v58  ;;  %v3872_v40 = vpop.f32.mrb[127].mxu1  ;;  %v3926_v25 = vsel %vm2480_vm2, %v10210_v53, 0.0  ;;  %v3962_v26 = vmul.f32 %v10210_v53, %v10210_v53 }
 0x87b   : > { %v10222_v57 = vadd.f32 %v3872_v40, %v10139_v58  ;;  %3986 = vadd.xlane.f32.xlu1 %v3985_v39  ;;  %v3911_v58 = vsel %vm2480_vm2, %v10197_v54, 0.0  ;;  %v3920_v32 = vsel %vm2480_vm2, %v10213_v50, 0.0  ;;  %v3960_v10 = vmul.f32 %v10213_v50, %v10213_v50 }
 0x87c   : > { %v3929_v15 = vsel %vm2480_vm2, %v10219_v38, 0.0  ;;  %v3963_v20 = vmul.f32 %v10219_v38, %v10219_v38  ;;  %v4006_v29 = vsel %vm2480_vm2, %v3962_v26, 0.0 }
 0x87d   : > { %3977 = vadd.xlane.f32.xlu0 %v3976_v22  ;;  %v3923_v21 = vsel %vm2480_vm2, %v10222_v57, 0.0  ;;  %v3961_v6 = vmul.f32 %v10222_v57, %v10222_v57  ;;  %v4000_v24 = vsel %vm2480_vm2, %v3960_v10, 0.0 }
 0x87e   : > { %v4009_v28 = vsel %vm2480_vm2, %v3963_v20, 0.0 }
 0x87f   : > { %3980 = vadd.xlane.f32.xlu1 %v3979_v35  ;;  %v4003_v2 = vsel %vm2480_vm2, %v3961_v6, 0.0 }
 0x881   : > { %3915 = vadd.xlane.f32.xlu0 %v3914_v5 }
 0x883   : > { %3918 = vadd.xlane.f32.xlu1 %v3917_v11 }
 0x885   : > { %3909 = vadd.xlane.f32.xlu0 %v3908_v45 }
 0x887   : > { %3912 = vadd.xlane.f32.xlu1 %v3911_v58 }
 0x889   : > { %3995 = vadd.xlane.f32.xlu0 %v3994_v56 }
 0x88b   : > { %3998 = vadd.xlane.f32.xlu1 %v3997_v55 }
 0x88d   : > { %3989 = vadd.xlane.f32.xlu0 %v3988_v34 }
 0x88f   : > { %3992 = vadd.xlane.f32.xlu1 %v3991_v30 }
 0x891   : > { %3927 = vadd.xlane.f32.xlu0 %v3926_v25 }
 0x893   : > { %3930 = vadd.xlane.f32.xlu1 %v3929_v15 }
 0x895   : > { %3921 = vadd.xlane.f32.xlu0 %v3920_v32 }
 0x897   : > { %3924 = vadd.xlane.f32.xlu1 %v3923_v21 }
 0x899   : > { %4001 = vadd.xlane.f32.xlu0 %v4000_v24 }
 0x89b   : > { %4004 = vadd.xlane.f32.xlu1 %v4003_v2 }
 0x89d   : > { %4007 = vadd.xlane.f32.xlu0 %v4006_v29 }
 0x89f   : > { %4010 = vadd.xlane.f32.xlu1 %v4009_v28 }
 0x8ee   : > { %v3892_v31 = vpop.xlane.xlu0 %3891 }
 0x8ef   : > { %v3934_v47 = vmul.f32 0.015625, %v3892_v31 }
 0x8f0   : > { %v3895_v17 = vpop.xlane.xlu1 %3894 }
 0x8f1   : > { %v3935_v3 = vmul.f32 0.015625, %v3895_v17  ;;  %v4030_v44 = vmul.f32 %v3934_v47, %v3934_v47  ;;  %v4078_v29 = vsub.f32 %v10142_v63, %v3934_v47 }
 0x8f2   : > { %v3886_v13 = vpop.xlane.xlu0 %3885 }
 0x8f3   : > { %v10281_v43 = vmul.f32 0.015625, %v3886_v13  ;;  %v4031_v40 = vmul.f32 %v3935_v3, %v3935_v3 }
 0x8f4   : > { %v3889_v42 = vpop.xlane.xlu1 %3888 }
 0x8f5   : > { %v10283_v4 = vmul.f32 0.015625, %v3889_v42  ;;  %v4028_v35 = vmul.f32 %v10281_v43, %v10281_v43 }
 0x8f6   : > { %v3972_v16 = vpop.xlane.xlu0 %3971 }
 0x8f7   : > { %v4014_v61 = vmul.f32 0.015625, %v3972_v16  ;;  %v4029_v1 = vmul.f32 %v10283_v4, %v10283_v4  ;;  %v11945_v16 = vld [vmem:[#allocation11_spill] sm:$0xff] }
 0x8f8   : > { %v3975_v59 = vpop.xlane.xlu1 %3974 }
 0x8f9   : > { %v4046_v39 = vsub.f32 %v4014_v61, %v4030_v44  ;;  %v4015_v27 = vmul.f32 0.015625, %v3975_v59  ;;  %v10304_v44 = vrot.slane %v10135_v12, %v11945_v16  ;;  %v4079_v61 = vsub.f32 %v10148_v48, %v3935_v3 }
 0x8fa   : > { %v3966_v22 = vpop.xlane.xlu0 %3965 }
 0x8fb   : > { %v4062_v5 = vmax.f32 %v4046_v39, 0.0  ;;  %v4047_v11 = vsub.f32 %v4015_v27, %v4031_v40  ;;  %v4012_v45 = vmul.f32 0.015625, %v3966_v22 }
 0x8fc   : > { %v3969_v58 = vpop.xlane.xlu1 %3968 }
 0x8fd   : > { %v4094_v8 = vadd.f32 1e-05, %v4062_v5  ;;  %v4063_v56 = vmax.f32 %v4047_v11, 0.0  ;;  %v4044_v9 = vsub.f32 %v4012_v45, %v4028_v35  ;;  %v4013_v55 = vmul.f32 0.015625, %v3969_v58  ;;  %v11946_v35 = vld [vmem:[#allocation12_spill] sm:$0xff] }
 0x8fe   : > { %v3904_v41 = vpop.xlane.xlu0 %3903  ;;  %v10311_v5 = vrot.slane %v10135_v12, %v11946_v35  ;;  %v4076_v11 = vsub.f32 %v10145_v52, %v10281_v43 }
 0x8ff   : > { %7930 = vrsqrt.f32 %v4094_v8  ;;  %v4095_v34 = vadd.f32 1e-05, %v4063_v56  ;;  %v4060_v30 = vmax.f32 %v4044_v9, 0.0  ;;  %v4045_v25 = vsub.f32 %v4013_v55, %v4029_v1 }
 0x900   : > { %v3907_v15 = vpop.xlane.xlu1 %3906  ;;  %v10289_v21 = vmul.f32 0.015625, %v3904_v41  ;;  %v4077_v55 = vsub.f32 %v10153_v19, %v10283_v4 }
 0x901   : > { %7932 = vrsqrt.f32 %v4095_v34  ;;  %v4092_v37 = vadd.f32 1e-05, %v4060_v30  ;;  %v4061_v32 = vmax.f32 %v4045_v25, 0.0  ;;  %v10291_v49 = vmul.f32 0.015625, %v3907_v15 }
 0x902   : > { %v3898_v10 = vpop.xlane.xlu0 %3897  ;;  %v4034_v26 = vmul.f32 %v10289_v21, %v10289_v21 }
 0x903   : > { %7934 = vrsqrt.f32 %v4092_v37  ;;  %v4093_v7 = vadd.f32 1e-05, %v4061_v32  ;;  %v10295_v2 = vmul.f32 0.015625, %v3898_v10  ;;  %v4035_v17 = vmul.f32 %v10291_v49, %v10291_v49 }
 0x904   : > { %v3901_v6 = vpop.xlane.xlu1 %3900 }
 0x905   : > { %7936 = vrsqrt.f32 %v4093_v7  ;;  %v10298_v28 = vmul.f32 0.015625, %v3901_v6  ;;  %v4032_v63 = vmul.f32 %v10295_v2, %v10295_v2 }
 0x906   : > { %v3984_v24 = vpop.xlane.xlu0 %3983 }
 0x907   : > { %v4018_v20 = vmul.f32 0.015625, %v3984_v24  ;;  %v4033_v48 = vmul.f32 %v10298_v28, %v10298_v28 }
 0x908   : > { %v3987_v0 = vpop.xlane.xlu1 %3986 }
 0x909   : > { %v7931_v31 = vpop.eup %7930  ;;  %v4050_v13 = vsub.f32 %v4018_v20, %v4034_v26  ;;  %v4019_v42 = vmul.f32 0.015625, %v3987_v0 }
 0x90a   : > { %v4126_v59 = vmul.f32 %v7931_v31, %v4078_v29  ;;  %v3978_v40 = vpop.xlane.xlu0 %3977 }
 0x90b   : > { %v7933_v39 = vpop.eup %7932  ;;  %v4066_v47 = vmax.f32 %v4050_v13, 0.0  ;;  %v4051_v27 = vsub.f32 %v4019_v42, %v4035_v17  ;;  %v4016_v22 = vmul.f32 0.015625, %v3978_v40 }
 0x90c   : > { %v4127_v45 = vmul.f32 %v7933_v39, %v4079_v61  ;;  %v3981_v3 = vpop.xlane.xlu1 %3980  ;;  %v4146_v41 = vmul.f32 %v10304_v44, %v4126_v59 }
 0x90d   : > { %v7935_v1 = vpop.eup %7934  ;;  %v4098_v58 = vadd.f32 1e-05, %v4066_v47  ;;  %v4067_v8 = vmax.f32 %v4051_v27, 0.0  ;;  %v4048_v56 = vsub.f32 %v4016_v22, %v4032_v63  ;;  %v4017_v9 = vmul.f32 0.015625, %v3981_v3 }
 0x90e   : > { %v4147_v34 = vmul.f32 %v10304_v44, %v4127_v45  ;;  %v3916_v30 = vpop.xlane.xlu0 %3915  ;;  %v4124_v25 = vmul.f32 %v7935_v1, %v4076_v11  ;;  %v4166_v31 = vadd.f32 %v10311_v5, %v4146_v41  ;;  %v4082_v11 = vsub.f32 %v10162_v62, %v10289_v21 }
 0x90f   : > { %v7937_v52 = vpop.eup %7936  ;;  %7938 = vrsqrt.f32 %v4098_v58  ;;  %v4099_v43 = vadd.f32 1e-05, %v4067_v8  ;;  %v4064_v15 = vmax.f32 %v4048_v56, 0.0  ;;  %v4049_v37 = vsub.f32 %v4017_v9, %v4033_v48 }
 0x910   : > { %v3919_v32 = vpop.xlane.xlu1 %3918  ;;  %v4125_v10 = vmul.f32 %v7937_v52, %v4077_v55  ;;  %v4144_v7 = vmul.f32 %v10304_v44, %v4124_v25  ;;  %v4167_v19 = vadd.f32 %v10311_v5, %v4147_v34  ;;  %v10325_v0 = vmul.f32 0.015625, %v3916_v30 }
 0x911   : > { %7940 = vrsqrt.f32 %v4099_v43  ;;  %v4096_v6 = vadd.f32 1e-05, %v4064_v15  ;;  %v4065_v24 = vmax.f32 %v4049_v37, 0.0  ;;  %v10329_v42 = vmul.f32 0.015625, %v3919_v32 }
 0x912   : > { %v3910_v4 = vpop.xlane.xlu0 %3909  ;;  %v4145_v26 = vmul.f32 %v10304_v44, %v4125_v10  ;;  %v4164_v20 = vadd.f32 %v10311_v5, %v4144_v7  ;;  %v4183_v61 = vmax.f32 %v4167_v19, 0.0  ;;  %v4038_v63 = vmul.f32 %v10325_v0, %v10325_v0 }
 0x913   : > { %7942 = vrsqrt.f32 %v4096_v6  ;;  %v4097_v29 = vadd.f32 1e-05, %v4065_v24  ;;  %v10333_v47 = vmul.f32 0.015625, %v3910_v4  ;;  %v4182_v22 = vmax.f32 %v4166_v31, 0.0 }
 0x914   : > { %v3913_v17 = vpop.xlane.xlu1 %3912  ;;  %v4165_v13 = vadd.f32 %v10311_v5, %v4145_v26  ;;  %v4180_v40 = vmax.f32 %v4164_v20, 0.0  ;;  %v4039_v58 = vmul.f32 %v10329_v42, %v10329_v42  ;;  %v4083_v55 = vsub.f32 %v10172_v23, %v10291_v49 }
 0x915   : > { %7944 = vrsqrt.f32 %v4097_v29  ;;  %v10337_v45 = vmul.f32 0.015625, %v3913_v17  ;;  %v4197_v9 = vpack.c.bf16 %v4183_v61, %v4182_v22  ;;  %v4036_v62 = vmul.f32 %v10333_v47, %v10333_v47 }
 0x916   : > { %v3996_v59 = vpop.xlane.xlu0 %3995  ;;  %v4181_v39 = vmax.f32 %v4165_v13, 0.0  ;;  %v4080_v43 = vsub.f32 %v10169_v14, %v10295_v2  ;;  %v4081_v24 = vsub.f32 %v10178_v51, %v10298_v28 }
 0x917   : > { %v4022_v27 = vmul.f32 0.015625, %v3996_v59  ;;  %v4037_v15 = vmul.f32 %v10337_v45, %v10337_v45 }
 0x918   : > { %v3999_v48 = vpop.xlane.xlu1 %3998  ;;  %v4196_v3 = vpack.c.bf16 %v4181_v39, %v4180_v40 }
 0x919   : > { %v7939_v1 = vpop.eup %7938  ;;  %v4054_v8 = vsub.f32 %v4022_v27, %v4038_v63  ;;  %v4023_v56 = vmul.f32 0.015625, %v3999_v48 }
 0x91a   : > { %7283 = vmatprep.mubr.msk.bf16.mxu0 %vm2480_vm2, %v4196_v3  ;;  %v3990_v41 = vpop.xlane.xlu0 %3989  ;;  %v4130_v34 = vmul.f32 %v7939_v1, %v4082_v11 }
 0x91b   : > { %v7941_v30 = vpop.eup %7940  ;;  %v4070_v21 = vmax.f32 %v4054_v8, 0.0  ;;  %v4055_v25 = vsub.f32 %v4023_v56, %v4039_v58  ;;  %v4020_v52 = vmul.f32 0.015625, %v3990_v41  ;;  %7284 = vmatmul.mubr.msk.bf16.vlgmr.msra.gmra.mrb[128].mxu0 %vm2480_vm2, %v4197_v9 }
 0x91c   : > { %v3993_v23 = vpop.xlane.xlu1 %3992  ;;  %v4131_v49 = vmul.f32 %v7941_v30, %v4083_v55  ;;  %v4150_v26 = vmul.f32 %v10304_v44, %v4130_v34 }
 0x91d   : > { %v7943_v37 = vpop.eup %7942  ;;  %v4102_v32 = vadd.f32 1e-05, %v4070_v21  ;;  %v4071_v10 = vmax.f32 %v4055_v25, 0.0  ;;  %v4052_v7 = vsub.f32 %v4020_v52, %v4036_v62  ;;  %v4021_v6 = vmul.f32 0.015625, %v3993_v23 }
 0x91e   : > { %v3928_v19 = vpop.xlane.xlu0 %3927  ;;  %v4128_v4 = vmul.f32 %v7943_v37, %v4080_v43  ;;  %v4151_v20 = vmul.f32 %v10304_v44, %v4131_v49  ;;  %v4170_v22 = vadd.f32 %v10311_v5, %v4150_v26  ;;  %v4086_v62 = vsub.f32 %v10186_v46, %v10325_v0 }
 0x91f   : > { %v7945_v14 = vpop.eup %7944  ;;  %7946 = vrsqrt.f32 %v4102_v32  ;;  %v4103_v2 = vadd.f32 1e-05, %v4071_v10  ;;  %v4068_v29 = vmax.f32 %v4052_v7, 0.0  ;;  %v4053_v31 = vsub.f32 %v4021_v6, %v4037_v15 }
 0x920   : > { %v3931_v17 = vpop.xlane.xlu1 %3930  ;;  %v4129_v13 = vmul.f32 %v7945_v14, %v4081_v24  ;;  %v4148_v61 = vmul.f32 %v10304_v44, %v4128_v4  ;;  %v4171_v51 = vadd.f32 %v10311_v5, %v4151_v20  ;;  %v10365_v55 = vmul.f32 0.015625, %v3928_v19 }
 0x921   : > { %7948 = vrsqrt.f32 %v4103_v2  ;;  %v4100_v59 = vadd.f32 1e-05, %v4068_v29  ;;  %v4069_v40 = vmax.f32 %v4053_v31, 0.0  ;;  %v4186_v30 = vmax.f32 %v4170_v22, 0.0 }
 0x922   : > { %v3922_v28 = vpop.xlane.xlu0 %3921  ;;  %v4149_v39 = vmul.f32 %v10304_v44, %v4129_v13  ;;  %v4168_v63 = vadd.f32 %v10311_v5, %v4148_v61  ;;  %v4187_v58 = vmax.f32 %v4171_v51, 0.0  ;;  %v10371_v21 = vmul.f32 0.015625, %v3931_v17 }
 0x923   : > { %7950 = vrsqrt.f32 %v4100_v59  ;;  %v4101_v27 = vadd.f32 1e-05, %v4069_v40  ;;  %v10360_v11 = vmul.f32 0.015625, %v3922_v28  ;;  %v4087_v32 = vsub.f32 %v10194_v60, %v10329_v42 }
 0x924   : > { %v3925_v48 = vpop.xlane.xlu1 %3924  ;;  %v4169_v3 = vadd.f32 %v10311_v5, %v4149_v39  ;;  %v4184_v56 = vmax.f32 %v4168_v63, 0.0  ;;  %v4199_v37 = vpack.c.bf16 %v4187_v58, %v4186_v30  ;;  %v4042_v46 = vmul.f32 %v10365_v55, %v10365_v55 }
 0x925   : > { %7952 = vrsqrt.f32 %v4101_v27  ;;  %v10363_v1 = vmul.f32 0.015625, %v3925_v48  ;;  %v4040_v41 = vmul.f32 %v10360_v11, %v10360_v11  ;;  %v4084_v4 = vsub.f32 %v10189_v33, %v10333_v47 }
 0x926   : > { %v4002_v8 = vpop.xlane.xlu0 %4001  ;;  %v4185_v9 = vmax.f32 %v4169_v3, 0.0  ;;  %v4043_v26 = vmul.f32 %v10371_v21, %v10371_v21  ;;  %v4085_v17 = vsub.f32 %v10197_v54, %v10337_v45 }
 0x927   : > { %v4024_v34 = vmul.f32 0.015625, %v4002_v8  ;;  %v4041_v15 = vmul.f32 %v10363_v1, %v10363_v1 }
 0x928   : > { %v4005_v25 = vpop.xlane.xlu1 %4004  ;;  %v4198_v52 = vpack.c.bf16 %v4185_v9, %v4184_v56 }
 0x929   : > { %v7947_v43 = vpop.eup %7946  ;;  %v4056_v23 = vsub.f32 %v4024_v34, %v4040_v41  ;;  %v4025_v49 = vmul.f32 0.015625, %v4005_v25  ;;  %v4088_v34 = vsub.f32 %v10213_v50, %v10360_v11  ;;  %v4091_v50 = vsub.f32 %v10219_v38, %v10371_v21 }
 0x92a   : > { %7287 = vmatprep.mubr.msk.bf16.mxu0 %vm2480_vm2, %v4198_v52  ;;  %v4008_v10 = vpop.xlane.xlu0 %4007  ;;  %v4134_v7 = vmul.f32 %v7947_v43, %v4086_v62  ;;  %v4089_v52 = vsub.f32 %v10222_v57, %v10363_v1 }
 0x92b   : > { %v7949_v6 = vpop.eup %7948  ;;  %v4072_v0 = vmax.f32 %v4056_v23, 0.0  ;;  %v4057_v24 = vsub.f32 %v4025_v49, %v4041_v15  ;;  %v4026_v19 = vmul.f32 0.015625, %v4008_v10  ;;  %7288 = vmatmul.mubr.msk.bf16.gmra.mrb[132].mxu0 %vm2480_vm2, %v4199_v37  ;;  %v4090_v23 = vsub.f32 %v10210_v53, %v10365_v55 }
 0x92c   : > { %v4011_v60 = vpop.xlane.xlu1 %4010  ;;  %v4135_v42 = vmul.f32 %v7949_v6, %v4087_v32  ;;  %v4154_v61 = vmul.f32 %v10304_v44, %v4134_v7 }
 0x92d   : > { %v7951_v20 = vpop.eup %7950  ;;  %v4104_v14 = vadd.f32 1e-05, %v4072_v0  ;;  %v4073_v2 = vmax.f32 %v4057_v24, 0.0  ;;  %v4058_v29 = vsub.f32 %v4026_v19, %v4042_v46  ;;  %v4027_v31 = vmul.f32 0.015625, %v4011_v60  ;;  %v10419_v60 = vld [vmem:[%s11746_s5 + $0x10] sm:$0xff] }
 0x92e   : > { %v4132_v13 = vmul.f32 %v7951_v20, %v4084_v4  ;;  %v4155_v59 = vmul.f32 %v10304_v44, %v4135_v42  ;;  %v4174_v3 = vadd.f32 %v10311_v5, %v4154_v61  ;;  %v11947_v42 = vld [vmem:[#allocation14_spill] sm:$0xff] }
 0x92f   : > { %v7953_v40 = vpop.eup %7952  ;;  %7954 = vrsqrt.f32 %v4104_v14  ;;  %v4105_v33 = vadd.f32 1e-05, %v4073_v2  ;;  %v4074_v47 = vmax.f32 %v4058_v29, 0.0  ;;  %v4059_v51 = vsub.f32 %v4027_v31, %v4043_v26 }
 0x930   : > { %v4133_v28 = vmul.f32 %v7953_v40, %v4085_v17  ;;  %v4152_v39 = vmul.f32 %v10304_v44, %v4132_v13  ;;  %v4175_v22 = vadd.f32 %v10311_v5, %v4155_v59  ;;  %v4190_v41 = vmax.f32 %v4174_v3, 0.0  ;;  %v11950_v40 = vld [vmem:[#allocation15_spill] sm:$0xff] }
 0x931   : > { %7956 = vrsqrt.f32 %v4105_v33  ;;  %v4106_v63 = vadd.f32 1e-05, %v4074_v47  ;;  %v4075_v27 = vmax.f32 %v4059_v51, 0.0 }
 0x932   : > { %v4153_v54 = vmul.f32 %v10304_v44, %v4133_v28  ;;  %v4172_v45 = vadd.f32 %v10311_v5, %v4152_v39  ;;  %v4191_v8 = vmax.f32 %v4175_v22, 0.0  ;;  %v11954_v28 = vld [vmem:[#allocation18_spill] sm:$0xff] }
 0x933   : > { %7958 = vrsqrt.f32 %v4106_v63  ;;  %v4107_v48 = vadd.f32 1e-05, %v4075_v27 }
 0x934   : > { %v4173_v58 = vadd.f32 %v10311_v5, %v4153_v54  ;;  %v4188_v56 = vmax.f32 %v4172_v45, 0.0  ;;  %v4201_v25 = vpack.c.bf16 %v4191_v8, %v4190_v41 }
 0x935   : > { %7960 = vrsqrt.f32 %v4107_v48 }
 0x936   : > { %v4189_v9 = vmax.f32 %v4173_v58, 0.0 }
 0x938   : > { %v4200_v30 = vpack.c.bf16 %v4189_v9, %v4188_v56 }
 0x939   : > { %v7955_v62 = vpop.eup %7954 }
 0x93a   : > { %7291 = vmatprep.mubr.msk.bf16.mxu0 %vm2480_vm2, %v4200_v30  ;;  %v4136_v43 = vmul.f32 %v7955_v62, %v4088_v34 }
 0x93b   : > { %v7957_v15 = vpop.eup %7956  ;;  %7292 = vmatmul.mubr.msk.bf16.gmra.mrb[136].mxu0 %vm2480_vm2, %v4201_v25  ;;  %v11956_v25 = vld [vmem:[#allocation17_spill] sm:$0xff] }
 0x93c   : > { %v4137_v49 = vmul.f32 %v7957_v15, %v4089_v52  ;;  %v4156_v37 = vmul.f32 %v10304_v44, %v4136_v43 }
 0x93d   : > { %v7959_v32 = vpop.eup %7958 }
 0x93e   : > { %v4157_v11 = vmul.f32 %v10304_v44, %v4137_v49  ;;  %v4176_v57 = vadd.f32 %v10311_v5, %v4156_v37  ;;  %v4138_v1 = vmul.f32 %v7959_v32, %v4090_v23  ;;  %v11958_v37 = vld [vmem:[#allocation19_spill] sm:$0xff] }
 0x93f   : > { %v7961_v10 = vpop.eup %7960 }
 0x940   : > { %v4177_v7 = vadd.f32 %v10311_v5, %v4157_v11  ;;  %v4139_v6 = vmul.f32 %v7961_v10, %v4091_v50  ;;  %v4158_v46 = vmul.f32 %v10304_v44, %v4138_v1  ;;  %v4192_v0 = vmax.f32 %v4176_v57, 0.0  ;;  %v11960_v50 = vld [vmem:[#allocation10_spill] sm:$0xff]  ;;  %v11962_v1 = vld [vmem:[#allocation8_spill] sm:$0xff] }
 0x942   : > { %v4193_v53 = vmax.f32 %v4177_v7, 0.0  ;;  %v4159_v55 = vmul.f32 %v10304_v44, %v4139_v6  ;;  %v4178_v24 = vadd.f32 %v10311_v5, %v4158_v46  ;;  %v4725_v44 = vrot.slane %v10419_v60, 6 }
 0x944   : > { %v4202_v19 = vpack.c.bf16 %v4193_v53, %v4192_v0  ;;  %v4179_v38 = vadd.f32 %v10311_v5, %v4159_v55  ;;  %v4194_v21 = vmax.f32 %v4178_v24, 0.0  ;;  %7481 = vpush %v4725_v44  ;;  %v10424_v5 = vrot.slane %v10135_v12, %v11947_v42  ;;  %v11952_v12 = vld [vmem:[#allocation16_spill] sm:$0xff] }
 0x946   : > { %7295 = vmatprep.mubr.msk.bf16.mxu0 %vm2480_vm2, %v4202_v19  ;;  %v4195_v4 = vmax.f32 %v4179_v38, 0.0 }
 0x948   : > { %v4203_v26 = vpack.c.bf16 %v4195_v4, %v4194_v21 }
 0x94a   : > { %7296 = vmatmul.mubr.msk.bf16.gmra.mrb[140].mxu0 %vm2480_vm2, %v4203_v26 }
 0x94b   : > { %7347 = vmatprep.mubr.bf16.mxu0 %v10129_v36  ;;  %v11948_v36 = vld [vmem:[#allocation13_spill] sm:$0xff] }
 0x975   : > { %s7482_s10 = spop %7481 }
 0x9ee   : > { %v7285_v20 = vpop.f32.mrb[128].mxu0 }
 0x9ef   : > { %v4308_v14 = vadd.f32 %v7285_v20, %v10424_v5  ;;  %v4299_v2 = vpop.f32.mrb[129].mxu0 }
 0x9f0   : > { %v4300_v29 = vadd.f32 %v4299_v2, %v10424_v5  ;;  %v7286_v31 = vpop.f32.mrb[130].mxu0  ;;  %v11964_v2 = vld [vmem:[#allocation20_spill] sm:$0xff] }
 0x9f1   : > { %v10429_v17 = vadd.f32 %v4308_v14, %v11948_v36  ;;  %v4311_v13 = vadd.f32 %v7286_v31, %v10424_v5  ;;  %v4302_v61 = vpop.f32.mrb[131].mxu0 }
 0x9f2   : > { %v4303_v59 = vadd.f32 %v4302_v61, %v10424_v5  ;;  %v10434_v33 = vadd.f32 %v4300_v29, %v11950_v40 }
 0x9f3   : > { %11949 = vst [vmem:[#allocation32_spill] sm:$0xff] %v10429_v17  ;;  %v10437_v47 = vadd.f32 %v4311_v13, %v11952_v12  ;;  %v4386_v51 = vsel %vm1875_vm0, %v10429_v17, 0.0  ;;  %v4446_v22 = vmul.f32 %v10429_v17, %v10429_v17  ;;  %v11968_v12 = vld [vmem:[#allocation22_spill] sm:$0xff] }
 0x9f4   : > { %11951 = vst [vmem:[#allocation31_spill] sm:$0xff] %v10434_v33  ;;  %4387 = vadd.xlane.f32.xlu0 %v4386_v51  ;;  %v10442_v39 = vadd.f32 %v4303_v59, %v11954_v28  ;;  %v4380_v27 = vsel %vm1875_vm0, %v10434_v33, 0.0  ;;  %v4444_v3 = vmul.f32 %v10434_v33, %v10434_v33  ;;  %v11966_v59 = vld [vmem:[#allocation21_spill] sm:$0xff] }
 0x9f5   : > { %11953 = vst [vmem:[#allocation30_spill] sm:$0xff] %v10437_v47  ;;  %v4389_v63 = vsel %vm1875_vm0, %v10437_v47, 0.0  ;;  %v4447_v45 = vmul.f32 %v10437_v47, %v10437_v47  ;;  %v4466_v48 = vsel %vm1875_vm0, %v4446_v22, 0.0 }
 0x9f6   : > { %11955 = vst [vmem:[#allocation34_spill] sm:$0xff] %v10442_v39  ;;  %4390 = vadd.xlane.f32.xlu1 %v4389_v63  ;;  %v4383_v54 = vsel %vm1875_vm0, %v10442_v39, 0.0  ;;  %v4445_v8 = vmul.f32 %v10442_v39, %v10442_v39  ;;  %v4460_v34 = vsel %vm1875_vm0, %v4444_v3, 0.0  ;;  %v11970_v63 = vld [vmem:[#allocation23_spill] sm:$0xff] }
 0x9f7   : > { %v4469_v58 = vsel %vm1875_vm0, %v4447_v45, 0.0 }
 0x9f8   : > { %4381 = vadd.xlane.f32.xlu0 %v4380_v27  ;;  %v4463_v23 = vsel %vm1875_vm0, %v4445_v8, 0.0 }
 0x9fa   : > { %4384 = vadd.xlane.f32.xlu1 %v4383_v54 }
 0x9fc   : > { %4467 = vadd.xlane.f32.xlu0 %v4466_v48 }
 0x9fe   : > { %v7289_v56 = vpop.f32.mrb[132].mxu0  ;;  %4470 = vadd.xlane.f32.xlu1 %v4469_v58 }
 0x9ff   : > { %v4324_v9 = vadd.f32 %v7289_v56, %v10424_v5  ;;  %v4315_v41 = vpop.f32.mrb[133].mxu0 }
 0xa00   : > { %v4316_v30 = vadd.f32 %v4315_v41, %v10424_v5  ;;  %v7290_v62 = vpop.f32.mrb[134].mxu0  ;;  %4461 = vadd.xlane.f32.xlu0 %v4460_v34 }
 0xa01   : > { %v10464_v52 = vadd.f32 %v4324_v9, %v11956_v25  ;;  %v4327_v43 = vadd.f32 %v7290_v62, %v10424_v5  ;;  %v4318_v15 = vpop.f32.mrb[135].mxu0 }
 0xa02   : > { %v4319_v49 = vadd.f32 %v4318_v15, %v10424_v5  ;;  %4464 = vadd.xlane.f32.xlu1 %v4463_v23  ;;  %v10470_v32 = vadd.f32 %v4316_v30, %v11958_v37  ;;  %v11972_v15 = vld [vmem:[#allocation24_spill] sm:$0xff] }
 0xa03   : > { %11957 = vst [vmem:[#allocation35_spill] sm:$0xff] %v10464_v52  ;;  %v10473_v11 = vadd.f32 %v4327_v43, %v11960_v50  ;;  %v4398_v57 = vsel %vm1875_vm0, %v10464_v52, 0.0  ;;  %v4450_v46 = vmul.f32 %v10464_v52, %v10464_v52 }
 0xa04   : > { %11959 = vst [vmem:[#allocation36_spill] sm:$0xff] %v10470_v32  ;;  %4399 = vadd.xlane.f32.xlu0 %v4398_v57  ;;  %v10478_v10 = vadd.f32 %v4319_v49, %v11962_v1  ;;  %v4392_v6 = vsel %vm1875_vm0, %v10470_v32, 0.0  ;;  %v4448_v24 = vmul.f32 %v10470_v32, %v10470_v32  ;;  %v11974_v1 = vld [vmem:[#allocation26_spill] sm:$0xff] }
 0xa05   : > { %11961 = vst [vmem:[#allocation33_spill] sm:$0xff] %v10473_v11  ;;  %v4401_v7 = vsel %vm1875_vm0, %v10473_v11, 0.0  ;;  %v4451_v53 = vmul.f32 %v10473_v11, %v10473_v11  ;;  %v4478_v55 = vsel %vm1875_vm0, %v4450_v46, 0.0  ;;  %v11976_v46 = vld [vmem:[#allocation25_spill] sm:$0xff] }
 0xa06   : > { %11963 = vst [vmem:[#allocation39_spill] sm:$0xff] %v10478_v10  ;;  %4402 = vadd.xlane.f32.xlu1 %v4401_v7  ;;  %v4395_v0 = vsel %vm1875_vm0, %v10478_v10, 0.0  ;;  %v4449_v38 = vmul.f32 %v10478_v10, %v10478_v10  ;;  %v4472_v44 = vsel %vm1875_vm0, %v4448_v24, 0.0 }
 0xa07   : > { %v4481_v19 = vsel %vm1875_vm0, %v4451_v53, 0.0 }
 0xa08   : > { %4393 = vadd.xlane.f32.xlu0 %v4392_v6  ;;  %v4475_v13 = vsel %vm1875_vm0, %v4449_v38, 0.0 }
 0xa0a   : > { %4396 = vadd.xlane.f32.xlu1 %v4395_v0 }
 0xa0c   : > { %4479 = vadd.xlane.f32.xlu0 %v4478_v55  ;;  %v11978_v55 = vld [vmem:[#allocation27_spill] sm:$0xff] }
 0xa0e   : > { %v7293_v21 = vpop.f32.mrb[136].mxu0  ;;  %4482 = vadd.xlane.f32.xlu1 %v4481_v19 }
 0xa0f   : > { %v4340_v4 = vadd.f32 %v7293_v21, %v10424_v5  ;;  %v4331_v26 = vpop.f32.mrb[137].mxu0 }
 0xa10   : > { %v4332_v20 = vadd.f32 %v4331_v26, %v10424_v5  ;;  %v7294_v14 = vpop.f32.mrb[138].mxu0  ;;  %4473 = vadd.xlane.f32.xlu0 %v4472_v44 }
 0xa11   : > { %v10500_v29 = vadd.f32 %v4340_v4, %v11964_v2  ;;  %v4343_v31 = vadd.f32 %v7294_v14, %v10424_v5  ;;  %v4334_v36 = vpop.f32.mrb[139].mxu0 }
 0xa12   : > { %v4335_v61 = vadd.f32 %v4334_v36, %v10424_v5  ;;  %4476 = vadd.xlane.f32.xlu1 %v4475_v13  ;;  %v10506_v40 = vadd.f32 %v4332_v20, %v11966_v59 }
 0xa13   : > { %11965 = vst [vmem:[#allocation40_spill] sm:$0xff] %v10500_v29  ;;  %v10509_v51 = vadd.f32 %v4343_v31, %v11968_v12  ;;  %v4410_v28 = vsel %vm1875_vm0, %v10500_v29, 0.0  ;;  %v4454_v45 = vmul.f32 %v10500_v29, %v10500_v29 }
 0xa14   : > { %11967 = vst [vmem:[#allocation37_spill] sm:$0xff] %v10506_v40  ;;  %4411 = vadd.xlane.f32.xlu0 %v4410_v28  ;;  %v10514_v27 = vadd.f32 %v4335_v61, %v11970_v63  ;;  %v4404_v54 = vsel %vm1875_vm0, %v10506_v40, 0.0  ;;  %v4452_v8 = vmul.f32 %v10506_v40, %v10506_v40 }
 0xa15   : > { %11969 = vst [vmem:[#allocation38_spill] sm:$0xff] %v10509_v51  ;;  %v4413_v22 = vsel %vm1875_vm0, %v10509_v51, 0.0  ;;  %v4455_v3 = vmul.f32 %v10509_v51, %v10509_v51  ;;  %v4490_v58 = vsel %vm1875_vm0, %v4454_v45, 0.0 }
 0xa16   : > { %11971 = vst [vmem:[#allocation13_spill] sm:$0xff] %v10514_v27  ;;  %4414 = vadd.xlane.f32.xlu1 %v4413_v22  ;;  %v4407_v48 = vsel %vm1875_vm0, %v10514_v27, 0.0  ;;  %v4453_v41 = vmul.f32 %v10514_v27, %v10514_v27  ;;  %v4484_v43 = vsel %vm1875_vm0, %v4452_v8, 0.0 }
 0xa17   : > { %v4493_v9 = vsel %vm1875_vm0, %v4455_v3, 0.0 }
 0xa18   : > { %4405 = vadd.xlane.f32.xlu0 %v4404_v54  ;;  %v4487_v57 = vsel %vm1875_vm0, %v4453_v41, 0.0 }
 0xa1a   : > { %4408 = vadd.xlane.f32.xlu1 %v4407_v48 }
 0xa1c   : > { %4491 = vadd.xlane.f32.xlu0 %v4490_v58 }
 0xa1d   : > { %v7297_v56 = vpop.f32.mrb[140].mxu0 }
 0xa1e   : > { %v4356_v34 = vadd.f32 %v7297_v56, %v10424_v5  ;;  %4494 = vadd.xlane.f32.xlu1 %v4493_v9  ;;  %v4347_v30 = vpop.f32.mrb[141].mxu0 }
 0xa1f   : > { %v4348_v62 = vadd.f32 %v4347_v30, %v10424_v5  ;;  %v7298_v25 = vpop.f32.mrb[142].mxu0 }
 0xa20   : > { %v10536_v23 = vadd.f32 %v4356_v34, %v11972_v15  ;;  %v4359_v49 = vadd.f32 %v7298_v25, %v10424_v5  ;;  %4485 = vadd.xlane.f32.xlu0 %v4484_v43  ;;  %v4350_v37 = vpop.f32.mrb[143].mxu0 }
 0xa21   : > { %v4351_v50 = vadd.f32 %v4350_v37, %v10424_v5  ;;  %v10547_v0 = vadd.f32 %v4348_v62, %v11976_v46 }
 0xa22   : > { %11973 = vst [vmem:[#allocation15_spill] sm:$0xff] %v10536_v23  ;;  %v10542_v7 = vadd.f32 %v4359_v49, %v11974_v1  ;;  %4488 = vadd.xlane.f32.xlu1 %v4487_v57  ;;  %v4422_v6 = vsel %vm1875_vm0, %v10536_v23, 0.0  ;;  %v4458_v26 = vmul.f32 %v10536_v23, %v10536_v23 }
 0xa23   : > { %11977 = vst [vmem:[#allocation18_spill] sm:$0xff] %v10547_v0  ;;  %v10552_v24 = vadd.f32 %v4351_v50, %v11978_v55  ;;  %v4416_v5 = vsel %vm1875_vm0, %v10547_v0, 0.0  ;;  %v4456_v19 = vmul.f32 %v10547_v0, %v10547_v0 }
 0xa24   : > { %11975 = vst [vmem:[#allocation16_spill] sm:$0xff] %v10542_v7  ;;  %4423 = vadd.xlane.f32.xlu0 %v4422_v6  ;;  %v4425_v53 = vsel %vm1875_vm0, %v10542_v7, 0.0  ;;  %v4459_v20 = vmul.f32 %v10542_v7, %v10542_v7  ;;  %v4502_v14 = vsel %vm1875_vm0, %v4458_v26, 0.0 }
 0xa25   : > { %11979 = vst [vmem:[#allocation17_spill] sm:$0xff] %v10552_v24  ;;  %v4419_v38 = vsel %vm1875_vm0, %v10552_v24, 0.0  ;;  %v4457_v21 = vmul.f32 %v10552_v24, %v10552_v24  ;;  %v4496_v4 = vsel %vm1875_vm0, %v4456_v19, 0.0 }
 0xa26   : > { %4426 = vadd.xlane.f32.xlu1 %v4425_v53  ;;  %v4505_v2 = vsel %vm1875_vm0, %v4459_v20, 0.0 }
 0xa27   : > { %v4499_v44 = vsel %vm1875_vm0, %v4457_v21, 0.0 }
 0xa28   : > { %4417 = vadd.xlane.f32.xlu0 %v4416_v5 }
 0xa2a   : > { %4420 = vadd.xlane.f32.xlu1 %v4419_v38 }
 0xa2c   : > { %4497 = vadd.xlane.f32.xlu0 %v4496_v4 }
 0xa2e   : > { %4500 = vadd.xlane.f32.xlu1 %v4499_v44 }
 0xa30   : > { %4503 = vadd.xlane.f32.xlu0 %v4502_v14 }
 0xa32   : > { %4506 = vadd.xlane.f32.xlu1 %v4505_v2 }
 0xa81   : > { %v4388_v31 = vpop.xlane.xlu0 %4387 }
 0xa82   : > { %v10570_v61 = vmul.f32 0.03125, %v4388_v31 }
 0xa83   : > { %v4391_v36 = vpop.xlane.xlu1 %4390 }
 0xa84   : > { %v4526_v63 = vmul.f32 %v10570_v61, %v10570_v61  ;;  %v10574_v54 = vmul.f32 0.03125, %v4391_v36 }
 0xa85   : > { %v4382_v13 = vpop.xlane.xlu0 %4381 }
 0xa86   : > { %v4527_v8 = vmul.f32 %v10574_v54, %v10574_v54  ;;  %v10578_v41 = vmul.f32 0.03125, %v4382_v13 }
 0xa87   : > { %v4385_v59 = vpop.xlane.xlu1 %4384 }
 0xa88   : > { %v10580_v25 = vmul.f32 0.03125, %v4385_v59  ;;  %v4524_v49 = vmul.f32 %v10578_v41, %v10578_v41 }
 0xa89   : > { %v4468_v12 = vpop.xlane.xlu0 %4467 }
 0xa8a   : > { %v4510_v28 = vmul.f32 0.03125, %v4468_v12  ;;  %v4525_v6 = vmul.f32 %v10580_v25, %v10580_v25 }
 0xa8b   : > { %v4471_v22 = vpop.xlane.xlu1 %4470 }
 0xa8c   : > { %v4542_v45 = vsub.f32 %v4510_v28, %v4526_v63  ;;  %v4511_v3 = vmul.f32 0.03125, %v4471_v22 }
 0xa8d   : > { %v4462_v48 = vpop.xlane.xlu0 %4461 }
 0xa8e   : > { %v4558_v56 = vmax.f32 %v4542_v45, 0.0  ;;  %v4543_v34 = vsub.f32 %v4511_v3, %v4527_v8  ;;  %v4508_v62 = vmul.f32 0.03125, %v4462_v48 }
 0xa8f   : > { %v4465_v58 = vpop.xlane.xlu1 %4464 }
 0xa90   : > { %v4590_v43 = vadd.f32 1e-05, %v4558_v56  ;;  %v4559_v37 = vmax.f32 %v4543_v34, 0.0  ;;  %v4509_v50 = vmul.f32 0.03125, %v4465_v58  ;;  %v4540_v1 = vsub.f32 %v4508_v62, %v4524_v49 }
 0xa91   : > { %v4400_v9 = vpop.xlane.xlu0 %4399  ;;  %v4574_v56 = vsub.f32 %v10429_v17, %v10570_v61 }
 0xa92   : > { %7962 = vrsqrt.f32 %v4590_v43  ;;  %v4591_v53 = vadd.f32 1e-05, %v4559_v37  ;;  %v4541_v55 = vsub.f32 %v4509_v50, %v4525_v6  ;;  %v10586_v5 = vmul.f32 0.03125, %v4400_v9  ;;  %v11980_v43 = vld [vmem:[#allocation28_spill] sm:$0xff] }
 0xa93   : > { %v4403_v30 = vpop.xlane.xlu1 %4402  ;;  %v4556_v38 = vmax.f32 %v4540_v1, 0.0 }
 0xa94   : > { %7964 = vrsqrt.f32 %v4591_v53  ;;  %v4557_v44 = vmax.f32 %v4541_v55, 0.0  ;;  %v4530_v20 = vmul.f32 %v10586_v5, %v10586_v5  ;;  %v10592_v14 = vmul.f32 0.03125, %v4403_v30 }
 0xa95   : > { %v4394_v15 = vpop.xlane.xlu0 %4393  ;;  %v4588_v31 = vadd.f32 1e-05, %v4556_v38  ;;  %v11981_v38 = vld [vmem:[#allocation29_spill] sm:$0xff] }
 0xa96   : > { %v10594_v36 = vmul.f32 0.03125, %v4394_v15  ;;  %v4589_v48 = vadd.f32 1e-05, %v4557_v44  ;;  %v4531_v3 = vmul.f32 %v10592_v14, %v10592_v14  ;;  %v10606_v15 = vrot.slane %v10419_v60, %v11980_v43 }
 0xa97   : > { %v4397_v57 = vpop.xlane.xlu1 %4396  ;;  %7966 = vrsqrt.f32 %v4588_v31 }
 0xa98   : > { %v10588_v21 = vmul.f32 0.03125, %v4397_v57  ;;  %v4528_v9 = vmul.f32 %v10594_v36, %v10594_v36  ;;  %7968 = vrsqrt.f32 %v4589_v48 }
 0xa99   : > { %v4480_v46 = vpop.xlane.xlu0 %4479 }
 0xa9a   : > { %v4514_v4 = vmul.f32 0.03125, %v4480_v46  ;;  %v4529_v59 = vmul.f32 %v10588_v21, %v10588_v21  ;;  %v4575_v46 = vsub.f32 %v10437_v47, %v10574_v54 }
 0xa9b   : > { %v4483_v19 = vpop.xlane.xlu1 %4482 }
 0xa9c   : > { %v4546_v12 = vsub.f32 %v4514_v4, %v4530_v20  ;;  %v4515_v28 = vmul.f32 0.03125, %v4483_v19  ;;  %v7963_v45 = vpop.eup %7962  ;;  %v10616_v4 = vrot.slane %v10419_v60, %v11981_v38  ;;  %v4572_v60 = vsub.f32 %v10434_v33, %v10578_v41 }
 0xa9d   : > { %v4474_v26 = vpop.xlane.xlu0 %4473  ;;  %v4622_v49 = vmul.f32 %v7963_v45, %v4574_v56 }
 0xa9e   : > { %v4512_v22 = vmul.f32 0.03125, %v4474_v26  ;;  %v4562_v34 = vmax.f32 %v4546_v12, 0.0  ;;  %v4547_v30 = vsub.f32 %v4515_v28, %v4531_v3  ;;  %v7965_v6 = vpop.eup %7964 }
 0xa9f   : > { %v4477_v2 = vpop.xlane.xlu1 %4476  ;;  %v4642_v26 = vmul.f32 %v10606_v15, %v4622_v49 }
 0xaa0   : > { %v4513_v13 = vmul.f32 0.03125, %v4477_v2  ;;  %v4544_v37 = vsub.f32 %v4512_v22, %v4528_v9  ;;  %v4594_v53 = vadd.f32 1e-05, %v4562_v34  ;;  %v4563_v55 = vmax.f32 %v4547_v30, 0.0 }
 0xaa1   : > { %v4412_v63 = vpop.xlane.xlu0 %4411  ;;  %v4623_v2 = vmul.f32 %v7965_v6, %v4575_v46  ;;  %v7967_v3 = vpop.eup %7966  ;;  %v10632_v34 = vadd.f32 %v10616_v4, %v4642_v26  ;;  %v4573_v46 = vsub.f32 %v10442_v39, %v10580_v25 }
 0xaa2   : > { %v4545_v58 = vsub.f32 %v4513_v13, %v4529_v59  ;;  %v10608_v57 = vmul.f32 0.03125, %v4412_v63  ;;  %v4560_v44 = vmax.f32 %v4544_v37, 0.0  ;;  %7970 = vrsqrt.f32 %v4594_v53  ;;  %v7969_v6 = vpop.eup %7968 }
 0xaa3   : > { %v4415_v8 = vpop.xlane.xlu1 %4414  ;;  %v4595_v22 = vadd.f32 1e-05, %v4563_v55  ;;  %v4643_v30 = vmul.f32 %v10606_v15, %v4623_v2  ;;  %v4620_v53 = vmul.f32 %v7967_v3, %v4572_v60 }
 0xaa4   : > { %v4561_v50 = vmax.f32 %v4545_v58, 0.0  ;;  %v10610_v61 = vmul.f32 0.03125, %v4415_v8  ;;  %v4534_v13 = vmul.f32 %v10608_v57, %v10608_v57  ;;  %v4592_v58 = vadd.f32 1e-05, %v4560_v44 }
 0xaa5   : > { %v4406_v62 = vpop.xlane.xlu0 %4405  ;;  %v4640_v60 = vmul.f32 %v10606_v15, %v4620_v53 }
 0xaa6   : > { %v10619_v20 = vmul.f32 0.03125, %v4406_v62  ;;  %v4593_v31 = vadd.f32 1e-05, %v4561_v50  ;;  %v4535_v54 = vmul.f32 %v10610_v61, %v10610_v61 }
 0xaa7   : > { %v4409_v1 = vpop.xlane.xlu1 %4408 }
 0xaa8   : > { %v10625_v28 = vmul.f32 0.03125, %v4409_v1  ;;  %v4532_v8 = vmul.f32 %v10619_v20, %v10619_v20  ;;  %7972 = vrsqrt.f32 %v4593_v31  ;;  %v11815_v31 = vmax.f32 %v10632_v34, 0.0 }
 0xaa9   : > { %v4492_v19 = vpop.xlane.xlu0 %4491  ;;  %7974 = vrsqrt.f32 %v4595_v22 }
 0xaaa   : > { %v4518_v59 = vmul.f32 0.03125, %v4492_v19  ;;  %v4533_v41 = vmul.f32 %v10625_v28, %v10625_v28  ;;  %7976 = vrsqrt.f32 %v4592_v58  ;;  %v4581_v43 = vsub.f32 %v10514_v27, %v10625_v28 }
 0xaab   : > { %v4495_v12 = vpop.xlane.xlu1 %4494 }
 0xaac   : > { %v4519_v63 = vmul.f32 0.03125, %v4495_v12  ;;  %v4550_v45 = vsub.f32 %v4518_v59, %v4534_v13  ;;  %v10641_v13 = vadd.f32 %v10616_v4, %v4643_v30  ;;  %v4621_v12 = vmul.f32 %v7969_v6, %v4573_v46 }
 0xaad   : > { %v4486_v48 = vpop.xlane.xlu0 %4485 }
 0xaae   : > { %v4551_v56 = vsub.f32 %v4519_v63, %v4535_v54  ;;  %v4516_v9 = vmul.f32 0.03125, %v4486_v48  ;;  %v4566_v62 = vmax.f32 %v4550_v45, 0.0  ;;  %v7971_v45 = vpop.eup %7970  ;;  %v4694_v48 = vmax.f32 %v11815_v31, 0.0 }
 0xaaf   : > { %v4489_v49 = vpop.xlane.xlu1 %4488  ;;  %v11814_v3 = vmax.f32 %v10641_v13, 0.0 }
 0xab0   : > { %v4567_v37 = vmax.f32 %v4551_v56, 0.0  ;;  %v4548_v50 = vsub.f32 %v4516_v9, %v4532_v8  ;;  %v4517_v1 = vmul.f32 0.03125, %v4489_v49  ;;  %v4598_v55 = vadd.f32 1e-05, %v4566_v62 }
 0xab1   : > { %v4424_v19 = vpop.xlane.xlu0 %4423  ;;  %v4641_v8 = vmul.f32 %v10606_v15, %v4621_v12  ;;  %v10648_v56 = vstv %s7482_s10  ;;  %v4578_v62 = vsub.f32 %v10464_v52, %v10586_v5  ;;  %v4579_v49 = vsub.f32 %v10473_v11, %v10592_v14 }
 0xab2   : > { %v4599_v26 = vadd.f32 1e-05, %v4567_v37  ;;  %v4564_v44 = vmax.f32 %v4548_v50, 0.0  ;;  %v4549_v2 = vsub.f32 %v4517_v1, %v4533_v41  ;;  %7978 = vrsqrt.f32 %v4598_v55  ;;  %v7973_v30 = vpop.eup %7972 }
 0xab3   : > { %v4427_v59 = vpop.xlane.xlu1 %4426  ;;  %v4576_v41 = vsub.f32 %v10470_v32, %v10594_v36  ;;  %v4577_v37 = vsub.f32 %v10478_v10, %v10588_v21  ;;  %v10661_v1 = vadd.f32 %v10616_v4, %v4640_v60  ;;  %v10663_v6 = vmul.f32 0.03125, %v4424_v19  ;;  %v7975_v53 = vpop.eup %7974 }
 0xab4   : > { %v4596_v54 = vadd.f32 1e-05, %v4564_v44  ;;  %v4565_v63 = vmax.f32 %v4549_v2, 0.0  ;;  %7980 = vrsqrt.f32 %v4599_v26  ;;  %v10667_v5 = vadd.f32 1e-07, %v4694_v48  ;;  %v7977_v26 = vpop.eup %7976 }
 0xab5   : > { %v4418_v25 = vpop.xlane.xlu0 %4417  ;;  %v4695_v14 = vmax.f32 %v11814_v3, 0.0  ;;  %v4626_v55 = vmul.f32 %v7971_v45, %v4578_v62  ;;  %v4582_v36 = vsub.f32 %v10500_v29, %v10608_v57  ;;  %v10674_v44 = vadd.f32 %v10616_v4, %v4641_v8 }
 0xab6   : > { %v4597_v22 = vadd.f32 1e-05, %v4565_v63  ;;  %7982 = vrsqrt.f32 %v4596_v54  ;;  %v10650_v9 = vmul.f32 0.03125, %v4418_v25  ;;  %v10676_v2 = vmul.f32 0.03125, %v4427_v59 }
 0xab7   : > { %v4421_v58 = vpop.xlane.xlu1 %4420  ;;  %v4625_v54 = vmul.f32 %v7973_v30, %v4577_v37  ;;  %v4583_v63 = vsub.f32 %v10509_v51, %v10610_v61  ;;  %v4580_v45 = vsub.f32 %v10506_v40, %v10619_v20  ;;  %v4538_v59 = vmul.f32 %v10663_v6, %v10663_v6 }
 0xab8   : > { %7984 = vrsqrt.f32 %v4597_v22  ;;  %v10665_v46 = vmul.f32 0.03125, %v4421_v58  ;;  %v4536_v19 = vmul.f32 %v10650_v9, %v10650_v9  ;;  %v4646_v8 = vmul.f32 %v10606_v15, %v4626_v55 }
 0xab9   : > { %v4498_v50 = vpop.xlane.xlu0 %4497  ;;  %v4627_v30 = vmul.f32 %v7975_v53, %v4579_v49  ;;  %v4624_v62 = vmul.f32 %v7977_v26, %v4576_v41  ;;  %v4645_v20 = vmul.f32 %v10606_v15, %v4625_v54 }
 0xaba   : > { %v4520_v12 = vmul.f32 0.03125, %v4498_v50  ;;  %v4537_v25 = vmul.f32 %v10665_v46, %v10665_v46  ;;  %v10695_v26 = vadd.f32 %v10616_v4, %v4646_v8  ;;  %v10706_v8 = vadd.f32 1e-07, %v4695_v14 }
 0xabb   : > { %v4501_v21 = vpop.xlane.xlu1 %4500  ;;  %v4644_v54 = vmul.f32 %v10606_v15, %v4624_v62 }
 0xabc   : > { %v4521_v60 = vmul.f32 0.03125, %v4501_v21  ;;  %v7979_v22 = vpop.eup %7978  ;;  %v4552_v48 = vsub.f32 %v4520_v12, %v4536_v19  ;;  %v4539_v21 = vmul.f32 %v10676_v2, %v10676_v2 }
 0xabd   : > { %v4504_v57 = vpop.xlane.xlu0 %4503  ;;  %v4630_v19 = vmul.f32 %v7979_v22, %v4582_v36  ;;  %v11819_v36 = vmax.f32 %v10661_v1, 0.0 }
 0xabe   : > { %v4522_v58 = vmul.f32 0.03125, %v4504_v57  ;;  %v4553_v37 = vsub.f32 %v4521_v60, %v4537_v25  ;;  %v7981_v50 = vpop.eup %7980  ;;  %v4568_v3 = vmax.f32 %v4552_v48, 0.0  ;;  %v4647_v25 = vmul.f32 %v10606_v15, %v4627_v30 }
 0xabf   : > { %v4507_v61 = vpop.xlane.xlu1 %4506  ;;  %v4631_v55 = vmul.f32 %v7981_v50, %v4583_v63  ;;  %v10701_v63 = vadd.f32 %v10616_v4, %v4645_v20  ;;  %v11818_v30 = vmax.f32 %v10674_v44, 0.0  ;;  %v10715_v50 = vadd.f32 %v10616_v4, %v4644_v54 }
 0xac0   : > { %v4554_v31 = vsub.f32 %v4522_v58, %v4538_v59  ;;  %v4523_v38 = vmul.f32 0.03125, %v4507_v61  ;;  %v4569_v12 = vmax.f32 %v4553_v37, 0.0  ;;  %v7983_v57 = vpop.eup %7982  ;;  %v4600_v49 = vadd.f32 1e-05, %v4568_v3 }
 0xac1   : > { %v4628_v60 = vmul.f32 %v7983_v57, %v4580_v45  ;;  %11982 = vst [vmem:[#allocation19_spill] sm:$0xff] %v10701_v63  ;;  %v4651_v3 = vmul.f32 %v10606_v15, %v4631_v55  ;;  %v11816_v37 = vmax.f32 %v10695_v26, 0.0  ;;  %v10712_v61 = vadd.f32 %v10616_v4, %v4647_v25  ;;  %11984 = vst [vmem:[#allocation8_spill] sm:$0xff] %v10715_v50 }
 0xac2   : > { %v4570_v41 = vmax.f32 %v4554_v31, 0.0  ;;  %v4555_v53 = vsub.f32 %v4523_v38, %v4539_v21  ;;  %v4601_v59 = vadd.f32 1e-05, %v4569_v12  ;;  %v7985_v48 = vpop.eup %7984  ;;  %7986 = vrsqrt.f32 %v4600_v49 }
 0xac3   : > { %v4650_v38 = vmul.f32 %v10606_v15, %v4630_v19  ;;  %v4629_v31 = vmul.f32 %v7985_v48, %v4581_v43  ;;  %v4648_v22 = vmul.f32 %v10606_v15, %v4628_v60  ;;  %11983 = vst [vmem:[#allocation10_spill] sm:$0xff] %v10712_v61  ;;  %v11817_v43 = vmax.f32 %v10701_v63, 0.0 }
 0xac4   : > { %v4602_v58 = vadd.f32 1e-05, %v4570_v41  ;;  %v4571_v28 = vmax.f32 %v4555_v53, 0.0  ;;  %7988 = vrsqrt.f32 %v4601_v59  ;;  %v10720_v21 = vmul.f32 %v10648_v56, %v10667_v5 }
 0xac5   : > { %v4649_v62 = vmul.f32 %v10606_v15, %v4629_v31  ;;  %v4692_v20 = vmax.f32 %v11819_v36, 0.0  ;;  %v10728_v19 = vadd.f32 %v10616_v4, %v4650_v38  ;;  %v10731_v12 = vadd.f32 %v10616_v4, %v4651_v3 }
 0xac6   : > { %v4603_v45 = vadd.f32 1e-05, %v4571_v28  ;;  %7990 = vrsqrt.f32 %v4602_v58  ;;  %v10734_v57 = vadd.f32 %v10616_v4, %v4648_v22  ;;  %v10738_v55 = vmul.f32 %v10648_v56, %v10706_v8 }
 0xac7   : > { %v10723_v14 = vadd.f32 %v10616_v4, %v4649_v62  ;;  %11986 = vst [vmem:[#allocation21_spill] sm:$0xff] %v10728_v19  ;;  %11987 = vst [vmem:[#allocation22_spill] sm:$0xff] %v10731_v12  ;;  %v4693_v49 = vmax.f32 %v11818_v30, 0.0  ;;  %v4698_v41 = vmax.f32 %v11816_v37, 0.0  ;;  %v11820_v53 = vmax.f32 %v10712_v61, 0.0 }
 0xac8   : > { %11988 = vst [vmem:[#allocation23_spill] sm:$0xff] %v10734_v57  ;;  %7992 = vrsqrt.f32 %v4603_v45  ;;  %v11821_v25 = vmax.f32 %v10715_v50, 0.0  ;;  %v10749_v59 = vsel %vm1875_vm0, %v10720_v21, -inf  ;;  %v4584_v48 = vsub.f32 %v10547_v0, %v10650_v9 }
 0xac9   : > { %11985 = vst [vmem:[#allocation20_spill] sm:$0xff] %v10723_v14  ;;  %v11822_v60 = vmax.f32 %v10723_v14, 0.0  ;;  %v10753_v54 = vadd.f32 1e-07, %v4692_v20  ;;  %v4697_v28 = vmax.f32 %v11817_v43, 0.0  ;;  %v11827_v38 = vmax.f32 %v10728_v19, 0.0 }
 0xaca   : > { %v11826_v31 = vmax.f32 %v10731_v12, 0.0  ;;  %v10762_v22 = vsel %vm1875_vm0, %v10738_v55, -inf  ;;  %v4585_v45 = vsub.f32 %v10552_v24, %v10665_v46  ;;  %v10766_v62 = vadd.f32 1e-07, %v4693_v49 }
 0xacb   : > { %v10768_v37 = vadd.f32 1e-07, %v4698_v41  ;;  %v4699_v43 = vmax.f32 %v11820_v53, 0.0  ;;  %v4696_v30 = vmax.f32 %v11821_v25, 0.0  ;;  %v4701_v36 = vmax.f32 %v11822_v60, 0.0 }
 0xacc   : > { %v7987_v58 = vpop.eup %7986  ;;  %v4586_v3 = vsub.f32 %v10536_v23, %v10663_v6  ;;  %v10781_v49 = vmul.f32 %v10648_v56, %v10753_v54  ;;  %v4702_v53 = vmax.f32 %v11827_v38, 0.0  ;;  %v4703_v25 = vmax.f32 %v11826_v31, 0.0 }
 0xacd   : > { %v4632_v9 = vmul.f32 %v7987_v58, %v4584_v48  ;;  %v10783_v58 = vadd.f32 1e-07, %v4697_v28  ;;  %v11989_v60 = vmax.f32 %v10734_v57, 0.0  ;;  %v4587_v6 = vsub.f32 %v10542_v7, %v10676_v2 }
 0xace   : > { %v7989_v20 = vpop.eup %7988  ;;  %v10797_v23 = vadd.f32 1e-07, %v4699_v43  ;;  %v10799_v0 = vadd.f32 1e-07, %v4696_v30  ;;  %v10803_v31 = vmul.f32 %v10648_v56, %v10768_v37  ;;  %v10805_v38 = vadd.f32 1e-07, %v4701_v36 }
 0xacf   : > { %v4652_v46 = vmul.f32 %v10606_v15, %v4632_v9  ;;  %v4633_v48 = vmul.f32 %v7989_v20, %v4585_v45  ;;  %v4700_v24 = vmax.f32 %v11989_v60, 0.0  ;;  %v10814_v43 = vadd.f32 1e-07, %v4703_v25 }
 0xad0   : > { %v7991_v41 = vpop.eup %7990  ;;  %v4730_v25 = vmul.f32 %v10648_v56, %v10766_v62  ;;  %v4745_v33 = vsel %vm1875_vm0, %v10781_v49, -inf }
 0xad1   : > { %v10794_v45 = vadd.f32 %v10616_v4, %v4652_v46  ;;  %v4653_v9 = vmul.f32 %v10606_v15, %v4633_v48  ;;  %v4634_v20 = vmul.f32 %v7991_v41, %v4586_v3  ;;  %v10812_v3 = vadd.f32 1e-07, %v4702_v53 }
 0xad2   : > { %v7993_v28 = vpop.eup %7992  ;;  %v10816_v30 = vadd.f32 1e-07, %v4700_v24  ;;  %v10820_v41 = vmul.f32 %v10648_v56, %v10783_v58  ;;  %v10831_v53 = vmul.f32 %v10648_v56, %v10797_v23  ;;  %v10835_v24 = vmul.f32 %v10648_v56, %v10805_v38 }
 0xad3   : > { %11990 = vst [vmem:[#allocation24_spill] sm:$0xff] %v10794_v45  ;;  %v11829_v60 = vmax.f32 %v10794_v45, 0.0  ;;  %v10809_v2 = vadd.f32 %v10616_v4, %v4653_v9  ;;  %v4654_v46 = vmul.f32 %v10606_v15, %v4634_v20  ;;  %v4635_v48 = vmul.f32 %v7993_v28, %v4587_v6 }
 0xad4   : > { %v10841_v20 = vmul.f32 %v10648_v56, %v10799_v0  ;;  %v10855_v51 = vmul.f32 %v10648_v56, %v10812_v3  ;;  %v10859_v29 = vmul.f32 %v10648_v56, %v10814_v43  ;;  %v4755_v40 = vsel %vm1875_vm0, %v10831_v53, -inf }
 0xad5   : > { %11991 = vst [vmem:[#allocation26_spill] sm:$0xff] %v10809_v2  ;;  %v4704_v36 = vmax.f32 %v11829_v60, 0.0  ;;  %v11832_v7 = vmax.f32 %v10809_v2, 0.0  ;;  %v10826_v9 = vadd.f32 %v10616_v4, %v4654_v46  ;;  %v4655_v6 = vmul.f32 %v10606_v15, %v4635_v48 }
 0xad6   : > { %v4753_v60 = vsel %vm1875_vm0, %v10803_v31, -inf  ;;  %v4746_v11 = vsel %vm1875_vm0, %v4730_v25, -inf  ;;  %v4749_v52 = vsel %vm1875_vm0, %v10841_v20, -inf  ;;  %v4759_v10 = vsel %vm1875_vm0, %v10835_v24, -inf }
 0xad7   : > { %11992 = vst [vmem:[#allocation25_spill] sm:$0xff] %v10826_v9  ;;  %v10843_v28 = vadd.f32 1e-07, %v4704_v36  ;;  %v4705_v15 = vmax.f32 %v11832_v7, 0.0  ;;  %v11838_v46 = vmax.f32 %v10826_v9, 0.0  ;;  %v10849_v48 = vadd.f32 %v10616_v4, %v4655_v6 }
 0xad8   : > { %v4751_v36 = vsel %vm1875_vm0, %v10820_v41, -inf  ;;  %v10865_v7 = vmul.f32 %v10648_v56, %v10816_v30  ;;  %v4761_v17 = vsel %vm1875_vm0, %v10855_v51, -inf  ;;  %v4763_v39 = vsel %vm1875_vm0, %v10859_v29, -inf }
 0xad9   : > { %11993 = vst [vmem:[#allocation27_spill] sm:$0xff] %v10849_v48  ;;  %v10867_v4 = vadd.f32 1e-07, %v4705_v15  ;;  %v4706_v6 = vmax.f32 %v11838_v46, 0.0  ;;  %v10881_v15 = vmul.f32 %v10648_v56, %v10843_v28  ;;  %v11994_v32 = vmax.f32 %v10849_v48, 0.0 }
 0xada   : > { %v4752_v42 = vmax.f32 %v4746_v11, %v4751_v36  ;;  %v4754_v18 = vmax.f32 %v10749_v59, %v4753_v60  ;;  %v4756_v2 = vmax.f32 %v10762_v22, %v4755_v40  ;;  %v4750_v45 = vmax.f32 %v4745_v33, %v4749_v52 }
 0xadb   : > { %v10885_v46 = vmul.f32 %v10648_v56, %v10867_v4  ;;  %v10887_v27 = vadd.f32 1e-07, %v4706_v6  ;;  %v4707_v47 = vmax.f32 %v11994_v32, 0.0  ;;  %v4757_v6 = vsel %vm1875_vm0, %v10865_v7, -inf }
 0xadc   : > { %v4760_v48 = vmax.f32 %v4752_v42, %v4759_v10  ;;  %v4762_v9 = vmax.f32 %v4754_v18, %v4761_v17  ;;  %v4764_v14 = vmax.f32 %v4756_v2, %v4763_v39  ;;  %v4758_v57 = vmax.f32 %v4750_v45, %v4757_v6 }
 0xadd   : > { %v10899_v35 = vmul.f32 %v10648_v56, %v10887_v27  ;;  %v10901_v16 = vadd.f32 1e-07, %v4707_v47  ;;  %v4767_v32 = vsel %vm1875_vm0, %v10885_v46, -inf  ;;  %v4765_v47 = vsel %vm1875_vm0, %v10881_v15, -inf }
 0xade   : > { %v4768_v12 = vmax.f32 %v4760_v48, %v4767_v32  ;;  %v4766_v42 = vmax.f32 %v4758_v57, %v4765_v47 }
 0xadf   : > { %v4769_v11 = vsel %vm1875_vm0, %v10899_v35, -inf  ;;  %v10913_v36 = vmul.f32 %v10648_v56, %v10901_v16 }
 0xae0   : > { %v4770_v40 = vmax.f32 %v4762_v9, %v4769_v11  ;;  %v4773_v10 = vmax.f32 %v4766_v42, %v4768_v12 }
 0xae1   : > { %v4771_v59 = vsel %vm1875_vm0, %v10913_v36, -inf }
 0xae2   : > { %v4772_v33 = vmax.f32 %v4764_v14, %v4771_v59 }
 0xae4   : > { %v4774_v52 = vmax.f32 %v4770_v40, %v4772_v33 }
 0xae6   : > { %v4775_v22 = vmax.f32 %v4773_v10, %v4774_v52 }
 0xae8   : > { %v4776_v60 = vrot.slane %v4775_v22, 4 }
 0xaea   : > { %v4777_v19 = vmax.f32 %v4775_v22, %v4776_v60 }
 0xaec   : > { %v4778_v56 = vrot.slane %v4777_v19, 2 }
 0xaee   : > { %v4779_v63 = vmax.f32 %v4777_v19, %v4778_v56 }
 0xaf0   : > { %v4780_v61 = vrot.slane %v4779_v63, 1 }
 0xaf2   : > { %v10919_v50 = vmax.f32 %v4779_v63, %v4780_v61 }
 0xaf4   : > { %v4782_v18 = vsub.f32 %v10781_v49, %v10919_v50  ;;  %v4783_v17 = vsub.f32 %v4730_v25, %v10919_v50  ;;  %v4784_v39 = vsub.f32 %v10720_v21, %v10919_v50  ;;  %v4785_v14 = vsub.f32 %v10738_v55, %v10919_v50 }
 0xaf5   : > { %v4786_v12 = vsub.f32 %v10841_v20, %v10919_v50  ;;  %v4787_v19 = vsub.f32 %v10820_v41, %v10919_v50  ;;  %v4788_v49 = vsub.f32 %v10803_v31, %v10919_v50  ;;  %v4789_v2 = vsub.f32 %v10831_v53, %v10919_v50 }
 0xaf6   : > { %v4798_v57 = vmul.f32 1.442695, %v4782_v18  ;;  %v4800_v63 = vmul.f32 1.442695, %v4783_v17  ;;  %v4802_v61 = vmul.f32 1.442695, %v4784_v39  ;;  %v4790_v25 = vsub.f32 %v10865_v7, %v10919_v50 }
 0xaf7   : > { %v4804_v45 = vmul.f32 1.442695, %v4785_v14  ;;  %v4806_v21 = vmul.f32 1.442695, %v4786_v12  ;;  %v4808_v55 = vmul.f32 1.442695, %v4787_v19  ;;  %v4791_v20 = vsub.f32 %v10835_v24, %v10919_v50 }
 0xaf8   : > { %7994 = vpow2.f32 %v4798_v57  ;;  %v4810_v9 = vmul.f32 1.442695, %v4788_v49  ;;  %v4812_v41 = vmul.f32 1.442695, %v4789_v2  ;;  %v4814_v31 = vmul.f32 1.442695, %v4790_v25 }
 0xaf9   : > { %7996 = vpow2.f32 %v4800_v63  ;;  %v4792_v53 = vsub.f32 %v10855_v51, %v10919_v50  ;;  %v4816_v48 = vmul.f32 1.442695, %v4791_v20  ;;  %v4793_v6 = vsub.f32 %v10859_v29, %v10919_v50 }
 0xafa   : > { %7998 = vpow2.f32 %v4802_v61  ;;  %v4794_v7 = vsub.f32 %v10881_v15, %v10919_v50  ;;  %v4795_v40 = vsub.f32 %v10885_v46, %v10919_v50  ;;  %v4796_v15 = vsub.f32 %v10899_v35, %v10919_v50 }
 0xafb   : > { %8000 = vpow2.f32 %v4804_v45  ;;  %v4818_v11 = vmul.f32 1.442695, %v4792_v53  ;;  %v4820_v59 = vmul.f32 1.442695, %v4793_v6 }
 0xafc   : > { %8002 = vpow2.f32 %v4806_v21  ;;  %v4822_v10 = vmul.f32 1.442695, %v4794_v7  ;;  %v4824_v46 = vmul.f32 1.442695, %v4795_v40  ;;  %v4826_v12 = vmul.f32 1.442695, %v4796_v15 }
 0xafd   : > { %8004 = vpow2.f32 %v4808_v55  ;;  %v7732_v40 = vld [vmem:[%s11744_s3 + $0x20] sm:$0xff]  }
 0xafe   : > { %8006 = vpow2.f32 %v4810_v9 }
 0xaff   : > { %8008 = vpow2.f32 %v4812_v41 }
 0xb00   : > { %8010 = vpow2.f32 %v4814_v31 }
 0xb01   : > { %8012 = vpow2.f32 %v4816_v48 }
 0xb02   : > { %v7995_v32 = vpop.eup %7994  ;;  %8014 = vpow2.f32 %v4818_v11  ;;  %v8134_v11 = vld [vmem:[%s8779_s7 + $0x10] sm:$0xff]  }
 0xb03   : > { %v7997_v47 = vpop.eup %7996  ;;  %v4830_v24 = vmul.f32 %v7995_v32, %v10753_v54  ;;  %8016 = vpow2.f32 %v4820_v59  ;;  %v8139_v59 = vld [vmem:[%s8779_s7 + $0x38] sm:$0xff]  }
 0xb04   : > { %v7999_v51 = vpop.eup %7998  ;;  %v4951_v33 = vpack.c.bf16 %v7997_v47, %v7995_v32  ;;  %v4831_v42 = vmul.f32 %v7997_v47, %v10766_v62  ;;  %v4797_v62 = vsub.f32 %v10913_v36, %v10919_v50  ;;  %8018 = vpow2.f32 %v4822_v10  ;;  %v8137_v47 = vld [vmem:[%s8779_s7 + $0x28] sm:$0xff]  }
 0xb05   : > { %v8001_v52 = vpop.eup %8000  ;;  %v4832_v29 = vmul.f32 %v7999_v51, %v10667_v5  ;;  %8020 = vpow2.f32 %v4824_v46 }
 0xb06   : > { %v8003_v22 = vpop.eup %8002  ;;  %7331 = vmatprep.subr.bf16.mxu0 %v4951_v33  ;;  %v4846_v60 = vpack.c.bf16 %v4831_v42, %v4830_v24  ;;  %v4952_v54 = vpack.c.bf16 %v8001_v52, %v7999_v51  ;;  %v4833_v56 = vmul.f32 %v8001_v52, %v10706_v8  ;;  %v4828_v19 = vmul.f32 1.442695, %v4797_v62  ;;  %v8138_v24 = vld [vmem:[%s8779_s7 + $0x30] sm:$0xff]   ;;  %v7733_v51 = vld [vmem:[%s11744_s3 + $0x28] sm:$0xff]  }
 0xb07   : > { %v8005_v18 = vpop.eup %8004  ;;  %7332 = vmatpush3.bf16.msra.mxu0 %v4951_v33  ;;  %v4834_v35 = vmul.f32 %v8003_v22, %v10799_v0  ;;  %8022 = vpow2.f32 %v4826_v12 }
 0xb08   : > { %v8007_v17 = vpop.eup %8006  ;;  %7299 = vmatprep.subr.bf16.mxu1 %v4846_v60  ;;  %7333 = vmatprep.subr.bf16.mxu0 %v4952_v54  ;;  %v4847_v5 = vpack.c.bf16 %v4833_v56, %v4832_v29  ;;  %v4835_v39 = vmul.f32 %v8005_v18, %v10783_v58  ;;  %v4953_v8 = vpack.c.bf16 %v8005_v18, %v8003_v22  ;;  %8024 = vpow2.f32 %v4828_v19 }
 0xb09   : > { %v8009_v14 = vpop.eup %8008  ;;  %7300 = vmatpush3.bf16.msra.mxu1 %v4846_v60  ;;  %v4836_v36 = vmul.f32 %v8007_v17, %v10768_v37 }
 0xb0a   : > { %7301 = vmatprep.subr.bf16.mxu1 %v4847_v5  ;;  %v8011_v57 = vpop.eup %8010  ;;  %v4848_v50 = vpack.c.bf16 %v4835_v39, %v4834_v35  ;;  %v4837_v63 = vmul.f32 %v8009_v14, %v10797_v23  ;;  %v4954_v0 = vpack.c.bf16 %v8009_v14, %v8007_v17 }
 0xb0b   : > { %7334 = vmatpush3.bf16.msra.mxu0 %v4952_v54  ;;  %v8013_v61 = vpop.eup %8012  ;;  %v4838_v45 = vmul.f32 %v8011_v57, %v10816_v30 }
 0xb0c   : > { %7335 = vmatprep.subr.bf16.mxu0 %v4953_v8  ;;  %v8015_v58 = vpop.eup %8014  ;;  %v4849_v49 = vpack.c.bf16 %v4837_v63, %v4836_v36  ;;  %v4839_v2 = vmul.f32 %v8013_v61, %v10805_v38  ;;  %v4955_v37 = vpack.c.bf16 %v8013_v61, %v8011_v57 }
 0xb0d   : > { %7302 = vmatpush3.bf16.msra.mxu1 %v4847_v5  ;;  %v8017_v21 = vpop.eup %8016  ;;  %v4840_v9 = vmul.f32 %v8015_v58, %v10812_v3 }
 0xb0e   : > { %7303 = vmatprep.subr.bf16.mxu1 %v4848_v50  ;;  %v8019_v23 = vpop.eup %8018  ;;  %v4850_v55 = vpack.c.bf16 %v4839_v2, %v4838_v45  ;;  %v4841_v25 = vmul.f32 %v8017_v21, %v10814_v43  ;;  %v4956_v20 = vpack.c.bf16 %v8017_v21, %v8015_v58 }
 0xb0f   : > { %7336 = vmatpush3.bf16.msra.mxu0 %v4953_v8  ;;  %v8021_v41 = vpop.eup %8020  ;;  %v4842_v31 = vmul.f32 %v8019_v23, %v10843_v28 }
 0xb10   : > { %7337 = vmatprep.subr.bf16.mxu0 %v4954_v0  ;;  %v4851_v38 = vpack.c.bf16 %v4841_v25, %v4840_v9  ;;  %v4843_v53 = vmul.f32 %v8021_v41, %v10867_v4  ;;  %v4957_v6 = vpack.c.bf16 %v8021_v41, %v8019_v23  ;;  %v8133_v4 = vld [vmem:[%s8779_s7 + $0x8] sm:$0xff]   ;;  %v11995_v23 = vmax.f32 %v10632_v34, 0.0 }
 0xb11   : > { %7304 = vmatpush3.bf16.msra.mxu1 %v4848_v50  ;;  %v8023_v30 = vpop.eup %8022 }
 0xb12   : > { %7305 = vmatprep.subr.bf16.mxu1 %v4849_v49  ;;  %v8025_v48 = vpop.eup %8024  ;;  %v4852_v3 = vpack.c.bf16 %v4843_v53, %v4842_v31  ;;  %v4844_v43 = vmul.f32 %v8023_v30, %v10887_v27  ;;  %v8136_v27 = vld [vmem:[%s8779_s7 + $0x20] sm:$0xff]  }
 0xb13   : > { %7338 = vmatpush3.bf16.msra.mxu0 %v4954_v0  ;;  %v4845_v7 = vmul.f32 %v8025_v48, %v10901_v16  ;;  %v4958_v32 = vpack.c.bf16 %v8025_v48, %v8023_v30  ;;  %v8135_v16 = vld [vmem:[%s8779_s7 + $0x18] sm:$0xff]   ;;  %v11997_v48 = vmax.f32 %v10641_v13, 0.0  ;;  %s6596_s7 = sshll.u32 %s8305_s25, 4  ;;  %s8248_s25 = smov [#allocation5]  }
 0xb14   : > { %7339 = vmatprep.subr.bf16.mxu0 %v4955_v37  ;;  %s11697_s15 = scalar_lea.hbm %s11747_s6, %s6596_s7  ;;  %s8177_s19 = sshll.u32 %s8248_s25, 4  ;;  %s8178_s19 = int_to_ptr.vmem [resolvable:$false] %s8177_s19 }
 0xb15   : > { %7306 = vmatpush3.bf16.msra.mxu1 %v4849_v49  ;;  %v4853_v28 = vpack.c.bf16 %v4845_v7, %v4844_v43  ;;  %s8179_s10 = scalar_lea.vmem %s8178_s19, 32  ;;  %p8180_p10 = scmp.lt.s32.totalorder %s11699_s26, %s8178_s19 }
 0xb16   : > { %7307 = vmatprep.subr.bf16.mxu1 %v4850_v55  ;;  %p8181_p0 = scmp.lt.s32.totalorder %s8179_s10, %s8173_s18 }
 0xb17   : > { %7340 = vmatpush3.bf16.msra.mxu0 %v4955_v37 }
 0xb18   : > { %7341 = vmatprep.subr.bf16.mxu0 %v4956_v20  ;;  %p8182_p2 = por %p8181_p0, %p8180_p10 }
 0xb19   : > { %7308 = vmatpush3.bf16.msra.mxu1 %v4850_v55 }
 0xb1a   : > { %7309 = vmatprep.subr.bf16.mxu1 %v4851_v38  ;;  %p8183_p4 = pnand %p8182_p2, %p8176_p8 }
 0xb1b   : > { %7342 = vmatpush3.bf16.msra.mxu0 %v4956_v20  ;;  %v11996_v20 = vmax.f32 %v10661_v1, 0.0 }
 0xb1c   : > { %7343 = vmatprep.subr.bf16.mxu0 %v4957_v6 }
 0xb1d   : > { %7310 = vmatpush3.bf16.msra.mxu1 %v4851_v38 }
 0xb1e   : > { %7311 = vmatprep.subr.bf16.mxu1 %v4852_v3 }
 0xb1f   : > { %7344 = vmatpush3.bf16.msra.mxu0 %v4957_v6 }
 0xb20   : > { %7345 = vmatprep.subr.bf16.mxu0 %v4958_v32 }
 0xb21   : > { %7312 = vmatpush3.bf16.msra.mxu1 %v4852_v3 }
 0xb22   : > { %7313 = vmatprep.subr.bf16.mxu1 %v4853_v28 }
 0xb23   : > { %7346 = vmatpush3.bf16.msra.mxu0 %v4958_v32  ;;  %v11998_v32 = vmax.f32 %v10674_v44, 0.0 }
 0xb25   : > { %7314 = vmatpush3.bf16.msra.mxu1 %v4853_v28 }
 0xb26   : > { %7348 = vmatmul.mubr.bf16.vlgmr.msra.gmra.mrb[144].mxu0 %v8133_v4  ;;  %7363 = vmatprep.subr.bf16.mxu1 %v7732_v40 }
 0xb27   : > { %7351 = vmatprep.mubr.bf16.mxu0 %v8134_v11 }
 0xb28   : > { %7316 = vmatmul.mubr.bf16.vlgmr.msra.gmra.mrb[128].mxu1 %v8133_v4 }
 0xb29   : > { %7319 = vmatprep.mubr.bf16.mxu1 %v8134_v11  ;;  %7364 = vmatpush3.bf16.msra.mxu1 %v7732_v40 }
 0xb2a   : > { %7365 = vmatprep.subr.bf16.mxu1 %v7733_v51 }
 0xb2d   : > { %7366 = vmatpush3.bf16.msra.mxu1 %v7733_v51 }
 0xb2e   : > { %7352 = vmatmul.mubr.bf16.gmra.mrb[148].mxu0 %v8135_v16 }
 0xb2f   : > { %7355 = vmatprep.mubr.bf16.mxu0 %v8136_v27 }
 0xb30   : > { %7320 = vmatmul.mubr.bf16.gmra.mrb[132].mxu1 %v8135_v16 }
 0xb31   : > { %7323 = vmatprep.mubr.bf16.mxu1 %v8136_v27 }
 0xb36   : > { %7356 = vmatmul.mubr.bf16.gmra.mrb[152].mxu0 %v8137_v47 }
 0xb37   : > { %7359 = vmatprep.mubr.bf16.mxu0 %v8138_v24 }
 0xb38   : > { %7324 = vmatmul.mubr.bf16.gmra.mrb[136].mxu1 %v8137_v47 }
 0xb39   : > { %7327 = vmatprep.mubr.bf16.mxu1 %v8138_v24 }
 0xb3e   : > { %7360 = vmatmul.mubr.bf16.gmra.mrb[156].mxu0 %v8139_v59 }
 0xb40   : > { %7328 = vmatmul.mubr.bf16.gmra.mrb[140].mxu1 %v8139_v59 }
 0xbf9   : > { %v7349_v33 = vpop.f32.mrb[144].mxu0 }
 0xbfa   : > { %vm5058_vm5 = vcmp.gt.f32.partialorder %v7349_v33, 0.0  ;;  %v4993_v42 = vpop.f32.mrb[145].mxu0 }
 0xbfb   : > { %v5074_v52 = vsel %vm5058_vm5, %v7349_v33, 1.0  ;;  %vm5056_vm6 = vcmp.gt.f32.partialorder %v4993_v42, 0.0  ;;  %v7350_v29 = vpop.f32.mrb[146].mxu0  ;;  %v7317_v10 = vpop.f32.mrb[128].mxu1 }
 0xbfc   : > { %8026 = vrcp.f32 %v5074_v52  ;;  %v5072_v15 = vsel %vm5056_vm6, %v4993_v42, 1.0  ;;  %vm5059_vm7 = vcmp.gt.f32.partialorder %v7350_v29, 0.0  ;;  %v4996_v22 = vpop.f32.mrb[147].mxu0  ;;  %v4888_v60 = vpop.f32.mrb[129].mxu1 }
 0xbfd   : > { %8028 = vrcp.f32 %v5072_v15  ;;  %v5075_v54 = vsel %vm5059_vm7, %v7350_v29, 1.0  ;;  %vm5057_vm8 = vcmp.gt.f32.partialorder %v4996_v22, 0.0  ;;  %v7318_v56 = vpop.f32.mrb[130].mxu1 }
 0xbfe   : > { %8030 = vrcp.f32 %v5075_v54  ;;  %v5073_v18 = vsel %vm5057_vm8, %v4996_v22, 1.0  ;;  %v4891_v46 = vpop.f32.mrb[131].mxu1 }
 0xbff   : > { %8032 = vrcp.f32 %v5073_v18 }
 0xc01   : > { %v10985_v62 = vpop.f32.mrb[148].mxu0 }
 0xc02   : > { %vm5062_vm9 = vcmp.gt.f32.partialorder %v10985_v62, 0.0  ;;  %v10988_v17 = vpop.f32.mrb[149].mxu0 }
 0xc03   : > { %v5078_v5 = vsel %vm5062_vm9, %v10985_v62, 1.0  ;;  %vm5060_vm10 = vcmp.gt.f32.partialorder %v10988_v17, 0.0  ;;  %v10994_v35 = vpop.f32.mrb[150].mxu0  ;;  %v7321_v39 = vpop.f32.mrb[132].mxu1 }
 0xc04   : > { %8034 = vrcp.f32 %v5078_v5  ;;  %v5076_v14 = vsel %vm5060_vm10, %v10988_v17, 1.0  ;;  %vm5063_vm11 = vcmp.gt.f32.partialorder %v10994_v35, 0.0  ;;  %v11000_v8 = vpop.f32.mrb[151].mxu0  ;;  %v4904_v12 = vpop.f32.mrb[133].mxu1 }
 0xc05   : > { %8036 = vrcp.f32 %v5076_v14  ;;  %v5079_v19 = vsel %vm5063_vm11, %v10994_v35, 1.0  ;;  %vm5061_vm12 = vcmp.gt.f32.partialorder %v11000_v8, 0.0  ;;  %v7322_v57 = vpop.f32.mrb[134].mxu1  ;;  %v12002_v14 = vld [vmem:[#allocation10_spill] sm:$0xff] }
 0xc06   : > { %v8027_v50 = vpop.eup %8026  ;;  %8038 = vrcp.f32 %v5079_v19  ;;  %v5077_v36 = vsel %vm5061_vm12, %v11000_v8, 1.0  ;;  %v4907_v63 = vpop.f32.mrb[135].mxu1 }
 0xc07   : > { %v8029_v61 = vpop.eup %8028  ;;  %8040 = vrcp.f32 %v5077_v36  ;;  %v5106_v0 = vmul.f32 %v8027_v50, %v7317_v10  ;;  %v11999_v10 = vmax.f32 %v10695_v26, 0.0 }
 0xc08   : > { %v8031_v58 = vpop.eup %8030  ;;  %v5104_v49 = vmul.f32 %v8029_v61, %v4888_v60 }
 0xc09   : > { %v8033_v45 = vpop.eup %8032  ;;  %v5122_v2 = vsel %vm5058_vm5, %v5106_v0, 0.0  ;;  %v5107_v21 = vmul.f32 %v8031_v58, %v7318_v56  ;;  %v11010_v37 = vpop.f32.mrb[152].mxu0  ;;  %v12000_v56 = vld [vmem:[#allocation8_spill] sm:$0xff] }
 0xc0a   : > { %v5138_v55 = vadd.f32 %v5122_v2, %v11995_v23  ;;  %v5120_v9 = vsel %vm5056_vm6, %v5104_v49, 0.0  ;;  %v5105_v25 = vmul.f32 %v8033_v45, %v4891_v46  ;;  %vm5066_vm13 = vcmp.gt.f32.partialorder %v11010_v37, 0.0  ;;  %v11016_v41 = vpop.f32.mrb[153].mxu0 }
 0xc0b   : > { %v5136_v30 = vadd.f32 %v5120_v9, %v11996_v20  ;;  %v5123_v38 = vsel %vm5059_vm7, %v5107_v21, 0.0  ;;  %v5082_v31 = vsel %vm5066_vm13, %v11010_v37, 1.0  ;;  %vm5064_vm14 = vcmp.gt.f32.partialorder %v11016_v41, 0.0  ;;  %v11025_v34 = vpop.f32.mrb[154].mxu0  ;;  %v7325_v53 = vpop.f32.mrb[136].mxu1  ;;  %vm11584_vm7 = vmpackc.low %vm1875_vm0, %vm1875_vm0 }
 0xc0c   : > { %v5139_v6 = vadd.f32 %v5123_v38, %v11997_v48  ;;  %v5121_v3 = vsel %vm5057_vm8, %v5105_v25, 0.0  ;;  %8042 = vrcp.f32 %v5082_v31  ;;  %v5080_v1 = vsel %vm5064_vm14, %v11016_v41, 1.0  ;;  %v11033_v43 = vpop.f32.mrb[155].mxu0  ;;  %v4920_v7 = vpop.f32.mrb[137].mxu1 }
 0xc0d   : > { %v5137_v28 = vadd.f32 %v5121_v3, %v11998_v32  ;;  %8044 = vrcp.f32 %v5080_v1  ;;  %vm5067_vm15 = vcmp.gt.f32.partialorder %v11025_v34, 0.0  ;;  %vm5065_vm1 = vcmp.gt.f32.partialorder %v11033_v43, 0.0  ;;  %v7326_v13 = vpop.f32.mrb[138].mxu1 }
 0xc0e   : > { %v8035_v4 = vpop.eup %8034  ;;  %v5153_v11 = vpack.c.bf16 %v5139_v6, %v5138_v55  ;;  %v5083_v16 = vsel %vm5067_vm15, %v11025_v34, 1.0  ;;  %v5081_v27 = vsel %vm5065_vm1, %v11033_v43, 1.0  ;;  %v4923_v47 = vpop.f32.mrb[139].mxu1  ;;  %v12001_v18 = vmax.f32 %v12000_v56, 0.0 }
 0xc0f   : > { %v8037_v24 = vpop.eup %8036  ;;  %v5152_v44 = vpack.c.bf16 %v5137_v28, %v5136_v30  ;;  %8046 = vrcp.f32 %v5083_v16  ;;  %v5110_v59 = vmul.f32 %v8035_v4, %v7321_v39 }
 0xc10   : > { %v8039_v40 = vpop.eup %8038  ;;  %8048 = vrcp.f32 %v5081_v27  ;;  %v5108_v51 = vmul.f32 %v8037_v24, %v4904_v12  ;;  %v12003_v12 = vmax.f32 %v12002_v14, 0.0  ;;  %v12020_v14 = vld [vmem:[#allocation26_spill] sm:$0xff] }
 0xc11   : > { %v8041_v33 = vpop.eup %8040  ;;  %v5126_v42 = vsel %vm5062_vm9, %v5110_v59, 0.0  ;;  %v5111_v52 = vmul.f32 %v8039_v40, %v7322_v57  ;;  %v7361_v29 = vpop.f32.mrb[156].mxu0  ;;  %7367 = vmatprep.mubr.msk.bf16.mxu1 %vm1875_vm0, %v5152_v44 }
 0xc12   : > { %v5142_v15 = vadd.f32 %v5126_v42, %v11999_v10  ;;  %v5124_v22 = vsel %vm5060_vm10, %v5108_v51, 0.0  ;;  %v5109_v60 = vmul.f32 %v8041_v33, %v4907_v63  ;;  %vm5070_vm3 = vcmp.gt.f32.partialorder %v7361_v29, 0.0  ;;  %v5041_v54 = vpop.f32.mrb[157].mxu0  ;;  %7368 = vmatmul.mubr.msk.bf16.vlgmr.msra.gmra.mrb[144].mxu1 %vm1875_vm0, %v5153_v11  ;;  %v12004_v63 = vld [vmem:[#allocation19_spill] sm:$0xff] }
 0xc13   : > { %v5140_v46 = vadd.f32 %v5124_v22, %v12001_v18  ;;  %v5127_v62 = vsel %vm5063_vm11, %v5111_v52, 0.0  ;;  %v5086_v5 = vsel %vm5070_vm3, %v7361_v29, 1.0  ;;  %vm5068_vm4 = vcmp.gt.f32.partialorder %v5041_v54, 0.0  ;;  %v7362_v39 = vpop.f32.mrb[158].mxu0  ;;  %v7329_v26 = vpop.f32.mrb[140].mxu1  ;;  %v12010_v11 = vld [vmem:[#allocation23_spill] sm:$0xff] }
 0xc14   : > { %v5143_v17 = vadd.f32 %v5127_v62, %v12003_v12  ;;  %v5125_v19 = vsel %vm5061_vm12, %v5109_v60, 0.0  ;;  %8050 = vrcp.f32 %v5086_v5  ;;  %v5084_v57 = vsel %vm5068_vm4, %v5041_v54, 1.0  ;;  %v5044_v50 = vpop.f32.mrb[159].mxu0  ;;  %v4936_v36 = vpop.f32.mrb[141].mxu1  ;;  %v12014_v22 = vld [vmem:[#allocation25_spill] sm:$0xff]  ;;  %v12016_v18 = vld [vmem:[#allocation27_spill] sm:$0xff] }
 0xc15   : > { %v12005_v61 = vmax.f32 %v12004_v63, 0.0  ;;  %8052 = vrcp.f32 %v5084_v57  ;;  %vm5071_vm5 = vcmp.gt.f32.partialorder %v7362_v39, 0.0  ;;  %vm5069_vm6 = vcmp.gt.f32.partialorder %v5044_v50, 0.0  ;;  %v7330_v0 = vpop.f32.mrb[142].mxu1  ;;  %v12018_v5 = vld [vmem:[#allocation24_spill] sm:$0xff] }
 0xc16   : > { %v8043_v58 = vpop.eup %8042  ;;  %v5155_v49 = vpack.c.bf16 %v5143_v17, %v5142_v15  ;;  %v5087_v45 = vsel %vm5071_vm5, %v7362_v39, 1.0  ;;  %v5085_v2 = vsel %vm5069_vm6, %v5044_v50, 1.0  ;;  %v4939_v8 = vpop.f32.mrb[143].mxu1  ;;  %v12011_v41 = vmax.f32 %v12010_v11, 0.0  ;;  %v11104_v39 = vld [vmem:[%s11746_s5 + $0x10] sm:$0xff] }
 0xc17   : > { %v5141_v35 = vadd.f32 %v5125_v19, %v12005_v61  ;;  %v8045_v21 = vpop.eup %8044  ;;  %8054 = vrcp.f32 %v5087_v45  ;;  %v5114_v55 = vmul.f32 %v8043_v58, %v7325_v53  ;;  %v12006_v53 = vld [vmem:[#allocation21_spill] sm:$0xff]  ;;  %v12015_v60 = vmax.f32 %v12014_v22, 0.0 }
 0xc18   : > { %8056 = vrcp.f32 %v5085_v2  ;;  %v5112_v9 = vmul.f32 %v8045_v21, %v4920_v7  ;;  %v12007_v3 = vmax.f32 %v12006_v53, 0.0  ;;  %v12008_v7 = vld [vmem:[#allocation22_spill] sm:$0xff]  ;;  %v12021_v12 = vmax.f32 %v12020_v14, 0.0 }
 0xc19   : > { %v5154_v23 = vpack.c.bf16 %v5141_v35, %v5140_v46  ;;  %v8047_v25 = vpop.eup %8046  ;;  %v5130_v20 = vsel %vm5066_vm13, %v5114_v55, 0.0  ;;  %v12009_v32 = vmax.f32 %v12008_v7, 0.0  ;;  %v12017_v46 = vmax.f32 %v12016_v18, 0.0 }
 0xc1a   : > { %v8049_v30 = vpop.eup %8048  ;;  %v5128_v38 = vsel %vm5064_vm14, %v5112_v9, 0.0  ;;  %v5115_v31 = vmul.f32 %v8047_v25, %v7326_v13  ;;  %v5146_v1 = vadd.f32 %v5130_v20, %v12007_v3  ;;  %v12012_v13 = vld [vmem:[#allocation20_spill] sm:$0xff] }
 0xc1b   : > { %7371 = vmatprep.mubr.msk.bf16.mxu1 %vm1875_vm0, %v5154_v23  ;;  %v5113_v48 = vmul.f32 %v8049_v30, %v4923_v47  ;;  %v5144_v16 = vadd.f32 %v5128_v38, %v12011_v41  ;;  %v12013_v27 = vmax.f32 %v12012_v13, 0.0 }
 0xc1c   : > { %7372 = vmatmul.mubr.msk.bf16.gmra.mrb[148].mxu1 %vm1875_vm0, %v5155_v49  ;;  %v5131_v6 = vsel %vm5067_vm15, %v5115_v31, 0.0 }
 0xc1d   : > { %v5147_v37 = vadd.f32 %v5131_v6, %v12009_v32  ;;  %v5129_v28 = vsel %vm5065_vm1, %v5113_v48, 0.0 }
 0xc1e   : > { %v8051_v4 = vpop.eup %8050  ;;  %v5145_v24 = vadd.f32 %v5129_v28, %v12013_v27 }
 0xc1f   : > { %v8053_v47 = vpop.eup %8052  ;;  %v5157_v44 = vpack.c.bf16 %v5147_v37, %v5146_v1  ;;  %v5118_v34 = vmul.f32 %v8051_v4, %v7329_v26  ;;  %v12019_v26 = vmax.f32 %v12018_v5, 0.0 }
 0xc20   : > { %v5156_v59 = vpack.c.bf16 %v5145_v24, %v5144_v16  ;;  %v5116_v40 = vmul.f32 %v8053_v47, %v4936_v36  ;;  %v12022_v36 = vld [vmem:[#allocation9_spill] sm:$0xff] }
 0xc21   : > { %v8055_v51 = vpop.eup %8054  ;;  %v5134_v33 = vsel %vm5070_vm3, %v5118_v34, 0.0  ;;  %v11108_v50 = vrot.slane %v11104_v39, %v12022_v36 }
 0xc22   : > { %v8057_v42 = vpop.eup %8056  ;;  %v5132_v52 = vsel %vm5068_vm4, %v5116_v40, 0.0  ;;  %v5119_v43 = vmul.f32 %v8055_v51, %v7330_v0  ;;  %7375 = vmatprep.mubr.msk.bf16.mxu1 %vm1875_vm0, %v5156_v59  ;;  %v5150_v56 = vadd.f32 %v5134_v33, %v12015_v60 }
 0xc23   : > { %v5117_v10 = vmul.f32 %v8057_v42, %v4939_v8  ;;  %v5148_v54 = vadd.f32 %v5132_v52, %v12019_v26 }
 0xc24   : > { %7376 = vmatmul.mubr.msk.bf16.gmra.mrb[152].mxu1 %vm1875_vm0, %v5157_v44  ;;  %v5135_v15 = vsel %vm5071_vm5, %v5119_v43, 0.0 }
 0xc25   : > { %v5151_v62 = vadd.f32 %v5135_v15, %v12017_v46  ;;  %v5133_v29 = vsel %vm5069_vm6, %v5117_v10, 0.0 }
 0xc26   : > { %v5149_v17 = vadd.f32 %v5133_v29, %v12021_v12 }
 0xc27   : > { %v5159_v19 = vpack.c.bf16 %v5151_v62, %v5150_v56 }
 0xc28   : > { %v5158_v57 = vpack.c.bf16 %v5149_v17, %v5148_v54 }
 0xc2a   : > { %7379 = vmatprep.mubr.msk.bf16.mxu1 %vm1875_vm0, %v5158_v57 }
 0xc2c   : > { %7380 = vmatmul.mubr.msk.bf16.gmra.mrb[156].mxu1 %vm1875_vm0, %v5159_v19 }
 0xce5   : > { %v7369_v63 = vpop.f32.mrb[144].mxu1 }
 0xce6   : > { %v11111_v61 = vadd.f32 %v7369_v63, %v11108_v50  ;;  %v5239_v35 = vpop.f32.mrb[145].mxu1 }
 0xce7   : > { %v11114_v0 = vadd.f32 %v5239_v35, %v11108_v50  ;;  %v7370_v58 = vpop.f32.mrb[146].mxu1 }
 0xce8   : > { %v11117_v49 = vadd.f32 %v7370_v58, %v11108_v50  ;;  %v5242_v45 = vpop.f32.mrb[147].mxu1  ;;  %v5308_v2 = vsel %vm2480_vm2, %v11111_v61, 0.0  ;;  %v5368_v1 = vmul.f32 %v11111_v61, %v11111_v61 }
 0xce9   : > { %v11122_v8 = vadd.f32 %v5242_v45, %v11108_v50  ;;  %5309 = vadd.xlane.f32.xlu0 %v5308_v2  ;;  %v5302_v23 = vsel %vm2480_vm2, %v11114_v0, 0.0  ;;  %v5366_v55 = vmul.f32 %v11114_v0, %v11114_v0 }
 0xcea   : > { %v5311_v21 = vsel %vm2480_vm2, %v11117_v49, 0.0  ;;  %v5369_v37 = vmul.f32 %v11117_v49, %v11117_v49  ;;  %v5388_v28 = vsel %vm2480_vm2, %v5368_v1, 0.0  ;;  %v7736_v1 = vld [vmem:[%s11745_s4 + $0x50] sm:$0xff]  }
 0xceb   : > { %5312 = vadd.xlane.f32.xlu1 %v5311_v21  ;;  %v5305_v30 = vsel %vm2480_vm2, %v11122_v8, 0.0  ;;  %v5367_v38 = vmul.f32 %v11122_v8, %v11122_v8  ;;  %v5382_v3 = vsel %vm2480_vm2, %v5366_v55, 0.0 }
 0xcec   : > { %v5391_v11 = vsel %vm2480_vm2, %v5369_v37, 0.0 }
 0xced   : > { %5303 = vadd.xlane.f32.xlu0 %v5302_v23  ;;  %v5385_v32 = vsel %vm2480_vm2, %v5367_v38, 0.0 }
 0xcef   : > { %v7373_v9 = vpop.f32.mrb[148].mxu1  ;;  %5306 = vadd.xlane.f32.xlu1 %v5305_v30  ;;  %v7735_v30 = vld [vmem:[%s11745_s4 + $0x48] sm:$0xff]  }
 0xcf0   : > { %v11131_v25 = vadd.f32 %v7373_v9, %v11108_v50  ;;  %v5255_v20 = vpop.f32.mrb[149].mxu1 }
 0xcf1   : > { %v11138_v31 = vadd.f32 %v5255_v20, %v11108_v50  ;;  %v7374_v48 = vpop.f32.mrb[150].mxu1  ;;  %5383 = vadd.xlane.f32.xlu0 %v5382_v3  ;;  %v7734_v20 = vld [vmem:[%s11745_s4 + $0x40] sm:$0xff]  }
 0xcf2   : > { %v11141_v6 = vadd.f32 %v7374_v48, %v11108_v50  ;;  %v5258_v53 = vpop.f32.mrb[151].mxu1  ;;  %v5320_v24 = vsel %vm2480_vm2, %v11131_v25, 0.0  ;;  %v5372_v56 = vmul.f32 %v11131_v25, %v11131_v25  ;;  %7383 = vmatprep.subr.bf16.mxu0 %v7734_v20 }
 0xcf3   : > { %v11147_v7 = vadd.f32 %v5258_v53, %v11108_v50  ;;  %5386 = vadd.xlane.f32.xlu1 %v5385_v32  ;;  %v5314_v40 = vsel %vm2480_vm2, %v11138_v31, 0.0  ;;  %v5370_v51 = vmul.f32 %v11138_v31, %v11138_v31  ;;  %7384 = vmatpush3.bf16.msra.mxu0 %v7734_v20 }
 0xcf4   : > { %v5323_v59 = vsel %vm2480_vm2, %v11141_v6, 0.0  ;;  %v5373_v5 = vmul.f32 %v11141_v6, %v11141_v6  ;;  %v5400_v26 = vsel %vm2480_vm2, %v5372_v56, 0.0  ;;  %7385 = vmatprep.subr.bf16.mxu0 %v7735_v30 }
 0xcf5   : > { %5389 = vadd.xlane.f32.xlu0 %v5388_v28  ;;  %v5317_v42 = vsel %vm2480_vm2, %v11147_v7, 0.0  ;;  %v5371_v52 = vmul.f32 %v11147_v7, %v11147_v7  ;;  %v5394_v60 = vsel %vm2480_vm2, %v5370_v51, 0.0 }
 0xcf6   : > { %v5403_v54 = vsel %vm2480_vm2, %v5373_v5, 0.0 }
 0xcf7   : > { %v7377_v4 = vpop.f32.mrb[152].mxu1  ;;  %5392 = vadd.xlane.f32.xlu1 %v5391_v11  ;;  %v5397_v29 = vsel %vm2480_vm2, %v5371_v52, 0.0  ;;  %7386 = vmatpush3.bf16.msra.mxu0 %v7735_v30 }
 0xcf8   : > { %v11155_v41 = vadd.f32 %v7377_v4, %v11108_v50  ;;  %v5271_v16 = vpop.f32.mrb[153].mxu1  ;;  %7387 = vmatprep.subr.bf16.mxu0 %v7736_v1  ;;  %v7737_v4 = vld [vmem:[%s11745_s4 + $0x58] sm:$0xff]  }
 0xcf9   : > { %v11158_v13 = vadd.f32 %v5271_v16, %v11108_v50  ;;  %v7378_v27 = vpop.f32.mrb[154].mxu1  ;;  %5321 = vadd.xlane.f32.xlu0 %v5320_v24 }
 0xcfa   : > { %v11163_v47 = vadd.f32 %v7378_v27, %v11108_v50  ;;  %v5274_v44 = vpop.f32.mrb[155].mxu1  ;;  %v5332_v14 = vsel %vm2480_vm2, %v11155_v41, 0.0  ;;  %v5376_v63 = vmul.f32 %v11155_v41, %v11155_v41 }
 0xcfb   : > { %v11166_v34 = vadd.f32 %v5274_v44, %v11108_v50  ;;  %5324 = vadd.xlane.f32.xlu1 %v5323_v59  ;;  %v5326_v17 = vsel %vm2480_vm2, %v11158_v13, 0.0  ;;  %v5374_v19 = vmul.f32 %v11158_v13, %v11158_v13  ;;  %7388 = vmatpush3.bf16.msra.mxu0 %v7736_v1 }
 0xcfc   : > { %v5335_v12 = vsel %vm2480_vm2, %v11163_v47, 0.0  ;;  %v5377_v58 = vmul.f32 %v11163_v47, %v11163_v47  ;;  %v5412_v45 = vsel %vm2480_vm2, %v5376_v63, 0.0  ;;  %7389 = vmatprep.subr.bf16.mxu0 %v7737_v4 }
 0xcfd   : > { %5315 = vadd.xlane.f32.xlu0 %v5314_v40  ;;  %v5329_v57 = vsel %vm2480_vm2, %v11166_v34, 0.0  ;;  %v5375_v36 = vmul.f32 %v11166_v34, %v11166_v34 }
 0xcfe   : > { %v5415_v2 = vsel %vm2480_vm2, %v5377_v58, 0.0 }
 0xcff   : > { %v7381_v33 = vpop.f32.mrb[156].mxu1  ;;  %5318 = vadd.xlane.f32.xlu1 %v5317_v42  ;;  %v5409_v35 = vsel %vm2480_vm2, %v5375_v36, 0.0  ;;  %7390 = vmatpush3.bf16.msra.mxu0 %v7737_v4 }
 0xd00   : > { %v11179_v43 = vadd.f32 %v7381_v33, %v11108_v50  ;;  %v5287_v10 = vpop.f32.mrb[157].mxu1 }
 0xd01   : > { %v11182_v15 = vadd.f32 %v5287_v10, %v11108_v50  ;;  %v7382_v22 = vpop.f32.mrb[158].mxu1  ;;  %5395 = vadd.xlane.f32.xlu0 %v5394_v60 }
 0xd02   : > { %v11188_v18 = vadd.f32 %v7382_v22, %v11108_v50  ;;  %v5290_v46 = vpop.f32.mrb[159].mxu1  ;;  %v5344_v21 = vsel %vm2480_vm2, %v11179_v43, 0.0  ;;  %v5380_v3 = vmul.f32 %v11179_v43, %v11179_v43 }
 0xd03   : > { %v11191_v62 = vadd.f32 %v5290_v46, %v11108_v50  ;;  %5398 = vadd.xlane.f32.xlu1 %v5397_v29  ;;  %v5406_v50 = vsel %vm2480_vm2, %v5374_v19, 0.0  ;;  %v5338_v55 = vsel %vm2480_vm2, %v11182_v15, 0.0  ;;  %v5378_v9 = vmul.f32 %v11182_v15, %v11182_v15 }
 0xd04   : > { %v5347_v23 = vsel %vm2480_vm2, %v11188_v18, 0.0  ;;  %v5381_v37 = vmul.f32 %v11188_v18, %v11188_v18  ;;  %v5424_v28 = vsel %vm2480_vm2, %v5380_v3, 0.0 }
 0xd05   : > { %5401 = vadd.xlane.f32.xlu0 %v5400_v26  ;;  %v5341_v38 = vsel %vm2480_vm2, %v11191_v62, 0.0  ;;  %v5379_v48 = vmul.f32 %v11191_v62, %v11191_v62  ;;  %v5418_v53 = vsel %vm2480_vm2, %v5378_v9, 0.0 }
 0xd06   : > { %v5427_v11 = vsel %vm2480_vm2, %v5381_v37, 0.0 }
 0xd07   : > { %5404 = vadd.xlane.f32.xlu1 %v5403_v54  ;;  %v5421_v32 = vsel %vm2480_vm2, %v5379_v48, 0.0 }
 0xd09   : > { %5333 = vadd.xlane.f32.xlu0 %v5332_v14 }
 0xd0b   : > { %5336 = vadd.xlane.f32.xlu1 %v5335_v12 }
 0xd0d   : > { %5327 = vadd.xlane.f32.xlu0 %v5326_v17 }
 0xd0f   : > { %5330 = vadd.xlane.f32.xlu1 %v5329_v57 }
 0xd11   : > { %5407 = vadd.xlane.f32.xlu0 %v5406_v50 }
 0xd13   : > { %5410 = vadd.xlane.f32.xlu1 %v5409_v35 }
 0xd15   : > { %5413 = vadd.xlane.f32.xlu0 %v5412_v45 }
 0xd17   : > { %5416 = vadd.xlane.f32.xlu1 %v5415_v2 }
 0xd19   : > { %5345 = vadd.xlane.f32.xlu0 %v5344_v21 }
 0xd1b   : > { %5348 = vadd.xlane.f32.xlu1 %v5347_v23 }
 0xd1d   : > { %5339 = vadd.xlane.f32.xlu0 %v5338_v55 }
 0xd1f   : > { %5342 = vadd.xlane.f32.xlu1 %v5341_v38 }
 0xd21   : > { %5419 = vadd.xlane.f32.xlu0 %v5418_v53 }
 0xd23   : > { %5422 = vadd.xlane.f32.xlu1 %v5421_v32  ;;  %v12023_v32 = vld [vmem:[#allocation11_spill] sm:$0xff] }
 0xd24   : > { %v11268_v37 = vrot.slane %v11104_v39, %v12023_v32 }
 0xd25   : > { %5425 = vadd.xlane.f32.xlu0 %v5424_v28 }
 0xd27   : > { %5428 = vadd.xlane.f32.xlu1 %v5427_v11 }
 0xd76   : > { %v5310_v16 = vpop.xlane.xlu0 %5309 }
 0xd77   : > { %v11250_v33 = vmul.f32 0.015625, %v5310_v16 }
 0xd78   : > { %v5313_v27 = vpop.xlane.xlu1 %5312 }
 0xd79   : > { %v11252_v10 = vmul.f32 0.015625, %v5313_v27  ;;  %v5448_v5 = vmul.f32 %v11250_v33, %v11250_v33 }
 0xd7a   : > { %v5304_v24 = vpop.xlane.xlu0 %5303 }
 0xd7b   : > { %v5350_v44 = vmul.f32 0.015625, %v5304_v24  ;;  %v5449_v12 = vmul.f32 %v11252_v10, %v11252_v10 }
 0xd7c   : > { %v5307_v59 = vpop.xlane.xlu1 %5306 }
 0xd7d   : > { %v5351_v40 = vmul.f32 0.015625, %v5307_v59  ;;  %v5446_v42 = vmul.f32 %v5350_v44, %v5350_v44  ;;  %v5494_v28 = vsub.f32 %v11114_v0, %v5350_v44 }
 0xd7e   : > { %v5384_v51 = vpop.xlane.xlu0 %5383 }
 0xd7f   : > { %v5430_v52 = vmul.f32 0.015625, %v5384_v51  ;;  %v5447_v60 = vmul.f32 %v5351_v40, %v5351_v40  ;;  %v12024_v51 = vld [vmem:[#allocation12_spill] sm:$0xff] }
 0xd80   : > { %v5387_v22 = vpop.xlane.xlu1 %5386 }
 0xd81   : > { %v5462_v56 = vsub.f32 %v5430_v52, %v5446_v42  ;;  %v5431_v46 = vmul.f32 0.015625, %v5387_v22  ;;  %v11277_v42 = vrot.slane %v11104_v39, %v12024_v51  ;;  %v5495_v52 = vsub.f32 %v11122_v8, %v5351_v40 }
 0xd82   : > { %v5390_v29 = vpop.xlane.xlu0 %5389 }
 0xd83   : > { %v5478_v26 = vmax.f32 %v5462_v56, 0.0  ;;  %v5463_v54 = vsub.f32 %v5431_v46, %v5447_v60  ;;  %v5432_v14 = vmul.f32 0.015625, %v5390_v29 }
 0xd84   : > { %v5393_v17 = vpop.xlane.xlu1 %5392 }
 0xd85   : > { %v5510_v19 = vadd.f32 1e-05, %v5478_v26  ;;  %v5479_v57 = vmax.f32 %v5463_v54, 0.0  ;;  %v5464_v36 = vsub.f32 %v5432_v14, %v5448_v5  ;;  %v5433_v50 = vmul.f32 0.015625, %v5393_v17 }
 0xd86   : > { %v5322_v63 = vpop.xlane.xlu0 %5321  ;;  %v5496_v5 = vsub.f32 %v11111_v61, %v11250_v33 }
 0xd87   : > { %8058 = vrsqrt.f32 %v5510_v19  ;;  %v5511_v35 = vadd.f32 1e-05, %v5479_v57  ;;  %v5480_v58 = vmax.f32 %v5464_v36, 0.0  ;;  %v5465_v45 = vsub.f32 %v5433_v50, %v5449_v12 }
 0xd88   : > { %v5325_v2 = vpop.xlane.xlu1 %5324  ;;  %v11262_v53 = vmul.f32 0.015625, %v5322_v63  ;;  %v5497_v36 = vsub.f32 %v11117_v49, %v11252_v10 }
 0xd89   : > { %8060 = vrsqrt.f32 %v5511_v35  ;;  %v5512_v21 = vadd.f32 1e-05, %v5480_v58  ;;  %v5481_v23 = vmax.f32 %v5465_v45, 0.0  ;;  %v11271_v4 = vmul.f32 0.015625, %v5325_v2 }
 0xd8a   : > { %v5316_v55 = vpop.xlane.xlu0 %5315  ;;  %v5452_v0 = vmul.f32 %v11262_v53, %v11262_v53 }
 0xd8b   : > { %8062 = vrsqrt.f32 %v5512_v21  ;;  %v5513_v9 = vadd.f32 1e-05, %v5481_v23  ;;  %v11258_v20 = vmul.f32 0.015625, %v5316_v55  ;;  %v5453_v26 = vmul.f32 %v11271_v4, %v11271_v4 }
 0xd8c   : > { %v5319_v30 = vpop.xlane.xlu1 %5318 }
 0xd8d   : > { %8064 = vrsqrt.f32 %v5513_v9  ;;  %v11260_v38 = vmul.f32 0.015625, %v5319_v30  ;;  %v5450_v3 = vmul.f32 %v11258_v20, %v11258_v20 }
 0xd8e   : > { %v5396_v48 = vpop.xlane.xlu0 %5395 }
 0xd8f   : > { %v5434_v1 = vmul.f32 0.015625, %v5396_v48  ;;  %v5451_v27 = vmul.f32 %v11260_v38, %v11260_v38 }
 0xd90   : > { %v5399_v11 = vpop.xlane.xlu1 %5398 }
 0xd91   : > { %v8059_v16 = vpop.eup %8058  ;;  %v5466_v24 = vsub.f32 %v5434_v1, %v5450_v3  ;;  %v5435_v59 = vmul.f32 0.015625, %v5399_v11 }
 0xd92   : > { %v5402_v22 = vpop.xlane.xlu0 %5401  ;;  %v5542_v60 = vmul.f32 %v8059_v16, %v5494_v28 }
 0xd93   : > { %v8061_v56 = vpop.eup %8060  ;;  %v5482_v44 = vmax.f32 %v5466_v24, 0.0  ;;  %v5467_v46 = vsub.f32 %v5435_v59, %v5451_v27  ;;  %v5436_v29 = vmul.f32 0.015625, %v5402_v22 }
 0xd94   : > { %v5405_v54 = vpop.xlane.xlu1 %5404  ;;  %v5543_v14 = vmul.f32 %v8061_v56, %v5495_v52  ;;  %v5562_v12 = vmul.f32 %v11268_v37, %v5542_v60 }
 0xd95   : > { %v8063_v8 = vpop.eup %8062  ;;  %v5514_v40 = vadd.f32 1e-05, %v5482_v44  ;;  %v5483_v17 = vmax.f32 %v5467_v46, 0.0  ;;  %v5468_v19 = vsub.f32 %v5436_v29, %v5452_v0  ;;  %v5437_v57 = vmul.f32 0.015625, %v5405_v54 }
 0xd96   : > { %v5544_v50 = vmul.f32 %v8063_v8, %v5496_v5  ;;  %v5334_v63 = vpop.xlane.xlu0 %5333  ;;  %v5563_v35 = vmul.f32 %v11268_v37, %v5543_v14  ;;  %v5582_v55 = vadd.f32 %v11277_v42, %v5562_v12  ;;  %v5498_v44 = vsub.f32 %v11138_v31, %v11258_v20 }
 0xd97   : > { %v8065_v61 = vpop.eup %8064  ;;  %8066 = vrsqrt.f32 %v5514_v40  ;;  %v5515_v33 = vadd.f32 1e-05, %v5483_v17  ;;  %v5484_v58 = vmax.f32 %v5468_v19, 0.0  ;;  %v5469_v45 = vsub.f32 %v5437_v57, %v5453_v26 }
 0xd98   : > { %v5564_v2 = vmul.f32 %v11268_v37, %v5544_v50  ;;  %v5545_v21 = vmul.f32 %v8065_v61, %v5497_v36  ;;  %v5337_v23 = vpop.xlane.xlu1 %5336  ;;  %v5583_v9 = vadd.f32 %v11277_v42, %v5563_v35  ;;  %v5598_v16 = vmax.f32 %v5582_v55, 0.0 }
 0xd99   : > { %8068 = vrsqrt.f32 %v5515_v33  ;;  %v5516_v30 = vadd.f32 1e-05, %v5484_v58  ;;  %v5485_v49 = vmax.f32 %v5469_v45, 0.0  ;;  %v11300_v60 = vmul.f32 0.015625, %v5334_v63 }
 0xd9a   : > { %v5584_v10 = vadd.f32 %v11277_v42, %v5564_v2  ;;  %v5565_v48 = vmul.f32 %v11268_v37, %v5545_v21  ;;  %v5328_v3 = vpop.xlane.xlu0 %5327  ;;  %v5599_v27 = vmax.f32 %v5583_v9, 0.0  ;;  %v11306_v46 = vmul.f32 0.015625, %v5337_v23 }
 0xd9b   : > { %8070 = vrsqrt.f32 %v5516_v30  ;;  %v5517_v1 = vadd.f32 1e-05, %v5485_v49  ;;  %v11296_v28 = vmul.f32 0.015625, %v5328_v3  ;;  %v5499_v8 = vsub.f32 %v11147_v7, %v11260_v38 }
 0xd9c   : > { %v5585_v32 = vadd.f32 %v11277_v42, %v5565_v48  ;;  %v5331_v11 = vpop.xlane.xlu1 %5330  ;;  %v5614_v59 = vpack.c.bf16 %v5599_v27, %v5598_v16  ;;  %v5600_v52 = vmax.f32 %v5584_v10, 0.0  ;;  %v5456_v20 = vmul.f32 %v11300_v60, %v11300_v60 }
 0xd9d   : > { %8072 = vrsqrt.f32 %v5517_v1  ;;  %v11298_v24 = vmul.f32 0.015625, %v5331_v11  ;;  %v5454_v56 = vmul.f32 %v11296_v28, %v11296_v28  ;;  %v5500_v50 = vsub.f32 %v11131_v25, %v11262_v53 }
 0xd9e   : > { %v5408_v51 = vpop.xlane.xlu0 %5407  ;;  %v5601_v22 = vmax.f32 %v5585_v32, 0.0  ;;  %7391 = vmatprep.mubr.msk.bf16.mxu0 %vm2480_vm2, %v5614_v59  ;;  %v5457_v63 = vmul.f32 %v11306_v46, %v11306_v46  ;;  %v5501_v21 = vsub.f32 %v11141_v6, %v11271_v4 }
 0xd9f   : > { %v5438_v0 = vmul.f32 0.015625, %v5408_v51  ;;  %v5455_v54 = vmul.f32 %v11298_v24, %v11298_v24 }
 0xda0   : > { %v5411_v29 = vpop.xlane.xlu1 %5410  ;;  %v5615_v5 = vpack.c.bf16 %v5601_v22, %v5600_v52 }
 0xda1   : > { %v8067_v26 = vpop.eup %8066  ;;  %v5470_v14 = vsub.f32 %v5438_v0, %v5454_v56  ;;  %v5439_v12 = vmul.f32 0.015625, %v5411_v29 }
 0xda2   : > { %7392 = vmatmul.mubr.msk.bf16.vlgmr.msra.gmra.mrb[160].mxu0 %vm2480_vm2, %v5615_v5  ;;  %v5414_v40 = vpop.xlane.xlu0 %5413  ;;  %v5546_v17 = vmul.f32 %v8067_v26, %v5498_v44 }
 0xda3   : > { %v8069_v31 = vpop.eup %8068  ;;  %v5486_v19 = vmax.f32 %v5470_v14, 0.0  ;;  %v5471_v57 = vsub.f32 %v5439_v12, %v5455_v54  ;;  %v5440_v36 = vmul.f32 0.015625, %v5414_v40  ;;  %v5502_v12 = vsub.f32 %v11158_v13, %v11296_v28 }
 0xda4   : > { %v5417_v35 = vpop.xlane.xlu1 %5416  ;;  %v5547_v61 = vmul.f32 %v8069_v31, %v5499_v8  ;;  %v5566_v7 = vmul.f32 %v11268_v37, %v5546_v17 }
 0xda5   : > { %v8071_v38 = vpop.eup %8070  ;;  %v5518_v33 = vadd.f32 1e-05, %v5486_v19  ;;  %v5487_v58 = vmax.f32 %v5471_v57, 0.0  ;;  %v5472_v45 = vsub.f32 %v5440_v36, %v5456_v20  ;;  %v5441_v2 = vmul.f32 0.015625, %v5417_v35 }
 0xda6   : > { %v5346_v23 = vpop.xlane.xlu0 %5345  ;;  %v5567_v55 = vmul.f32 %v11268_v37, %v5547_v61  ;;  %v5586_v25 = vadd.f32 %v11277_v42, %v5566_v7  ;;  %v5548_v53 = vmul.f32 %v8071_v38, %v5500_v50  ;;  %v5503_v50 = vsub.f32 %v11166_v34, %v11298_v24 }
 0xda7   : > { %v8073_v9 = vpop.eup %8072  ;;  %8074 = vrsqrt.f32 %v5518_v33  ;;  %v5519_v30 = vadd.f32 1e-05, %v5487_v58  ;;  %v5488_v49 = vmax.f32 %v5472_v45, 0.0  ;;  %v5473_v10 = vsub.f32 %v5441_v2, %v5457_v63 }
 0xda8   : > { %v5349_v48 = vpop.xlane.xlu1 %5348  ;;  %v5587_v3 = vadd.f32 %v11277_v42, %v5567_v55  ;;  %v5549_v1 = vmul.f32 %v8073_v9, %v5501_v21  ;;  %v5602_v6 = vmax.f32 %v5586_v25, 0.0  ;;  %v5568_v27 = vmul.f32 %v11268_v37, %v5548_v53 }
 0xda9   : > { %8076 = vrsqrt.f32 %v5519_v30  ;;  %v5520_v32 = vadd.f32 1e-05, %v5488_v49  ;;  %v5489_v11 = vmax.f32 %v5473_v10, 0.0  ;;  %v11335_v26 = vmul.f32 0.015625, %v5346_v23 }
 0xdaa   : > { %v5340_v16 = vpop.xlane.xlu0 %5339  ;;  %v5603_v4 = vmax.f32 %v5587_v3, 0.0  ;;  %v5569_v56 = vmul.f32 %v11268_v37, %v5549_v1  ;;  %v5588_v0 = vadd.f32 %v11277_v42, %v5568_v27  ;;  %v11341_v8 = vmul.f32 0.015625, %v5349_v48 }
 0xdab   : > { %8078 = vrsqrt.f32 %v5520_v32  ;;  %v5521_v59 = vadd.f32 1e-05, %v5489_v11  ;;  %v11327_v51 = vmul.f32 0.015625, %v5340_v16  ;;  %v5460_v13 = vmul.f32 %v11335_v26, %v11335_v26 }
 0xdac   : > { %v5343_v52 = vpop.xlane.xlu1 %5342  ;;  %v5616_v22 = vpack.c.bf16 %v5603_v4, %v5602_v6  ;;  %v5589_v5 = vadd.f32 %v11277_v42, %v5569_v56  ;;  %v5604_v17 = vmax.f32 %v5588_v0, 0.0  ;;  %v5504_v58 = vsub.f32 %v11155_v41, %v11300_v60 }
 0xdad   : > { %8080 = vrsqrt.f32 %v5521_v59  ;;  %v11331_v44 = vmul.f32 0.015625, %v5343_v52  ;;  %v5458_v54 = vmul.f32 %v11327_v51, %v11327_v51  ;;  %v5461_v45 = vmul.f32 %v11341_v8, %v11341_v8 }
 0xdae   : > { %7395 = vmatprep.mubr.msk.bf16.mxu0 %vm2480_vm2, %v5616_v22  ;;  %v5420_v29 = vpop.xlane.xlu0 %5419  ;;  %v5605_v31 = vmax.f32 %v5589_v5, 0.0  ;;  %v5505_v9 = vsub.f32 %v11163_v47, %v11306_v46 }
 0xdaf   : > { %v5442_v14 = vmul.f32 0.015625, %v5420_v29  ;;  %v5459_v19 = vmul.f32 %v11331_v44, %v11331_v44  ;;  %v5506_v29 = vsub.f32 %v11182_v15, %v11327_v51 }
 0xdb0   : > { %v5423_v40 = vpop.xlane.xlu1 %5422  ;;  %v5617_v63 = vpack.c.bf16 %v5605_v31, %v5604_v17  ;;  %v5508_v17 = vsub.f32 %v11179_v43, %v11335_v26 }
 0xdb1   : > { %v8075_v20 = vpop.eup %8074  ;;  %v5474_v57 = vsub.f32 %v5442_v14, %v5458_v54  ;;  %v5443_v36 = vmul.f32 0.015625, %v5423_v40  ;;  %v5507_v14 = vsub.f32 %v11191_v62, %v11331_v44 }
 0xdb2   : > { %v5426_v35 = vpop.xlane.xlu0 %5425  ;;  %v5550_v61 = vmul.f32 %v8075_v20, %v5502_v12  ;;  %7396 = vmatmul.mubr.msk.bf16.gmra.mrb[164].mxu0 %vm2480_vm2, %v5617_v63 }
 0xdb3   : > { %v8077_v7 = vpop.eup %8076  ;;  %v5490_v28 = vmax.f32 %v5474_v57, 0.0  ;;  %v5475_v38 = vsub.f32 %v5443_v36, %v5459_v19  ;;  %v5444_v33 = vmul.f32 0.015625, %v5426_v35  ;;  %v5509_v57 = vsub.f32 %v11188_v18, %v11341_v8 }
 0xdb4   : > { %v5429_v2 = vpop.xlane.xlu1 %5428  ;;  %v5551_v34 = vmul.f32 %v8077_v7, %v5503_v50  ;;  %v5570_v24 = vmul.f32 %v11268_v37, %v5550_v61 }
 0xdb5   : > { %v8079_v21 = vpop.eup %8078  ;;  %v5522_v23 = vadd.f32 1e-05, %v5490_v28  ;;  %v5491_v55 = vmax.f32 %v5475_v38, 0.0  ;;  %v5476_v25 = vsub.f32 %v5444_v33, %v5460_v13  ;;  %v5445_v53 = vmul.f32 0.015625, %v5429_v2  ;;  %v12025_v38 = vld [vmem:[#allocation14_spill] sm:$0xff] }
 0xdb6   : > { %v5571_v30 = vmul.f32 %v11268_v37, %v5551_v34  ;;  %v5590_v41 = vadd.f32 %v11277_v42, %v5570_v24  ;;  %v5552_v60 = vmul.f32 %v8079_v21, %v5504_v58  ;;  %v11386_v33 = vrot.slane %v11104_v39, %v12025_v38  ;;  %v12026_v21 = vld [vmem:[#allocation31_spill] sm:$0xff] }
 0xdb7   : > { %v8081_v49 = vpop.eup %8080  ;;  %8082 = vrsqrt.f32 %v5522_v23  ;;  %v5523_v10 = vadd.f32 1e-05, %v5491_v55  ;;  %v5492_v48 = vmax.f32 %v5476_v25, 0.0  ;;  %v5477_v3 = vsub.f32 %v5445_v53, %v5461_v45  ;;  %v12027_v25 = vld [vmem:[#allocation34_spill] sm:$0xff] }
 0xdb8   : > { %v5591_v1 = vadd.f32 %v11277_v42, %v5571_v30  ;;  %v5553_v32 = vmul.f32 %v8081_v49, %v5505_v9  ;;  %v5572_v11 = vmul.f32 %v11268_v37, %v5552_v60  ;;  %v5606_v4 = vmax.f32 %v5590_v41, 0.0  ;;  %v12028_v60 = vld [vmem:[#allocation32_spill] sm:$0xff] }
 0xdb9   : > { %8084 = vrsqrt.f32 %v5523_v10  ;;  %v5524_v16 = vadd.f32 1e-05, %v5492_v48  ;;  %v5493_v6 = vmax.f32 %v5477_v3, 0.0  ;;  %v12029_v48 = vld [vmem:[#allocation30_spill] sm:$0xff] }
 0xdba   : > { %v5607_v47 = vmax.f32 %v5591_v1, 0.0  ;;  %v5573_v46 = vmul.f32 %v11268_v37, %v5553_v32  ;;  %v5592_v27 = vadd.f32 %v11277_v42, %v5572_v11 }
 0xdbb   : > { %8086 = vrsqrt.f32 %v5524_v16  ;;  %v5525_v59 = vadd.f32 1e-05, %v5493_v6 }
 0xdbc   : > { %v5618_v52 = vpack.c.bf16 %v5607_v47, %v5606_v4  ;;  %v5593_v22 = vadd.f32 %v11277_v42, %v5573_v46  ;;  %v5608_v56 = vmax.f32 %v5592_v27, 0.0 }
 0xdbd   : > { %8088 = vrsqrt.f32 %v5525_v59 }
 0xdbe   : > { %7399 = vmatprep.mubr.msk.bf16.mxu0 %vm2480_vm2, %v5618_v52  ;;  %v5609_v0 = vmax.f32 %v5593_v22, 0.0 }
 0xdc0   : > { %v5619_v5 = vpack.c.bf16 %v5609_v0, %v5608_v56 }
 0xdc1   : > { %v8083_v54 = vpop.eup %8082 }
 0xdc2   : > { %7400 = vmatmul.mubr.msk.bf16.gmra.mrb[168].mxu0 %vm2480_vm2, %v5619_v5  ;;  %v5554_v12 = vmul.f32 %v8083_v54, %v5506_v29  ;;  %v12030_v29 = vld [vmem:[#allocation36_spill] sm:$0xff] }
 0xdc3   : > { %v8085_v40 = vpop.eup %8084 }
 0xdc4   : > { %v5555_v31 = vmul.f32 %v8085_v40, %v5507_v14  ;;  %v5574_v20 = vmul.f32 %v11268_v37, %v5554_v12  ;;  %v12031_v14 = vld [vmem:[#allocation39_spill] sm:$0xff] }
 0xdc5   : > { %v8087_v19 = vpop.eup %8086 }
 0xdc6   : > { %v5575_v15 = vmul.f32 %v11268_v37, %v5555_v31  ;;  %v5594_v51 = vadd.f32 %v11277_v42, %v5574_v20  ;;  %v5556_v36 = vmul.f32 %v8087_v19, %v5508_v17  ;;  %v12032_v19 = vld [vmem:[#allocation35_spill] sm:$0xff] }
 0xdc7   : > { %v8089_v62 = vpop.eup %8088 }
 0xdc8   : > { %v5595_v44 = vadd.f32 %v11277_v42, %v5575_v15  ;;  %v5557_v50 = vmul.f32 %v8089_v62, %v5509_v57  ;;  %v5576_v63 = vmul.f32 %v11268_v37, %v5556_v36  ;;  %v5610_v35 = vmax.f32 %v5594_v51, 0.0  ;;  %v12033_v51 = vld [vmem:[#allocation33_spill] sm:$0xff] }
 0xdca   : > { %v5611_v43 = vmax.f32 %v5595_v44, 0.0  ;;  %v5577_v26 = vmul.f32 %v11268_v37, %v5557_v50  ;;  %v5596_v61 = vadd.f32 %v11277_v42, %v5576_v63 }
 0xdcc   : > { %v5620_v7 = vpack.c.bf16 %v5611_v43, %v5610_v35  ;;  %v5597_v18 = vadd.f32 %v11277_v42, %v5577_v26  ;;  %v5612_v8 = vmax.f32 %v5596_v61, 0.0 }
 0xdce   : > { %7403 = vmatprep.mubr.msk.bf16.mxu0 %vm2480_vm2, %v5620_v7  ;;  %v5613_v13 = vmax.f32 %v5597_v18, 0.0 }
 0xdd0   : > { %v5621_v28 = vpack.c.bf16 %v5613_v13, %v5612_v8 }
 0xdd2   : > { %7404 = vmatmul.mubr.msk.bf16.gmra.mrb[172].mxu0 %vm2480_vm2, %v5621_v28  ;;  %v12034_v28 = vld [vmem:[#allocation37_spill] sm:$0xff]  ;;  %vm8245_vm2 = vmmov 0  }
 0xe75   : > { %v7393_v58 = vpop.f32.mrb[160].mxu0 }
 0xe76   : > { %v5726_v45 = vadd.f32 %v7393_v58, %v11386_v33  ;;  %v5717_v37 = vpop.f32.mrb[161].mxu0 }
 0xe77   : > { %v5718_v2 = vadd.f32 %v5717_v37, %v11386_v33  ;;  %v7394_v34 = vpop.f32.mrb[162].mxu0  ;;  %v12035_v37 = vld [vmem:[#allocation13_spill] sm:$0xff] }
 0xe78   : > { %v5729_v42 = vadd.f32 %v7394_v34, %v11386_v33  ;;  %v5720_v24 = vpop.f32.mrb[163].mxu0  ;;  %v11407_v49 = vadd.f32 %v5726_v45, %v12028_v60 }
 0xe79   : > { %v11392_v23 = vadd.f32 %v5718_v2, %v12026_v21  ;;  %v5721_v55 = vadd.f32 %v5720_v24, %v11386_v33 }
 0xe7a   : > { %v11411_v3 = vadd.f32 %v5729_v42, %v12029_v48  ;;  %v5802_v32 = vsel %vm1875_vm0, %v11407_v49, 0.0  ;;  %v5862_v11 = vmul.f32 %v11407_v49, %v11407_v49 }
 0xe7b   : > { %v11396_v53 = vadd.f32 %v5721_v55, %v12027_v25  ;;  %v5796_v39 = vsel %vm1875_vm0, %v11392_v23, 0.0  ;;  %v5860_v9 = vmul.f32 %v11392_v23, %v11392_v23  ;;  %v12036_v25 = vld [vmem:[#allocation40_spill] sm:$0xff] }
 0xe7c   : > { %5797 = vadd.xlane.f32.xlu0 %v5796_v39  ;;  %v5805_v16 = vsel %vm1875_vm0, %v11411_v3, 0.0  ;;  %v5863_v6 = vmul.f32 %v11411_v3, %v11411_v3  ;;  %v5882_v47 = vsel %vm1875_vm0, %v5862_v11, 0.0 }
 0xe7d   : > { %v5799_v30 = vsel %vm1875_vm0, %v11396_v53, 0.0  ;;  %v5861_v41 = vmul.f32 %v11396_v53, %v11396_v53  ;;  %v5876_v10 = vsel %vm1875_vm0, %v5860_v9, 0.0 }
 0xe7e   : > { %5800 = vadd.xlane.f32.xlu1 %v5799_v30  ;;  %v5885_v22 = vsel %vm1875_vm0, %v5863_v6, 0.0  ;;  %v12037_v30 = vld [vmem:[#allocation38_spill] sm:$0xff] }
 0xe7f   : > { %v5879_v1 = vsel %vm1875_vm0, %v5861_v41, 0.0 }
 0xe80   : > { %5877 = vadd.xlane.f32.xlu0 %v5876_v10 }
 0xe82   : > { %5880 = vadd.xlane.f32.xlu1 %v5879_v1 }
 0xe84   : > { %5803 = vadd.xlane.f32.xlu0 %v5802_v32 }
 0xe85   : > { %v7397_v4 = vpop.f32.mrb[164].mxu0 }
 0xe86   : > { %5806 = vadd.xlane.f32.xlu1 %v5805_v16  ;;  %v5742_v46 = vadd.f32 %v7397_v4, %v11386_v33  ;;  %v5733_v27 = vpop.f32.mrb[165].mxu0 }
 0xe87   : > { %v5734_v59 = vadd.f32 %v5733_v27, %v11386_v33  ;;  %v7398_v52 = vpop.f32.mrb[166].mxu0 }
 0xe88   : > { %5883 = vadd.xlane.f32.xlu0 %v5882_v47  ;;  %v5745_v56 = vadd.f32 %v7398_v52, %v11386_v33  ;;  %v5736_v0 = vpop.f32.mrb[167].mxu0  ;;  %v11443_v57 = vadd.f32 %v5742_v46, %v12032_v19 }
 0xe89   : > { %v11428_v5 = vadd.f32 %v5734_v59, %v12030_v29  ;;  %v5737_v54 = vadd.f32 %v5736_v0, %v11386_v33  ;;  %v12038_v59 = vld [vmem:[#allocation18_spill] sm:$0xff]  ;;  %v12039_v0 = vld [vmem:[#allocation17_spill] sm:$0xff] }
 0xe8a   : > { %5886 = vadd.xlane.f32.xlu1 %v5885_v22  ;;  %v11447_v36 = vadd.f32 %v5745_v56, %v12033_v51  ;;  %v5814_v44 = vsel %vm1875_vm0, %v11443_v57, 0.0  ;;  %v5866_v63 = vmul.f32 %v11443_v57, %v11443_v57 }
 0xe8b   : > { %v11432_v12 = vadd.f32 %v5737_v54, %v12031_v14  ;;  %v5808_v40 = vsel %vm1875_vm0, %v11428_v5, 0.0  ;;  %v5864_v17 = vmul.f32 %v11428_v5, %v11428_v5 }
 0xe8c   : > { %5809 = vadd.xlane.f32.xlu0 %v5808_v40  ;;  %v5817_v61 = vsel %vm1875_vm0, %v11447_v36, 0.0  ;;  %v5867_v18 = vmul.f32 %v11447_v36, %v11447_v36  ;;  %v5894_v45 = vsel %vm1875_vm0, %v5866_v63, 0.0 }
 0xe8d   : > { %v5811_v31 = vsel %vm1875_vm0, %v11432_v12, 0.0  ;;  %v5865_v20 = vmul.f32 %v11432_v12, %v11432_v12  ;;  %v5888_v15 = vsel %vm1875_vm0, %v5864_v17, 0.0 }
 0xe8e   : > { %5812 = vadd.xlane.f32.xlu1 %v5811_v31  ;;  %v5897_v34 = vsel %vm1875_vm0, %v5867_v18, 0.0  ;;  %v12040_v31 = vld [vmem:[#allocation15_spill] sm:$0xff]  ;;  %v8247_v18 = vmov 0  }
 0xe8f   : > { %v5891_v62 = vsel %vm1875_vm0, %v5865_v20, 0.0  ;;  %7535 = vset.pattern.permute.xlu0 %v8247_v18 }
 0xe90   : > { %5889 = vadd.xlane.f32.xlu0 %v5888_v15  ;;  %v12041_v15 = vld [vmem:[#allocation16_spill] sm:$0xff] }
 0xe92   : > { %5892 = vadd.xlane.f32.xlu1 %v5891_v62 }
 0xe94   : > { %5815 = vadd.xlane.f32.xlu0 %v5814_v44 }
 0xe95   : > { %v7401_v50 = vpop.f32.mrb[168].mxu0 }
 0xe96   : > { %v5758_v35 = vadd.f32 %v7401_v50, %v11386_v33  ;;  %v5749_v43 = vpop.f32.mrb[169].mxu0  ;;  %5818 = vadd.xlane.f32.xlu1 %v5817_v61 }
 0xe97   : > { %v5750_v26 = vadd.f32 %v5749_v43, %v11386_v33  ;;  %v7402_v7 = vpop.f32.mrb[170].mxu0 }
 0xe98   : > { %v5761_v8 = vadd.f32 %v7402_v7, %v11386_v33  ;;  %v5752_v13 = vpop.f32.mrb[171].mxu0  ;;  %5895 = vadd.xlane.f32.xlu0 %v5894_v45  ;;  %v11479_v39 = vadd.f32 %v5758_v35, %v12036_v25  ;;  %v8246_v7 = vmov 0.0  }
 0xe99   : > { %v11462_v38 = vadd.f32 %v5750_v26, %v12034_v28  ;;  %v5753_v58 = vadd.f32 %v5752_v13, %v11386_v33  ;;  %v8244_v26 = vmov 0.0|0.0   ;;  %7439 = vmatprep.mubr.msk.f32.mxu1 %vm8245_vm2, %v8246_v7  ;;  %v12043_v7 = vld [vmem:[#allocation29_spill] sm:$0xff] }
 0xe9a   : > { %5898 = vadd.xlane.f32.xlu1 %v5897_v34  ;;  %v11483_v41 = vadd.f32 %v5761_v8, %v12037_v30  ;;  %v5826_v10 = vsel %vm1875_vm0, %v11479_v39, 0.0  ;;  %v5870_v1 = vmul.f32 %v11479_v39, %v11479_v39  ;;  %7442 = vmatprep.subr.bf16.mxu1 %v8244_v26  ;;  %v11536_v8 = vld [vmem:[%s11746_s5 + $0x18] sm:$0xff] }
 0xe9b   : > { %v11467_v2 = vadd.f32 %v5753_v58, %v12035_v37  ;;  %v5820_v42 = vsel %vm1875_vm0, %v11462_v38, 0.0  ;;  %v5868_v21 = vmul.f32 %v11462_v38, %v11462_v38 }
 0xe9c   : > { %5821 = vadd.xlane.f32.xlu0 %v5820_v42  ;;  %v5829_v16 = vsel %vm1875_vm0, %v11483_v41, 0.0  ;;  %v5871_v47 = vmul.f32 %v11483_v41, %v11483_v41  ;;  %v5906_v22 = vsel %vm1875_vm0, %v5870_v1, 0.0 }
 0xe9d   : > { %v5823_v24 = vsel %vm1875_vm0, %v11467_v2, 0.0  ;;  %v5869_v55 = vmul.f32 %v11467_v2, %v11467_v2  ;;  %v5900_v9 = vsel %vm1875_vm0, %v5868_v21, 0.0 }
 0xe9e   : > { %5824 = vadd.xlane.f32.xlu1 %v5823_v24  ;;  %v5909_v54 = vsel %vm1875_vm0, %v5871_v47, 0.0 }
 0xe9f   : > { %v5903_v60 = vsel %vm1875_vm0, %v5869_v55, 0.0 }
 0xea0   : > { %5901 = vadd.xlane.f32.xlu0 %v5900_v9 }
 0xea2   : > { %5904 = vadd.xlane.f32.xlu1 %v5903_v60 }
 0xea4   : > { %5827 = vadd.xlane.f32.xlu0 %v5826_v10 }
 0xea5   : > { %v7405_v48 = vpop.f32.mrb[172].mxu0 }
 0xea6   : > { %v5774_v32 = vadd.f32 %v7405_v48, %v11386_v33  ;;  %v5765_v11 = vpop.f32.mrb[173].mxu0  ;;  %5830 = vadd.xlane.f32.xlu1 %v5829_v16 }
 0xea7   : > { %v5766_v6 = vadd.f32 %v5765_v11, %v11386_v33  ;;  %v7406_v4 = vpop.f32.mrb[174].mxu0 }
 0xea8   : > { %v5777_v46 = vadd.f32 %v7406_v4, %v11386_v33  ;;  %v5768_v27 = vpop.f32.mrb[175].mxu0  ;;  %5907 = vadd.xlane.f32.xlu0 %v5906_v22  ;;  %v11515_v20 = vadd.f32 %v5774_v32, %v12040_v31 }
 0xea9   : > { %v11498_v52 = vadd.f32 %v5766_v6, %v12038_v59  ;;  %v5769_v56 = vadd.f32 %v5768_v27, %v11386_v33 }
 0xeaa   : > { %5910 = vadd.xlane.f32.xlu1 %v5909_v54  ;;  %v11519_v51 = vadd.f32 %v5777_v46, %v12041_v15  ;;  %v5838_v44 = vsel %vm1875_vm0, %v11515_v20, 0.0  ;;  %v5874_v50 = vmul.f32 %v11515_v20, %v11515_v20  ;;  %v12042_v15 = vld [vmem:[#allocation28_spill] sm:$0xff] }
 0xeab   : > { %v11503_v29 = vadd.f32 %v5769_v56, %v12039_v0  ;;  %v5832_v14 = vsel %vm1875_vm0, %v11498_v52, 0.0  ;;  %v5872_v17 = vmul.f32 %v11498_v52, %v11498_v52 }
 0xeac   : > { %5833 = vadd.xlane.f32.xlu0 %v5832_v14  ;;  %v5841_v63 = vsel %vm1875_vm0, %v11519_v51, 0.0  ;;  %v5875_v35 = vmul.f32 %v11519_v51, %v11519_v51  ;;  %v5918_v43 = vsel %vm1875_vm0, %v5874_v50, 0.0 }
 0xead   : > { %v5835_v40 = vsel %vm1875_vm0, %v11503_v29, 0.0  ;;  %v5873_v33 = vmul.f32 %v11503_v29, %v11503_v29  ;;  %v5912_v19 = vsel %vm1875_vm0, %v5872_v17, 0.0 }
 0xeae   : > { %5836 = vadd.xlane.f32.xlu1 %v5835_v40  ;;  %v5921_v61 = vsel %vm1875_vm0, %v5875_v35, 0.0 }
 0xeaf   : > { %v5915_v62 = vsel %vm1875_vm0, %v5873_v33, 0.0 }
 0xeb0   : > { %5913 = vadd.xlane.f32.xlu0 %v5912_v19  ;;  %v8142_v19 = vld [vmem:[%s11746_s5] sm:$0xff] }
 0xeb1   : > { %v11561_v18 = vrot.slane %v8142_v19, %v12043_v7 }
 0xeb2   : > { %5916 = vadd.xlane.f32.xlu1 %v5915_v62  ;;  %v11553_v62 = vrot.slane %v8142_v19, %v12042_v15 }
 0xeb4   : > { %5839 = vadd.xlane.f32.xlu0 %v5838_v44 }
 0xeb6   : > { %5842 = vadd.xlane.f32.xlu1 %v5841_v63 }
 0xeb8   : > { %5919 = vadd.xlane.f32.xlu0 %v5918_v43 }
 0xeba   : > { %5922 = vadd.xlane.f32.xlu1 %v5921_v61 }
 0xece   : > { %6110 = vperm.xlu0 %7535, %v11536_v8  }
 0xf09   : > { %v5798_v13 = vpop.xlane.xlu0 %5797 }
 0xf0a   : > { %v5844_v28 = vmul.f32 0.03125, %v5798_v13 }
 0xf0b   : > { %v5801_v58 = vpop.xlane.xlu1 %5800 }
 0xf0c   : > { %v5845_v45 = vmul.f32 0.03125, %v5801_v58  ;;  %v5940_v34 = vmul.f32 %v5844_v28, %v5844_v28  ;;  %v5988_v44 = vsub.f32 %v11392_v23, %v5844_v28 }
 0xf0d   : > { %v5878_v37 = vpop.xlane.xlu0 %5877 }
 0xf0e   : > { %v5924_v42 = vmul.f32 0.03125, %v5878_v37  ;;  %v5941_v21 = vmul.f32 %v5845_v45, %v5845_v45  ;;  %v5989_v13 = vsub.f32 %v11396_v53, %v5845_v45 }
 0xf0f   : > { %v5881_v24 = vpop.xlane.xlu1 %5880 }
 0xf10   : > { %v5956_v55 = vsub.f32 %v5924_v42, %v5940_v34  ;;  %v5925_v25 = vmul.f32 0.03125, %v5881_v24 }
 0xf11   : > { %v5804_v9 = vpop.xlane.xlu0 %5803 }
 0xf12   : > { %v5972_v30 = vmax.f32 %v5956_v55, 0.0  ;;  %v5957_v60 = vsub.f32 %v5925_v25, %v5941_v21  ;;  %v11539_v10 = vmul.f32 0.03125, %v5804_v9 }
 0xf13   : > { %v5807_v48 = vpop.xlane.xlu1 %5806 }
 0xf14   : > { %v6004_v1 = vadd.f32 1e-05, %v5972_v30  ;;  %v5973_v32 = vmax.f32 %v5957_v60, 0.0  ;;  %v11541_v11 = vmul.f32 0.03125, %v5807_v48  ;;  %v5942_v4 = vmul.f32 %v11539_v10, %v11539_v10 }
 0xf15   : > { %v5884_v16 = vpop.xlane.xlu0 %5883 }
 0xf16   : > { %8090 = vrsqrt.f32 %v6004_v1  ;;  %v6005_v6 = vadd.f32 1e-05, %v5973_v32  ;;  %v5926_v47 = vmul.f32 0.03125, %v5884_v16  ;;  %v5943_v27 = vmul.f32 %v11541_v11, %v11541_v11 }
 0xf17   : > { %v5887_v46 = vpop.xlane.xlu1 %5886  ;;  %v5990_v32 = vsub.f32 %v11407_v49, %v11539_v10 }
 0xf18   : > { %8092 = vrsqrt.f32 %v6005_v6  ;;  %v5958_v59 = vsub.f32 %v5926_v47, %v5942_v4  ;;  %v5927_v22 = vmul.f32 0.03125, %v5887_v46 }
 0xf19   : > { %v5810_v54 = vpop.xlane.xlu0 %5809 }
 0xf1a   : > { %v5974_v56 = vmax.f32 %v5958_v59, 0.0  ;;  %v5959_v0 = vsub.f32 %v5927_v22, %v5943_v27  ;;  %v11547_v17 = vmul.f32 0.03125, %v5810_v54  ;;  %v5991_v22 = vsub.f32 %v11411_v3, %v11541_v11 }
 0xf1b   : > { %v5813_v33 = vpop.xlane.xlu1 %5812 }
 0xf1c   : > { %v6006_v14 = vadd.f32 1e-05, %v5974_v56  ;;  %v5975_v40 = vmax.f32 %v5959_v0, 0.0  ;;  %v11556_v50 = vmul.f32 0.03125, %v5813_v33  ;;  %v5944_v43 = vmul.f32 %v11547_v17, %v11547_v17 }
 0xf1d   : > { %v5890_v63 = vpop.xlane.xlu0 %5889 }
 0xf1e   : > { %8094 = vrsqrt.f32 %v6006_v14  ;;  %v6007_v31 = vadd.f32 1e-05, %v5975_v40  ;;  %v5928_v61 = vmul.f32 0.03125, %v5890_v63  ;;  %v5945_v23 = vmul.f32 %v11556_v50, %v11556_v50 }
 0xf1f   : > { %v5893_v37 = vpop.xlane.xlu1 %5892 }
 0xf20   : > { %v8091_v35 = vpop.eup %8090  ;;  %8096 = vrsqrt.f32 %v6007_v31  ;;  %v5960_v28 = vsub.f32 %v5928_v61, %v5944_v43  ;;  %v5929_v42 = vmul.f32 0.03125, %v5893_v37 }
 0xf21   : > { %v6036_v58 = vmul.f32 %v8091_v35, %v5988_v44  ;;  %v5816_v21 = vpop.xlane.xlu0 %5815 }
 0xf22   : > { %v8093_v34 = vpop.eup %8092  ;;  %v5976_v25 = vmax.f32 %v5960_v28, 0.0  ;;  %v5961_v9 = vsub.f32 %v5929_v42, %v5945_v23  ;;  %v11567_v30 = vmul.f32 0.03125, %v5816_v21  ;;  %v5992_v21 = vsub.f32 %v11428_v5, %v11547_v17 }
 0xf23   : > { %v6037_v24 = vmul.f32 %v8093_v34, %v5989_v13  ;;  %v6056_v55 = vmul.f32 %v11553_v62, %v6036_v58  ;;  %v5819_v60 = vpop.xlane.xlu1 %5818 }
 0xf24   : > { %v6008_v45 = vadd.f32 1e-05, %v5976_v25  ;;  %v5977_v1 = vmax.f32 %v5961_v9, 0.0  ;;  %v11573_v16 = vmul.f32 0.03125, %v5819_v60  ;;  %v5946_v27 = vmul.f32 %v11567_v30, %v11567_v30 }
 0xf25   : > { %v6057_v48 = vmul.f32 %v11553_v62, %v6037_v24  ;;  %v6076_v53 = vadd.f32 %v11561_v18, %v6056_v55  ;;  %v5896_v6 = vpop.xlane.xlu0 %5895 }
 0xf26   : > { %8098 = vrsqrt.f32 %v6008_v45  ;;  %v6009_v46 = vadd.f32 1e-05, %v5977_v1  ;;  %v5930_v59 = vmul.f32 0.03125, %v5896_v6  ;;  %v5947_v10 = vmul.f32 %v11573_v16, %v11573_v16 }
 0xf27   : > { %v6077_v4 = vadd.f32 %v11561_v18, %v6057_v48  ;;  %v5899_v0 = vpop.xlane.xlu1 %5898  ;;  %v6092_v54 = vmax.f32 %v6076_v53, 0.0  ;;  %v5993_v1 = vsub.f32 %v11432_v12, %v11556_v50 }
 0xf28   : > { %v8095_v47 = vpop.eup %8094  ;;  %8100 = vrsqrt.f32 %v6009_v46  ;;  %v5962_v40 = vsub.f32 %v5930_v59, %v5946_v27  ;;  %v5931_v33 = vmul.f32 0.03125, %v5899_v0 }
 0xf29   : > { %v6038_v56 = vmul.f32 %v8095_v47, %v5990_v32  ;;  %v6093_v14 = vmax.f32 %v6077_v4, 0.0  ;;  %v5822_v15 = vpop.xlane.xlu0 %5821 }
 0xf2a   : > { %v8097_v49 = vpop.eup %8096  ;;  %v5978_v44 = vmax.f32 %v5962_v40, 0.0  ;;  %v5963_v63 = vsub.f32 %v5931_v33, %v5947_v10  ;;  %v11589_v35 = vmul.f32 0.03125, %v5822_v15  ;;  %v5994_v33 = vsub.f32 %v11443_v57, %v11567_v30 }
 0xf2b   : > { %v6039_v19 = vmul.f32 %v8097_v49, %v5991_v22  ;;  %v7443_v3 = vpack.c.bf16 %v6093_v14, %v6092_v54  ;;  %v6058_v11 = vmul.f32 %v11553_v62, %v6038_v56  ;;  %v5825_v43 = vpop.xlane.xlu1 %5824 }
 0xf2c   : > { %v6010_v13 = vadd.f32 1e-05, %v5978_v44  ;;  %v5979_v58 = vmax.f32 %v5963_v63, 0.0  ;;  %v11596_v37 = vmul.f32 0.03125, %v5825_v43  ;;  %v5948_v42 = vmul.f32 %v11589_v35, %v11589_v35 }
 0xf2d   : > { %7445 = vmatpush3.bf16.xpose.msk.msra.mxu1 %vm11584_vm7, %v7443_v3  ;;  %v6059_v61 = vmul.f32 %v11553_v62, %v6039_v19  ;;  %v6078_v7 = vadd.f32 %v11561_v18, %v6058_v11  ;;  %v5902_v34 = vpop.xlane.xlu0 %5901  ;;  %v5995_v43 = vsub.f32 %v11447_v36, %v11573_v16 }
 0xf2e   : > { %7446 = vmatprep.subr.bf16.mxu1 %v8244_v26  ;;  %8102 = vrsqrt.f32 %v6010_v13  ;;  %v6011_v28 = vadd.f32 1e-05, %v5979_v58  ;;  %v5932_v24 = vmul.f32 0.03125, %v5902_v34  ;;  %v5949_v48 = vmul.f32 %v11596_v37, %v11596_v37 }
 0xf2f   : > { %v6079_v23 = vadd.f32 %v11561_v18, %v6059_v61  ;;  %v5905_v55 = vpop.xlane.xlu1 %5904  ;;  %v6094_v25 = vmax.f32 %v6078_v7, 0.0 }
 0xf30   : > { %v8099_v60 = vpop.eup %8098  ;;  %8104 = vrsqrt.f32 %v6011_v28  ;;  %v5964_v53 = vsub.f32 %v5932_v24, %v5948_v42  ;;  %v5933_v45 = vmul.f32 0.03125, %v5905_v55 }
 0xf31   : > { %v6095_v9 = vmax.f32 %v6079_v23, 0.0  ;;  %v6040_v32 = vmul.f32 %v8099_v60, %v5992_v21  ;;  %v5828_v6 = vpop.xlane.xlu0 %5827 }
 0xf32   : > { %v8101_v47 = vpop.eup %8100  ;;  %v5980_v46 = vmax.f32 %v5964_v53, 0.0  ;;  %v5965_v27 = vsub.f32 %v5933_v45, %v5949_v48  ;;  %v11607_v5 = vmul.f32 0.03125, %v5828_v6 }
 0xf33   : > { %v7447_v4 = vpack.c.bf16 %v6095_v9, %v6094_v25  ;;  %v6041_v17 = vmul.f32 %v8101_v47, %v5993_v1  ;;  %v5831_v59 = vpop.xlane.xlu1 %5830  ;;  %v6060_v22 = vmul.f32 %v11553_v62, %v6040_v32  ;;  %v5996_v1 = vsub.f32 %v11462_v38, %v11589_v35 }
 0xf34   : > { %v6012_v56 = vadd.f32 1e-05, %v5980_v46  ;;  %v5981_v0 = vmax.f32 %v5965_v27, 0.0  ;;  %v11613_v12 = vmul.f32 0.03125, %v5831_v59  ;;  %v5950_v10 = vmul.f32 %v11607_v5, %v11607_v5 }
 0xf35   : > { %7449 = vmatpush3.bf16.xpose.msk.msra.mxu1 %vm11584_vm7, %v7447_v4  ;;  %v5908_v50 = vpop.xlane.xlu0 %5907  ;;  %v6061_v54 = vmul.f32 %v11553_v62, %v6041_v17  ;;  %v6080_v14 = vadd.f32 %v11561_v18, %v6060_v22  ;;  %v5997_v17 = vsub.f32 %v11467_v2, %v11596_v37 }
 0xf36   : > { %7450 = vmatprep.subr.bf16.mxu1 %v8244_v26  ;;  %8106 = vrsqrt.f32 %v6012_v56  ;;  %v6013_v49 = vadd.f32 1e-05, %v5981_v0  ;;  %v5934_v40 = vmul.f32 0.03125, %v5908_v50  ;;  %v5951_v11 = vmul.f32 %v11613_v12, %v11613_v12 }
 0xf37   : > { %v5911_v19 = vpop.xlane.xlu1 %5910  ;;  %v6081_v15 = vadd.f32 %v11561_v18, %v6061_v54  ;;  %v6096_v13 = vmax.f32 %v6080_v14, 0.0 }
 0xf38   : > { %v8103_v3 = vpop.eup %8102  ;;  %8108 = vrsqrt.f32 %v6013_v49  ;;  %v5966_v44 = vsub.f32 %v5934_v40, %v5950_v10  ;;  %v5935_v63 = vmul.f32 0.03125, %v5911_v19 }
 0xf39   : > { %v6042_v61 = vmul.f32 %v8103_v3, %v5994_v33  ;;  %v5834_v7 = vpop.xlane.xlu0 %5833  ;;  %v6097_v58 = vmax.f32 %v6081_v15, 0.0 }
 0xf3a   : > { %v8105_v34 = vpop.eup %8104  ;;  %v5982_v23 = vmax.f32 %v5966_v44, 0.0  ;;  %v5967_v57 = vsub.f32 %v5935_v63, %v5951_v11  ;;  %v11626_v30 = vmul.f32 0.03125, %v5834_v7 }
 0xf3b   : > { %v6043_v28 = vmul.f32 %v8105_v34, %v5995_v43  ;;  %v5837_v42 = vpop.xlane.xlu1 %5836  ;;  %v7451_v24 = vpack.c.bf16 %v6097_v58, %v6096_v13  ;;  %v6062_v21 = vmul.f32 %v11553_v62, %v6042_v61  ;;  %v5998_v43 = vsub.f32 %v11479_v39, %v11607_v5 }
 0xf3c   : > { %v6014_v55 = vadd.f32 1e-05, %v5982_v23  ;;  %v5983_v25 = vmax.f32 %v5967_v57, 0.0  ;;  %v11629_v9 = vmul.f32 0.03125, %v5837_v42  ;;  %v5952_v53 = vmul.f32 %v11626_v30, %v11626_v30 }
 0xf3d   : > { %7453 = vmatpush3.bf16.xpose.msk.msra.mxu1 %vm11584_vm7, %v7451_v24  ;;  %v5914_v36 = vpop.xlane.xlu0 %5913  ;;  %v6063_v16 = vmul.f32 %v11553_v62, %v6043_v28  ;;  %v6082_v60 = vadd.f32 %v11561_v18, %v6062_v21  ;;  %v5999_v57 = vsub.f32 %v11483_v41, %v11613_v12  ;;  %v6000_v12 = vsub.f32 %v11498_v52, %v11626_v30 }
 0xf3e   : > { %8110 = vrsqrt.f32 %v6014_v55  ;;  %v6015_v48 = vadd.f32 1e-05, %v5983_v25  ;;  %v5936_v45 = vmul.f32 0.03125, %v5914_v36  ;;  %7454 = vmatprep.subr.bf16.mxu1 %v8244_v26  ;;  %v5953_v47 = vmul.f32 %v11629_v9, %v11629_v9 }
 0xf3f   : > { %v5917_v32 = vpop.xlane.xlu1 %5916  ;;  %v6083_v6 = vadd.f32 %v11561_v18, %v6063_v16  ;;  %v6098_v56 = vmax.f32 %v6082_v60, 0.0 }
 0xf40   : > { %v8107_v4 = vpop.eup %8106  ;;  %8112 = vrsqrt.f32 %v6015_v48  ;;  %v5968_v46 = vsub.f32 %v5936_v45, %v5952_v53  ;;  %v5937_v27 = vmul.f32 0.03125, %v5917_v32  ;;  %v6001_v32 = vsub.f32 %v11503_v29, %v11629_v9 }
 0xf41   : > { %v6044_v59 = vmul.f32 %v8107_v4, %v5996_v1  ;;  %v5840_v22 = vpop.xlane.xlu0 %5839  ;;  %v6099_v0 = vmax.f32 %v6083_v6, 0.0 }
 0xf42   : > { %v8109_v50 = vpop.eup %8108  ;;  %v5984_v54 = vmax.f32 %v5968_v46, 0.0  ;;  %v5969_v38 = vsub.f32 %v5937_v27, %v5953_v47  ;;  %v11645_v35 = vmul.f32 0.03125, %v5840_v22 }
 0xf43   : > { %v6045_v14 = vmul.f32 %v8109_v50, %v5997_v17  ;;  %v5843_v49 = vpop.xlane.xlu1 %5842  ;;  %v7455_v10 = vpack.c.bf16 %v6099_v0, %v6098_v56  ;;  %v6064_v40 = vmul.f32 %v11553_v62, %v6044_v59 }
 0xf44   : > { %v6016_v33 = vadd.f32 1e-05, %v5984_v54  ;;  %v5985_v19 = vmax.f32 %v5969_v38, 0.0  ;;  %v5859_v15 = vmul.f32 0.03125, %v5843_v49  ;;  %v5954_v44 = vmul.f32 %v11645_v35, %v11645_v35 }
 0xf45   : > { %7457 = vmatpush3.bf16.xpose.msk.msra.mxu1 %vm11584_vm7, %v7455_v10  ;;  %v5920_v2 = vpop.xlane.xlu0 %5919  ;;  %v6065_v37 = vmul.f32 %v11553_v62, %v6045_v14  ;;  %v6084_v3 = vadd.f32 %v11561_v18, %v6064_v40  ;;  %v6002_v29 = vsub.f32 %v11515_v20, %v11645_v35 }
 0xf46   : > { %8114 = vrsqrt.f32 %v6016_v33  ;;  %v6017_v11 = vadd.f32 1e-05, %v5985_v19  ;;  %v5938_v63 = vmul.f32 0.03125, %v5920_v2  ;;  %7458 = vmatprep.subr.bf16.mxu1 %v8244_v26  ;;  %v5955_v58 = vmul.f32 %v5859_v15, %v5859_v15 }
 0xf47   : > { %v5923_v61 = vpop.xlane.xlu1 %5922  ;;  %v6085_v7 = vadd.f32 %v11561_v18, %v6065_v37  ;;  %v6100_v42 = vmax.f32 %v6084_v3, 0.0  ;;  %v6003_v56 = vsub.f32 %v11519_v51, %v5859_v15  ;;  %v6112_v15 = vrot.slane %v11536_v8, 1 }
 0xf48   : > { %v8111_v13 = vpop.eup %8110  ;;  %8116 = vrsqrt.f32 %v6017_v11  ;;  %v5970_v34 = vsub.f32 %v5938_v63, %v5954_v44  ;;  %v5939_v23 = vmul.f32 0.03125, %v5923_v61 }
 0xf49   : > { %v6046_v28 = vmul.f32 %v8111_v13, %v5998_v43  ;;  %v6101_v24 = vmax.f32 %v6085_v7, 0.0 }
 0xf4a   : > { %v8113_v21 = vpop.eup %8112  ;;  %v5986_v55 = vmax.f32 %v5970_v34, 0.0  ;;  %v5971_v25 = vsub.f32 %v5939_v23, %v5955_v58 }
 0xf4b   : > { %v6047_v36 = vmul.f32 %v8113_v21, %v5999_v57  ;;  %v7459_v16 = vpack.c.bf16 %v6101_v24, %v6100_v42  ;;  %v6066_v39 = vmul.f32 %v11553_v62, %v6046_v28 }
 0xf4c   : > { %v6018_v5 = vadd.f32 1e-05, %v5986_v55  ;;  %v5987_v60 = vmax.f32 %v5971_v25, 0.0 }
 0xf4d   : > { %7461 = vmatpush3.bf16.xpose.msk.msra.mxu1 %vm11584_vm7, %v7459_v16  ;;  %v6067_v48 = vmul.f32 %v11553_v62, %v6047_v36  ;;  %v6086_v53 = vadd.f32 %v11561_v18, %v6066_v39 }
 0xf4e   : > { %8118 = vrsqrt.f32 %v6018_v5  ;;  %v6019_v41 = vadd.f32 1e-05, %v5987_v60  ;;  %7462 = vmatprep.subr.bf16.mxu1 %v8244_v26 }
 0xf4f   : > { %v6087_v45 = vadd.f32 %v11561_v18, %v6067_v48  ;;  %v6102_v4 = vmax.f32 %v6086_v53, 0.0 }
 0xf50   : > { %v8115_v1 = vpop.eup %8114  ;;  %8120 = vrsqrt.f32 %v6019_v41 }
 0xf51   : > { %v6048_v6 = vmul.f32 %v8115_v1, %v6000_v12  ;;  %v6103_v47 = vmax.f32 %v6087_v45, 0.0 }
 0xf52   : > { %v8117_v46 = vpop.eup %8116 }
 0xf53   : > { %v6049_v27 = vmul.f32 %v8117_v46, %v6001_v32  ;;  %v7463_v17 = vpack.c.bf16 %v6103_v47, %v6102_v4  ;;  %v6068_v59 = vmul.f32 %v11553_v62, %v6048_v6 }
 0xf55   : > { %7465 = vmatpush3.bf16.xpose.msk.msra.mxu1 %vm11584_vm7, %v7463_v17  ;;  %v6069_v52 = vmul.f32 %v11553_v62, %v6049_v27  ;;  %v6088_v30 = vadd.f32 %v11561_v18, %v6068_v59 }
 0xf56   : > { %7466 = vmatprep.subr.bf16.mxu1 %v8244_v26 }
 0xf57   : > { %v6089_v9 = vadd.f32 %v11561_v18, %v6069_v52  ;;  %v6104_v50 = vmax.f32 %v6088_v30, 0.0 }
 0xf58   : > { %v8119_v22 = vpop.eup %8118 }
 0xf59   : > { %v6050_v0 = vmul.f32 %v8119_v22, %v6002_v29  ;;  %v6105_v54 = vmax.f32 %v6089_v9, 0.0 }
 0xf5a   : > { %v8121_v38 = vpop.eup %8120 }
 0xf5b   : > { %v6051_v14 = vmul.f32 %v8121_v38, %v6003_v56  ;;  %v7467_v49 = vpack.c.bf16 %v6105_v54, %v6104_v50  ;;  %v6070_v10 = vmul.f32 %v11553_v62, %v6050_v0 }
 0xf5d   : > { %v6071_v40 = vmul.f32 %v11553_v62, %v6051_v14  ;;  %7469 = vmatpush3.bf16.xpose.msk.msra.mxu1 %vm11584_vm7, %v7467_v49  ;;  %v6090_v20 = vadd.f32 %v11561_v18, %v6070_v10  ;;  %v6111_v62 = vpop.permute.xlu0 %6110 }
 0xf5e   : > { %7470 = vmatprep.subr.bf16.mxu1 %v8244_v26  ;;  %v6113_v2 = vrot.slane %v6111_v62, 2 }
 0xf5f   : > { %v6091_v51 = vadd.f32 %v11561_v18, %v6071_v40  ;;  %v6106_v35 = vmax.f32 %v6090_v20, 0.0 }
 0xf61   : > { %v6107_v33 = vmax.f32 %v6091_v51, 0.0 }
 0xf63   : > { %v7471_v19 = vpack.c.bf16 %v6107_v33, %v6106_v35 }
 0xf65   : > { %7473 = vmatpush3.bf16.xpose.msk.msra.mxu1 %vm11584_vm7, %v7471_v19 }
 0xf6c   : > { %7440 = vmatmul.mubr.msk.f32.vlgmr.msra.gmra.mrb[160].mxu1 %vm1875_vm0, %v6112_v15 }
0x103f   : > { %v6231_v26 = vpop.f32.mrb[160].mxu1 }
0x1040   : > { %v6232_v37 = vadd.f32 %v6231_v26, %v6113_v2  ;;  %v7441_v18 = vpop.f32.mrb[161].mxu1 }
0x1042   : > { %6235 = vst [vmem:[%s283_s20] sm:$0x1] %v6232_v37 }
0x1043   : > { %8186 = shalt.err (!%p8183_p4)
}
0x1044   : > { %s8187_s28 = scalar_lea.hbm %s11697_s15, 16  ;;  %s8191_s14 = scalar_lea.hbm %s11747_s6, 32 }
0x1045   : > { %p8188_p5 = scmp.ne.s32.totalorder %s11697_s15, %s8187_s28  ;;  %p8192_p1 = scmp.lt.u32.totalorder %s11697_s15, %s11747_s6 }
0x1046   : > { %p8193_p3 = scmp.lt.u32.totalorder %s8191_s14, %s8187_s28  ;;  %p8195_p11 = scmp.lt.u32.totalorder %s8187_s28, %s11697_s15 }
0x1047   : > { %p8189_p7 = pnand %p8188_p5, %p12046_p12 }
0x1048   : > { %p8194_p6 = por %p8193_p3, %p8192_p1 }
0x1049   : > { %p8190_p9 = pneg %p8189_p7 }
0x104a   : > { %p8196_p13 = por %p8195_p11, %p8194_p6 }
0x104c   : > { %p8197_p8 = pnand %p8196_p13, %p8190_p9 }
0x104e   : > { %8200 = shalt.err (!%p8197_p8)
}
0x104f   : > { %7485 = dma.vmem_to_hbm [thread:$0]  (%p12046_p12), %s11699_s26, 16, %s11697_s15, %s6237_s16  }
0x1050 PF: > { %s6261_s20 = sand.u32 1, %s8227_s21   ;;  %p12047_p10 = scmp.ne.s32.totalorder %s11857_s9, 0 }
0x1051   : > { %p12048_p0 = scmp.ge.s32.totalorder %s8239_s24, 2  ;;  %s6262_s29 = scalar_lea.sflag [#allocation4], %s6261_s20 }
0x1053   : > { %p7492_p2 = pnand %p12048_p0, %p12047_p10 }
0x1055   : > { %8222 = dma.done.wait (!%p7492_p2), %s6262_s29, 16  }
0x1056   : > { %8224 = vsyncadd (!%p7492_p2), %s6262_s29, 4294967280  ;;  %p19_p4 = scmp.ge.s32.totalorder %s8309_s27, 4   ;;  %s12049_s21 = smov %s8231_s22 }
0x1057   : > { %s12050_s22 = smov %s8235_s23  ;;  %s12051_s23 = smov %s8321_s30 }
0x1058   : > { %s12052_s24 = smov %s8309_s27  ;;  %21 = sbr.rel (!%p19_p4) target bundleno = 5 (0x5), region = 99 }
0x105f   :  { %6266 = vsyncpa [#allocation3], 1 }
0x1060   :  { %6268 = vsyncpa [#allocation3 + $0x1], 1 }
0x1061   :  { %6269 = vsyncpa [#allocation4], 1 }
0x1062   :  { %6271 = vsyncpa [#allocation4 + $0x1], 1 }

</bundles_post_ra>
